<compile_context>
chip_gen: v7x
topology: tpu7x:2x2x1
jax: 0.10.0
libtpu: 0.0.40
codegen_flags: <defaults>
</compile_context>

<pallas_src>
import functools

import jax
import jax.numpy as jnp
from jax.experimental import pallas as pl
from jax.experimental.pallas import tpu as pltpu


# Architecture constants implied by fc(3136, 512): 84x84 Atari input.
H1 = W1 = 20            # conv1 output spatial (k=8, stride 4)
HP = WP = 10            # parity-plane spatial (H1 // 2)
H2 = W2 = 9             # conv2 output spatial (k=4, stride 2)
H3 = W3 = 7             # conv3 output spatial (k=3, stride 1)
C1, C2, C3 = 32, 64, 64
R1 = H1 * W1            # 400 conv1 rows (parity-plane order)
R1P = 408               # padded to a multiple of 8
L2 = 90                 # conv2 rows per image: row = ho*10 + wo  (wo==9 rows are garbage)
L3 = 68                 # conv3 rows per image: row = yo*10 + xo  (xo>6 / row 67 are garbage)
FC_OUT = 512
HEAD_PAD = 128          # head output padded to a full lane group


# ----------------------------------------------------------------------------
# Kernel A: conv1 + conv2 + conv3 fused, one image per (parallel) grid step
# ----------------------------------------------------------------------------
def _conv_stack_kernel(col1_ref, w1_ref, b1_ref, w2_ref, b2_ref,
                       w3_ref, b3_ref, o_ref):
    # ---- conv1: one im2col matmul (rows already in parity-plane order) -----
    a1 = jnp.dot(col1_ref[0], w1_ref[...], preferred_element_type=jnp.float32)
    a1 = jnp.maximum(a1 + b1_ref[...], 0.0)                    # (408, 32) f32

    # ---- conv2 (4x4, stride 2): 16 accumulated matmuls, one contiguous
    #      static slice of a1 per tap (parity planes make stride-2 contiguous).
    b2 = b2_ref[...]                                           # hoisted once
    acc2 = jnp.zeros((L2, C2), jnp.float32)
    for ki in range(4):
        for kj in range(4):
            plane = 2 * (ki % 2) + (kj % 2)
            start = plane * (HP * WP) + (ki // 2) * WP + (kj // 2)
            t = ki * 4 + kj
            lhs = a1[start:start + L2, :].astype(jnp.bfloat16)           # (90, 32)
            acc2 = acc2 + jnp.dot(lhs, w2_ref[t * C1:(t + 1) * C1, :],
                                  preferred_element_type=jnp.float32)
    a2 = jnp.maximum(acc2 + b2, 0.0)                           # (90, 64) f32, row = ho*10+wo

    # ---- conv3 (3x3, stride 1): 9 accumulated matmuls, one contiguous
    #      static slice of a2 per tap.
    b3 = b3_ref[...]
    acc3 = jnp.zeros((L3, C3), jnp.float32)
    for ki in range(3):
        for kj in range(3):
            t = ki * 3 + kj
            s3 = ki * WP + kj
            lhs = a2[s3:s3 + L3, :].astype(jnp.bfloat16)                 # (68, 64)
            acc3 = acc3 + jnp.dot(lhs, w3_ref[t * C2:(t + 1) * C2, :],
                                  preferred_element_type=jnp.float32)
    a3 = jnp.maximum(acc3 + b3, 0.0)                           # (68, 64) f32, row = yo*10+xo

    o_ref[0] = a3.astype(jnp.bfloat16)


def _conv_stack(col1, kp):
    n = col1.shape[0]
    k1 = col1.shape[-1]
    return pl.pallas_call(
        _conv_stack_kernel,
        out_shape=jax.ShapeDtypeStruct((n, L3, C3), jnp.bfloat16),
        grid=(n,),
        in_specs=[
            pl.BlockSpec((1, R1P, k1), lambda i: (i, 0, 0)),       # per-image col1
            pl.BlockSpec((k1, C1), lambda i: (0, 0)),              # weights: DMA'd once,
            pl.BlockSpec((1, C1), lambda i: (0, 0)),               # stay VMEM-resident
            pl.BlockSpec((16 * C1, C2), lambda i: (0, 0)),
            pl.BlockSpec((1, C2), lambda i: (0, 0)),
            pl.BlockSpec((9 * C2, C3), lambda i: (0, 0)),
            pl.BlockSpec((1, C3), lambda i: (0, 0)),
        ],
        out_specs=pl.BlockSpec((1, L3, C3), lambda i: (i, 0, 0)),
        compiler_params=pltpu.CompilerParams(
            dimension_semantics=("parallel",)),
    )(col1, kp["w1"], kp["b1"], kp["w2"], kp["b2"], kp["w3"], kp["b3"])


# ----------------------------------------------------------------------------
# Kernel B: fc + head over the whole batch (fc weight pushed through MXU once)
# ----------------------------------------------------------------------------
def _fc_head_kernel(feat_ref, wfc_ref, bfc_ref, wh_ref, bh_ref, o_ref):
    feat = feat_ref[...]                                       # (Np, 68*64) bf16
    m = feat.shape[0]
    # fc as K-blocked accumulation over the 7 valid row-runs of the conv3 map.
    # Lane offsets are multiples of 640 = 5*128 (tile-aligned); wfc rows were
    # permuted at pack time, so no in-kernel flatten / gather is needed.
    acc = jnp.zeros((m, FC_OUT), jnp.float32)
    for yo in range(H3):
        lhs = feat[:, yo * (WP * C3): yo * (WP * C3) + W3 * C3]          # (Np, 448)
        acc = acc + jnp.dot(lhs, wfc_ref[yo * (W3 * C3):(yo + 1) * (W3 * C3), :],
                            preferred_element_type=jnp.float32)
    h = acc + bfc_ref[...]
    h = jnp.where(h > 0, h, 0.01 * h).astype(jnp.bfloat16)     # LeakyReLU(0.01), as in module
    q = jnp.dot(h, wh_ref[...], preferred_element_type=jnp.float32) + bh_ref[...]
    o_ref[...] = q                                             # (Np, 128) lane-dense f32


def _fc_head(feat, kp):
    m = feat.shape[0]
    vmem = pl.BlockSpec(memory_space=pltpu.MemorySpace.VMEM)
    return pl.pallas_call(
        _fc_head_kernel,
        out_shape=jax.ShapeDtypeStruct((m, HEAD_PAD), jnp.float32),
        in_specs=[vmem] * 5,
        out_specs=vmem,
    )(feat, kp["wfc"], kp["bfc"], kp["wh"], kp["bh"])


# ----------------------------------------------------------------------------
# Wrapper-side glue: im2col for conv1 only (pure input layout prep)
# ----------------------------------------------------------------------------
def _im2col_nhwc(x, kh, kw, stride):
    """x: (N,H,W,C) -> (N,Ho,Wo,kh*kw*C); feature order (ki, kj, c)."""
    n, h, w, c = x.shape
    ho = (h - kh) // stride + 1
    wo = (w - kw) // stride + 1
    cols = []
    for ki in range(kh):
        for kj in range(kw):
            cols.append(x[:, ki:ki + stride * ho:stride,
                          kj:kj + stride * wo:stride, :])
    return jnp.concatenate(cols, axis=-1), ho, wo


# ----------------------------------------------------------------------------
# Parameters: PyTorch-layout init, then one-time packing for the kernels
# ----------------------------------------------------------------------------
def init_dqn_params(key, channels, num_actions):
    keys = jax.random.split(key, 10)

    def kaiming(k, shape):           # kaiming_normal_ (fan_in, gain sqrt(2))
        fan_in = shape[1] * shape[2] * shape[3]
        return jax.random.normal(k, shape, jnp.float32) * jnp.sqrt(2.0 / fan_in)

    def uniform(k, shape, fan_in):   # PyTorch default bias / linear init
        bound = 1.0 / jnp.sqrt(fan_in)
        return jax.random.uniform(k, shape, jnp.float32, -bound, bound)

    return {
        "conv1_w": kaiming(keys[0], (32, channels, 8, 8)),
        "conv1_b": uniform(keys[1], (32,), channels * 8 * 8),
        "conv2_w": kaiming(keys[2], (64, 32, 4, 4)),
        "conv2_b": uniform(keys[3], (64,), 32 * 4 * 4),
        "conv3_w": kaiming(keys[4], (64, 64, 3, 3)),
        "conv3_b": uniform(keys[5], (64,), 64 * 3 * 3),
        "fc_w": uniform(keys[6], (512, 3136), 3136),      # (out, in) like nn.Linear
        "fc_b": uniform(keys[7], (512,), 3136),
        "head_w": uniform(keys[8], (num_actions, 512), 512),
        "head_b": uniform(keys[9], (num_actions,), 512),
    }


def pack_params(p):
    """One-time weight packing: bf16, pre-flattened, fc permuted, head padded."""
    def conv_mat(w):   # (Cout,Cin,kh,kw) -> (kh*kw*Cin, Cout), rows (ki, kj, ci)
        cout, cin, kh, kw = w.shape
        return (jnp.transpose(w, (2, 3, 1, 0))
                .reshape(kh * kw * cin, cout).astype(jnp.bfloat16))

    # fc: torch weight (512, 3136) with input index c*49 + yo*7 + xo (NCHW
    # flatten).  Permute rows to (yo, xo, c) so kernel B's per-yo K blocks line
    # up with the natural (row, channel) lane layout of the conv3 feature map.
    wfc = (p["fc_w"].reshape(FC_OUT, C3, H3, W3).transpose(2, 3, 1, 0)
           .reshape(H3 * W3 * C3, FC_OUT).astype(jnp.bfloat16))

    wh = p["head_w"].T                                     # (512, A)
    a = wh.shape[1]
    assert a <= HEAD_PAD
    wh = jnp.pad(wh, ((0, 0), (0, HEAD_PAD - a))).astype(jnp.bfloat16)
    bh = jnp.pad(p["head_b"], (0, HEAD_PAD - a))           # zero pad => slice is exact

    return {
        "w1": conv_mat(p["conv1_w"]), "b1": p["conv1_b"].reshape(1, -1),
        "w2": conv_mat(p["conv2_w"]), "b2": p["conv2_b"].reshape(1, -1),
        "w3": conv_mat(p["conv3_w"]), "b3": p["conv3_b"].reshape(1, -1),
        "wfc": wfc, "bfc": p["fc_b"].reshape(1, -1),
        "wh": wh, "bh": bh.reshape(1, -1),
    }


# ----------------------------------------------------------------------------
# Forward pass (matches DQN.forward semantics; bf16 activations, f32 accum)
# ----------------------------------------------------------------------------
@functools.partial(jax.jit, static_argnames=("num_actions",))
def dqn_forward(kp, x, *, num_actions):
    n = x.shape[0]
    x = jnp.transpose(x, (0, 2, 3, 1))                     # NCHW -> NHWC, once
    col1, h1, w1 = _im2col_nhwc(x, 8, 8, 4)                # (N, 20, 20, 64*Cin)
    assert (h1, w1) == (H1, W1), "fc(3136, 512) implies 84x84 input"
    k1 = col1.shape[-1]
    # Parity-plane row order: row = (2*(h%2)+(w%2))*100 + (h//2)*10 + (w//2).
    # This makes every stride-2 conv2 tap a single contiguous slice in-kernel.
    col1 = col1.reshape(n, HP, 2, WP, 2, k1).transpose(0, 2, 4, 1, 3, 5)
    col1 = col1.reshape(n, R1, k1)
    col1 = jnp.pad(col1, ((0, 0), (0, R1P - R1), (0, 0))).astype(jnp.bfloat16)

    feat = _conv_stack(col1, kp)                           # (N, 68, 64) bf16
    feat = feat.reshape(n, L3 * C3)                        # lane = row*64 + c
    n_pad = max(8, -(-n // 8) * 8)
    feat = jnp.pad(feat, ((0, n_pad - n), (0, 0)))

    q = _fc_head(feat, kp)                                 # (n_pad, 128) f32
    return q[:n, :num_actions]


# ----------------------------------------------------------------------------
# Pure-JAX f32 reference (for numerical sanity check only)
# ----------------------------------------------------------------------------
def _ref_forward(p, x):
    dn = ("NCHW", "OIHW", "NCHW")
    y = jax.lax.conv_general_dilated(x, p["conv1_w"], (4, 4), "VALID",
                                     dimension_numbers=dn)
    y = jax.nn.relu(y + p["conv1_b"][None, :, None, None])
    y = jax.lax.conv_general_dilated(y, p["conv2_w"], (2, 2), "VALID",
                                     dimension_numbers=dn)
    y = jax.nn.relu(y + p["conv2_b"][None, :, None, None])
    y = jax.lax.conv_general_dilated(y, p["conv3_w"], (1, 1), "VALID",
                                     dimension_numbers=dn)
    y = jax.nn.relu(y + p["conv3_b"][None, :, None, None])
    y = y.reshape(y.shape[0], -1)
    y = y @ p["fc_w"].T + p["fc_b"]
    y = jnp.where(y > 0, y, 0.01 * y)                      # LeakyReLU(0.01)
    return y @ p["head_w"].T + p["head_b"]


if __name__ == "__main__":
    # fc hard-codes 3136 = 64*7*7 input features => 84x84 input (Atari).
    batch, channels, spatial, num_actions = 2, 4, 84, 6

    key = jax.random.PRNGKey(0)
    k_params, k_x = jax.random.split(key)
    params = init_dqn_params(k_params, channels, num_actions)
    packed = pack_params(params)
    x = jax.random.uniform(k_x, (batch, channels, spatial, spatial), jnp.float32)

    q = dqn_forward(packed, x, num_actions=num_actions)
    jax.block_until_ready(q)
    assert q.shape == (batch, num_actions), q.shape
    assert q.dtype == jnp.float32

    # bf16 activations / f32 accumulation => loose tolerance vs f32 reference.
    q_ref = _ref_forward(params, x)
    err = float(jnp.max(jnp.abs(q - q_ref)))
    scale = float(jnp.max(jnp.abs(q_ref))) + 1e-6
    assert err <= 0.1 * scale + 0.05, (err, scale)

    print("KERNEL_OK")
</pallas_src>

<mosaic_0001>
module attributes {stable_mosaic.version = 11 : i64} {
  func.func @_conv_stack_kernel(%arg0: i32, %arg1: memref<1x408x256xbf16, #tpu.memory_space<vmem>>, %arg2: memref<256x32xbf16, #tpu.memory_space<vmem>>, %arg3: memref<1x32xf32, #tpu.memory_space<vmem>>, %arg4: memref<512x64xbf16, #tpu.memory_space<vmem>>, %arg5: memref<1x64xf32, #tpu.memory_space<vmem>>, %arg6: memref<576x64xbf16, #tpu.memory_space<vmem>>, %arg7: memref<1x64xf32, #tpu.memory_space<vmem>>, %arg8: memref<1x68x64xbf16, #tpu.memory_space<vmem>>) attributes {dimension_semantics = [#tpu.dimension_semantics<parallel>], iteration_bounds = array<i64: 2>, scalar_prefetch = 0 : i64, scratch_operands = 0 : i64, tpu.core_type = #tpu.core_type<tc>, window_params = [{transform_indices = @transform_0, window_bounds = array<i64: 1, 408, 256>}, {pipeline_mode = #tpu.pipeline_mode<synchronous>, transform_indices = @transform_1, window_bounds = array<i64: 256, 32>}, {pipeline_mode = #tpu.pipeline_mode<synchronous>, transform_indices = @transform_2, window_bounds = array<i64: 1, 32>}, {pipeline_mode = #tpu.pipeline_mode<synchronous>, transform_indices = @transform_3, window_bounds = array<i64: 512, 64>}, {pipeline_mode = #tpu.pipeline_mode<synchronous>, transform_indices = @transform_4, window_bounds = array<i64: 1, 64>}, {pipeline_mode = #tpu.pipeline_mode<synchronous>, transform_indices = @transform_5, window_bounds = array<i64: 576, 64>}, {pipeline_mode = #tpu.pipeline_mode<synchronous>, transform_indices = @transform_6, window_bounds = array<i64: 1, 64>}, {transform_indices = @transform_7, window_bounds = array<i64: 1, 68, 64>}]} {
    %c0 = arith.constant 0 : index
    %c0_0 = arith.constant 0 : index
    %c0_1 = arith.constant 0 : index
    %0 = vector.load %arg1[%c0, %c0_0, %c0_1] : memref<1x408x256xbf16, #tpu.memory_space<vmem>>, vector<1x408x256xbf16>
    %1 = vector.shape_cast %0 : vector<1x408x256xbf16> to vector<408x256xbf16>
    %c0_2 = arith.constant 0 : index
    %c0_3 = arith.constant 0 : index
    %2 = vector.load %arg2[%c0_2, %c0_3] : memref<256x32xbf16, #tpu.memory_space<vmem>>, vector<256x32xbf16>
    %cst = arith.constant dense<0.000000e+00> : vector<408x32xf32>
    %3 = tpu.matmul %1, %2, %cst {dimension_numbers = #tpu.dot_dimension_numbers<[1], [0], [0], [1], [0, 0, 1, 1], [], []>} : vector<408x256xbf16>, vector<256x32xbf16>, vector<408x32xf32> -> vector<408x32xf32>
    %c0_4 = arith.constant 0 : index
    %c0_5 = arith.constant 0 : index
    %4 = vector.load %arg3[%c0_4, %c0_5] : memref<1x32xf32, #tpu.memory_space<vmem>>, vector<1x32xf32>
    %5 = vector.broadcast %4 : vector<1x32xf32> to vector<408x32xf32>
    %6 = arith.addf %3, %5 : vector<408x32xf32>
    %cst_6 = arith.constant 0.000000e+00 : f32
    %7 = vector.broadcast %cst_6 : f32 to vector<408x32xf32>
    %8 = arith.maximumf %6, %7 : vector<408x32xf32>
    %c0_7 = arith.constant 0 : index
    %c0_8 = arith.constant 0 : index
    %9 = vector.load %arg5[%c0_7, %c0_8] : memref<1x64xf32, #tpu.memory_space<vmem>>, vector<1x64xf32>
    %cst_9 = arith.constant 0.000000e+00 : f32
    %10 = vector.broadcast %cst_9 : f32 to vector<90x64xf32>
    %11 = vector.extract_strided_slice %8 {offsets = [0, 0], sizes = [90, 32], strides = [1, 1]} : vector<408x32xf32> to vector<90x32xf32>
    %12 = arith.truncf %11 : vector<90x32xf32> to vector<90x32xbf16>
    %c0_10 = arith.constant 0 : index
    %c0_11 = arith.constant 0 : index
    %13 = vector.load %arg4[%c0_10, %c0_11] : memref<512x64xbf16, #tpu.memory_space<vmem>>, vector<32x64xbf16>
    %cst_12 = arith.constant dense<0.000000e+00> : vector<90x64xf32>
    %14 = tpu.matmul %12, %13, %cst_12 {dimension_numbers = #tpu.dot_dimension_numbers<[1], [0], [0], [1], [0, 0, 1, 1], [], []>} : vector<90x32xbf16>, vector<32x64xbf16>, vector<90x64xf32> -> vector<90x64xf32>
    %15 = arith.addf %10, %14 : vector<90x64xf32>
    %16 = vector.extract_strided_slice %8 {offsets = [100, 0], sizes = [90, 32], strides = [1, 1]} : vector<408x32xf32> to vector<90x32xf32>
    %17 = arith.truncf %16 : vector<90x32xf32> to vector<90x32xbf16>
    %c32 = arith.constant 32 : index
    %c0_13 = arith.constant 0 : index
    %18 = vector.load %arg4[%c32, %c0_13] : memref<512x64xbf16, #tpu.memory_space<vmem>>, vector<32x64xbf16>
    %cst_14 = arith.constant dense<0.000000e+00> : vector<90x64xf32>
    %19 = tpu.matmul %17, %18, %cst_14 {dimension_numbers = #tpu.dot_dimension_numbers<[1], [0], [0], [1], [0, 0, 1, 1], [], []>} : vector<90x32xbf16>, vector<32x64xbf16>, vector<90x64xf32> -> vector<90x64xf32>
    %20 = arith.addf %15, %19 : vector<90x64xf32>
    %21 = vector.extract_strided_slice %8 {offsets = [1, 0], sizes = [90, 32], strides = [1, 1]} : vector<408x32xf32> to vector<90x32xf32>
    %22 = arith.truncf %21 : vector<90x32xf32> to vector<90x32xbf16>
    %c64 = arith.constant 64 : index
    %c0_15 = arith.constant 0 : index
    %23 = vector.load %arg4[%c64, %c0_15] : memref<512x64xbf16, #tpu.memory_space<vmem>>, vector<32x64xbf16>
    %cst_16 = arith.constant dense<0.000000e+00> : vector<90x64xf32>
    %24 = tpu.matmul %22, %23, %cst_16 {dimension_numbers = #tpu.dot_dimension_numbers<[1], [0], [0], [1], [0, 0, 1, 1], [], []>} : vector<90x32xbf16>, vector<32x64xbf16>, vector<90x64xf32> -> vector<90x64xf32>
    %25 = arith.addf %20, %24 : vector<90x64xf32>
    %26 = vector.extract_strided_slice %8 {offsets = [101, 0], sizes = [90, 32], strides = [1, 1]} : vector<408x32xf32> to vector<90x32xf32>
    %27 = arith.truncf %26 : vector<90x32xf32> to vector<90x32xbf16>
    %c96 = arith.constant 96 : index
    %c0_17 = arith.constant 0 : index
    %28 = vector.load %arg4[%c96, %c0_17] : memref<512x64xbf16, #tpu.memory_space<vmem>>, vector<32x64xbf16>
    %cst_18 = arith.constant dense<0.000000e+00> : vector<90x64xf32>
    %29 = tpu.matmul %27, %28, %cst_18 {dimension_numbers = #tpu.dot_dimension_numbers<[1], [0], [0], [1], [0, 0, 1, 1], [], []>} : vector<90x32xbf16>, vector<32x64xbf16>, vector<90x64xf32> -> vector<90x64xf32>
    %30 = arith.addf %25, %29 : vector<90x64xf32>
    %31 = vector.extract_strided_slice %8 {offsets = [200, 0], sizes = [90, 32], strides = [1, 1]} : vector<408x32xf32> to vector<90x32xf32>
    %32 = arith.truncf %31 : vector<90x32xf32> to vector<90x32xbf16>
    %c128 = arith.constant 128 : index
    %c0_19 = arith.constant 0 : index
    %33 = vector.load %arg4[%c128, %c0_19] : memref<512x64xbf16, #tpu.memory_space<vmem>>, vector<32x64xbf16>
    %cst_20 = arith.constant dense<0.000000e+00> : vector<90x64xf32>
    %34 = tpu.matmul %32, %33, %cst_20 {dimension_numbers = #tpu.dot_dimension_numbers<[1], [0], [0], [1], [0, 0, 1, 1], [], []>} : vector<90x32xbf16>, vector<32x64xbf16>, vector<90x64xf32> -> vector<90x64xf32>
    %35 = arith.addf %30, %34 : vector<90x64xf32>
    %36 = vector.extract_strided_slice %8 {offsets = [300, 0], sizes = [90, 32], strides = [1, 1]} : vector<408x32xf32> to vector<90x32xf32>
    %37 = arith.truncf %36 : vector<90x32xf32> to vector<90x32xbf16>
    %c160 = arith.constant 160 : index
    %c0_21 = arith.constant 0 : index
    %38 = vector.load %arg4[%c160, %c0_21] : memref<512x64xbf16, #tpu.memory_space<vmem>>, vector<32x64xbf16>
    %cst_22 = arith.constant dense<0.000000e+00> : vector<90x64xf32>
    %39 = tpu.matmul %37, %38, %cst_22 {dimension_numbers = #tpu.dot_dimension_numbers<[1], [0], [0], [1], [0, 0, 1, 1], [], []>} : vector<90x32xbf16>, vector<32x64xbf16>, vector<90x64xf32> -> vector<90x64xf32>
    %40 = arith.addf %35, %39 : vector<90x64xf32>
    %41 = vector.extract_strided_slice %8 {offsets = [201, 0], sizes = [90, 32], strides = [1, 1]} : vector<408x32xf32> to vector<90x32xf32>
    %42 = arith.truncf %41 : vector<90x32xf32> to vector<90x32xbf16>
    %c192 = arith.constant 192 : index
    %c0_23 = arith.constant 0 : index
    %43 = vector.load %arg4[%c192, %c0_23] : memref<512x64xbf16, #tpu.memory_space<vmem>>, vector<32x64xbf16>
    %cst_24 = arith.constant dense<0.000000e+00> : vector<90x64xf32>
    %44 = tpu.matmul %42, %43, %cst_24 {dimension_numbers = #tpu.dot_dimension_numbers<[1], [0], [0], [1], [0, 0, 1, 1], [], []>} : vector<90x32xbf16>, vector<32x64xbf16>, vector<90x64xf32> -> vector<90x64xf32>
    %45 = arith.addf %40, %44 : vector<90x64xf32>
    %46 = vector.extract_strided_slice %8 {offsets = [301, 0], sizes = [90, 32], strides = [1, 1]} : vector<408x32xf32> to vector<90x32xf32>
    %47 = arith.truncf %46 : vector<90x32xf32> to vector<90x32xbf16>
    %c224 = arith.constant 224 : index
    %c0_25 = arith.constant 0 : index
    %48 = vector.load %arg4[%c224, %c0_25] : memref<512x64xbf16, #tpu.memory_space<vmem>>, vector<32x64xbf16>
    %cst_26 = arith.constant dense<0.000000e+00> : vector<90x64xf32>
    %49 = tpu.matmul %47, %48, %cst_26 {dimension_numbers = #tpu.dot_dimension_numbers<[1], [0], [0], [1], [0, 0, 1, 1], [], []>} : vector<90x32xbf16>, vector<32x64xbf16>, vector<90x64xf32> -> vector<90x64xf32>
    %50 = arith.addf %45, %49 : vector<90x64xf32>
    %51 = vector.extract_strided_slice %8 {offsets = [10, 0], sizes = [90, 32], strides = [1, 1]} : vector<408x32xf32> to vector<90x32xf32>
    %52 = arith.truncf %51 : vector<90x32xf32> to vector<90x32xbf16>
    %c256 = arith.constant 256 : index
    %c0_27 = arith.constant 0 : index
    %53 = vector.load %arg4[%c256, %c0_27] : memref<512x64xbf16, #tpu.memory_space<vmem>>, vector<32x64xbf16>
    %cst_28 = arith.constant dense<0.000000e+00> : vector<90x64xf32>
    %54 = tpu.matmul %52, %53, %cst_28 {dimension_numbers = #tpu.dot_dimension_numbers<[1], [0], [0], [1], [0, 0, 1, 1], [], []>} : vector<90x32xbf16>, vector<32x64xbf16>, vector<90x64xf32> -> vector<90x64xf32>
    %55 = arith.addf %50, %54 : vector<90x64xf32>
    %56 = vector.extract_strided_slice %8 {offsets = [110, 0], sizes = [90, 32], strides = [1, 1]} : vector<408x32xf32> to vector<90x32xf32>
    %57 = arith.truncf %56 : vector<90x32xf32> to vector<90x32xbf16>
    %c288 = arith.constant 288 : index
    %c0_29 = arith.constant 0 : index
    %58 = vector.load %arg4[%c288, %c0_29] : memref<512x64xbf16, #tpu.memory_space<vmem>>, vector<32x64xbf16>
    %cst_30 = arith.constant dense<0.000000e+00> : vector<90x64xf32>
    %59 = tpu.matmul %57, %58, %cst_30 {dimension_numbers = #tpu.dot_dimension_numbers<[1], [0], [0], [1], [0, 0, 1, 1], [], []>} : vector<90x32xbf16>, vector<32x64xbf16>, vector<90x64xf32> -> vector<90x64xf32>
    %60 = arith.addf %55, %59 : vector<90x64xf32>
    %61 = vector.extract_strided_slice %8 {offsets = [11, 0], sizes = [90, 32], strides = [1, 1]} : vector<408x32xf32> to vector<90x32xf32>
    %62 = arith.truncf %61 : vector<90x32xf32> to vector<90x32xbf16>
    %c320 = arith.constant 320 : index
    %c0_31 = arith.constant 0 : index
    %63 = vector.load %arg4[%c320, %c0_31] : memref<512x64xbf16, #tpu.memory_space<vmem>>, vector<32x64xbf16>
    %cst_32 = arith.constant dense<0.000000e+00> : vector<90x64xf32>
    %64 = tpu.matmul %62, %63, %cst_32 {dimension_numbers = #tpu.dot_dimension_numbers<[1], [0], [0], [1], [0, 0, 1, 1], [], []>} : vector<90x32xbf16>, vector<32x64xbf16>, vector<90x64xf32> -> vector<90x64xf32>
    %65 = arith.addf %60, %64 : vector<90x64xf32>
    %66 = vector.extract_strided_slice %8 {offsets = [111, 0], sizes = [90, 32], strides = [1, 1]} : vector<408x32xf32> to vector<90x32xf32>
    %67 = arith.truncf %66 : vector<90x32xf32> to vector<90x32xbf16>
    %c352 = arith.constant 352 : index
    %c0_33 = arith.constant 0 : index
    %68 = vector.load %arg4[%c352, %c0_33] : memref<512x64xbf16, #tpu.memory_space<vmem>>, vector<32x64xbf16>
    %cst_34 = arith.constant dense<0.000000e+00> : vector<90x64xf32>
    %69 = tpu.matmul %67, %68, %cst_34 {dimension_numbers = #tpu.dot_dimension_numbers<[1], [0], [0], [1], [0, 0, 1, 1], [], []>} : vector<90x32xbf16>, vector<32x64xbf16>, vector<90x64xf32> -> vector<90x64xf32>
    %70 = arith.addf %65, %69 : vector<90x64xf32>
    %71 = vector.extract_strided_slice %8 {offsets = [210, 0], sizes = [90, 32], strides = [1, 1]} : vector<408x32xf32> to vector<90x32xf32>
    %72 = arith.truncf %71 : vector<90x32xf32> to vector<90x32xbf16>
    %c384 = arith.constant 384 : index
    %c0_35 = arith.constant 0 : index
    %73 = vector.load %arg4[%c384, %c0_35] : memref<512x64xbf16, #tpu.memory_space<vmem>>, vector<32x64xbf16>
    %cst_36 = arith.constant dense<0.000000e+00> : vector<90x64xf32>
    %74 = tpu.matmul %72, %73, %cst_36 {dimension_numbers = #tpu.dot_dimension_numbers<[1], [0], [0], [1], [0, 0, 1, 1], [], []>} : vector<90x32xbf16>, vector<32x64xbf16>, vector<90x64xf32> -> vector<90x64xf32>
    %75 = arith.addf %70, %74 : vector<90x64xf32>
    %76 = vector.extract_strided_slice %8 {offsets = [310, 0], sizes = [90, 32], strides = [1, 1]} : vector<408x32xf32> to vector<90x32xf32>
    %77 = arith.truncf %76 : vector<90x32xf32> to vector<90x32xbf16>
    %c416 = arith.constant 416 : index
    %c0_37 = arith.constant 0 : index
    %78 = vector.load %arg4[%c416, %c0_37] : memref<512x64xbf16, #tpu.memory_space<vmem>>, vector<32x64xbf16>
    %cst_38 = arith.constant dense<0.000000e+00> : vector<90x64xf32>
    %79 = tpu.matmul %77, %78, %cst_38 {dimension_numbers = #tpu.dot_dimension_numbers<[1], [0], [0], [1], [0, 0, 1, 1], [], []>} : vector<90x32xbf16>, vector<32x64xbf16>, vector<90x64xf32> -> vector<90x64xf32>
    %80 = arith.addf %75, %79 : vector<90x64xf32>
    %81 = vector.extract_strided_slice %8 {offsets = [211, 0], sizes = [90, 32], strides = [1, 1]} : vector<408x32xf32> to vector<90x32xf32>
    %82 = arith.truncf %81 : vector<90x32xf32> to vector<90x32xbf16>
    %c448 = arith.constant 448 : index
    %c0_39 = arith.constant 0 : index
    %83 = vector.load %arg4[%c448, %c0_39] : memref<512x64xbf16, #tpu.memory_space<vmem>>, vector<32x64xbf16>
    %cst_40 = arith.constant dense<0.000000e+00> : vector<90x64xf32>
    %84 = tpu.matmul %82, %83, %cst_40 {dimension_numbers = #tpu.dot_dimension_numbers<[1], [0], [0], [1], [0, 0, 1, 1], [], []>} : vector<90x32xbf16>, vector<32x64xbf16>, vector<90x64xf32> -> vector<90x64xf32>
    %85 = arith.addf %80, %84 : vector<90x64xf32>
    %86 = vector.extract_strided_slice %8 {offsets = [311, 0], sizes = [90, 32], strides = [1, 1]} : vector<408x32xf32> to vector<90x32xf32>
    %87 = arith.truncf %86 : vector<90x32xf32> to vector<90x32xbf16>
    %c480 = arith.constant 480 : index
    %c0_41 = arith.constant 0 : index
    %88 = vector.load %arg4[%c480, %c0_41] : memref<512x64xbf16, #tpu.memory_space<vmem>>, vector<32x64xbf16>
    %cst_42 = arith.constant dense<0.000000e+00> : vector<90x64xf32>
    %89 = tpu.matmul %87, %88, %cst_42 {dimension_numbers = #tpu.dot_dimension_numbers<[1], [0], [0], [1], [0, 0, 1, 1], [], []>} : vector<90x32xbf16>, vector<32x64xbf16>, vector<90x64xf32> -> vector<90x64xf32>
    %90 = arith.addf %85, %89 : vector<90x64xf32>
    %91 = vector.broadcast %9 : vector<1x64xf32> to vector<90x64xf32>
    %92 = arith.addf %90, %91 : vector<90x64xf32>
    %cst_43 = arith.constant 0.000000e+00 : f32
    %93 = vector.broadcast %cst_43 : f32 to vector<90x64xf32>
    %94 = arith.maximumf %92, %93 : vector<90x64xf32>
    %c0_44 = arith.constant 0 : index
    %c0_45 = arith.constant 0 : index
    %95 = vector.load %arg7[%c0_44, %c0_45] : memref<1x64xf32, #tpu.memory_space<vmem>>, vector<1x64xf32>
    %cst_46 = arith.constant 0.000000e+00 : f32
    %96 = vector.broadcast %cst_46 : f32 to vector<68x64xf32>
    %97 = vector.extract_strided_slice %94 {offsets = [0, 0], sizes = [68, 64], strides = [1, 1]} : vector<90x64xf32> to vector<68x64xf32>
    %98 = arith.truncf %97 : vector<68x64xf32> to vector<68x64xbf16>
    %c0_47 = arith.constant 0 : index
    %c0_48 = arith.constant 0 : index
    %99 = vector.load %arg6[%c0_47, %c0_48] : memref<576x64xbf16, #tpu.memory_space<vmem>>, vector<64x64xbf16>
    %cst_49 = arith.constant dense<0.000000e+00> : vector<68x64xf32>
    %100 = tpu.matmul %98, %99, %cst_49 {dimension_numbers = #tpu.dot_dimension_numbers<[1], [0], [0], [1], [0, 0, 1, 1], [], []>} : vector<68x64xbf16>, vector<64x64xbf16>, vector<68x64xf32> -> vector<68x64xf32>
    %101 = arith.addf %96, %100 : vector<68x64xf32>
    %102 = vector.extract_strided_slice %94 {offsets = [1, 0], sizes = [68, 64], strides = [1, 1]} : vector<90x64xf32> to vector<68x64xf32>
    %103 = arith.truncf %102 : vector<68x64xf32> to vector<68x64xbf16>
    %c64_50 = arith.constant 64 : index
    %c0_51 = arith.constant 0 : index
    %104 = vector.load %arg6[%c64_50, %c0_51] : memref<576x64xbf16, #tpu.memory_space<vmem>>, vector<64x64xbf16>
    %cst_52 = arith.constant dense<0.000000e+00> : vector<68x64xf32>
    %105 = tpu.matmul %103, %104, %cst_52 {dimension_numbers = #tpu.dot_dimension_numbers<[1], [0], [0], [1], [0, 0, 1, 1], [], []>} : vector<68x64xbf16>, vector<64x64xbf16>, vector<68x64xf32> -> vector<68x64xf32>
    %106 = arith.addf %101, %105 : vector<68x64xf32>
    %107 = vector.extract_strided_slice %94 {offsets = [2, 0], sizes = [68, 64], strides = [1, 1]} : vector<90x64xf32> to vector<68x64xf32>
    %108 = arith.truncf %107 : vector<68x64xf32> to vector<68x64xbf16>
    %c128_53 = arith.constant 128 : index
    %c0_54 = arith.constant 0 : index
    %109 = vector.load %arg6[%c128_53, %c0_54] : memref<576x64xbf16, #tpu.memory_space<vmem>>, vector<64x64xbf16>
    %cst_55 = arith.constant dense<0.000000e+00> : vector<68x64xf32>
    %110 = tpu.matmul %108, %109, %cst_55 {dimension_numbers = #tpu.dot_dimension_numbers<[1], [0], [0], [1], [0, 0, 1, 1], [], []>} : vector<68x64xbf16>, vector<64x64xbf16>, vector<68x64xf32> -> vector<68x64xf32>
    %111 = arith.addf %106, %110 : vector<68x64xf32>
    %112 = vector.extract_strided_slice %94 {offsets = [10, 0], sizes = [68, 64], strides = [1, 1]} : vector<90x64xf32> to vector<68x64xf32>
    %113 = arith.truncf %112 : vector<68x64xf32> to vector<68x64xbf16>
    %c192_56 = arith.constant 192 : index
    %c0_57 = arith.constant 0 : index
    %114 = vector.load %arg6[%c192_56, %c0_57] : memref<576x64xbf16, #tpu.memory_space<vmem>>, vector<64x64xbf16>
    %cst_58 = arith.constant dense<0.000000e+00> : vector<68x64xf32>
    %115 = tpu.matmul %113, %114, %cst_58 {dimension_numbers = #tpu.dot_dimension_numbers<[1], [0], [0], [1], [0, 0, 1, 1], [], []>} : vector<68x64xbf16>, vector<64x64xbf16>, vector<68x64xf32> -> vector<68x64xf32>
    %116 = arith.addf %111, %115 : vector<68x64xf32>
    %117 = vector.extract_strided_slice %94 {offsets = [11, 0], sizes = [68, 64], strides = [1, 1]} : vector<90x64xf32> to vector<68x64xf32>
    %118 = arith.truncf %117 : vector<68x64xf32> to vector<68x64xbf16>
    %c256_59 = arith.constant 256 : index
    %c0_60 = arith.constant 0 : index
    %119 = vector.load %arg6[%c256_59, %c0_60] : memref<576x64xbf16, #tpu.memory_space<vmem>>, vector<64x64xbf16>
    %cst_61 = arith.constant dense<0.000000e+00> : vector<68x64xf32>
    %120 = tpu.matmul %118, %119, %cst_61 {dimension_numbers = #tpu.dot_dimension_numbers<[1], [0], [0], [1], [0, 0, 1, 1], [], []>} : vector<68x64xbf16>, vector<64x64xbf16>, vector<68x64xf32> -> vector<68x64xf32>
    %121 = arith.addf %116, %120 : vector<68x64xf32>
    %122 = vector.extract_strided_slice %94 {offsets = [12, 0], sizes = [68, 64], strides = [1, 1]} : vector<90x64xf32> to vector<68x64xf32>
    %123 = arith.truncf %122 : vector<68x64xf32> to vector<68x64xbf16>
    %c320_62 = arith.constant 320 : index
    %c0_63 = arith.constant 0 : index
    %124 = vector.load %arg6[%c320_62, %c0_63] : memref<576x64xbf16, #tpu.memory_space<vmem>>, vector<64x64xbf16>
    %cst_64 = arith.constant dense<0.000000e+00> : vector<68x64xf32>
    %125 = tpu.matmul %123, %124, %cst_64 {dimension_numbers = #tpu.dot_dimension_numbers<[1], [0], [0], [1], [0, 0, 1, 1], [], []>} : vector<68x64xbf16>, vector<64x64xbf16>, vector<68x64xf32> -> vector<68x64xf32>
    %126 = arith.addf %121, %125 : vector<68x64xf32>
    %127 = vector.extract_strided_slice %94 {offsets = [20, 0], sizes = [68, 64], strides = [1, 1]} : vector<90x64xf32> to vector<68x64xf32>
    %128 = arith.truncf %127 : vector<68x64xf32> to vector<68x64xbf16>
    %c384_65 = arith.constant 384 : index
    %c0_66 = arith.constant 0 : index
    %129 = vector.load %arg6[%c384_65, %c0_66] : memref<576x64xbf16, #tpu.memory_space<vmem>>, vector<64x64xbf16>
    %cst_67 = arith.constant dense<0.000000e+00> : vector<68x64xf32>
    %130 = tpu.matmul %128, %129, %cst_67 {dimension_numbers = #tpu.dot_dimension_numbers<[1], [0], [0], [1], [0, 0, 1, 1], [], []>} : vector<68x64xbf16>, vector<64x64xbf16>, vector<68x64xf32> -> vector<68x64xf32>
    %131 = arith.addf %126, %130 : vector<68x64xf32>
    %132 = vector.extract_strided_slice %94 {offsets = [21, 0], sizes = [68, 64], strides = [1, 1]} : vector<90x64xf32> to vector<68x64xf32>
    %133 = arith.truncf %132 : vector<68x64xf32> to vector<68x64xbf16>
    %c448_68 = arith.constant 448 : index
    %c0_69 = arith.constant 0 : index
    %134 = vector.load %arg6[%c448_68, %c0_69] : memref<576x64xbf16, #tpu.memory_space<vmem>>, vector<64x64xbf16>
    %cst_70 = arith.constant dense<0.000000e+00> : vector<68x64xf32>
    %135 = tpu.matmul %133, %134, %cst_70 {dimension_numbers = #tpu.dot_dimension_numbers<[1], [0], [0], [1], [0, 0, 1, 1], [], []>} : vector<68x64xbf16>, vector<64x64xbf16>, vector<68x64xf32> -> vector<68x64xf32>
    %136 = arith.addf %131, %135 : vector<68x64xf32>
    %137 = vector.extract_strided_slice %94 {offsets = [22, 0], sizes = [68, 64], strides = [1, 1]} : vector<90x64xf32> to vector<68x64xf32>
    %138 = arith.truncf %137 : vector<68x64xf32> to vector<68x64xbf16>
    %c512 = arith.constant 512 : index
    %c0_71 = arith.constant 0 : index
    %139 = vector.load %arg6[%c512, %c0_71] : memref<576x64xbf16, #tpu.memory_space<vmem>>, vector<64x64xbf16>
    %cst_72 = arith.constant dense<0.000000e+00> : vector<68x64xf32>
    %140 = tpu.matmul %138, %139, %cst_72 {dimension_numbers = #tpu.dot_dimension_numbers<[1], [0], [0], [1], [0, 0, 1, 1], [], []>} : vector<68x64xbf16>, vector<64x64xbf16>, vector<68x64xf32> -> vector<68x64xf32>
    %141 = arith.addf %136, %140 : vector<68x64xf32>
    %142 = vector.broadcast %95 : vector<1x64xf32> to vector<68x64xf32>
    %143 = arith.addf %141, %142 : vector<68x64xf32>
    %cst_73 = arith.constant 0.000000e+00 : f32
    %144 = vector.broadcast %cst_73 : f32 to vector<68x64xf32>
    %145 = arith.maximumf %143, %144 : vector<68x64xf32>
    %146 = arith.truncf %145 : vector<68x64xf32> to vector<68x64xbf16>
    %c0_74 = arith.constant 0 : index
    %c0_75 = arith.constant 0 : index
    %c0_76 = arith.constant 0 : index
    %147 = vector.load %arg8[%c0_74, %c0_75, %c0_76] : memref<1x68x64xbf16, #tpu.memory_space<vmem>>, vector<1x68x64xbf16>
    %148 = vector.shape_cast %147 : vector<1x68x64xbf16> to vector<68x64xbf16>
    %149 = vector.shape_cast %146 : vector<68x64xbf16> to vector<1x68x64xbf16>
    tpu.vector_store %arg8[%c0_74, %c0_75, %c0_76], %149 {strides = array<i32>} : memref<1x68x64xbf16, #tpu.memory_space<vmem>>, vector<1x68x64xbf16>,
    return
  }
  func.func @transform_0(%arg0: i32) -> (i32, i32, i32) {
    %c0_i32 = arith.constant 0 : i32
    %c0_i32_0 = arith.constant 0 : i32
    %c0_i32_1 = arith.constant 0 : i32
    return %arg0, %c0_i32, %c0_i32_0 : i32, i32, i32
  }
  func.func @transform_1(%arg0: i32) -> (i32, i32) {
    %c0_i32 = arith.constant 0 : i32
    %c0_i32_0 = arith.constant 0 : i32
    %c0_i32_1 = arith.constant 0 : i32
    return %c0_i32, %c0_i32_0 : i32, i32
  }
  func.func @transform_2(%arg0: i32) -> (i32, i32) {
    %c0_i32 = arith.constant 0 : i32
    %c0_i32_0 = arith.constant 0 : i32
    %c0_i32_1 = arith.constant 0 : i32
    return %c0_i32, %c0_i32_0 : i32, i32
  }
  func.func @transform_3(%arg0: i32) -> (i32, i32) {
    %c0_i32 = arith.constant 0 : i32
    %c0_i32_0 = arith.constant 0 : i32
    %c0_i32_1 = arith.constant 0 : i32
    return %c0_i32, %c0_i32_0 : i32, i32
  }
  func.func @transform_4(%arg0: i32) -> (i32, i32) {
    %c0_i32 = arith.constant 0 : i32
    %c0_i32_0 = arith.constant 0 : i32
    %c0_i32_1 = arith.constant 0 : i32
    return %c0_i32, %c0_i32_0 : i32, i32
  }
  func.func @transform_5(%arg0: i32) -> (i32, i32) {
    %c0_i32 = arith.constant 0 : i32
    %c0_i32_0 = arith.constant 0 : i32
    %c0_i32_1 = arith.constant 0 : i32
    return %c0_i32, %c0_i32_0 : i32, i32
  }
  func.func @transform_6(%arg0: i32) -> (i32, i32) {
    %c0_i32 = arith.constant 0 : i32
    %c0_i32_0 = arith.constant 0 : i32
    %c0_i32_1 = arith.constant 0 : i32
    return %c0_i32, %c0_i32_0 : i32, i32
  }
  func.func @transform_7(%arg0: i32) -> (i32, i32, i32) {
    %c0_i32 = arith.constant 0 : i32
    %c0_i32_0 = arith.constant 0 : i32
    %c0_i32_1 = arith.constant 0 : i32
    return %arg0, %c0_i32, %c0_i32_0 : i32, i32, i32
  }
}

module attributes {stable_mosaic.version = 11 : i64} {
  func.func @_fc_head_kernel(%arg0: memref<8x4352xbf16, #tpu.memory_space<vmem>>, %arg1: memref<3136x512xbf16, #tpu.memory_space<vmem>>, %arg2: memref<1x512xf32, #tpu.memory_space<vmem>>, %arg3: memref<512x128xbf16, #tpu.memory_space<vmem>>, %arg4: memref<1x128xf32, #tpu.memory_space<vmem>>, %arg5: memref<8x128xf32, #tpu.memory_space<vmem>>) attributes {dimension_semantics = [], scalar_prefetch = 0 : i64, scratch_operands = 0 : i64, tpu.core_type = #tpu.core_type<tc>} {
    %c0 = arith.constant 0 : index
    %c0_0 = arith.constant 0 : index
    %0 = vector.load %arg0[%c0, %c0_0] : memref<8x4352xbf16, #tpu.memory_space<vmem>>, vector<8x4352xbf16>
    %cst = arith.constant 0.000000e+00 : f32
    %1 = vector.broadcast %cst : f32 to vector<8x512xf32>
    %2 = vector.extract_strided_slice %0 {offsets = [0, 0], sizes = [8, 448], strides = [1, 1]} : vector<8x4352xbf16> to vector<8x448xbf16>
    %c0_1 = arith.constant 0 : index
    %c0_2 = arith.constant 0 : index
    %3 = vector.load %arg1[%c0_1, %c0_2] : memref<3136x512xbf16, #tpu.memory_space<vmem>>, vector<448x512xbf16>
    %cst_3 = arith.constant dense<0.000000e+00> : vector<8x512xf32>
    %4 = tpu.matmul %2, %3, %cst_3 {dimension_numbers = #tpu.dot_dimension_numbers<[1], [0], [0], [1], [0, 0, 1, 1], [], []>} : vector<8x448xbf16>, vector<448x512xbf16>, vector<8x512xf32> -> vector<8x512xf32>
    %5 = arith.addf %1, %4 : vector<8x512xf32>
    %6 = vector.extract_strided_slice %0 {offsets = [0, 640], sizes = [8, 448], strides = [1, 1]} : vector<8x4352xbf16> to vector<8x448xbf16>
    %c448 = arith.constant 448 : index
    %c0_4 = arith.constant 0 : index
    %7 = vector.load %arg1[%c448, %c0_4] : memref<3136x512xbf16, #tpu.memory_space<vmem>>, vector<448x512xbf16>
    %cst_5 = arith.constant dense<0.000000e+00> : vector<8x512xf32>
    %8 = tpu.matmul %6, %7, %cst_5 {dimension_numbers = #tpu.dot_dimension_numbers<[1], [0], [0], [1], [0, 0, 1, 1], [], []>} : vector<8x448xbf16>, vector<448x512xbf16>, vector<8x512xf32> -> vector<8x512xf32>
    %9 = arith.addf %5, %8 : vector<8x512xf32>
    %10 = vector.extract_strided_slice %0 {offsets = [0, 1280], sizes = [8, 448], strides = [1, 1]} : vector<8x4352xbf16> to vector<8x448xbf16>
    %c896 = arith.constant 896 : index
    %c0_6 = arith.constant 0 : index
    %11 = vector.load %arg1[%c896, %c0_6] : memref<3136x512xbf16, #tpu.memory_space<vmem>>, vector<448x512xbf16>
    %cst_7 = arith.constant dense<0.000000e+00> : vector<8x512xf32>
    %12 = tpu.matmul %10, %11, %cst_7 {dimension_numbers = #tpu.dot_dimension_numbers<[1], [0], [0], [1], [0, 0, 1, 1], [], []>} : vector<8x448xbf16>, vector<448x512xbf16>, vector<8x512xf32> -> vector<8x512xf32>
    %13 = arith.addf %9, %12 : vector<8x512xf32>
    %14 = vector.extract_strided_slice %0 {offsets = [0, 1920], sizes = [8, 448], strides = [1, 1]} : vector<8x4352xbf16> to vector<8x448xbf16>
    %c1344 = arith.constant 1344 : index
    %c0_8 = arith.constant 0 : index
    %15 = vector.load %arg1[%c1344, %c0_8] : memref<3136x512xbf16, #tpu.memory_space<vmem>>, vector<448x512xbf16>
    %cst_9 = arith.constant dense<0.000000e+00> : vector<8x512xf32>
    %16 = tpu.matmul %14, %15, %cst_9 {dimension_numbers = #tpu.dot_dimension_numbers<[1], [0], [0], [1], [0, 0, 1, 1], [], []>} : vector<8x448xbf16>, vector<448x512xbf16>, vector<8x512xf32> -> vector<8x512xf32>
    %17 = arith.addf %13, %16 : vector<8x512xf32>
    %18 = vector.extract_strided_slice %0 {offsets = [0, 2560], sizes = [8, 448], strides = [1, 1]} : vector<8x4352xbf16> to vector<8x448xbf16>
    %c1792 = arith.constant 1792 : index
    %c0_10 = arith.constant 0 : index
    %19 = vector.load %arg1[%c1792, %c0_10] : memref<3136x512xbf16, #tpu.memory_space<vmem>>, vector<448x512xbf16>
    %cst_11 = arith.constant dense<0.000000e+00> : vector<8x512xf32>
    %20 = tpu.matmul %18, %19, %cst_11 {dimension_numbers = #tpu.dot_dimension_numbers<[1], [0], [0], [1], [0, 0, 1, 1], [], []>} : vector<8x448xbf16>, vector<448x512xbf16>, vector<8x512xf32> -> vector<8x512xf32>
    %21 = arith.addf %17, %20 : vector<8x512xf32>
    %22 = vector.extract_strided_slice %0 {offsets = [0, 3200], sizes = [8, 448], strides = [1, 1]} : vector<8x4352xbf16> to vector<8x448xbf16>
    %c2240 = arith.constant 2240 : index
    %c0_12 = arith.constant 0 : index
    %23 = vector.load %arg1[%c2240, %c0_12] : memref<3136x512xbf16, #tpu.memory_space<vmem>>, vector<448x512xbf16>
    %cst_13 = arith.constant dense<0.000000e+00> : vector<8x512xf32>
    %24 = tpu.matmul %22, %23, %cst_13 {dimension_numbers = #tpu.dot_dimension_numbers<[1], [0], [0], [1], [0, 0, 1, 1], [], []>} : vector<8x448xbf16>, vector<448x512xbf16>, vector<8x512xf32> -> vector<8x512xf32>
    %25 = arith.addf %21, %24 : vector<8x512xf32>
    %26 = vector.extract_strided_slice %0 {offsets = [0, 3840], sizes = [8, 448], strides = [1, 1]} : vector<8x4352xbf16> to vector<8x448xbf16>
    %c2688 = arith.constant 2688 : index
    %c0_14 = arith.constant 0 : index
    %27 = vector.load %arg1[%c2688, %c0_14] : memref<3136x512xbf16, #tpu.memory_space<vmem>>, vector<448x512xbf16>
    %cst_15 = arith.constant dense<0.000000e+00> : vector<8x512xf32>
    %28 = tpu.matmul %26, %27, %cst_15 {dimension_numbers = #tpu.dot_dimension_numbers<[1], [0], [0], [1], [0, 0, 1, 1], [], []>} : vector<8x448xbf16>, vector<448x512xbf16>, vector<8x512xf32> -> vector<8x512xf32>
    %29 = arith.addf %25, %28 : vector<8x512xf32>
    %c0_16 = arith.constant 0 : index
    %c0_17 = arith.constant 0 : index
    %30 = vector.load %arg2[%c0_16, %c0_17] : memref<1x512xf32, #tpu.memory_space<vmem>>, vector<1x512xf32>
    %31 = vector.broadcast %30 : vector<1x512xf32> to vector<8x512xf32>
    %32 = arith.addf %29, %31 : vector<8x512xf32>
    %cst_18 = arith.constant 0.000000e+00 : f32
    %33 = vector.broadcast %cst_18 : f32 to vector<8x512xf32>
    %34 = arith.cmpf ogt, %32, %33 : vector<8x512xf32>
    %cst_19 = arith.constant 0.00999999977 : f32
    %35 = vector.broadcast %cst_19 : f32 to vector<8x512xf32>
    %36 = arith.mulf %35, %32 : vector<8x512xf32>
    %37 = arith.select %34, %32, %36 : vector<8x512xi1>, vector<8x512xf32>
    %38 = arith.truncf %37 : vector<8x512xf32> to vector<8x512xbf16>
    %c0_20 = arith.constant 0 : index
    %c0_21 = arith.constant 0 : index
    %39 = vector.load %arg3[%c0_20, %c0_21] : memref<512x128xbf16, #tpu.memory_space<vmem>>, vector<512x128xbf16>
    %cst_22 = arith.constant dense<0.000000e+00> : vector<8x128xf32>
    %40 = tpu.matmul %38, %39, %cst_22 {dimension_numbers = #tpu.dot_dimension_numbers<[1], [0], [0], [1], [0, 0, 1, 1], [], []>} : vector<8x512xbf16>, vector<512x128xbf16>, vector<8x128xf32> -> vector<8x128xf32>
    %c0_23 = arith.constant 0 : index
    %c0_24 = arith.constant 0 : index
    %41 = vector.load %arg4[%c0_23, %c0_24] : memref<1x128xf32, #tpu.memory_space<vmem>>, vector<1x128xf32>
    %42 = vector.broadcast %41 : vector<1x128xf32> to vector<8x128xf32>
    %43 = arith.addf %40, %42 : vector<8x128xf32>
    %c0_25 = arith.constant 0 : index
    %c0_26 = arith.constant 0 : index
    %44 = vector.load %arg5[%c0_25, %c0_26] : memref<8x128xf32, #tpu.memory_space<vmem>>, vector<8x128xf32>
    tpu.vector_store %arg5[%c0_25, %c0_26], %43 {strides = array<i32>} : memref<8x128xf32, #tpu.memory_space<vmem>>, vector<8x128xf32>,
    return
  }
}

</mosaic_0001>

<bundles_post_ra>
// kernel: dqn_forward.2
= control target key start
LH: loop header
LB: loop body
LE: loop exit
PB: predicated region body
PF: predicated region fallthrough
CT: control target
= control target key end

     0   :  { %s6494_s24 = smov 0   ;;  %s7945_s0 = inlined_call_operand.vmem [shape: bf16[2,408,256], index: 0, kind: input, shape index: {}]   ;;  %s7946_s1 = inlined_call_operand.vmem [shape: bf16[256,32], index: 1, kind: input, shape index: {}]   ;;  %s7947_s2 = inlined_call_operand.vmem [shape: f32[1,32], index: 2, kind: input, shape index: {}]   ;;  %s7948_s3 = inlined_call_operand.vmem [shape: bf16[512,64], index: 3, kind: input, shape index: {}]   ;;  %s7949_s4 = inlined_call_operand.vmem [shape: f32[1,64], index: 4, kind: input, shape index: {}]   ;;  %s7950_s5 = inlined_call_operand.vmem [shape: bf16[576,64], index: 5, kind: input, shape index: {}]   ;;  %s7951_s6 = inlined_call_operand.vmem [shape: f32[1,64], index: 6, kind: input, shape index: {}]   ;;  %s7952_s7 = inlined_call_operand.vmem [shape: bf16[2,68,64], index: 7, kind: output, shape index: {}]  }
   0x1 LB: > { %s5064_s25 = sadd.s32 4294967295, %s6449_s24   ;;  %p5068_p0 = scmp.ge.s32.totalorder %s6449_s24, 1  ;;  %s6449_s24 = sphi %s6494_s24, %s17_s24  }
   0x2   : > { %p237_p1 = scmp.lt.s32.totalorder %s6449_s24, 3 }
   0x4   : > { %p238_p2 = pnand %p5068_p0, %p237_p1 }
   0x6   : > { %241 = sbr.rel (%p238_p2) target bundleno = 1417 (0x589), region = 48 }
   0xd   : > { %v6281_v0 = vld [vmem:[%s7946_s1] sm:$0xff]   ;;  %v6451_v1 = vmov 0   ;;  %v6282_v2 = vld [vmem:[%s7946_s1 + $0x8] sm:$0xff]   ;;  %p269_p3 = scmp.lt.s32.totalorder %s5064_s25, 1  ;;  %v6283_v3 = vld [vmem:[%s7946_s1 + $0x10] sm:$0xff]   ;;  %vm2273_vm1 = vcmask 1046528  }
   0xe   : > { %723 = vmatprep.subr.bf16.mxu0 %v6451_v1  ;;  %v6284_v4 = vld [vmem:[%s7946_s1 + $0x18] sm:$0xff]   ;;  %v6285_v5 = vld [vmem:[%s7946_s1 + $0x20] sm:$0xff]   ;;  %v6286_v7 = vld [vmem:[%s7946_s1 + $0x28] sm:$0xff]   ;;  %vm1280_vm0 = vsmask.f32 7424  ;;  %vm1041_vm3 = vcmask 1045504  }
   0xf   : > { %724 = vmatpush1.bf16.msra.mxu0 %v6281_v0  ;;  %s8002_s25 = smov (!%p269_p3, %s5064_s25), 1  ;;  %v6287_v8 = vld [vmem:[%s7946_s1 + $0x30] sm:$0xff]   ;;  %v6288_v9 = vld [vmem:[%s7946_s1 + $0x38] sm:$0xff]   ;;  %v6289_v10 = vld [vmem:[%s7946_s1 + $0x40] sm:$0xff]   ;;  %vm2563_vm2 = vsmask.f32 6400 }
  0x10   : > { %725 = vmatprep.subr.bf16.mxu0 %v6451_v1  ;;  %s6268_s11 = smul.u32 408, %s8002_s25  ;;  %v6290_v11 = vld [vmem:[%s7946_s1 + $0x48] sm:$0xff]   ;;  %v6291_v12 = vld [vmem:[%s7946_s1 + $0x50] sm:$0xff]   ;;  %v6292_v13 = vld [vmem:[%s7946_s1 + $0x58] sm:$0xff]   ;;  %vm1065_vm4 = vcmask 261120   ;;  %vm2424_vm6 = vcmask 1044480  }
  0x11   : > { %v6293_v14 = vld [vmem:[%s7946_s1 + $0x60] sm:$0xff]   ;;  %v6294_v15 = vld [vmem:[%s7946_s1 + $0x68] sm:$0xff]   ;;  %v6295_v16 = vld [vmem:[%s7946_s1 + $0x70] sm:$0xff]   ;;  %vm1449_vm5 = vsmask.f32 5376  ;;  %vm6453_vm8 = vmmov 0  }
  0x12   : > { %s6523_s16 = scalar_lea.vmem %s7945_s0, %s6268_s11  ;;  %v6296_v17 = vld [vmem:[%s7946_s1 + $0x78] sm:$0xff]   ;;  %v6374_v58 = vld [vmem:[%s7948_s3 + $0x10] sm:$0xff]   ;;  %vm2745_vm7 = vsmask.f32 4352  ;;  %vm3708_vm9 = vcmask 523264   ;;  %s6269_s15 = smul.u32 36, %s8002_s25 }
  0x13   : > { %726 = vmatpush1.bf16.msra.mxu0 %v6282_v2  ;;  %v6299_v6 = vld [vmem:[%s6523_s16 + $0x4] ss:$8 sps:$4 sm:$0xff]   ;;  %v6297_v18 = vld [vmem:[%s6523_s16] ss:$8 sps:$4 sm:$0xff]   ;;  %v6300_v19 = vld [vmem:[%s6523_s16 + $0x14] ss:$8 sps:$4 sm:$0xff]   ;;  %5580 = vmatprep.subr.bf16.mxu1 %v6374_v58 }
  0x14   : > { %727 = vmatprep.subr.bf16.mxu0 %v6451_v1  ;;  %755 = vmatprep.mubr.bf16.mxu0 %v6299_v6  ;;  %v6302_v20 = vld [vmem:[%s6523_s16 + $0x10] ss:$8 sps:$4 sm:$0xff]   ;;  %v6303_v21 = vld [vmem:[%s6523_s16 + $0x24] ss:$8 sps:$4 sm:$0xff]   ;;  %v6305_v22 = vld [vmem:[%s6523_s16 + $0x20] ss:$8 sps:$4 sm:$0xff]   ;;  %s7907_s19 = scalar_lea.vmem %s7952_s7, %s6269_s15 }
  0x15   : > { %v6306_v23 = vld [vmem:[%s6523_s16 + $0x34] ss:$8 sps:$4 sm:$0xff]   ;;  %v6308_v24 = vld [vmem:[%s6523_s16 + $0x30] ss:$8 sps:$4 sm:$0xff]   ;;  %v6309_v25 = vld [vmem:[%s6523_s16 + $0x44] ss:$8 sps:$4 sm:$0xff]   ;;  %5581 = vmatpush3.bf16.msra.mxu1 %v6374_v58 }
  0x16   : > { %v6311_v26 = vld [vmem:[%s6523_s16 + $0x40] ss:$8 sps:$4 sm:$0xff]   ;;  %v6312_v27 = vld [vmem:[%s6523_s16 + $0x54] ss:$8 sps:$4 sm:$0xff]   ;;  %v6314_v28 = vld [vmem:[%s6523_s16 + $0x50] ss:$8 sps:$4 sm:$0xff]  }
  0x17   : > { %728 = vmatpush1.bf16.msra.mxu0 %v6283_v3  ;;  %v6315_v29 = vld [vmem:[%s6523_s16 + $0x64] ss:$8 sps:$4 sm:$0xff]   ;;  %v6317_v30 = vld [vmem:[%s6523_s16 + $0x60] ss:$8 sps:$4 sm:$0xff]   ;;  %v6318_v31 = vld [vmem:[%s6523_s16 + $0x74] ss:$8 sps:$4 sm:$0xff]  }
  0x18   : > { %729 = vmatprep.subr.bf16.mxu0 %v6451_v1  ;;  %v6320_v32 = vld [vmem:[%s6523_s16 + $0x70] ss:$8 sps:$4 sm:$0xff]   ;;  %v6321_v33 = vld [vmem:[%s6523_s16 + $0x84] ss:$8 sps:$4 sm:$0xff]   ;;  %v6323_v34 = vld [vmem:[%s6523_s16 + $0x80] ss:$8 sps:$4 sm:$0xff]  }
  0x19   : > { %v6324_v35 = vld [vmem:[%s6523_s16 + $0x94] ss:$8 sps:$4 sm:$0xff]   ;;  %v6326_v36 = vld [vmem:[%s6523_s16 + $0x90] ss:$8 sps:$4 sm:$0xff]   ;;  %v6327_v37 = vld [vmem:[%s6523_s16 + $0xa4] ss:$8 sps:$4 sm:$0xff]  }
  0x1a   : > { %v6329_v38 = vld [vmem:[%s6523_s16 + $0xa0] ss:$8 sps:$4 sm:$0xff]   ;;  %v6330_v39 = vld [vmem:[%s6523_s16 + $0xb4] ss:$8 sps:$4 sm:$0xff]   ;;  %v6332_v40 = vld [vmem:[%s6523_s16 + $0xb0] ss:$8 sps:$4 sm:$0xff]  }
  0x1b   : > { %730 = vmatpush1.bf16.msra.mxu0 %v6284_v4  ;;  %v6333_v41 = vld [vmem:[%s6523_s16 + $0xc4] ss:$8 sps:$4 sm:$0xff]   ;;  %v6335_v42 = vld [vmem:[%s6523_s16 + $0xc0] ss:$8 sps:$4 sm:$0xff]   ;;  %v6336_v43 = vld [vmem:[%s6523_s16 + $0xd4] ss:$8 sps:$4 sm:$0xff]  }
  0x1c   : > { %731 = vmatprep.subr.bf16.mxu0 %v6451_v1  ;;  %v6338_v44 = vld [vmem:[%s6523_s16 + $0xd0] ss:$8 sps:$4 sm:$0xff]   ;;  %v6339_v45 = vld [vmem:[%s6523_s16 + $0xe4] ss:$8 sps:$4 sm:$0xff]   ;;  %v6341_v46 = vld [vmem:[%s6523_s16 + $0xe0] ss:$8 sps:$4 sm:$0xff]  }
  0x1d   : > { %v6342_v47 = vld [vmem:[%s6523_s16 + $0xf4] ss:$8 sps:$4 sm:$0xff]   ;;  %v6344_v48 = vld [vmem:[%s6523_s16 + $0xf0] ss:$8 sps:$4 sm:$0xff]   ;;  %v6345_v49 = vld [vmem:[%s6523_s16 + $0x104] ss:$8 sps:$4 sm:$0xff]  }
  0x1e   : > { %v6347_v50 = vld [vmem:[%s6523_s16 + $0x100] ss:$8 sps:$4 sm:$0xff]   ;;  %v6348_v51 = vld [vmem:[%s6523_s16 + $0x114] ss:$8 sps:$4 sm:$0xff]   ;;  %v6350_v52 = vld [vmem:[%s6523_s16 + $0x110] ss:$8 sps:$4 sm:$0xff]  }
  0x1f   : > { %732 = vmatpush1.bf16.msra.mxu0 %v6285_v5  ;;  %v6351_v53 = vld [vmem:[%s6523_s16 + $0x124] ss:$8 sps:$4 sm:$0xff]   ;;  %v6353_v54 = vld [vmem:[%s6523_s16 + $0x120] ss:$8 sps:$4 sm:$0xff]   ;;  %v6354_v55 = vld [vmem:[%s6523_s16 + $0x134] ss:$8 sps:$4 sm:$0xff]  }
  0x20   : > { %733 = vmatprep.subr.bf16.mxu0 %v6451_v1  ;;  %v6356_v56 = vld [vmem:[%s6523_s16 + $0x130] ss:$8 sps:$4 sm:$0xff]   ;;  %v6357_v57 = vld [vmem:[%s6523_s16 + $0x144] ss:$8 sps:$4 sm:$0xff]   ;;  %v6359_v60 = vld [vmem:[%s6523_s16 + $0x140] ss:$8 sps:$4 sm:$0xff]  }
  0x21   : > { %v6375_v59 = vld [vmem:[%s7948_s3 + $0x18] sm:$0xff]   ;;  %v6363_v63 = vld [vmem:[%s6523_s16 + $0x164] ss:$8 sps:$4 sm:$0xff]   ;;  %v6365_v0 = vld [vmem:[%s6523_s16 + $0x160] ss:$8 sps:$4 sm:$0xff]   ;;  %vm4998_vm10 = vcmask 519168  }
  0x22   : > { %5582 = vmatprep.subr.bf16.mxu1 %v6375_v59  ;;  %v6360_v61 = vld [vmem:[%s6523_s16 + $0x154] ss:$8 sps:$4 sm:$0xff]   ;;  %v6362_v62 = vld [vmem:[%s6523_s16 + $0x150] ss:$8 sps:$4 sm:$0xff]   ;;  %v6614_v2 = vld [vmem:[%s7948_s3] sm:$0xff]   ;;  %vm5007_vm11 = vcmask 517120  }
  0x23   : > { %734 = vmatpush1.bf16.msra.mxu0 %v6286_v7  ;;  %5583 = vmatpush3.bf16.msra.mxu1 %v6375_v59  ;;  %v6368_v3 = vld [vmem:[%s6523_s16 + $0x170] ss:$8 sps:$4 sm:$0xff]   ;;  %v6369_v4 = vld [vmem:[%s6523_s16 + $0x184] ss:$8 sps:$4 sm:$0xff]   ;;  %v6371_v6 = vld [vmem:[%s6523_s16 + $0x180] ss:$8 sps:$4 sm:$0xff]  }
  0x24   : > { %735 = vmatprep.subr.bf16.mxu0 %v6451_v1  ;;  %5596 = vmatprep.subr.bf16.mxu1 %v6614_v2  ;;  %v330_v5 = vld [vmem:[%s6523_s16 + $0x190] sm:$0xff] }
  0x25   : > { %v5123_v7 = vcombine.high %v330_v5, %v330_v5 }
  0x27   : > { %736 = vmatpush1.bf16.msra.mxu0 %v6287_v8  ;;  %v5122_v8 = vcombine.low %v330_v5, %v330_v5 }
  0x28   : > { %737 = vmatprep.subr.bf16.mxu0 %v6451_v1 }
  0x2b   : > { %738 = vmatpush1.bf16.msra.mxu0 %v6288_v9  ;;  %v6624_v9 = vld [vmem:[%s7947_s2] ss:$0 sm:$0xff] }
  0x2c   : > { %739 = vmatprep.subr.bf16.mxu0 %v6451_v1 }
  0x2f   : > { %740 = vmatpush1.bf16.msra.mxu0 %v6289_v10 }
  0x30   : > { %741 = vmatprep.subr.bf16.mxu0 %v6451_v1 }
  0x33   : > { %742 = vmatpush1.bf16.msra.mxu0 %v6290_v11 }
  0x34   : > { %743 = vmatprep.subr.bf16.mxu0 %v6451_v1 }
  0x37   : > { %744 = vmatpush1.bf16.msra.mxu0 %v6291_v12 }
  0x38   : > { %745 = vmatprep.subr.bf16.mxu0 %v6451_v1 }
  0x3b   : > { %746 = vmatpush1.bf16.msra.mxu0 %v6292_v13 }
  0x3c   : > { %747 = vmatprep.subr.bf16.mxu0 %v6451_v1 }
  0x3f   : > { %748 = vmatpush1.bf16.msra.mxu0 %v6293_v14 }
  0x40   : > { %749 = vmatprep.subr.bf16.mxu0 %v6451_v1 }
  0x43   : > { %750 = vmatpush1.bf16.msra.mxu0 %v6294_v15 }
  0x44   : > { %751 = vmatprep.subr.bf16.mxu0 %v6451_v1 }
  0x47   : > { %752 = vmatpush1.bf16.msra.mxu0 %v6295_v16 }
  0x48   : > { %753 = vmatprep.subr.bf16.mxu0 %v6451_v1  ;;  %v6366_v1 = vld [vmem:[%s6523_s16 + $0x174] ss:$8 sps:$4 sm:$0xff]  }
  0x4b   : > { %754 = vmatpush1.bf16.msra.mxu0 %v6296_v17 }
  0x4e   : > { %756 = vmatmul.mubr.bf16.vlgmr.msra.gmra.mrb[0].mxu0 %v6297_v18 }
  0x4f   : > { %763 = vmatprep.mubr.bf16.mxu0 %v6300_v19 }
  0x56   : > { %764 = vmatmul.mubr.bf16.gmra.mrb[4].mxu0 %v6302_v20 }
  0x57   : > { %771 = vmatprep.mubr.bf16.mxu0 %v6303_v21 }
  0x5e   : > { %772 = vmatmul.mubr.bf16.gmra.mrb[8].mxu0 %v6305_v22 }
  0x5f   : > { %779 = vmatprep.mubr.bf16.mxu0 %v6306_v23 }
  0x66   : > { %780 = vmatmul.mubr.bf16.gmra.mrb[12].mxu0 %v6308_v24 }
  0x67   : > { %787 = vmatprep.mubr.bf16.mxu0 %v6309_v25 }
  0x6e   : > { %788 = vmatmul.mubr.bf16.gmra.mrb[16].mxu0 %v6311_v26 }
  0x6f   : > { %795 = vmatprep.mubr.bf16.mxu0 %v6312_v27 }
  0x76   : > { %796 = vmatmul.mubr.bf16.gmra.mrb[20].mxu0 %v6314_v28 }
  0x77   : > { %803 = vmatprep.mubr.bf16.mxu0 %v6315_v29 }
  0x7e   : > { %804 = vmatmul.mubr.bf16.gmra.mrb[24].mxu0 %v6317_v30 }
  0x7f   : > { %811 = vmatprep.mubr.bf16.mxu0 %v6318_v31 }
  0x86   : > { %812 = vmatmul.mubr.bf16.gmra.mrb[28].mxu0 %v6320_v32 }
  0x87   : > { %819 = vmatprep.mubr.bf16.mxu0 %v6321_v33 }
  0x8e   : > { %820 = vmatmul.mubr.bf16.gmra.mrb[32].mxu0 %v6323_v34 }
  0x8f   : > { %827 = vmatprep.mubr.bf16.mxu0 %v6324_v35 }
  0x96   : > { %828 = vmatmul.mubr.bf16.gmra.mrb[36].mxu0 %v6326_v36 }
  0x97   : > { %835 = vmatprep.mubr.bf16.mxu0 %v6327_v37 }
  0x9e   : > { %836 = vmatmul.mubr.bf16.gmra.mrb[40].mxu0 %v6329_v38 }
  0x9f   : > { %843 = vmatprep.mubr.bf16.mxu0 %v6330_v39 }
  0xa6   : > { %844 = vmatmul.mubr.bf16.gmra.mrb[44].mxu0 %v6332_v40 }
  0xa7   : > { %851 = vmatprep.mubr.bf16.mxu0 %v6333_v41 }
  0xae   : > { %852 = vmatmul.mubr.bf16.gmra.mrb[48].mxu0 %v6335_v42 }
  0xaf   : > { %859 = vmatprep.mubr.bf16.mxu0 %v6336_v43 }
  0xb6   : > { %860 = vmatmul.mubr.bf16.gmra.mrb[52].mxu0 %v6338_v44 }
  0xb7   : > { %867 = vmatprep.mubr.bf16.mxu0 %v6339_v45 }
  0xbe   : > { %868 = vmatmul.mubr.bf16.gmra.mrb[56].mxu0 %v6341_v46 }
  0xbf   : > { %875 = vmatprep.mubr.bf16.mxu0 %v6342_v47 }
  0xc6   : > { %876 = vmatmul.mubr.bf16.gmra.mrb[60].mxu0 %v6344_v48 }
  0xc7   : > { %883 = vmatprep.mubr.bf16.mxu0 %v6345_v49 }
  0xce   : > { %884 = vmatmul.mubr.bf16.gmra.mrb[64].mxu0 %v6347_v50 }
  0xcf   : > { %891 = vmatprep.mubr.bf16.mxu0 %v6348_v51 }
  0xd6   : > { %892 = vmatmul.mubr.bf16.gmra.mrb[68].mxu0 %v6350_v52 }
  0xd7   : > { %899 = vmatprep.mubr.bf16.mxu0 %v6351_v53 }
  0xde   : > { %900 = vmatmul.mubr.bf16.gmra.mrb[72].mxu0 %v6353_v54 }
  0xdf   : > { %907 = vmatprep.mubr.bf16.mxu0 %v6354_v55 }
  0xe6   : > { %908 = vmatmul.mubr.bf16.gmra.mrb[76].mxu0 %v6356_v56 }
  0xe7   : > { %915 = vmatprep.mubr.bf16.mxu0 %v6357_v57 }
  0xee   : > { %916 = vmatmul.mubr.bf16.gmra.mrb[80].mxu0 %v6359_v60 }
  0xef   : > { %923 = vmatprep.mubr.bf16.mxu0 %v6360_v61 }
  0xf6   : > { %924 = vmatmul.mubr.bf16.gmra.mrb[84].mxu0 %v6362_v62 }
  0xf7   : > { %931 = vmatprep.mubr.bf16.mxu0 %v6363_v63 }
  0xfe   : > { %932 = vmatmul.mubr.bf16.gmra.mrb[88].mxu0 %v6365_v0 }
  0xff   : > { %939 = vmatprep.mubr.bf16.mxu0 %v6366_v1 }
 0x106   : > { %940 = vmatmul.mubr.bf16.gmra.mrb[92].mxu0 %v6368_v3 }
 0x107   : > { %947 = vmatprep.mubr.bf16.mxu0 %v6369_v4 }
 0x10e   : > { %948 = vmatmul.mubr.bf16.gmra.mrb[96].mxu0 %v6371_v6 }
 0x10f   : > { %955 = vmatprep.mubr.bf16.mxu0 %v5123_v7 }
 0x116   : > { %956 = vmatmul.mubr.bf16.gmra.mrb[100].mxu0 %v5122_v8 }
 0x121   : > { %v757_v10 = vpop.f32.mrb[0].mxu0 }
 0x122   : > { %v758_v11 = vadd.f32 %v6624_v9, %v757_v10  ;;  %v759_v12 = vpop.f32.mrb[1].mxu0 }
 0x123   : > { %v760_v13 = vpop.f32.mrb[2].mxu0 }
 0x124   : > { %v761_v14 = vadd.f32 %v6624_v9, %v760_v13  ;;  %v762_v15 = vpop.f32.mrb[3].mxu0  ;;  %v963_v16 = vmax.f32 %v758_v11, 0.0 }
 0x126   : > { %v964_v17 = vmax.f32 %v761_v14, 0.0 }
 0x128   : > { %v6628_v18 = vpack.c.bf16 %v964_v17, %v963_v16 }
 0x129   : > { %v765_v19 = vpop.f32.mrb[4].mxu0 }
 0x12a   : > { %v766_v20 = vadd.f32 %v6624_v9, %v765_v19  ;;  %v767_v21 = vpop.f32.mrb[5].mxu0  ;;  %v1283_v23 = vshll.u32 %v6628_v18, 16  ;;  %v1281_v32 = vshrl.u32 %v6628_v18, 16 }
 0x12b   : > { %v768_v22 = vpop.f32.mrb[6].mxu0 }
 0x12c   : > { %v965_v24 = vmax.f32 %v766_v20, 0.0  ;;  %v769_v25 = vadd.f32 %v6624_v9, %v768_v22  ;;  %v770_v26 = vpop.f32.mrb[7].mxu0  ;;  %v1285_v29 = vrot.slane %v1283_v23, 1 }
 0x12e   : > { %v2257_v27 = vpack.c.bf16 %v965_v24, %v964_v17  ;;  %v966_v28 = vmax.f32 %v769_v25, 0.0  ;;  %v1286_v40 = vor.u32 %v1285_v29, %v1281_v32 }
 0x130   : > { %v6633_v30 = vpack.c.bf16 %v966_v28, %v965_v24  ;;  %v2565_v37 = vshrl.u32 %v2257_v27, 16  ;;  %v2568_v42 = vshll.u32 %v2257_v27, 16  ;;  %v2274_v47 = vrot.slane %v2257_v27, 1 }
 0x131   : > { %v773_v31 = vpop.f32.mrb[8].mxu0 }
 0x132   : > { %v1287_v33 = vshll.u32 %v6633_v30, 16  ;;  %v775_v34 = vpop.f32.mrb[9].mxu0  ;;  %v774_v35 = vadd.f32 %v6624_v9, %v773_v31  ;;  %v2567_v48 = vrot.slane %v2565_v37, 1  ;;  %v2570_v50 = vrot.slane %v2568_v42, 2 }
 0x133   : > { %v776_v36 = vpop.f32.mrb[10].mxu0  ;;  %v1291_v55 = vshrl.u32 %v6633_v30, 16 }
 0x134   : > { %v777_v38 = vadd.f32 %v6624_v9, %v776_v36  ;;  %v778_v39 = vpop.f32.mrb[11].mxu0  ;;  %v1289_v41 = vrot.slane %v1287_v33, 1  ;;  %v967_v43 = vmax.f32 %v774_v35, 0.0  ;;  %v2571_v5 = vor.u32 %v2570_v50, %v2567_v48 }
 0x136   : > { %v968_v44 = vmax.f32 %v777_v38, 0.0  ;;  %v6640_v45 = vsel %vm1280_vm0, %v1286_v40, %v1289_v41  ;;  %v2258_v46 = vpack.c.bf16 %v967_v43, %v966_v28  ;;  %v1293_v4 = vor.u32 %v1291_v55, %v1289_v41 }
 0x138   : > { %v6642_v49 = vpack.c.bf16 %v968_v44, %v967_v43  ;;  %v2275_v51 = vrot.slane %v2258_v46, 1  ;;  %v2573_v52 = vshrl.u32 %v2258_v46, 16  ;;  %v2576_v53 = vshll.u32 %v2258_v46, 16 }
 0x139   : > { %v781_v54 = vpop.f32.mrb[12].mxu0 }
 0x13a   : > { %v1294_v56 = vshll.u32 %v6642_v49, 16  ;;  %v782_v57 = vadd.f32 %v6624_v9, %v781_v54  ;;  %v783_v58 = vpop.f32.mrb[13].mxu0  ;;  %v2575_v59 = vrot.slane %v2573_v52, 1  ;;  %v2578_v60 = vrot.slane %v2576_v53, 2 }
 0x13b   : > { %v784_v61 = vpop.f32.mrb[14].mxu0  ;;  %v6648_v62 = vsel %vm2273_vm1, %v2274_v47, %v2275_v51  ;;  %v1298_v17 = vshrl.u32 %v6642_v49, 16 }
 0x13c   : > { %v1296_v63 = vrot.slane %v1294_v56, 1  ;;  %v969_v0 = vmax.f32 %v782_v57, 0.0  ;;  %v785_v1 = vadd.f32 %v6624_v9, %v784_v61  ;;  %v786_v3 = vpop.f32.mrb[15].mxu0  ;;  %v2579_v6 = vor.u32 %v2578_v60, %v2575_v59 }
 0x13e   : > { %v2259_v7 = vpack.c.bf16 %v969_v0, %v968_v44  ;;  %v970_v8 = vmax.f32 %v785_v1, 0.0  ;;  %v6652_v10 = vsel %vm1280_vm0, %v1293_v4, %v1296_v63  ;;  %v6655_v11 = vsel %vm2563_vm2, %v2571_v5, %v2579_v6 }
 0x13f   : > { %v1300_v29 = vor.u32 %v1298_v17, %v1296_v63 }
 0x140   : > { %v2277_v12 = vrot.slane %v2259_v7, 1  ;;  %v2582_v13 = vshrl.u32 %v2259_v7, 16  ;;  %v2585_v14 = vshll.u32 %v2259_v7, 16  ;;  %v6657_v15 = vpack.c.bf16 %v970_v8, %v969_v0 }
 0x141   : > { %v789_v16 = vpop.f32.mrb[16].mxu0 }
 0x142   : > { %v2584_v19 = vrot.slane %v2582_v13, 1  ;;  %v2587_v20 = vrot.slane %v2585_v14, 2  ;;  %v1301_v21 = vshll.u32 %v6657_v15, 16  ;;  %v791_v22 = vpop.f32.mrb[17].mxu0  ;;  %v790_v23 = vadd.f32 %v6624_v9, %v789_v16 }
 0x143   : > { %v792_v24 = vpop.f32.mrb[18].mxu0  ;;  %v6663_v25 = vsel %vm2273_vm1, %v2275_v51, %v2277_v12  ;;  %v1305_v42 = vshrl.u32 %v6657_v15, 16 }
 0x144   : > { %v2588_v26 = vor.u32 %v2587_v20, %v2584_v19  ;;  %v793_v27 = vadd.f32 %v6624_v9, %v792_v24  ;;  %v794_v28 = vpop.f32.mrb[19].mxu0  ;;  %v1303_v31 = vrot.slane %v1301_v21, 1  ;;  %v971_v32 = vmax.f32 %v790_v23, 0.0 }
 0x146   : > { %v972_v33 = vmax.f32 %v793_v27, 0.0  ;;  %v6667_v34 = vsel %vm1280_vm0, %v1300_v29, %v1303_v31  ;;  %v6670_v35 = vsel %vm2563_vm2, %v2579_v6, %v2588_v26  ;;  %v2260_v36 = vpack.c.bf16 %v971_v32, %v970_v8 }
 0x147   : > { %v1307_v55 = vor.u32 %v1305_v42, %v1303_v31 }
 0x148   : > { %v6672_v37 = vpack.c.bf16 %v972_v33, %v971_v32  ;;  %v2279_v38 = vrot.slane %v2260_v36, 1  ;;  %v2591_v39 = vshrl.u32 %v2260_v36, 16  ;;  %v2594_v40 = vshll.u32 %v2260_v36, 16 }
 0x149   : > { %v797_v41 = vpop.f32.mrb[20].mxu0 }
 0x14a   : > { %v1308_v43 = vshll.u32 %v6672_v37, 16  ;;  %v798_v44 = vadd.f32 %v6624_v9, %v797_v41  ;;  %v799_v46 = vpop.f32.mrb[21].mxu0  ;;  %v2593_v47 = vrot.slane %v2591_v39, 1  ;;  %v2596_v48 = vrot.slane %v2594_v40, 2 }
 0x14b   : > { %v800_v50 = vpop.f32.mrb[22].mxu0  ;;  %v6678_v51 = vsel %vm2273_vm1, %v2277_v12, %v2279_v38  ;;  %v1312_v5 = vshrl.u32 %v6672_v37, 16 }
 0x14c   : > { %v973_v52 = vmax.f32 %v798_v44, 0.0  ;;  %v801_v53 = vadd.f32 %v6624_v9, %v800_v50  ;;  %v802_v54 = vpop.f32.mrb[23].mxu0  ;;  %v1310_v56 = vrot.slane %v1308_v43, 1  ;;  %v2597_v57 = vor.u32 %v2596_v48, %v2593_v47 }
 0x14e   : > { %v2261_v58 = vpack.c.bf16 %v973_v52, %v972_v33  ;;  %v974_v59 = vmax.f32 %v801_v53, 0.0  ;;  %v6682_v60 = vsel %vm1280_vm0, %v1307_v55, %v1310_v56  ;;  %v6685_v61 = vsel %vm2563_vm2, %v2588_v26, %v2597_v57 }
 0x14f   : > { %v1314_v20 = vor.u32 %v1312_v5, %v1310_v56 }
 0x150   : > { %v2281_v63 = vrot.slane %v2261_v58, 1  ;;  %v2600_v0 = vshrl.u32 %v2261_v58, 16  ;;  %v2603_v1 = vshll.u32 %v2261_v58, 16  ;;  %v6687_v3 = vpack.c.bf16 %v974_v59, %v973_v52 }
 0x151   : > { %v805_v4 = vpop.f32.mrb[24].mxu0 }
 0x152   : > { %v2602_v6 = vrot.slane %v2600_v0, 1  ;;  %v2605_v7 = vrot.slane %v2603_v1, 2  ;;  %v1315_v8 = vshll.u32 %v6687_v3, 16  ;;  %v807_v12 = vpop.f32.mrb[25].mxu0  ;;  %v806_v13 = vadd.f32 %v6624_v9, %v805_v4 }
 0x153   : > { %v808_v14 = vpop.f32.mrb[26].mxu0  ;;  %v6693_v16 = vsel %vm2273_vm1, %v2279_v38, %v2281_v63 }
 0x154   : > { %v809_v17 = vadd.f32 %v6624_v9, %v808_v14  ;;  %v810_v19 = vpop.f32.mrb[27].mxu0  ;;  %v6696_v21 = vrot.slane %v1315_v8, 1  ;;  %v2606_v22 = vor.u32 %v2605_v7, %v2602_v6  ;;  %v975_v23 = vmax.f32 %v806_v13, 0.0 }
 0x156   : > { %v976_v24 = vmax.f32 %v809_v17, 0.0  ;;  %v6700_v26 = vsel %vm1280_vm0, %v1314_v20, %v6696_v21  ;;  %v6703_v27 = vsel %vm2563_vm2, %v2597_v57, %v2606_v22  ;;  %v6705_v28 = vpack.c.bf16 %v975_v23, %v974_v59 }
 0x158   : > { %v1025_v29 = vpack.c.bf16 %v976_v24, %v975_v23  ;;  %v7954_v31 = vrot.slane %v6705_v28, 1  ;;  %v2609_v32 = vshrl.u32 %v6705_v28, 16  ;;  %v2612_v33 = vshll.u32 %v6705_v28, 16 }
 0x159   : > { %v813_v36 = vpop.f32.mrb[28].mxu0 }
 0x15a   : > { %v814_v38 = vadd.f32 %v6624_v9, %v813_v36  ;;  %v815_v39 = vpop.f32.mrb[29].mxu0  ;;  %v2611_v40 = vrot.slane %v2609_v32, 1  ;;  %v2614_v41 = vrot.slane %v2612_v33, 2  ;;  %v6714_v43 = vsel %vm2273_vm1, %v2281_v63, %v7954_v31 }
 0x15b   : > { %v816_v42 = vpop.f32.mrb[30].mxu0  ;;  %v1451_v50 = vshrl.u32 %v1025_v29, 16  ;;  %v1454_v52 = vshll.u32 %v1025_v29, 16  ;;  %v1042_v6 = vrot.slane %v1025_v29, 2 }
 0x15c   : > { %v977_v44 = vmax.f32 %v814_v38, 0.0  ;;  %v817_v46 = vadd.f32 %v6624_v9, %v816_v42  ;;  %v818_v47 = vpop.f32.mrb[31].mxu0  ;;  %v6717_v48 = vor.u32 %v2614_v41, %v2611_v40 }
 0x15d   : > { %v1453_v58 = vrot.slane %v1451_v50, 2  ;;  %v1456_v59 = vrot.slane %v1454_v52, 3 }
 0x15e   : > { %v2408_v53 = vpack.c.bf16 %v977_v44, %v976_v24  ;;  %v978_v54 = vmax.f32 %v817_v46, 0.0  ;;  %v6721_v55 = vsel %vm2563_vm2, %v2606_v22, %v6717_v48 }
 0x15f   : > { %v1457_v24 = vor.u32 %v1456_v59, %v1453_v58 }
 0x160   : > { %v1026_v56 = vpack.c.bf16 %v978_v54, %v977_v44  ;;  %v2747_v8 = vshrl.u32 %v2408_v53, 16  ;;  %v2750_v19 = vshll.u32 %v2408_v53, 16  ;;  %v2425_v29 = vrot.slane %v2408_v53, 3 }
 0x161   : > { %v821_v57 = vpop.f32.mrb[32].mxu0 }
 0x162   : > { %v1459_v63 = vshrl.u32 %v1026_v56, 16  ;;  %v1462_v0 = vshll.u32 %v1026_v56, 16  ;;  %v823_v1 = vpop.f32.mrb[33].mxu0  ;;  %v822_v4 = vadd.f32 %v6624_v9, %v821_v57  ;;  %v1043_v7 = vrot.slane %v1026_v56, 2 }
 0x163   : > { %v824_v5 = vpop.f32.mrb[34].mxu0  ;;  %v2749_v36 = vrot.slane %v2747_v8, 3  ;;  %v2752_v40 = vrot.slane %v2750_v19, 4 }
 0x164   : > { %v1461_v12 = vrot.slane %v1459_v63, 2  ;;  %v1464_v13 = vrot.slane %v1462_v0, 3  ;;  %v825_v14 = vadd.f32 %v6624_v9, %v824_v5  ;;  %v826_v17 = vpop.f32.mrb[35].mxu0  ;;  %v979_v20 = vmax.f32 %v822_v4, 0.0 }
 0x165   : > { %v1044_v22 = vsel %vm1041_vm3, %v1042_v6, %v1043_v7  ;;  %v6377_v6 = vld [vmem:[%s7948_s3 + $0x8] sm:$0xff]  }
 0x166   : > { %v980_v23 = vmax.f32 %v825_v14, 0.0  ;;  %5584 = vmatprep.mubr.msk.bf16.mxu1 %vm1065_vm4, %v1044_v22  ;;  %v1465_v32 = vor.u32 %v1464_v13, %v1461_v12  ;;  %v2409_v33 = vpack.c.bf16 %v979_v20, %v978_v54  ;;  %v2753_v12 = vor.u32 %v2752_v40, %v2749_v36 }
 0x168   : > { %v1027_v38 = vpack.c.bf16 %v980_v23, %v979_v20  ;;  %v6728_v39 = vsel %vm1449_vm5, %v1457_v24, %v1465_v32  ;;  %v2426_v41 = vrot.slane %v2409_v33, 3  ;;  %v2755_v42 = vshrl.u32 %v2409_v33, 16 }
 0x169   : > { %v2758_v44 = vshll.u32 %v2409_v33, 16  ;;  %v829_v46 = vpop.f32.mrb[36].mxu0 }
 0x16a   : > { %v1045_v47 = vrot.slane %v1027_v38, 2  ;;  %v1468_v50 = vshrl.u32 %v1027_v38, 16  ;;  %v1471_v52 = vshll.u32 %v1027_v38, 16  ;;  %v830_v56 = vadd.f32 %v6624_v9, %v829_v46  ;;  %v831_v57 = vpop.f32.mrb[37].mxu0 }
 0x16b   : > { %v2757_v58 = vrot.slane %v2755_v42, 3  ;;  %v2760_v54 = vrot.slane %v2758_v44, 4  ;;  %v832_v59 = vpop.f32.mrb[38].mxu0  ;;  %v6732_v53 = vsel %vm2424_vm6, %v2425_v29, %v2426_v41 }
 0x16c   : > { %v1470_v63 = vrot.slane %v1468_v50, 2  ;;  %v1473_v0 = vrot.slane %v1471_v52, 3  ;;  %v981_v1 = vmax.f32 %v830_v56, 0.0  ;;  %v833_v4 = vadd.f32 %v6624_v9, %v832_v59  ;;  %v834_v5 = vpop.f32.mrb[39].mxu0 }
 0x16d   : > { %v1046_v8 = vsel %vm1041_vm3, %v1043_v7, %v1045_v47  ;;  %v2761_v13 = vor.u32 %v2760_v54, %v2757_v58  ;;  %v6747_v7 = vld [vmem:[%s7948_s3 + $0x20] sm:$0xff]  }
 0x16e   : > { %v1474_v14 = vor.u32 %v1473_v0, %v1470_v63  ;;  %v2410_v17 = vpack.c.bf16 %v981_v1, %v980_v23  ;;  %v982_v19 = vmax.f32 %v833_v4, 0.0  ;;  %5585 = vmatmul.mubr.msk.bf16.vlgmr.msra.gmra.mrb[0].mxu1 %vm1065_vm4, %v1046_v8 }
 0x16f   : > { %5597 = vmatpush3.bf16.msra.mxu1 %v6614_v2  ;;  %v6742_v20 = vsel %vm2745_vm7, %v2753_v12, %v2761_v13 }
 0x170   : > { %v2428_v22 = vrot.slane %v2410_v17, 3  ;;  %v2764_v24 = vshrl.u32 %v2410_v17, 16  ;;  %v2767_v33 = vshll.u32 %v2410_v17, 16  ;;  %v1028_v29 = vpack.c.bf16 %v982_v19, %v981_v1  ;;  %5598 = vmatprep.subr.bf16.mxu1 %v6377_v6 }
 0x171   : > { %v837_v36 = vpop.f32.mrb[40].mxu0  ;;  %v6750_v23 = vsel %vm1449_vm5, %v1465_v32, %v1474_v14 }
 0x172   : > { %v2766_v38 = vrot.slane %v2764_v24, 3  ;;  %v2769_v40 = vrot.slane %v2767_v33, 4  ;;  %v1047_v2 = vrot.slane %v1028_v29, 2  ;;  %v1477_v42 = vshrl.u32 %v1028_v29, 16  ;;  %v839_v44 = vpop.f32.mrb[41].mxu0 }
 0x173   : > { %v1480_v46 = vshll.u32 %v1028_v29, 16  ;;  %v838_v50 = vadd.f32 %v6624_v9, %v837_v36  ;;  %v840_v52 = vpop.f32.mrb[42].mxu0  ;;  %5599 = vmatpush3.bf16.msra.mxu1 %v6377_v6  ;;  %v6754_v56 = vsel %vm2424_vm6, %v2426_v41, %v2428_v22 }
 0x174   : > { %v2770_v57 = vor.u32 %v2769_v40, %v2766_v38  ;;  %v1479_v58 = vrot.slane %v1477_v42, 2  ;;  %v841_v54 = vadd.f32 %v6624_v9, %v840_v52  ;;  %v842_v59 = vpop.f32.mrb[43].mxu0  ;;  %v1048_v32 = vsel %vm1041_vm3, %v1045_v47, %v1047_v2  ;;  %5612 = vmatprep.subr.bf16.mxu1 %v6747_v7 }
 0x175   : > { %v1482_v63 = vrot.slane %v1480_v46, 3  ;;  %v983_v0 = vmax.f32 %v838_v50, 0.0  ;;  %5588 = vmatprep.mubr.msk.bf16.mxu1 %vm1065_vm4, %v1048_v32 }
 0x176   : > { %v984_v1 = vmax.f32 %v841_v54, 0.0  ;;  %v6761_v4 = vsel %vm2745_vm7, %v2761_v13, %v2770_v57 }
 0x177   : > { %v2411_v5 = vpack.c.bf16 %v983_v0, %v982_v19  ;;  %v1483_v41 = vor.u32 %v1482_v63, %v1479_v58 }
 0x178   : > { %v1029_v6 = vpack.c.bf16 %v984_v1, %v983_v0 }
 0x179   : > { %v2430_v8 = vrot.slane %v2411_v5, 3  ;;  %v2773_v12 = vshrl.u32 %v2411_v5, 16  ;;  %v2776_v17 = vshll.u32 %v2411_v5, 16  ;;  %v845_v24 = vpop.f32.mrb[44].mxu0  ;;  %v6764_v33 = vsel %vm1449_vm5, %v1474_v14, %v1483_v41 }
 0x17a   : > { %v1049_v47 = vrot.slane %v1029_v6, 2  ;;  %v1486_v29 = vshrl.u32 %v1029_v6, 16  ;;  %v1489_v36 = vshll.u32 %v1029_v6, 16  ;;  %v846_v38 = vadd.f32 %v6624_v9, %v845_v24  ;;  %v847_v40 = vpop.f32.mrb[45].mxu0 }
 0x17b   : > { %v2775_v42 = vrot.slane %v2773_v12, 3  ;;  %v2778_v44 = vrot.slane %v2776_v17, 4  ;;  %v848_v13 = vpop.f32.mrb[46].mxu0  ;;  %v6768_v19 = vsel %vm2424_vm6, %v2428_v22, %v2430_v8 }
 0x17c   : > { %v1488_v46 = vrot.slane %v1486_v29, 2  ;;  %v1491_v50 = vrot.slane %v1489_v36, 3  ;;  %v985_v52 = vmax.f32 %v846_v38, 0.0  ;;  %v849_v58 = vadd.f32 %v6624_v9, %v848_v13  ;;  %v850_v54 = vpop.f32.mrb[47].mxu0 }
 0x17d   : > { %v1050_v14 = vsel %vm1041_vm3, %v1047_v2, %v1049_v47  ;;  %v2779_v59 = vor.u32 %v2778_v44, %v2775_v42 }
 0x17e   : > { %v2412_v32 = vpack.c.bf16 %v985_v52, %v984_v1  ;;  %v986_v63 = vmax.f32 %v849_v58, 0.0  ;;  %5589 = vmatmul.mubr.msk.bf16.gmra.mrb[4].mxu1 %vm1065_vm4, %v1050_v14  ;;  %v1492_v0 = vor.u32 %v1491_v50, %v1488_v46 }
 0x17f   : > { %v6774_v5 = vsel %vm2745_vm7, %v2770_v57, %v2779_v59 }
 0x180   : > { %7958 = vst [vmem:[#allocation2_spill] sm:$0xff] %v6774_v5  ;;  %v2432_v6 = vrot.slane %v2412_v32, 3  ;;  %v2782_v22 = vshrl.u32 %v2412_v32, 16  ;;  %v2785_v12 = vshll.u32 %v2412_v32, 16  ;;  %v1030_v17 = vpack.c.bf16 %v986_v63, %v985_v52 }
 0x181   : > { %v853_v24 = vpop.f32.mrb[48].mxu0  ;;  %v6777_v29 = vsel %vm1449_vm5, %v1483_v41, %v1492_v0 }
 0x182   : > { %v2784_v36 = vrot.slane %v2782_v22, 3  ;;  %v2787_v38 = vrot.slane %v2785_v12, 4  ;;  %v1051_v2 = vrot.slane %v1030_v17, 2  ;;  %v1495_v40 = vshrl.u32 %v1030_v17, 16  ;;  %v855_v1 = vpop.f32.mrb[49].mxu0 }
 0x183   : > { %v1498_v42 = vshll.u32 %v1030_v17, 16  ;;  %v854_v44 = vadd.f32 %v6624_v9, %v853_v24  ;;  %v856_v13 = vpop.f32.mrb[50].mxu0  ;;  %v6781_v57 = vsel %vm2424_vm6, %v2430_v8, %v2432_v6 }
 0x184   : > { %v1497_v46 = vrot.slane %v1495_v40, 2  ;;  %v857_v50 = vadd.f32 %v6624_v9, %v856_v13  ;;  %v1052_v52 = vsel %vm1041_vm3, %v1049_v47, %v1051_v2  ;;  %v858_v58 = vpop.f32.mrb[51].mxu0  ;;  %v2788_v41 = vor.u32 %v2787_v38, %v2784_v36 }
 0x185   : > { %v1500_v54 = vrot.slane %v1498_v42, 3  ;;  %v987_v14 = vmax.f32 %v854_v44, 0.0  ;;  %5592 = vmatprep.mubr.msk.bf16.mxu1 %vm1065_vm4, %v1052_v52 }
 0x186   : > { %v988_v32 = vmax.f32 %v857_v50, 0.0  ;;  %5593 = vmatmul.mubr.msk.bf16.gmra.mrb[8].mxu1 %vm1065_vm4, %v1051_v2  ;;  %v6788_v22 = vsel %vm2745_vm7, %v2779_v59, %v2788_v41 }
 0x187   : > { %7959 = vst [vmem:[#allocation3_spill] sm:$0xff] %v6788_v22  ;;  %v6790_v12 = vpack.c.bf16 %v987_v14, %v986_v63  ;;  %5600 = vmatprep.mubr.msk.bf16.mxu1 %vm1065_vm4, %v6628_v18  ;;  %v6794_v8 = vor.u32 %v1500_v54, %v1497_v46 }
 0x188   : > { %v2740_v47 = vpack.c.bf16 %v988_v32, %v988_v32 }
 0x189   : > { %v7953_v17 = vrot.slane %v6790_v12, 3  ;;  %v2791_v24 = vshrl.u32 %v6790_v12, 16  ;;  %v2794_v36 = vshll.u32 %v6790_v12, 16  ;;  %v861_v38 = vpop.f32.mrb[52].mxu0  ;;  %v6801_v2 = vsel %vm1449_vm5, %v1492_v0, %v6794_v8  ;;  %v6379_v0 = vld [vmem:[%s7948_s3 + $0x28] sm:$0xff]  }
 0x18a   : > { %v2800_v59 = vshll.u32 %v2740_v47, 16  ;;  %v862_v63 = vadd.f32 %v6624_v9, %v861_v38  ;;  %v863_v40 = vpop.f32.mrb[53].mxu0 }
 0x18b   : > { %v2793_v1 = vrot.slane %v2791_v24, 3  ;;  %v2796_v18 = vrot.slane %v2794_v36, 4  ;;  %v864_v42 = vpop.f32.mrb[54].mxu0  ;;  %v6807_v44 = vsel %vm2424_vm6, %v2432_v6, %v7953_v17 }
 0x18c   : > { %v2802_v13 = vrot.slane %v2800_v59, 4  ;;  %v989_v46 = vmax.f32 %v862_v63, 0.0  ;;  %v865_v50 = vadd.f32 %v6624_v9, %v864_v42  ;;  %v866_v52 = vpop.f32.mrb[55].mxu0 }
 0x18d   : > { %v2797_v58 = vor.u32 %v2796_v18, %v2793_v1 }
 0x18e   : > { %5601 = vmatmul.mubr.msk.bf16.vlgmr.msra.gmra.mrb[0].mxu1 %vm1065_vm4, %v6633_v30  ;;  %v6815_v54 = vpack.c.bf16 %v989_v46, %v988_v32  ;;  %v990_v14 = vmax.f32 %v865_v50, 0.0  ;;  %v6829_v30 = vld [vmem:[%s7948_s3 + $0x30] sm:$0xff]  }
 0x18f   : > { %5613 = vmatpush3.bf16.msra.mxu1 %v6747_v7  ;;  %5604 = vmatprep.mubr.msk.bf16.mxu1 %vm1065_vm4, %v6642_v49  ;;  %v6821_v6 = vsel %vm2745_vm7, %v2788_v41, %v2797_v58  ;;  %v6824_v47 = vsel %vm2745_vm7, %v2797_v58, %v2802_v13 }
 0x190   : > { %7960 = vst [vmem:[#allocation4_spill] sm:$0xff] %v6821_v6  ;;  %7961 = vst [vmem:[#allocation5_spill] sm:$0xff] %v6824_v47  ;;  %v2927_v24 = vpack.c.bf16 %v990_v14, %v989_v46  ;;  %5614 = vmatprep.subr.bf16.mxu1 %v6379_v0  ;;  %v1915_v32 = vshll.u32 %v6815_v54, 16  ;;  %v1913_v1 = vshrl.u32 %v6815_v54, 16 }
 0x191   : > { %v869_v36 = vpop.f32.mrb[56].mxu0 }
 0x192   : > { %v871_v7 = vpop.f32.mrb[57].mxu0  ;;  %v3232_v38 = vshrl.u32 %v2927_v24, 16  ;;  %v3235_v59 = vshll.u32 %v2927_v24, 16  ;;  %v870_v49 = vadd.f32 %v6624_v9, %v869_v36  ;;  %v1917_v18 = vrot.slane %v1915_v32, 1 }
 0x193   : > { %v872_v41 = vpop.f32.mrb[58].mxu0  ;;  %5615 = vmatpush3.bf16.msra.mxu1 %v6379_v0  ;;  %v2943_v58 = vrot.slane %v2927_v24, 1 }
 0x194   : > { %v873_v63 = vadd.f32 %v6624_v9, %v872_v41  ;;  %v874_v40 = vpop.f32.mrb[59].mxu0  ;;  %5628 = vmatprep.subr.bf16.mxu1 %v6829_v30  ;;  %v991_v42 = vmax.f32 %v870_v49, 0.0  ;;  %v3234_v46 = vrot.slane %v3232_v38, 1  ;;  %v3237_v50 = vrot.slane %v3235_v59, 2 }
 0x195   : > { %v1918_v41 = vor.u32 %v1917_v18, %v1913_v1 }
 0x196   : > { %5605 = vmatmul.mubr.msk.bf16.gmra.mrb[4].mxu1 %vm1065_vm4, %v6657_v15  ;;  %v992_v13 = vmax.f32 %v873_v63, 0.0  ;;  %v6838_v52 = vpack.c.bf16 %v991_v42, %v990_v14  ;;  %v3238_v63 = vor.u32 %v3237_v50, %v3234_v46 }
 0x197   : > { %5608 = vmatprep.mubr.msk.bf16.mxu1 %vm1065_vm4, %v6672_v37 }
 0x198   : > { %v2928_v0 = vpack.c.bf16 %v992_v13, %v991_v42  ;;  %v1919_v36 = vshll.u32 %v6838_v52, 16  ;;  %v1923_v38 = vshrl.u32 %v6838_v52, 16 }
 0x199   : > { %v877_v7 = vpop.f32.mrb[60].mxu0 }
 0x19a   : > { %v2944_v40 = vrot.slane %v2928_v0, 1  ;;  %v3240_v32 = vshrl.u32 %v2928_v0, 16  ;;  %v3243_v49 = vshll.u32 %v2928_v0, 16  ;;  %v878_v17 = vadd.f32 %v6624_v9, %v877_v7  ;;  %v879_v15 = vpop.f32.mrb[61].mxu0 }
 0x19b   : > { %v880_v59 = vpop.f32.mrb[62].mxu0  ;;  %v1921_v14 = vrot.slane %v1919_v36, 1 }
 0x19c   : > { %v3242_v31 = vrot.slane %v3240_v32, 1  ;;  %v3245_v47 = vrot.slane %v3243_v49, 2  ;;  %v993_v37 = vmax.f32 %v878_v17, 0.0  ;;  %v881_v24 = vadd.f32 %v6624_v9, %v880_v59  ;;  %v882_v42 = vpop.f32.mrb[63].mxu0 }
 0x19d   : > { %v6847_v6 = vsel %vm1280_vm0, %v1918_v41, %v1921_v14  ;;  %v6850_v1 = vsel %vm2273_vm1, %v2943_v58, %v2944_v40  ;;  %v1925_v50 = vor.u32 %v1923_v38, %v1921_v14  ;;  %v6381_v38 = vld [vmem:[%s7948_s3 + $0x38] sm:$0xff]  }
 0x19e   : > { %7962 = vst [vmem:[#allocation6_spill] sm:$0xff] %v6850_v1  ;;  %v6852_v18 = vpack.c.bf16 %v993_v37, %v992_v13  ;;  %5609 = vmatmul.mubr.msk.bf16.gmra.mrb[8].mxu1 %vm1065_vm4, %v6687_v3  ;;  %v994_v0 = vmax.f32 %v881_v24, 0.0  ;;  %v3246_v36 = vor.u32 %v3245_v47, %v3242_v31 }
 0x19f   : > { %5616 = vmatprep.mubr.msk.bf16.mxu1 %vm1065_vm4, %v6640_v45 }
 0x1a0   : > { %v1926_v17 = vshll.u32 %v6852_v18, 16  ;;  %v2929_v46 = vpack.c.bf16 %v994_v0, %v993_v37  ;;  %v6860_v7 = vsel %vm2563_vm2, %v3238_v63, %v3246_v36  ;;  %v1930_v63 = vshrl.u32 %v6852_v18, 16 }
 0x1a1   : > { %7963 = vst [vmem:[#allocation7_spill] sm:$0xff] %v6860_v7  ;;  %v885_v41 = vpop.f32.mrb[64].mxu0 }
 0x1a2   : > { %v1928_v58 = vrot.slane %v1926_v17, 1  ;;  %v2946_v32 = vrot.slane %v2929_v46, 1  ;;  %v3249_v13 = vshrl.u32 %v2929_v46, 16  ;;  %v3252_v49 = vshll.u32 %v2929_v46, 16  ;;  %v887_v15 = vpop.f32.mrb[65].mxu0 }
 0x1a3   : > { %v886_v59 = vadd.f32 %v6624_v9, %v885_v41  ;;  %v888_v24 = vpop.f32.mrb[66].mxu0 }
 0x1a4   : > { %v3251_v31 = vrot.slane %v3249_v13, 1  ;;  %v3254_v47 = vrot.slane %v3252_v49, 2  ;;  %v889_v45 = vadd.f32 %v6624_v9, %v888_v24  ;;  %v890_v42 = vpop.f32.mrb[67].mxu0  ;;  %v6868_v14 = vsel %vm1280_vm0, %v1925_v50, %v1928_v58  ;;  %v6884_v49 = vld [vmem:[%s7948_s3 + $0x40] sm:$0xff]  }
 0x1a5   : > { %v995_v37 = vmax.f32 %v886_v59, 0.0  ;;  %v6872_v17 = vsel %vm2273_vm1, %v2944_v40, %v2946_v32 }
 0x1a6   : > { %7964 = vst [vmem:[#allocation8_spill] sm:$0xff] %v6872_v17  ;;  %v3255_v46 = vor.u32 %v3254_v47, %v3251_v31  ;;  %5617 = vmatmul.mubr.msk.bf16.vlgmr.msra.gmra.mrb[0].mxu1 %vm1065_vm4, %v6652_v10  ;;  %v996_v41 = vmax.f32 %v889_v45, 0.0 }
 0x1a7   : > { %v6876_v13 = vpack.c.bf16 %v995_v37, %v994_v0  ;;  %5629 = vmatpush3.bf16.msra.mxu1 %v6829_v30  ;;  %5620 = vmatprep.mubr.msk.bf16.mxu1 %vm1065_vm4, %v6667_v34  ;;  %v1932_v0 = vor.u32 %v1930_v63, %v1928_v58 }
 0x1a8   : > { %v2930_v50 = vpack.c.bf16 %v996_v41, %v995_v37  ;;  %5630 = vmatprep.subr.bf16.mxu1 %v6381_v38  ;;  %v6887_v40 = vsel %vm2563_vm2, %v3246_v36, %v3255_v46 }
 0x1a9   : > { %7965 = vst [vmem:[#allocation9_spill] sm:$0xff] %v6887_v40  ;;  %v1933_v10 = vshll.u32 %v6876_v13, 16  ;;  %v893_v15 = vpop.f32.mrb[68].mxu0  ;;  %v1937_v40 = vshrl.u32 %v6876_v13, 16 }
 0x1aa   : > { %v2948_v59 = vrot.slane %v2930_v50, 1  ;;  %v3258_v24 = vshrl.u32 %v2930_v50, 16  ;;  %v3261_v30 = vshll.u32 %v2930_v50, 16  ;;  %v894_v31 = vadd.f32 %v6624_v9, %v893_v15  ;;  %v895_v34 = vpop.f32.mrb[69].mxu0 }
 0x1ab   : > { %v896_v47 = vpop.f32.mrb[70].mxu0  ;;  %5631 = vmatpush3.bf16.msra.mxu1 %v6381_v38  ;;  %v1935_v45 = vrot.slane %v1933_v10, 1 }
 0x1ac   : > { %v3260_v42 = vrot.slane %v3258_v24, 1  ;;  %v3263_v37 = vrot.slane %v3261_v30, 2  ;;  %v997_v7 = vmax.f32 %v894_v31, 0.0  ;;  %v897_v17 = vadd.f32 %v6624_v9, %v896_v47  ;;  %v898_v36 = vpop.f32.mrb[71].mxu0  ;;  %5644 = vmatprep.subr.bf16.mxu1 %v6884_v49 }
 0x1ad   : > { %v6895_v58 = vsel %vm1280_vm0, %v1932_v0, %v1935_v45  ;;  %v6898_v63 = vsel %vm2273_vm1, %v2946_v32, %v2948_v59  ;;  %v1319_v0 = vshrl.u32 %v6687_v3, 16  ;;  %v1939_v31 = vor.u32 %v1937_v40, %v1935_v45 }
 0x1ae   : > { %7966 = vst [vmem:[#allocation10_spill] sm:$0xff] %v6898_v63  ;;  %v6900_v50 = vpack.c.bf16 %v997_v7, %v996_v41  ;;  %5621 = vmatmul.mubr.msk.bf16.gmra.mrb[4].mxu1 %vm1065_vm4, %v6682_v60  ;;  %v998_v38 = vmax.f32 %v897_v17, 0.0  ;;  %v3264_v10 = vor.u32 %v3263_v37, %v3260_v42 }
 0x1af   : > { %5624 = vmatprep.mubr.msk.bf16.mxu1 %vm1065_vm4, %v6700_v26  ;;  %v1321_v42 = vor.u32 %v1319_v0, %v6696_v21 }
 0x1b0   : > { %v1940_v15 = vshll.u32 %v6900_v50, 16  ;;  %v2931_v24 = vpack.c.bf16 %v998_v38, %v997_v7  ;;  %v6908_v30 = vsel %vm2563_vm2, %v3255_v46, %v3264_v10  ;;  %v1944_v3 = vshrl.u32 %v6900_v50, 16 }
 0x1b1   : > { %7967 = vst [vmem:[#allocation11_spill] sm:$0xff] %v6908_v30  ;;  %v901_v32 = vpop.f32.mrb[72].mxu0 }
 0x1b2   : > { %v2950_v41 = vrot.slane %v2931_v24, 1  ;;  %v3267_v34 = vshrl.u32 %v2931_v24, 16  ;;  %v3270_v47 = vshll.u32 %v2931_v24, 16  ;;  %v902_v60 = vadd.f32 %v6624_v9, %v901_v32  ;;  %v903_v17 = vpop.f32.mrb[73].mxu0 }
 0x1b3   : > { %v904_v37 = vpop.f32.mrb[74].mxu0  ;;  %v1942_v26 = vrot.slane %v1940_v15, 1 }
 0x1b4   : > { %v3269_v36 = vrot.slane %v3267_v34, 1  ;;  %v3272_v63 = vrot.slane %v3270_v47, 2  ;;  %v999_v7 = vmax.f32 %v902_v60, 0.0  ;;  %v905_v46 = vadd.f32 %v6624_v9, %v904_v37  ;;  %v906_v30 = vpop.f32.mrb[75].mxu0 }
 0x1b5   : > { %v6916_v40 = vsel %vm1280_vm0, %v1939_v31, %v1942_v26  ;;  %v6919_v45 = vsel %vm2273_vm1, %v2948_v59, %v2950_v41  ;;  %v1946_v34 = vor.u32 %v1944_v3, %v1942_v26  ;;  %v6383_v26 = vld [vmem:[%s7948_s3 + $0x48] sm:$0xff]  }
 0x1b6   : > { %7968 = vst [vmem:[#allocation12_spill] sm:$0xff] %v6919_v45  ;;  %v6921_v24 = vpack.c.bf16 %v999_v7, %v998_v38  ;;  %5625 = vmatmul.mubr.msk.bf16.gmra.mrb[8].mxu1 %vm1065_vm4, %v1321_v42  ;;  %v1000_v21 = vmax.f32 %v905_v46, 0.0  ;;  %v3273_v15 = vor.u32 %v3272_v63, %v3269_v36 }
 0x1b7   : > { %5632 = vmatprep.mubr.msk.bf16.mxu1 %vm1065_vm4, %v6728_v39 }
 0x1b8   : > { %v1947_v0 = vshll.u32 %v6921_v24, 16  ;;  %v6927_v30 = vpack.c.bf16 %v1000_v21, %v999_v7  ;;  %v6930_v32 = vsel %vm2563_vm2, %v3264_v10, %v3273_v15 }
 0x1b9   : > { %7970 = vst [vmem:[#allocation14_spill] sm:$0xff] %v6930_v32  ;;  %v909_v31 = vpop.f32.mrb[76].mxu0 }
 0x1ba   : > { %7969 = vst [vmem:[#allocation13_spill] sm:$0xff] %v6927_v30  ;;  %v7955_v59 = vrot.slane %v6927_v30, 1  ;;  %v3276_v38 = vshrl.u32 %v6927_v30, 16  ;;  %v3279_v47 = vshll.u32 %v6927_v30, 16  ;;  %v910_v63 = vadd.f32 %v6624_v9, %v909_v31  ;;  %v911_v60 = vpop.f32.mrb[77].mxu0 }
 0x1bb   : > { %v912_v17 = vpop.f32.mrb[78].mxu0  ;;  %v6936_v39 = vrot.slane %v1947_v0, 1 }
 0x1bc   : > { %v3278_v42 = vrot.slane %v3276_v38, 1  ;;  %v3281_v37 = vrot.slane %v3279_v47, 2  ;;  %v1001_v36 = vmax.f32 %v910_v63, 0.0  ;;  %v913_v10 = vadd.f32 %v6624_v9, %v912_v17  ;;  %v914_v7 = vpop.f32.mrb[79].mxu0 }
 0x1bd   : > { %v6944_v46 = vsel %vm1280_vm0, %v1946_v34, %v6936_v39  ;;  %v6949_v3 = vsel %vm2273_vm1, %v2950_v41, %v7955_v59  ;;  %v6961_v34 = vld [vmem:[%s7948_s3 + $0x50] sm:$0xff]  }
 0x1be   : > { %7971 = vst [vmem:[#allocation15_spill] sm:$0xff] %v6949_v3  ;;  %5633 = vmatmul.mubr.msk.bf16.vlgmr.msra.gmra.mrb[0].mxu1 %vm1065_vm4, %v6750_v23  ;;  %v1759_v0 = vpack.c.bf16 %v1001_v36, %v1000_v21  ;;  %v1002_v31 = vmax.f32 %v913_v10, 0.0  ;;  %v6953_v38 = vor.u32 %v3281_v37, %v3278_v42 }
 0x1bf   : > { %5645 = vmatpush3.bf16.msra.mxu1 %v6884_v49  ;;  %5636 = vmatprep.mubr.msk.bf16.mxu1 %vm1065_vm4, %v6764_v33 }
 0x1c0   : > { %7972 = vst [vmem:[#allocation16_spill] sm:$0xff] %v6953_v38  ;;  %v3077_v47 = vpack.c.bf16 %v1002_v31, %v1001_v36  ;;  %5646 = vmatprep.subr.bf16.mxu1 %v6383_v26  ;;  %v6965_v23 = vsel %vm2563_vm2, %v3273_v15, %v6953_v38  ;;  %v2082_v63 = vshrl.u32 %v1759_v0, 16  ;;  %v2085_v60 = vshll.u32 %v1759_v0, 16 }
 0x1c1   : > { %v917_v41 = vpop.f32.mrb[80].mxu0  ;;  %7973 = vst [vmem:[#allocation17_spill] sm:$0xff] %v6965_v23  ;;  %v1775_v7 = vrot.slane %v1759_v0, 2 }
 0x1c2   : > { %v919_v21 = vpop.f32.mrb[81].mxu0  ;;  %v918_v49 = vadd.f32 %v6624_v9, %v917_v41  ;;  %v3413_v33 = vshrl.u32 %v3077_v47, 16  ;;  %v3416_v36 = vshll.u32 %v3077_v47, 16  ;;  %v2087_v59 = vrot.slane %v2085_v60, 3 }
 0x1c3   : > { %v920_v17 = vpop.f32.mrb[82].mxu0  ;;  %5647 = vmatpush3.bf16.msra.mxu1 %v6383_v26  ;;  %v2084_v21 = vrot.slane %v2082_v63, 2  ;;  %v3093_v26 = vrot.slane %v3077_v47, 3 }
 0x1c4   : > { %v921_v42 = vadd.f32 %v6624_v9, %v920_v17  ;;  %v922_v37 = vpop.f32.mrb[83].mxu0  ;;  %5660 = vmatprep.subr.bf16.mxu1 %v6961_v34  ;;  %v1003_v10 = vmax.f32 %v918_v49, 0.0  ;;  %v3415_v41 = vrot.slane %v3413_v33, 3  ;;  %v3418_v9 = vrot.slane %v3416_v36, 4 }
 0x1c5   : > { %v2088_v33 = vor.u32 %v2087_v59, %v2084_v21 }
 0x1c6   : > { %5637 = vmatmul.mubr.msk.bf16.gmra.mrb[4].mxu1 %vm1065_vm4, %v6777_v29  ;;  %v1004_v15 = vmax.f32 %v921_v42, 0.0  ;;  %v1760_v38 = vpack.c.bf16 %v1003_v10, %v1002_v31  ;;  %v6977_v29 = vld [vmem:[%s7947_s2] ss:$0 sm:$0xff]  ;;  %v3419_v5 = vor.u32 %v3418_v9, %v3415_v41 }
 0x1c7   : > { %5640 = vmatprep.mubr.msk.bf16.mxu1 %vm1065_vm4, %v6801_v2 }
 0x1c8   : > { %v3078_v23 = vpack.c.bf16 %v1004_v15, %v1003_v10  ;;  %v1776_v17 = vrot.slane %v1760_v38, 2  ;;  %v2090_v37 = vshrl.u32 %v1760_v38, 16  ;;  %v2093_v32 = vshll.u32 %v1760_v38, 16 }
 0x1c9   : > { %v925_v30 = vpop.f32.mrb[84].mxu0 }
 0x1ca   : > { %v3094_v49 = vrot.slane %v3078_v23, 3  ;;  %v3421_v3 = vshrl.u32 %v3078_v23, 16  ;;  %v3424_v45 = vshll.u32 %v3078_v23, 16  ;;  %v926_v0 = vadd.f32 %v6977_v29, %v925_v30  ;;  %v927_v31 = vpop.f32.mrb[85].mxu0 }
 0x1cb   : > { %v2092_v2 = vrot.slane %v2090_v37, 2  ;;  %v2095_v47 = vrot.slane %v2093_v32, 3  ;;  %v928_v63 = vpop.f32.mrb[86].mxu0  ;;  %v6981_v60 = vsel %vm1041_vm3, %v1775_v7, %v1776_v17 }
 0x1cc   : > { %v3423_v38 = vrot.slane %v3421_v3, 3  ;;  %v3426_v42 = vrot.slane %v3424_v45, 4  ;;  %v1005_v36 = vmax.f32 %v926_v0, 0.0  ;;  %v929_v23 = vadd.f32 %v6977_v29, %v928_v63  ;;  %v930_v10 = vpop.f32.mrb[87].mxu0 }
 0x1cd   : > { %v2096_v1 = vor.u32 %v2095_v47, %v2092_v2  ;;  %v6985_v22 = vsel %vm2424_vm6, %v3093_v26, %v3094_v49 }
 0x1ce   : > { %v1761_v30 = vpack.c.bf16 %v1005_v36, %v1004_v15  ;;  %5641 = vmatmul.mubr.msk.bf16.gmra.mrb[8].mxu1 %vm1065_vm4, %v6794_v8  ;;  %v1006_v32 = vmax.f32 %v929_v23, 0.0  ;;  %v3427_v37 = vor.u32 %v3426_v42, %v3423_v38 }
 0x1cf   : > { %5648 = vmatprep.mubr.msk.bf16.mxu1 %vm1065_vm4, %v6815_v54  ;;  %v6992_v45 = vsel %vm1449_vm5, %v2088_v33, %v2096_v1 }
 0x1d0   : > { %v1778_v59 = vrot.slane %v1761_v30, 2  ;;  %v2099_v3 = vshrl.u32 %v1761_v30, 16  ;;  %v2102_v7 = vshll.u32 %v1761_v30, 16  ;;  %v3079_v21 = vpack.c.bf16 %v1006_v32, %v1005_v36 }
 0x1d1   : > { %v933_v0 = vpop.f32.mrb[88].mxu0  ;;  %v6995_v26 = vsel %vm2745_vm7, %v3419_v5, %v3427_v37  ;;  %v6385_v5 = vld [vmem:[%s7948_s3 + $0x58] sm:$0xff]  }
 0x1d2   : > { %7974 = vst [vmem:[#allocation18_spill] sm:$0xff] %v6995_v26  ;;  %v2101_v15 = vrot.slane %v2099_v3, 2  ;;  %v2104_v41 = vrot.slane %v2102_v7, 3  ;;  %v3096_v9 = vrot.slane %v3079_v21, 3  ;;  %v3430_v8 = vshrl.u32 %v3079_v21, 16  ;;  %v935_v31 = vpop.f32.mrb[89].mxu0 }
 0x1d3   : > { %v3433_v2 = vshll.u32 %v3079_v21, 16  ;;  %v934_v47 = vadd.f32 %v6977_v29, %v933_v0  ;;  %v936_v54 = vpop.f32.mrb[90].mxu0  ;;  %v6999_v63 = vsel %vm1041_vm3, %v1776_v17, %v1778_v59 }
 0x1d4   : > { %v2105_v33 = vor.u32 %v2104_v41, %v2101_v15  ;;  %v3432_v38 = vrot.slane %v3430_v8, 3  ;;  %v937_v42 = vadd.f32 %v6977_v29, %v936_v54  ;;  %v938_v36 = vpop.f32.mrb[91].mxu0  ;;  %v7006_v23 = vsel %vm2424_vm6, %v3094_v49, %v3096_v9  ;;  %v7019_v49 = vld [vmem:[%s7948_s3 + $0x60] sm:$0xff]  }
 0x1d5   : > { %v3435_v10 = vrot.slane %v3433_v2, 4  ;;  %v1007_v30 = vmax.f32 %v934_v47, 0.0 }
 0x1d6   : > { %5649 = vmatmul.mubr.msk.bf16.vlgmr.msra.gmra.mrb[0].mxu1 %vm1065_vm4, %v6838_v52  ;;  %v1008_v3 = vmax.f32 %v937_v42, 0.0  ;;  %v7011_v17 = vsel %vm1449_vm5, %v2096_v1, %v2105_v33 }
 0x1d7   : > { %v3436_v7 = vor.u32 %v3435_v10, %v3432_v38  ;;  %v1762_v21 = vpack.c.bf16 %v1007_v30, %v1006_v32  ;;  %5661 = vmatpush3.bf16.msra.mxu1 %v6961_v34  ;;  %5652 = vmatprep.mubr.msk.bf16.mxu1 %vm1065_vm4, %v6852_v18 }
 0x1d8   : > { %v3080_v0 = vpack.c.bf16 %v1008_v3, %v1007_v30  ;;  %5662 = vmatprep.subr.bf16.mxu1 %v6385_v5 }
 0x1d9   : > { %v1780_v15 = vrot.slane %v1762_v21, 2  ;;  %v2108_v52 = vshrl.u32 %v1762_v21, 16  ;;  %v2111_v41 = vshll.u32 %v1762_v21, 16  ;;  %v941_v8 = vpop.f32.mrb[92].mxu0  ;;  %v7022_v1 = vsel %vm2745_vm7, %v3427_v37, %v3436_v7 }
 0x1da   : > { %7975 = vst [vmem:[#allocation19_spill] sm:$0xff] %v7022_v1  ;;  %v3098_v32 = vrot.slane %v3080_v0, 3  ;;  %v3439_v31 = vshrl.u32 %v3080_v0, 16  ;;  %v3442_v34 = vshll.u32 %v3080_v0, 16  ;;  %v942_v2 = vadd.f32 %v6977_v29, %v941_v8  ;;  %v943_v18 = vpop.f32.mrb[93].mxu0 }
 0x1db   : > { %v2110_v47 = vrot.slane %v2108_v52, 2  ;;  %v2113_v54 = vrot.slane %v2111_v41, 3  ;;  %v944_v38 = vpop.f32.mrb[94].mxu0  ;;  %5663 = vmatpush3.bf16.msra.mxu1 %v6385_v5  ;;  %v7026_v42 = vsel %vm1041_vm3, %v1778_v59, %v1780_v15 }
 0x1dc   : > { %v3441_v36 = vrot.slane %v3439_v31, 3  ;;  %v3444_v10 = vrot.slane %v3442_v34, 4  ;;  %v1009_v30 = vmax.f32 %v942_v2, 0.0  ;;  %v945_v21 = vadd.f32 %v6977_v29, %v944_v38  ;;  %v946_v37 = vpop.f32.mrb[95].mxu0  ;;  %5676 = vmatprep.subr.bf16.mxu1 %v7019_v49 }
 0x1dd   : > { %v2114_v1 = vor.u32 %v2113_v54, %v2110_v47  ;;  %v7031_v0 = vsel %vm2424_vm6, %v3096_v9, %v3098_v32 }
 0x1de   : > { %v1763_v8 = vpack.c.bf16 %v1009_v30, %v1008_v3  ;;  %5653 = vmatmul.mubr.msk.bf16.gmra.mrb[4].mxu1 %vm1065_vm4, %v6876_v13  ;;  %v1010_v5 = vmax.f32 %v945_v21, 0.0  ;;  %v3445_v52 = vor.u32 %v3444_v10, %v3441_v36 }
 0x1df   : > { %5656 = vmatprep.mubr.msk.bf16.mxu1 %vm1065_vm4, %v6900_v50  ;;  %v7038_v59 = vsel %vm1449_vm5, %v2105_v33, %v2114_v1 }
 0x1e0   : > { %v1782_v41 = vrot.slane %v1763_v8, 2  ;;  %v2117_v31 = vshrl.u32 %v1763_v8, 16  ;;  %v2120_v34 = vshll.u32 %v1763_v8, 16  ;;  %v3081_v2 = vpack.c.bf16 %v1010_v5, %v1009_v30 }
 0x1e1   : > { %v949_v18 = vpop.f32.mrb[96].mxu0  ;;  %v7041_v9 = vsel %vm2745_vm7, %v3436_v7, %v3445_v52 }
 0x1e2   : > { %7976 = vst [vmem:[#allocation20_spill] sm:$0xff] %v7041_v9  ;;  %v2119_v3 = vrot.slane %v2117_v31, 2  ;;  %v2122_v47 = vrot.slane %v2120_v34, 3  ;;  %v3100_v54 = vrot.slane %v3081_v2, 3  ;;  %v3448_v13 = vshrl.u32 %v3081_v2, 16  ;;  %v951_v38 = vpop.f32.mrb[97].mxu0 }
 0x1e3   : > { %v3451_v36 = vshll.u32 %v3081_v2, 16  ;;  %v950_v10 = vadd.f32 %v6977_v29, %v949_v18  ;;  %v952_v50 = vpop.f32.mrb[98].mxu0  ;;  %v1783_v33 = vsel %vm1041_vm3, %v1780_v15, %v1782_v41 }
 0x1e4   : > { %v3450_v21 = vrot.slane %v3448_v13, 3  ;;  %v953_v37 = vadd.f32 %v6977_v29, %v952_v50  ;;  %v954_v8 = vpop.f32.mrb[99].mxu0  ;;  %v2123_v30 = vor.u32 %v2122_v47, %v2119_v3  ;;  %v7047_v26 = vsel %vm2424_vm6, %v3098_v32, %v3100_v54 }
 0x1e5   : > { %v3453_v7 = vrot.slane %v3451_v36, 4  ;;  %v1011_v31 = vmax.f32 %v950_v10, 0.0 }
 0x1e6   : > { %5657 = vmatmul.mubr.msk.bf16.gmra.mrb[8].mxu1 %vm1065_vm4, %v6921_v24  ;;  %v1012_v34 = vmax.f32 %v953_v37, 0.0  ;;  %v7052_v2 = vsel %vm1449_vm5, %v2114_v1, %v2123_v30 }
 0x1e7   : > { %v1764_v18 = vpack.c.bf16 %v1011_v31, %v1010_v5  ;;  %5664 = vmatprep.mubr.msk.bf16.mxu1 %vm1065_vm4, %v6981_v60  ;;  %v3454_v15 = vor.u32 %v3453_v7, %v3450_v21 }
 0x1e8   : > { %v7056_v13 = vpack.c.bf16 %v1012_v34, %v1011_v31 }
 0x1e9   : > { %v1784_v3 = vrot.slane %v1764_v18, 2  ;;  %v2126_v47 = vshrl.u32 %v1764_v18, 16  ;;  %v2129_v32 = vshll.u32 %v1764_v18, 16  ;;  %v957_v38 = vpop.f32.mrb[100].mxu0  ;;  %v7059_v36 = vsel %vm2745_vm7, %v3445_v52, %v3454_v15  ;;  %v6387_v52 = vld [vmem:[%s7948_s3 + $0x68] sm:$0xff]  }
 0x1ea   : > { %7977 = vst [vmem:[#allocation21_spill] sm:$0xff] %v7059_v36  ;;  %v3102_v10 = vrot.slane %v7056_v13, 3  ;;  %v3457_v50 = vshrl.u32 %v7056_v13, 16  ;;  %v3460_v1 = vshll.u32 %v7056_v13, 16  ;;  %v958_v5 = vadd.f32 %v6977_v29, %v957_v38  ;;  %v959_v37 = vpop.f32.mrb[101].mxu0  ;;  %v7995_v13 = vld [vmem:[#allocation17_spill] sm:$0xff] }
 0x1eb   : > { %v2128_v60 = vrot.slane %v2126_v47, 2  ;;  %v2131_v21 = vrot.slane %v2129_v32, 3  ;;  %v1785_v8 = vsel %vm1041_vm3, %v1782_v41, %v1784_v3  ;;  %v960_v7 = vpop.f32.mrb[102].mxu0 }
 0x1ec   : > { %v3459_v31 = vrot.slane %v3457_v50, 3  ;;  %v3462_v34 = vrot.slane %v3460_v1, 4  ;;  %v1013_v18 = vmax.f32 %v958_v5, 0.0  ;;  %v7072_v36 = vsel %vm2424_vm6, %v3100_v54, %v3102_v10  ;;  %v961_v9 = vpop.f32.mrb[103].mxu0  ;;  %v6388_v54 = vld [vmem:[%s7948_s3 + $0x70] sm:$0xff]   ;;  %v7998_v1 = vld [vmem:[#allocation19_spill] sm:$0xff] }
 0x1ed   : > { %v2132_v29 = vor.u32 %v2131_v21, %v2128_v60  ;;  %v7999_v5 = vld [vmem:[#allocation20_spill] sm:$0xff]  ;;  %v6410_v60 = vld [vmem:[%s7950_s5 + $0x80] sm:$0xff]   ;;  %v6411_v21 = vld [vmem:[%s7950_s5 + $0x88] sm:$0xff]  }
 0x1ee   : > { %5665 = vmatmul.mubr.msk.bf16.vlgmr.msra.gmra.mrb[0].mxu1 %vm1065_vm4, %v6999_v63  ;;  %v3407_v47 = vpack.c.bf16 %v1013_v18, %v1013_v18  ;;  %v3463_v41 = vor.u32 %v3462_v34, %v3459_v31  ;;  %v6414_v7 = vld [vmem:[%s7950_s5 + $0x98] sm:$0xff]   ;;  %v7307_v31 = vld [vmem:[%s7949_s4] ss:$0 sm:$0xff] }
 0x1ef   : > { %5677 = vmatpush3.bf16.msra.mxu1 %v7019_v49  ;;  %5668 = vmatprep.mubr.msk.bf16.mxu1 %vm1065_vm4, %v7026_v42  ;;  %v2133_v32 = vsel %vm1449_vm5, %v2123_v30, %v2132_v29  ;;  %v6389_v49 = vld [vmem:[%s7948_s3 + $0x78] sm:$0xff]   ;;  %v6390_v42 = vld [vmem:[%s7948_s3 + $0x80] sm:$0xff]  }
 0x1f0   : > { %v3466_v38 = vshll.u32 %v3407_v47, 16  ;;  %5678 = vmatprep.subr.bf16.mxu1 %v6387_v52  ;;  %v7084_v9 = vsel %vm2745_vm7, %v3454_v15, %v3463_v41  ;;  %v6404_v15 = vld [vmem:[%s7948_s3 + $0xf0] sm:$0xff]  }
 0x1f1   : > { %v8000_v37 = vld [vmem:[#allocation21_spill] sm:$0xff] }
 0x1f2   : > { %v3468_v50 = vrot.slane %v3466_v38, 4 }
 0x1f3   : > { %5679 = vmatpush3.bf16.msra.mxu1 %v6387_v52 }
 0x1f4   : > { %5692 = vmatprep.subr.bf16.mxu1 %v6388_v54  ;;  %v7087_v63 = vsel %vm2745_vm7, %v3463_v41, %v3468_v50 }
 0x1f6   : > { %5669 = vmatmul.mubr.msk.bf16.gmra.mrb[4].mxu1 %vm1065_vm4, %v1783_v33  ;;  %v7989_v33 = vld [vmem:[#allocation13_spill] sm:$0xff] }
 0x1f7   : > { %5672 = vmatprep.mubr.msk.bf16.mxu1 %vm1065_vm4, %v1785_v8  ;;  %v7990_v30 = vrot.slane %v7989_v33, 1  ;;  %v6412_v8 = vld [vmem:[%s7950_s5 + $0x90] sm:$0xff]  }
 0x1fe   : > { %5673 = vmatmul.mubr.msk.bf16.gmra.mrb[8].mxu1 %vm1065_vm4, %v1784_v3  ;;  %v7993_v3 = vld [vmem:[#allocation11_spill] sm:$0xff] }
 0x1ff   : > { %5680 = vmatprep.mubr.msk.bf16.mxu1 %vm1065_vm4, %v6847_v6  ;;  %v1951_v6 = vshrl.u32 %v6921_v24, 16  ;;  %v6393_v24 = vld [vmem:[%s7948_s3 + $0x98] sm:$0xff]  }
 0x206   : > { %5681 = vmatmul.mubr.msk.bf16.vlgmr.msra.gmra.mrb[0].mxu1 %vm1065_vm4, %v6868_v14  ;;  %v1953_v14 = vor.u32 %v1951_v6, %v6936_v39  ;;  %v6394_v39 = vld [vmem:[%s7948_s3 + $0xa0] sm:$0xff]  }
 0x207   : > { %5693 = vmatpush3.bf16.msra.mxu1 %v6388_v54  ;;  %5684 = vmatprep.mubr.msk.bf16.mxu1 %vm1065_vm4, %v6895_v58  ;;  %v6391_v58 = vld [vmem:[%s7948_s3 + $0x88] sm:$0xff]  }
 0x208   : > { %5694 = vmatprep.subr.bf16.mxu1 %v6389_v49 }
 0x20b   : > { %5695 = vmatpush3.bf16.msra.mxu1 %v6389_v49 }
 0x20c   : > { %5708 = vmatprep.subr.bf16.mxu1 %v6390_v42 }
 0x20e   : > { %5685 = vmatmul.mubr.msk.bf16.gmra.mrb[4].mxu1 %vm1065_vm4, %v6916_v40  ;;  %v6392_v40 = vld [vmem:[%s7948_s3 + $0x90] sm:$0xff]  }
 0x20f   : > { %5688 = vmatprep.mubr.msk.bf16.mxu1 %vm1065_vm4, %v6944_v46  ;;  %v7986_v46 = vld [vmem:[#allocation10_spill] sm:$0xff] }
 0x216   : > { %5689 = vmatmul.mubr.msk.bf16.gmra.mrb[8].mxu1 %vm1065_vm4, %v1953_v14 }
 0x217   : > { %5696 = vmatprep.mubr.msk.bf16.mxu1 %vm1065_vm4, %v6992_v45  ;;  %v6402_v45 = vld [vmem:[%s7948_s3 + $0xe0] sm:$0xff]  }
 0x21e   : > { %5697 = vmatmul.mubr.msk.bf16.vlgmr.msra.gmra.mrb[0].mxu1 %vm1065_vm4, %v7011_v17  ;;  %v7987_v17 = vld [vmem:[#allocation12_spill] sm:$0xff] }
 0x21f   : > { %5709 = vmatpush3.bf16.msra.mxu1 %v6390_v42  ;;  %5700 = vmatprep.mubr.msk.bf16.mxu1 %vm1065_vm4, %v7038_v59  ;;  %v7988_v59 = vld [vmem:[#allocation15_spill] sm:$0xff] }
 0x220   : > { %5710 = vmatprep.subr.bf16.mxu1 %v6391_v58 }
 0x223   : > { %5711 = vmatpush3.bf16.msra.mxu1 %v6391_v58 }
 0x224   : > { %5724 = vmatprep.subr.bf16.mxu1 %v6392_v40 }
 0x226   : > { %5701 = vmatmul.mubr.msk.bf16.gmra.mrb[4].mxu1 %vm1065_vm4, %v7052_v2  ;;  %v6403_v2 = vld [vmem:[%s7948_s3 + $0xe8] sm:$0xff]  }
 0x227   : > { %5704 = vmatprep.mubr.msk.bf16.mxu1 %vm1065_vm4, %v2133_v32 }
 0x22e   : > { %5705 = vmatmul.mubr.msk.bf16.gmra.mrb[8].mxu1 %vm1065_vm4, %v2132_v29 }
 0x22f   : > { %5712 = vmatprep.mubr.msk.bf16.mxu1 %vm1065_vm4, %v6648_v62  ;;  %v7978_v62 = vrot.slane %v6705_v28, 1  ;;  %v6397_v28 = vld [vmem:[%s7948_s3 + $0xb8] sm:$0xff]  }
 0x236   : > { %5713 = vmatmul.mubr.msk.bf16.vlgmr.msra.gmra.mrb[0].mxu1 %vm1065_vm4, %v6663_v25  ;;  %v6395_v25 = vld [vmem:[%s7948_s3 + $0xa8] sm:$0xff]  }
 0x237   : > { %5725 = vmatpush3.bf16.msra.mxu1 %v6392_v40  ;;  %5716 = vmatprep.mubr.msk.bf16.mxu1 %vm1065_vm4, %v6678_v51  ;;  %v6396_v51 = vld [vmem:[%s7948_s3 + $0xb0] sm:$0xff]  }
 0x238   : > { %5726 = vmatprep.subr.bf16.mxu1 %v6393_v24 }
 0x23b   : > { %5727 = vmatpush3.bf16.msra.mxu1 %v6393_v24 }
 0x23c   : > { %5740 = vmatprep.subr.bf16.mxu1 %v6394_v39 }
 0x23e   : > { %5717 = vmatmul.mubr.msk.bf16.gmra.mrb[4].mxu1 %vm1065_vm4, %v6693_v16  ;;  %v7979_v16 = vrot.slane %v6790_v12, 3  ;;  %v6401_v12 = vld [vmem:[%s7948_s3 + $0xd8] sm:$0xff]  }
 0x23f   : > { %5720 = vmatprep.mubr.msk.bf16.mxu1 %vm1065_vm4, %v6714_v43  ;;  %v6398_v43 = vld [vmem:[%s7948_s3 + $0xc0] sm:$0xff]  }
 0x246   : > { %5721 = vmatmul.mubr.msk.bf16.gmra.mrb[8].mxu1 %vm1065_vm4, %v7978_v62 }
 0x247   : > { %5728 = vmatprep.mubr.msk.bf16.mxu1 %vm1065_vm4, %v6732_v53  ;;  %v6399_v53 = vld [vmem:[%s7948_s3 + $0xc8] sm:$0xff]  }
 0x24e   : > { %5729 = vmatmul.mubr.msk.bf16.vlgmr.msra.gmra.mrb[0].mxu1 %vm1065_vm4, %v6754_v56  ;;  %v7981_v56 = vld [vmem:[#allocation3_spill] sm:$0xff] }
 0x24f   : > { %5741 = vmatpush3.bf16.msra.mxu1 %v6394_v39  ;;  %5732 = vmatprep.mubr.msk.bf16.mxu1 %vm1065_vm4, %v6768_v19  ;;  %v7982_v19 = vld [vmem:[#allocation4_spill] sm:$0xff] }
 0x250   : > { %5742 = vmatprep.subr.bf16.mxu1 %v6395_v25 }
 0x253   : > { %5743 = vmatpush3.bf16.msra.mxu1 %v6395_v25 }
 0x254   : > { %5756 = vmatprep.subr.bf16.mxu1 %v6396_v51 }
 0x256   : > { %5733 = vmatmul.mubr.msk.bf16.gmra.mrb[4].mxu1 %vm1065_vm4, %v6781_v57  ;;  %v7983_v57 = vld [vmem:[#allocation5_spill] sm:$0xff] }
 0x257   : > { %5736 = vmatprep.mubr.msk.bf16.mxu1 %vm1065_vm4, %v6807_v44  ;;  %v7985_v44 = vld [vmem:[#allocation8_spill] sm:$0xff] }
 0x25e   : > { %5737 = vmatmul.mubr.msk.bf16.gmra.mrb[8].mxu1 %vm1065_vm4, %v7979_v16 }
 0x25f   : > { %5744 = vmatprep.mubr.msk.bf16.mxu1 %vm1065_vm4, %v6655_v11  ;;  %v6406_v11 = vld [vmem:[%s7950_s5 + $0x20] sm:$0xff]  }
 0x266   : > { %5745 = vmatmul.mubr.msk.bf16.vlgmr.msra.gmra.mrb[0].mxu1 %vm1065_vm4, %v6670_v35  ;;  %v6452_v35 = vmov 0.0  }
 0x267   : > { %5757 = vmatpush3.bf16.msra.mxu1 %v6396_v51  ;;  %5748 = vmatprep.mubr.msk.bf16.mxu1 %vm1065_vm4, %v6685_v61  ;;  %v6407_v61 = vld [vmem:[%s7950_s5 + $0x28] sm:$0xff]  }
 0x268   : > { %5758 = vmatprep.subr.bf16.mxu1 %v6397_v28  ;;  %5836 = vmatprep.subr.bf16.mxu0 %v6452_v35 }
 0x269   : > { %5837 = vmatpush3.bf16.msra.mxu0 %v6406_v11  ;;  %5844 = vmatprep.mubr.msk.bf16.mxu0 %vm6453_vm8, %v6452_v35 }
 0x26a   : > { %5838 = vmatprep.subr.bf16.mxu0 %v6452_v35 }
 0x26b   : > { %5759 = vmatpush3.bf16.msra.mxu1 %v6397_v28 }
 0x26c   : > { %5772 = vmatprep.subr.bf16.mxu1 %v6398_v43 }
 0x26d   : > { %5839 = vmatpush3.bf16.msra.mxu0 %v6407_v61 }
 0x26e   : > { %5749 = vmatmul.mubr.msk.bf16.gmra.mrb[4].mxu1 %vm1065_vm4, %v6703_v27  ;;  %v6408_v27 = vld [vmem:[%s7950_s5 + $0x30] sm:$0xff]   ;;  %5840 = vmatprep.subr.bf16.mxu0 %v6452_v35 }
 0x26f   : > { %5752 = vmatprep.mubr.msk.bf16.mxu1 %vm1065_vm4, %v6721_v55  ;;  %v6409_v55 = vld [vmem:[%s7950_s5 + $0x38] sm:$0xff]  }
 0x271   : > { %5841 = vmatpush3.bf16.msra.mxu0 %v6408_v27 }
 0x272   : > { %5842 = vmatprep.subr.bf16.mxu0 %v6452_v35 }
 0x275   : > { %5843 = vmatpush3.bf16.msra.mxu0 %v6409_v55 }
 0x276   : > { %5753 = vmatmul.mubr.msk.bf16.gmra.mrb[8].mxu1 %vm1065_vm4, %v6717_v48  ;;  %5864 = vmatprep.subr.bf16.mxu0 %v6452_v35  ;;  %v7980_v48 = vld [vmem:[#allocation2_spill] sm:$0xff] }
 0x277   : > { %5760 = vmatprep.mubr.msk.bf16.mxu1 %vm1065_vm4, %v6742_v20  ;;  %v6400_v20 = vld [vmem:[%s7948_s3 + $0xd0] sm:$0xff]  }
 0x27e   : > { %5761 = vmatmul.mubr.msk.bf16.vlgmr.msra.gmra.mrb[0].mxu1 %vm1065_vm4, %v6761_v4  ;;  %v7984_v4 = vld [vmem:[#allocation6_spill] sm:$0xff] }
 0x27f   : > { %5773 = vmatpush3.bf16.msra.mxu1 %v6398_v43  ;;  %5764 = vmatprep.mubr.msk.bf16.mxu1 %vm1065_vm4, %v7980_v48 }
 0x280   : > { %5774 = vmatprep.subr.bf16.mxu1 %v6399_v53 }
 0x283   : > { %5775 = vmatpush3.bf16.msra.mxu1 %v6399_v53 }
 0x284   : > { %5788 = vmatprep.subr.bf16.mxu1 %v6400_v20 }
 0x286   : > { %5765 = vmatmul.mubr.msk.bf16.gmra.mrb[4].mxu1 %vm1065_vm4, %v7981_v56 }
 0x287   : > { %5768 = vmatprep.mubr.msk.bf16.mxu1 %vm1065_vm4, %v7982_v19 }
 0x28e   : > { %5769 = vmatmul.mubr.msk.bf16.gmra.mrb[8].mxu1 %vm1065_vm4, %v7983_v57 }
 0x28f   : > { %5776 = vmatprep.mubr.msk.bf16.mxu1 %vm1065_vm4, %v7984_v4 }
 0x296   : > { %5777 = vmatmul.mubr.msk.bf16.vlgmr.msra.gmra.mrb[0].mxu1 %vm1065_vm4, %v7985_v44 }
 0x297   : > { %5789 = vmatpush3.bf16.msra.mxu1 %v6400_v20  ;;  %5780 = vmatprep.mubr.msk.bf16.mxu1 %vm1065_vm4, %v7986_v46 }
 0x298   : > { %5790 = vmatprep.subr.bf16.mxu1 %v6401_v12 }
 0x29b   : > { %5791 = vmatpush3.bf16.msra.mxu1 %v6401_v12 }
 0x29c   : > { %5804 = vmatprep.subr.bf16.mxu1 %v6402_v45 }
 0x29e   : > { %5781 = vmatmul.mubr.msk.bf16.gmra.mrb[4].mxu1 %vm1065_vm4, %v7987_v17 }
 0x29f   : > { %5784 = vmatprep.mubr.msk.bf16.mxu1 %vm1065_vm4, %v7988_v59  ;;  %v6413_v59 = vld [vmem:[%s7950_s5] sm:$0xff]  }
 0x2a6   : > { %5785 = vmatmul.mubr.msk.bf16.gmra.mrb[8].mxu1 %vm1065_vm4, %v7990_v30 }
 0x2a7   : > { %5792 = vmatprep.mubr.msk.bf16.mxu1 %vm1065_vm4, %v6985_v22  ;;  %v7991_v22 = vld [vmem:[#allocation7_spill] sm:$0xff] }
 0x2ae   : > { %5793 = vmatmul.mubr.msk.bf16.vlgmr.msra.gmra.mrb[0].mxu1 %vm1065_vm4, %v7006_v23  ;;  %v6405_v23 = vld [vmem:[%s7948_s3 + $0xf8] sm:$0xff]  }
 0x2af   : > { %5805 = vmatpush3.bf16.msra.mxu1 %v6402_v45  ;;  %5796 = vmatprep.mubr.msk.bf16.mxu1 %vm1065_vm4, %v7031_v0  ;;  %v7992_v0 = vld [vmem:[#allocation9_spill] sm:$0xff] }
 0x2b0   : > { %5806 = vmatprep.subr.bf16.mxu1 %v6403_v2 }
 0x2b3   : > { %5807 = vmatpush3.bf16.msra.mxu1 %v6403_v2 }
 0x2b4   : > { %5820 = vmatprep.subr.bf16.mxu1 %v6404_v15 }
 0x2b6   : > { %5797 = vmatmul.mubr.msk.bf16.gmra.mrb[4].mxu1 %vm1065_vm4, %v7047_v26  ;;  %v7994_v26 = vld [vmem:[#allocation14_spill] sm:$0xff] }
 0x2b7   : > { %5800 = vmatprep.mubr.msk.bf16.mxu1 %vm1065_vm4, %v7072_v36  ;;  %v7996_v36 = vld [vmem:[#allocation16_spill] sm:$0xff] }
 0x2be   : > { %5801 = vmatmul.mubr.msk.bf16.gmra.mrb[8].mxu1 %vm1065_vm4, %v3102_v10  ;;  %v7997_v10 = vld [vmem:[#allocation18_spill] sm:$0xff] }
 0x2bf   : > { %5808 = vmatprep.mubr.msk.bf16.mxu1 %vm1065_vm4, %v7991_v22 }
 0x2c6   : > { %5809 = vmatmul.mubr.msk.bf16.vlgmr.msra.gmra.mrb[0].mxu1 %vm1065_vm4, %v7992_v0 }
 0x2c7   : > { %5821 = vmatpush3.bf16.msra.mxu1 %v6404_v15  ;;  %5812 = vmatprep.mubr.msk.bf16.mxu1 %vm1065_vm4, %v7993_v3 }
 0x2c8   : > { %5822 = vmatprep.subr.bf16.mxu1 %v6405_v23 }
 0x2cb   : > { %5823 = vmatpush3.bf16.msra.mxu1 %v6405_v23 }
 0x2cc   : > { %5948 = vmatprep.subr.bf16.mxu1 %v6452_v35 }
 0x2ce   : > { %5813 = vmatmul.mubr.msk.bf16.gmra.mrb[4].mxu1 %vm1065_vm4, %v7994_v26 }
 0x2cf   : > { %5816 = vmatprep.mubr.msk.bf16.mxu1 %vm1065_vm4, %v7995_v13 }
 0x2d6   : > { %5817 = vmatmul.mubr.msk.bf16.gmra.mrb[8].mxu1 %vm1065_vm4, %v7996_v36 }
 0x2d7   : > { %5824 = vmatprep.mubr.msk.bf16.mxu1 %vm1065_vm4, %v7997_v10 }
 0x2de   : > { %5825 = vmatmul.mubr.msk.bf16.vlgmr.msra.gmra.mrb[0].mxu1 %vm1065_vm4, %v7998_v1 }
 0x2df   : > { %5828 = vmatprep.mubr.msk.bf16.mxu1 %vm1065_vm4, %v7999_v5  ;;  %5949 = vmatpush3.bf16.msra.mxu1 %v6410_v60 }
 0x2e0   : > { %5950 = vmatprep.subr.bf16.mxu1 %v6452_v35 }
 0x2e3   : > { %5951 = vmatpush3.bf16.msra.mxu1 %v6411_v21 }
 0x2e4   : > { %5952 = vmatprep.subr.bf16.mxu1 %v6452_v35 }
 0x2e6   : > { %5829 = vmatmul.mubr.msk.bf16.gmra.mrb[4].mxu1 %vm1065_vm4, %v8000_v37 }
 0x2e7   : > { %5832 = vmatprep.mubr.msk.bf16.mxu1 %vm1065_vm4, %v7084_v9  ;;  %5953 = vmatpush3.bf16.msra.mxu1 %v6412_v8 }
 0x2e8   : > { %5954 = vmatprep.subr.bf16.mxu1 %v6452_v35 }
 0x2eb   : > { %5955 = vmatpush3.bf16.msra.mxu1 %v6414_v7 }
 0x2ec   : > { %6004 = vmatprep.subr.bf16.mxu1 %v6452_v35 }
 0x2ee   : > { %5833 = vmatmul.mubr.msk.bf16.gmra.mrb[8].mxu1 %vm1065_vm4, %v7087_v63 }
 0x2ef   : > { %5956 = vmatprep.mubr.msk.bf16.mxu1 %vm6453_vm8, %v6452_v35 }
 0x3b1   : > { %v5826_v34 = vpop.f32.mrb[0].mxu1 }
 0x3b2   : > { %v3601_v18 = vadd.f32 %v5826_v34, %v7307_v31  ;;  %v3534_v52 = vpop.f32.mrb[1].mxu1 }
 0x3b3   : > { %v3599_v29 = vadd.f32 %v7307_v31, %v3534_v52  ;;  %v5827_v47 = vpop.f32.mrb[2].mxu1 }
 0x3b4   : > { %v3602_v41 = vadd.f32 %v5827_v47, %v7307_v31  ;;  %v3537_v32 = vpop.f32.mrb[3].mxu1  ;;  %v3613_v54 = vmax.f32 %v3601_v18, 0.0  ;;  %v6415_v47 = vld [vmem:[%s7950_s5 + $0x8] sm:$0xff]  }
 0x3b5   : > { %v3600_v38 = vadd.f32 %v7307_v31, %v3537_v32  ;;  %v3611_v50 = vmax.f32 %v3599_v29, 0.0 }
 0x3b6   : > { %v3614_v9 = vmax.f32 %v3602_v41, 0.0 }
 0x3b7   : > { %v3612_v63 = vmax.f32 %v3600_v38, 0.0 }
 0x3b8   : > { %v7313_v49 = vpack.c.bf16 %v3614_v9, %v3613_v54 }
 0x3b9   : > { %v7315_v42 = vpack.c.bf16 %v3612_v63, %v3611_v50  ;;  %v7317_v6 = vpack.c.bf16 %v3613_v54, %v3612_v63  ;;  %v5830_v14 = vpop.f32.mrb[4].mxu1 }
 0x3ba   : > { %v3605_v58 = vadd.f32 %v5830_v14, %v7307_v31  ;;  %v3550_v40 = vpop.f32.mrb[5].mxu1  ;;  %v3653_v24 = vshll.u32 %v7313_v49, 16  ;;  %v3657_v51 = vshrl.u32 %v7313_v49, 16  ;;  %v4512_v16 = vrot.slane %v7313_v49, 2 }
 0x3bb   : > { %v3646_v39 = vshrl.u32 %v7315_v42, 16  ;;  %v3648_v62 = vshll.u32 %v7315_v42, 16  ;;  %v5831_v25 = vpop.f32.mrb[6].mxu1  ;;  %v3915_v28 = vrot.slane %v7315_v42, 1  ;;  %v4062_v43 = vrot.slane %v7317_v6, 1 }
 0x3bc   : > { %v4200_v11 = vshrl.u32 %v7317_v6, 16  ;;  %v4203_v61 = vshll.u32 %v7317_v6, 16  ;;  %v3553_v27 = vpop.f32.mrb[7].mxu1  ;;  %v3603_v53 = vadd.f32 %v7307_v31, %v3550_v40  ;;  %v3606_v48 = vadd.f32 %v5831_v25, %v7307_v31 }
 0x3bd   : > { %v3650_v55 = vrot.slane %v3648_v62, 1  ;;  %v3604_v20 = vadd.f32 %v7307_v31, %v3553_v27  ;;  %v3617_v57 = vmax.f32 %v3605_v58, 0.0  ;;  %v3655_v4 = vrot.slane %v3653_v24, 1 }
 0x3be   : > { %v4202_v56 = vrot.slane %v4200_v11, 1  ;;  %v4205_v19 = vrot.slane %v4203_v61, 2  ;;  %v3615_v12 = vmax.f32 %v3603_v53, 0.0  ;;  %v3618_v44 = vmax.f32 %v3606_v48, 0.0  ;;  %v6418_v53 = vld [vmem:[%s7950_s5 + $0xc0] sm:$0xff]  }
 0x3bf   : > { %v3616_v46 = vmax.f32 %v3604_v20, 0.0  ;;  %v3651_v45 = vor.u32 %v3650_v55, %v3646_v39  ;;  %v4371_v17 = vrot.slane %v7317_v6, 2  ;;  %v7336_v30 = vrot.slane %v3657_v51, 2 }
 0x3c0   : > { %v4206_v33 = vor.u32 %v4205_v19, %v4202_v56  ;;  %v3916_v2 = vrot.slane %v7313_v49, 1  ;;  %v7339_v15 = vpack.c.bf16 %v3615_v12, %v3614_v9  ;;  %v7341_v22 = vpack.c.bf16 %v3618_v44, %v3617_v57 }
 0x3c1   : > { %v7343_v23 = vpack.c.bf16 %v3616_v46, %v3615_v12  ;;  %v7345_v0 = vpack.c.bf16 %v3617_v57, %v3616_v46  ;;  %v5834_v3 = vpop.f32.mrb[8].mxu1  ;;  %v3656_v36 = vsel %vm1280_vm0, %v3651_v45, %v3655_v4  ;;  %v3659_v10 = vor.u32 %v3657_v51, %v3655_v4 }
 0x3c2   : > { %v3609_v26 = vadd.f32 %v5834_v3, %v7307_v31  ;;  %v3566_v13 = vpop.f32.mrb[9].mxu1  ;;  %v7352_v1 = vsel %vm2273_vm1, %v3915_v28, %v3916_v2  ;;  %v4208_v5 = vshrl.u32 %v7339_v15, 16  ;;  %v4211_v37 = vshll.u32 %v7339_v15, 16  ;;  %5845 = vmatmul.mubr.msk.bf16.vlgmr.msra.gmra.mrb[104].mxu0 %vm3708_vm9, %v3656_v36  ;;  %v6416_v28 = vld [vmem:[%s7950_s5 + $0x10] sm:$0xff]   ;;  %v6417_v3 = vld [vmem:[%s7950_s5 + $0x18] sm:$0xff]  }
 0x3c3   : > { %v5835_v60 = vpop.f32.mrb[10].mxu1  ;;  %v4808_v21 = vrot.slane %v7313_v49, 3  ;;  %v7358_v8 = vrot.slane %v3653_v24, 3  ;;  %v3607_v34 = vadd.f32 %v7307_v31, %v3566_v13  ;;  %5865 = vmatpush3.bf16.msra.mxu0 %v6413_v59  ;;  %5848 = vmatprep.mubr.msk.bf16.mxu0 %vm6453_vm8, %v6452_v35  ;;  %v3661_v29 = vshll.u32 %v7343_v23, 16 }
 0x3c4   : > { %v3621_v7 = vmax.f32 %v3609_v26, 0.0  ;;  %v3610_v18 = vadd.f32 %v5835_v60, %v7307_v31  ;;  %v3569_v52 = vpop.f32.mrb[11].mxu1  ;;  %v4210_v41 = vrot.slane %v4208_v5, 1  ;;  %v4213_v32 = vrot.slane %v4211_v37, 2  ;;  %5866 = vmatprep.subr.bf16.mxu0 %v6452_v35  ;;  %v6419_v5 = vld [vmem:[%s7950_s5 + $0xc8] sm:$0xff]  }
 0x3c5   : > { %v3608_v38 = vadd.f32 %v7307_v31, %v3569_v52  ;;  %v4217_v54 = vshrl.u32 %v7345_v0, 16  ;;  %v4063_v9 = vrot.slane %v7339_v15, 1  ;;  %v3619_v50 = vmax.f32 %v3607_v34, 0.0 }
 0x3c6   : > { %v3622_v63 = vmax.f32 %v3610_v18, 0.0  ;;  %v3663_v14 = vrot.slane %v3661_v29, 1  ;;  %v4372_v58 = vrot.slane %v7339_v15, 2  ;;  %v4501_v40 = vpack.c.bf16 %v3621_v7, %v3621_v7 }
 0x3c7   : > { %v3620_v24 = vmax.f32 %v3608_v38, 0.0  ;;  %v4214_v39 = vor.u32 %v4213_v32, %v4210_v41  ;;  %v7373_v62 = vpack.c.bf16 %v3619_v50, %v3618_v44  ;;  %v7377_v51 = vrot.slane %v3661_v29, 3  ;;  %5867 = vmatpush3.bf16.msra.mxu0 %v6415_v47 }
 0x3c8   : > { %v7375_v25 = vpack.c.bf16 %v3622_v63, %v3621_v7  ;;  %v4219_v31 = vrot.slane %v4217_v54, 1  ;;  %v7382_v11 = vpack.c.bf16 %v3619_v50, %v3619_v50  ;;  %v3664_v55 = vsel %vm1280_vm0, %v3659_v10, %v3663_v14  ;;  %5868 = vmatprep.subr.bf16.mxu0 %v6452_v35  ;;  %v6420_v63 = vld [vmem:[%s7950_s5 + $0xd0] sm:$0xff]  }
 0x3c9   : > { %v7384_v61 = vpack.c.bf16 %v3620_v24, %v3619_v50  ;;  %v4215_v27 = vsel %vm2563_vm2, %v4206_v33, %v4214_v39  ;;  %v7394_v56 = vpack.c.bf16 %v3620_v24, %v3620_v24  ;;  %v4220_v19 = vshll.u32 %v7345_v0, 16 }
 0x3ca   : > { %v4671_v48 = vshrl.u32 %v7375_v25, 16  ;;  %v4674_v20 = vshll.u32 %v7375_v25, 16  ;;  %5957 = vmatmul.mubr.msk.bf16.vlgmr.msra.gmra.mrb[12].mxu1 %vm3708_vm9, %v4215_v27  ;;  %5849 = vmatmul.mubr.msk.bf16.gmra.mrb[108].mxu0 %vm3708_vm9, %v3664_v55  ;;  %v3665_v57 = vshrl.u32 %v7343_v23, 16  ;;  %v3669_v4 = vshll.u32 %v7341_v22, 16 }
 0x3cb   : > { %5960 = vmatprep.mubr.msk.bf16.mxu1 %vm6453_vm8, %v6452_v35  ;;  %v4226_v12 = vshrl.u32 %v7373_v62, 16  ;;  %v4229_v44 = vshll.u32 %v7373_v62, 16  ;;  %v7405_v46 = vrot.slane %v4501_v40, 2  ;;  %v4815_v59 = vrot.slane %v7375_v25, 3  ;;  %5852 = vmatprep.mubr.msk.bf16.mxu0 %vm6453_vm8, %v6452_v35  ;;  %v6436_v25 = vld [vmem:[%s7950_s5 + $0xb0] sm:$0xff]  }
 0x3cc   : > { %v7407_v45 = vrot.slane %v4671_v48, 2  ;;  %v4222_v33 = vrot.slane %v4220_v19, 2  ;;  %5869 = vmatpush3.bf16.msra.mxu0 %v6416_v28  ;;  %v3667_v26 = vor.u32 %v3665_v57, %v3663_v14  ;;  %v3671_v13 = vrot.slane %v3669_v4, 1  ;;  %6005 = vmatpush3.bf16.msra.mxu1 %v6418_v53 }
 0x3cd   : > { %v4228_v36 = vrot.slane %v4226_v12, 1  ;;  %v3673_v10 = vshrl.u32 %v7341_v22, 16  ;;  %5870 = vmatprep.subr.bf16.mxu0 %v6452_v35  ;;  %v4231_v60 = vrot.slane %v4229_v44, 2  ;;  %v3677_v7 = vshll.u32 %v7382_v11, 16  ;;  %6006 = vmatprep.subr.bf16.mxu1 %v6452_v35 }
 0x3ce   : > { %v4223_v37 = vor.u32 %v4222_v33, %v4219_v31  ;;  %v4235_v34 = vshrl.u32 %v7394_v56, 16  ;;  %v7425_v18 = vrot.slane %v4674_v20, 3  ;;  %v3672_v52 = vsel %vm1280_vm0, %v3667_v26, %v3671_v13  ;;  %v6422_v33 = vld [vmem:[%s7950_s5 + $0xd8] sm:$0xff]  }
 0x3cf   : > { %v3675_v29 = vor.u32 %v3673_v10, %v3671_v13  ;;  %v4238_v47 = vshll.u32 %v7394_v56, 16  ;;  %v4232_v32 = vor.u32 %v4231_v60, %v4228_v36  ;;  %v7432_v38 = vrot.slane %v3677_v7, 1 }
 0x3d0   : > { %v4224_v41 = vsel %vm2563_vm2, %v4214_v39, %v4223_v37  ;;  %5871 = vmatpush3.bf16.msra.mxu0 %v6417_v3  ;;  %v4237_v54 = vrot.slane %v4235_v34, 1  ;;  %6007 = vmatpush3.bf16.msra.mxu1 %v6419_v5  ;;  %v4513_v14 = vrot.slane %v7343_v23, 2  ;;  %v4515_v40 = vrot.slane %v7341_v22, 2 }
 0x3d1   : > { %v4240_v50 = vrot.slane %v4238_v47, 2  ;;  %5892 = vmatprep.subr.bf16.mxu0 %v6452_v35  ;;  %v4517_v24 = vrot.slane %v7384_v61, 2  ;;  %v4653_v39 = vrot.slane %v3665_v57, 2  ;;  %v4233_v31 = vsel %vm2563_vm2, %v4223_v37, %v4232_v32  ;;  %6008 = vmatprep.subr.bf16.mxu1 %v6452_v35 }
 0x3d2   : > { %5961 = vmatmul.mubr.msk.bf16.gmra.mrb[16].mxu1 %vm3708_vm9, %v4224_v41  ;;  %v3680_v28 = vsel %vm1280_vm0, %v3675_v29, %v7432_v38  ;;  %v4809_v27 = vrot.slane %v7343_v23, 3  ;;  %5853 = vmatmul.mubr.msk.bf16.gmra.mrb[112].mxu0 %vm3708_vm9, %v3672_v52  ;;  %v7455_v53 = vsel %vm1041_vm3, %v4512_v16, %v4513_v14  ;;  %v7458_v48 = vsel %vm1041_vm3, %v4513_v14, %v4515_v40 }
 0x3d3   : > { %5964 = vmatprep.mubr.msk.bf16.mxu1 %vm6453_vm8, %v6452_v35  ;;  %v7450_v55 = vor.u32 %v4240_v50, %v4237_v54  ;;  %v3918_v20 = vrot.slane %v7343_v23, 1  ;;  %5856 = vmatprep.mubr.msk.bf16.mxu0 %vm6453_vm8, %v6452_v35  ;;  %v7464_v19 = vsel %vm1041_vm3, %v4515_v40, %v4517_v24  ;;  %v7468_v57 = vsel %vm1041_vm3, %v4517_v24, %v7405_v46 }
 0x3d4   : > { %v7473_v16 = vsel %vm2424_vm6, %v4808_v21, %v4809_v27  ;;  %v4811_v12 = vrot.slane %v7341_v22, 3  ;;  %6009 = vmatpush3.bf16.msra.mxu1 %v6420_v63  ;;  %v3920_v26 = vrot.slane %v7341_v22, 1  ;;  %v4813_v21 = vrot.slane %v7384_v61, 3 }
 0x3d5   : > { %v4242_v44 = vsel %vm2563_vm2, %v4232_v32, %v7450_v55  ;;  %v7484_v3 = vsel %vm2273_vm1, %v3916_v2, %v3918_v20  ;;  %6010 = vmatprep.subr.bf16.mxu1 %v6452_v35  ;;  %v3922_v36 = vrot.slane %v7382_v11, 1  ;;  %v7498_v5 = vsel %vm2273_vm1, %v4062_v43, %v4063_v9 }
 0x3d6   : > { %v7490_v13 = vsel %vm2424_vm6, %v4809_v27, %v4811_v12  ;;  %v4065_v2 = vrot.slane %v7345_v0, 1  ;;  %v7502_v37 = vsel %vm2273_vm1, %v3918_v20, %v3920_v26  ;;  %v7505_v60 = vsel %vm2424_vm6, %v4811_v12, %v4813_v21  ;;  %v6430_v20 = vld [vmem:[%s7950_s5 + $0x118] sm:$0xff]  }
 0x3d7   : > { %v7510_v7 = vsel %vm2424_vm6, %v4813_v21, %v4815_v59  ;;  %v4067_v34 = vrot.slane %v7373_v62, 1  ;;  %v7516_v43 = vsel %vm2273_vm1, %v3920_v26, %v3922_v36  ;;  %v4069_v29 = vrot.slane %v7394_v56, 1  ;;  %v6441_v12 = vld [vmem:[%s7950_s5 + $0xf8] sm:$0xff]  }
 0x3d8   : > { %v7521_v52 = vsel %vm2273_vm1, %v4063_v9, %v4065_v2  ;;  %v7529_v47 = vsel %vm1041_vm3, %v4371_v17, %v4372_v58  ;;  %6011 = vmatpush3.bf16.msra.mxu1 %v6422_v33  ;;  %v4374_v32 = vrot.slane %v7345_v0, 2  ;;  %v4376_v54 = vrot.slane %v7373_v62, 2 }
 0x3d9   : > { %v7532_v41 = vsel %vm2273_vm1, %v4065_v2, %v4067_v34  ;;  %v4378_v9 = vrot.slane %v7394_v56, 2  ;;  %6060 = vmatprep.subr.bf16.mxu1 %v6452_v35  ;;  %v7542_v6 = vsel %vm2273_vm1, %v4067_v34, %v4069_v29  ;;  %v4652_v17 = vor.u32 %v7358_v8, %v7336_v30 }
 0x3da   : > { %5965 = vmatmul.mubr.msk.bf16.gmra.mrb[20].mxu1 %vm3708_vm9, %v4233_v31  ;;  %v4655_v50 = vor.u32 %v7377_v51, %v4653_v39  ;;  %v4657_v0 = vrot.slane %v3673_v10, 2  ;;  %5857 = vmatmul.mubr.msk.bf16.gmra.mrb[116].mxu0 %vm3708_vm9, %v3680_v28  ;;  %v7555_v62 = vsel %vm1041_vm3, %v4372_v58, %v4374_v32  ;;  %v7558_v63 = vsel %vm1041_vm3, %v4374_v32, %v4376_v54 }
 0x3db   : > { %5968 = vmatprep.mubr.msk.bf16.mxu1 %vm6453_vm8, %v6452_v35  ;;  %v7563_v30 = vsel %vm1041_vm3, %v4376_v54, %v4378_v9  ;;  %v4658_v8 = vrot.slane %v3669_v4, 3  ;;  %5860 = vmatprep.mubr.msk.bf16.mxu0 %vm6453_vm8, %v6452_v35  ;;  %v4662_v15 = vshrl.u32 %v7384_v61, 16  ;;  %v4665_v58 = vshll.u32 %v7384_v61, 16 }
 0x3dc   : > { %v7570_v51 = vsel %vm1449_vm5, %v4652_v17, %v4655_v50  ;;  %v7576_v24 = vor.u32 %v7425_v18, %v7407_v45  ;;  %v3681_v39 = vshrl.u32 %v7382_v11, 16  ;;  %v6421_v45 = vld [vmem:[%s7950_s5 + $0x40] sm:$0xff]   ;;  %v6423_v18 = vld [vmem:[%s7950_s5 + $0x48] sm:$0xff]  }
 0x3dd   : > { %v4659_v10 = vor.u32 %v4658_v8, %v4657_v0  ;;  %v4664_v14 = vrot.slane %v4662_v15, 2  ;;  %v4667_v40 = vrot.slane %v4665_v58, 3 }
 0x3de   : > { %v3683_v28 = vor.u32 %v3681_v39, %v7432_v38  ;;  %v6424_v38 = vld [vmem:[%s7950_s5 + $0x50] sm:$0xff]  }
 0x3df   : > { %v7580_v4 = vsel %vm1449_vm5, %v4655_v50, %v4659_v10  ;;  %v4668_v31 = vor.u32 %v4667_v40, %v4664_v14 }
 0x3e1   : > { %v7585_v27 = vsel %vm1449_vm5, %v4659_v10, %v4668_v31  ;;  %v7589_v61 = vsel %vm1449_vm5, %v4668_v31, %v7576_v24 }
 0x3e2   : > { %5969 = vmatmul.mubr.msk.bf16.gmra.mrb[24].mxu1 %vm3708_vm9, %v4242_v44  ;;  %5861 = vmatmul.mubr.msk.bf16.gmra.mrb[120].mxu0 %vm3708_vm9, %v3683_v28 }
 0x3e3   : > { %5972 = vmatprep.mubr.msk.bf16.mxu1 %vm6453_vm8, %v6452_v35  ;;  %5872 = vmatprep.mubr.msk.bf16.mxu0 %vm6453_vm8, %v6452_v35 }
 0x3ea   : > { %5973 = vmatmul.mubr.msk.bf16.gmra.mrb[28].mxu1 %vm3708_vm9, %v7450_v55  ;;  %5873 = vmatmul.mubr.msk.bf16.vlgmr.msra.gmra.mrb[124].mxu0 %vm3708_vm9, %v7315_v42  ;;  %v6426_v42 = vld [vmem:[%s7950_s5 + $0x100] sm:$0xff]   ;;  %v6425_v55 = vld [vmem:[%s7950_s5 + $0x58] sm:$0xff]  }
 0x3eb   : > { %6012 = vmatprep.mubr.msk.bf16.mxu1 %vm6453_vm8, %v6452_v35  ;;  %5893 = vmatpush3.bf16.msra.mxu0 %v6421_v45 }
 0x3ec   : > { %5876 = vmatprep.mubr.msk.bf16.mxu0 %vm6453_vm8, %v6452_v35  ;;  %5894 = vmatprep.subr.bf16.mxu0 %v6452_v35 }
 0x3ef   : > { %5895 = vmatpush3.bf16.msra.mxu0 %v6423_v18 }
 0x3f0   : > { %5896 = vmatprep.subr.bf16.mxu0 %v6452_v35 }
 0x3f2   : > { %6013 = vmatmul.mubr.msk.bf16.vlgmr.msra.gmra.mrb[32].mxu1 %vm3708_vm9, %v7455_v53  ;;  %5877 = vmatmul.mubr.msk.bf16.gmra.mrb[128].mxu0 %vm3708_vm9, %v7313_v49  ;;  %v6427_v53 = vld [vmem:[%s7950_s5 + $0x108] sm:$0xff]   ;;  %v6428_v49 = vld [vmem:[%s7950_s5 + $0x110] sm:$0xff]  }
 0x3f3   : > { %6016 = vmatprep.mubr.msk.bf16.mxu1 %vm6453_vm8, %v6452_v35  ;;  %5880 = vmatprep.mubr.msk.bf16.mxu0 %vm6453_vm8, %v6452_v35 }
 0x3f4   : > { %5897 = vmatpush3.bf16.msra.mxu0 %v6424_v38  ;;  %6061 = vmatpush3.bf16.msra.mxu1 %v6426_v42 }
 0x3f5   : > { %5898 = vmatprep.subr.bf16.mxu0 %v6452_v35  ;;  %6062 = vmatprep.subr.bf16.mxu1 %v6452_v35 }
 0x3f8   : > { %5899 = vmatpush3.bf16.msra.mxu0 %v6425_v55  ;;  %6063 = vmatpush3.bf16.msra.mxu1 %v6427_v53 }
 0x3f9   : > { %5920 = vmatprep.subr.bf16.mxu0 %v6452_v35  ;;  %6064 = vmatprep.subr.bf16.mxu1 %v6452_v35 }
 0x3fa   : > { %6017 = vmatmul.mubr.msk.bf16.gmra.mrb[36].mxu1 %vm3708_vm9, %v7458_v48  ;;  %5881 = vmatmul.mubr.msk.bf16.gmra.mrb[132].mxu0 %vm3708_vm9, %v7343_v23  ;;  %v6431_v23 = vld [vmem:[%s7950_s5 + $0x68] sm:$0xff]   ;;  %v6434_v48 = vld [vmem:[%s7950_s5 + $0xa0] sm:$0xff]  }
 0x3fb   : > { %6020 = vmatprep.mubr.msk.bf16.mxu1 %vm6453_vm8, %v6452_v35  ;;  %5884 = vmatprep.mubr.msk.bf16.mxu0 %vm6453_vm8, %v6452_v35 }
 0x3fc   : > { %6065 = vmatpush3.bf16.msra.mxu1 %v6428_v49 }
 0x3fd   : > { %6066 = vmatprep.subr.bf16.mxu1 %v6452_v35 }
 0x400   : > { %6067 = vmatpush3.bf16.msra.mxu1 %v6430_v20 }
 0x402   : > { %6021 = vmatmul.mubr.msk.bf16.gmra.mrb[40].mxu1 %vm3708_vm9, %v7464_v19  ;;  %5885 = vmatmul.mubr.msk.bf16.gmra.mrb[136].mxu0 %vm3708_vm9, %v7341_v22  ;;  %v6429_v22 = vld [vmem:[%s7950_s5 + $0x60] sm:$0xff]  }
 0x403   : > { %6024 = vmatprep.mubr.msk.bf16.mxu1 %vm6453_vm8, %v6452_v35  ;;  %5888 = vmatprep.mubr.msk.bf16.mxu0 %vm6453_vm8, %v6452_v35  ;;  %v6438_v19 = vld [vmem:[%s7950_s5 + $0xe0] sm:$0xff]  }
 0x40a   : > { %6025 = vmatmul.mubr.msk.bf16.gmra.mrb[44].mxu1 %vm3708_vm9, %v7468_v57  ;;  %5889 = vmatmul.mubr.msk.bf16.gmra.mrb[140].mxu0 %vm3708_vm9, %v7382_v11  ;;  %v6435_v11 = vld [vmem:[%s7950_s5 + $0xa8] sm:$0xff]  }
 0x40b   : > { %6028 = vmatprep.mubr.msk.bf16.mxu1 %vm6453_vm8, %v6452_v35  ;;  %5900 = vmatprep.mubr.msk.bf16.mxu0 %vm6453_vm8, %v6452_v35  ;;  %v6439_v57 = vld [vmem:[%s7950_s5 + $0xe8] sm:$0xff]  }
 0x412   : > { %6029 = vmatmul.mubr.msk.bf16.gmra.mrb[48].mxu1 %vm3708_vm9, %v7405_v46  ;;  %5901 = vmatmul.mubr.msk.bf16.vlgmr.msra.gmra.mrb[144].mxu0 %vm3708_vm9, %v7352_v1  ;;  %v6432_v46 = vld [vmem:[%s7950_s5 + $0x70] sm:$0xff]   ;;  %v6433_v1 = vld [vmem:[%s7950_s5 + $0x78] sm:$0xff]  }
 0x413   : > { %6068 = vmatprep.mubr.msk.bf16.mxu1 %vm6453_vm8, %v6452_v35  ;;  %5921 = vmatpush3.bf16.msra.mxu0 %v6429_v22 }
 0x414   : > { %5904 = vmatprep.mubr.msk.bf16.mxu0 %vm6453_vm8, %v6452_v35  ;;  %5922 = vmatprep.subr.bf16.mxu0 %v6452_v35 }
 0x417   : > { %5923 = vmatpush3.bf16.msra.mxu0 %v6431_v23 }
 0x418   : > { %5924 = vmatprep.subr.bf16.mxu0 %v6452_v35 }
 0x41a   : > { %6069 = vmatmul.mubr.msk.bf16.vlgmr.msra.gmra.mrb[52].mxu1 %vm3708_vm9, %v7473_v16  ;;  %5905 = vmatmul.mubr.msk.bf16.gmra.mrb[148].mxu0 %vm3708_vm9, %v7484_v3  ;;  %v6440_v16 = vld [vmem:[%s7950_s5 + $0xf0] sm:$0xff]  }
 0x41b   : > { %6072 = vmatprep.mubr.msk.bf16.mxu1 %vm6453_vm8, %v6452_v35  ;;  %5908 = vmatprep.mubr.msk.bf16.mxu0 %vm6453_vm8, %v6452_v35 }
 0x41c   : > { %5925 = vmatpush3.bf16.msra.mxu0 %v6432_v46 }
 0x41d   : > { %5926 = vmatprep.subr.bf16.mxu0 %v6452_v35 }
 0x420   : > { %5927 = vmatpush3.bf16.msra.mxu0 %v6433_v1 }
 0x421   : > { %5976 = vmatprep.subr.bf16.mxu0 %v6452_v35 }
 0x422   : > { %6073 = vmatmul.mubr.msk.bf16.gmra.mrb[56].mxu1 %vm3708_vm9, %v7490_v13  ;;  %5909 = vmatmul.mubr.msk.bf16.gmra.mrb[152].mxu0 %vm3708_vm9, %v7502_v37 }
 0x423   : > { %6076 = vmatprep.mubr.msk.bf16.mxu1 %vm6453_vm8, %v6452_v35  ;;  %5912 = vmatprep.mubr.msk.bf16.mxu0 %vm6453_vm8, %v6452_v35 }
 0x42a   : > { %6077 = vmatmul.mubr.msk.bf16.gmra.mrb[60].mxu1 %vm3708_vm9, %v7505_v60  ;;  %5913 = vmatmul.mubr.msk.bf16.gmra.mrb[156].mxu0 %vm3708_vm9, %v7516_v43 }
 0x42b   : > { %6080 = vmatprep.mubr.msk.bf16.mxu1 %vm6453_vm8, %v6452_v35  ;;  %5916 = vmatprep.mubr.msk.bf16.mxu0 %vm6453_vm8, %v6452_v35 }
 0x432   : > { %6081 = vmatmul.mubr.msk.bf16.gmra.mrb[64].mxu1 %vm3708_vm9, %v7510_v7  ;;  %5917 = vmatmul.mubr.msk.bf16.gmra.mrb[160].mxu0 %vm3708_vm9, %v3922_v36 }
 0x433   : > { %6084 = vmatprep.mubr.msk.bf16.mxu1 %vm6453_vm8, %v6452_v35  ;;  %5928 = vmatprep.mubr.msk.bf16.mxu0 %vm6453_vm8, %v6452_v35 }
 0x43a   : > { %6085 = vmatmul.mubr.msk.bf16.gmra.mrb[68].mxu1 %vm3708_vm9, %v4815_v59  ;;  %5929 = vmatmul.mubr.msk.bf16.vlgmr.msra.gmra.mrb[164].mxu0 %vm3708_vm9, %v7498_v5  ;;  %v6437_v59 = vld [vmem:[%s7950_s5 + $0xb8] sm:$0xff]  }
 0x43b   : > { %5977 = vmatpush3.bf16.msra.mxu0 %v6434_v48  ;;  %5932 = vmatprep.mubr.msk.bf16.mxu0 %vm6453_vm8, %v6452_v35 }
 0x43c   : > { %5978 = vmatprep.subr.bf16.mxu0 %v6452_v35 }
 0x43f   : > { %5979 = vmatpush3.bf16.msra.mxu0 %v6435_v11 }
 0x440   : > { %5980 = vmatprep.subr.bf16.mxu0 %v6452_v35 }
 0x442   : > { %5933 = vmatmul.mubr.msk.bf16.gmra.mrb[168].mxu0 %vm3708_vm9, %v7521_v52 }
 0x443   : > { %5936 = vmatprep.mubr.msk.bf16.mxu0 %vm6453_vm8, %v6452_v35  ;;  %5981 = vmatpush3.bf16.msra.mxu0 %v6436_v25 }
 0x444   : > { %5982 = vmatprep.subr.bf16.mxu0 %v6452_v35 }
 0x447   : > { %5983 = vmatpush3.bf16.msra.mxu0 %v6437_v59 }
 0x448   : > { %6032 = vmatprep.subr.bf16.mxu0 %v6452_v35 }
 0x44a   : > { %5937 = vmatmul.mubr.msk.bf16.gmra.mrb[172].mxu0 %vm3708_vm9, %v7532_v41 }
 0x44b   : > { %5940 = vmatprep.mubr.msk.bf16.mxu0 %vm6453_vm8, %v6452_v35 }
 0x452   : > { %5941 = vmatmul.mubr.msk.bf16.gmra.mrb[176].mxu0 %vm3708_vm9, %v7542_v6 }
 0x453   : > { %5944 = vmatprep.mubr.msk.bf16.mxu0 %vm6453_vm8, %v6452_v35 }
 0x45a   : > { %5945 = vmatmul.mubr.msk.bf16.gmra.mrb[180].mxu0 %vm3708_vm9, %v4069_v29 }
 0x45b   : > { %5984 = vmatprep.mubr.msk.bf16.mxu0 %vm6453_vm8, %v6452_v35 }
 0x462   : > { %5985 = vmatmul.mubr.msk.bf16.vlgmr.msra.gmra.mrb[184].mxu0 %vm3708_vm9, %v7529_v47 }
 0x463   : > { %6033 = vmatpush3.bf16.msra.mxu0 %v6438_v19  ;;  %5988 = vmatprep.mubr.msk.bf16.mxu0 %vm6453_vm8, %v6452_v35 }
 0x464   : > { %6034 = vmatprep.subr.bf16.mxu0 %v6452_v35 }
 0x467   : > { %6035 = vmatpush3.bf16.msra.mxu0 %v6439_v57 }
 0x468   : > { %6036 = vmatprep.subr.bf16.mxu0 %v6452_v35 }
 0x46a   : > { %5989 = vmatmul.mubr.msk.bf16.gmra.mrb[188].mxu0 %vm3708_vm9, %v7555_v62 }
 0x46b   : > { %5992 = vmatprep.mubr.msk.bf16.mxu0 %vm6453_vm8, %v6452_v35  ;;  %6037 = vmatpush3.bf16.msra.mxu0 %v6440_v16 }
 0x46c   : > { %6038 = vmatprep.subr.bf16.mxu0 %v6452_v35 }
 0x46f   : > { %6039 = vmatpush3.bf16.msra.mxu0 %v6441_v12 }
 0x472   : > { %5993 = vmatmul.mubr.msk.bf16.gmra.mrb[192].mxu0 %vm3708_vm9, %v7558_v63 }
 0x473   : > { %5996 = vmatprep.mubr.msk.bf16.mxu0 %vm6453_vm8, %v6452_v35 }
 0x47a   : > { %5997 = vmatmul.mubr.msk.bf16.gmra.mrb[196].mxu0 %vm3708_vm9, %v7563_v30 }
 0x47b   : > { %6000 = vmatprep.mubr.msk.bf16.mxu0 %vm6453_vm8, %v6452_v35 }
 0x482   : > { %6001 = vmatmul.mubr.msk.bf16.gmra.mrb[200].mxu0 %vm3708_vm9, %v4378_v9 }
 0x483   : > { %6040 = vmatprep.mubr.msk.bf16.mxu0 %vm6453_vm8, %v6452_v35 }
 0x48a   : > { %6041 = vmatmul.mubr.msk.bf16.vlgmr.msra.gmra.mrb[204].mxu0 %vm3708_vm9, %v7570_v51 }
 0x48b   : > { %6044 = vmatprep.mubr.msk.bf16.mxu0 %vm6453_vm8, %v6452_v35 }
 0x492   : > { %6045 = vmatmul.mubr.msk.bf16.gmra.mrb[208].mxu0 %vm3708_vm9, %v7580_v4 }
 0x493   : > { %6048 = vmatprep.mubr.msk.bf16.mxu0 %vm6453_vm8, %v6452_v35 }
 0x495   : > { %v3758_v44 = vpop.f32.mrb[104].mxu0 }
 0x496   : > { %v5846_v33 = vpop.f32.mrb[105].mxu0 }
 0x497   : > { %v3761_v56 = vpop.f32.mrb[106].mxu0 }
 0x498   : > { %v5847_v3 = vpop.f32.mrb[107].mxu0 }
 0x49a   : > { %6049 = vmatmul.mubr.msk.bf16.gmra.mrb[212].mxu0 %vm3708_vm9, %v7585_v27 }
 0x49b   : > { %6052 = vmatprep.mubr.msk.bf16.mxu0 %vm6453_vm8, %v6452_v35 }
 0x49d   : > { %v7812_v26 = vpop.f32.mrb[12].mxu1  ;;  %v3766_v13 = vpop.f32.mrb[108].mxu0 }
 0x49e   : > { %v5958_v21 = vpop.f32.mrb[13].mxu1  ;;  %v5850_v5 = vpop.f32.mrb[109].mxu0 }
 0x49f   : > { %v7814_v36 = vpop.f32.mrb[14].mxu1  ;;  %v3769_v37 = vpop.f32.mrb[110].mxu0 }
 0x4a0   : > { %v5959_v2 = vpop.f32.mrb[15].mxu1  ;;  %v5851_v60 = vpop.f32.mrb[111].mxu0 }
 0x4a2   : > { %6053 = vmatmul.mubr.msk.bf16.gmra.mrb[216].mxu0 %vm3708_vm9, %v7589_v61 }
 0x4a3   : > { %6056 = vmatprep.mubr.msk.bf16.mxu0 %vm6453_vm8, %v6452_v35 }
 0x4a5   : > { %v7820_v7 = vpop.f32.mrb[16].mxu1  ;;  %v3774_v43 = vpop.f32.mrb[112].mxu0 }
 0x4a6   : > { %v5962_v34 = vpop.f32.mrb[17].mxu1  ;;  %v5854_v29 = vpop.f32.mrb[113].mxu0 }
 0x4a7   : > { %v7822_v52 = vpop.f32.mrb[18].mxu1  ;;  %v3777_v41 = vpop.f32.mrb[114].mxu0 }
 0x4a8   : > { %v5963_v47 = vpop.f32.mrb[19].mxu1  ;;  %v5855_v32 = vpop.f32.mrb[115].mxu0 }
 0x4aa   : > { %6057 = vmatmul.mubr.msk.bf16.gmra.mrb[220].mxu0 %vm3708_vm9, %v7576_v24 }
 0x4ad   : > { %v7826_v54 = vpop.f32.mrb[20].mxu1  ;;  %v3782_v6 = vpop.f32.mrb[116].mxu0 }
 0x4ae   : > { %v5966_v9 = vpop.f32.mrb[21].mxu1  ;;  %v5858_v35 = vpop.f32.mrb[117].mxu0 }
 0x4af   : > { %v7828_v17 = vpop.f32.mrb[22].mxu1  ;;  %v3785_v0 = vpop.f32.mrb[118].mxu0 }
 0x4b0   : > { %v5967_v50 = vpop.f32.mrb[23].mxu1  ;;  %v5859_v62 = vpop.f32.mrb[119].mxu0 }
 0x4b5   : > { %v7830_v63 = vpop.f32.mrb[24].mxu1  ;;  %v3790_v8 = vpop.f32.mrb[120].mxu0 }
 0x4b6   : > { %v5970_v30 = vpop.f32.mrb[25].mxu1  ;;  %v5862_v15 = vpop.f32.mrb[121].mxu0 }
 0x4b7   : > { %v7832_v51 = vpop.f32.mrb[26].mxu1  ;;  %v3793_v10 = vpop.f32.mrb[122].mxu0 }
 0x4b8   : > { %v5971_v58 = vpop.f32.mrb[27].mxu1  ;;  %v5863_v14 = vpop.f32.mrb[123].mxu0 }
 0x4bd   : > { %v7834_v40 = vpop.f32.mrb[28].mxu1  ;;  %v3864_v39 = vpop.f32.mrb[124].mxu0 }
 0x4be   : > { %v5974_v24 = vpop.f32.mrb[29].mxu1  ;;  %v3865_v4 = vadd.f32 %v3864_v39, %v3758_v44  ;;  %v5874_v28 = vpop.f32.mrb[125].mxu0 }
 0x4bf   : > { %v4351_v31 = vpop.f32.mrb[30].mxu1  ;;  %v3867_v61 = vpop.f32.mrb[126].mxu0 }
 0x4c0   : > { %v5975_v27 = vpop.f32.mrb[31].mxu1  ;;  %v3868_v45 = vadd.f32 %v3867_v61, %v3761_v56  ;;  %v5875_v18 = vpop.f32.mrb[127].mxu0 }
 0x4c5   : > { %v7836_v38 = vpop.f32.mrb[32].mxu1  ;;  %v3872_v55 = vpop.f32.mrb[128].mxu0 }
 0x4c6   : > { %v6014_v42 = vpop.f32.mrb[33].mxu1  ;;  %v3873_v53 = vadd.f32 %v3872_v55, %v3766_v13  ;;  %v5878_v20 = vpop.f32.mrb[129].mxu0 }
 0x4c7   : > { %v7838_v49 = vpop.f32.mrb[34].mxu1  ;;  %v3875_v23 = vpop.f32.mrb[130].mxu0 }
 0x4c8   : > { %v6015_v22 = vpop.f32.mrb[35].mxu1  ;;  %v3876_v46 = vadd.f32 %v3875_v23, %v3769_v37  ;;  %v5879_v1 = vpop.f32.mrb[131].mxu0 }
 0x4cd   : > { %v7840_v48 = vpop.f32.mrb[36].mxu1  ;;  %v3880_v25 = vpop.f32.mrb[132].mxu0 }
 0x4ce   : > { %v6018_v11 = vpop.f32.mrb[37].mxu1  ;;  %v3881_v59 = vadd.f32 %v3880_v25, %v3774_v43  ;;  %v5882_v57 = vpop.f32.mrb[133].mxu0 }
 0x4cf   : > { %v7842_v19 = vpop.f32.mrb[38].mxu1  ;;  %v3883_v12 = vpop.f32.mrb[134].mxu0 }
 0x4d0   : > { %v6019_v16 = vpop.f32.mrb[39].mxu1  ;;  %v3884_v44 = vadd.f32 %v3883_v12, %v3777_v41  ;;  %v5883_v33 = vpop.f32.mrb[135].mxu0 }
 0x4d5   : > { %v7844_v56 = vpop.f32.mrb[40].mxu1  ;;  %v3888_v21 = vpop.f32.mrb[136].mxu0 }
 0x4d6   : > { %v6022_v3 = vpop.f32.mrb[41].mxu1  ;;  %v3889_v13 = vadd.f32 %v3888_v21, %v3782_v6  ;;  %v5886_v2 = vpop.f32.mrb[137].mxu0 }
 0x4d7   : > { %v7846_v5 = vpop.f32.mrb[42].mxu1  ;;  %v3891_v60 = vpop.f32.mrb[138].mxu0 }
 0x4d8   : > { %v6023_v37 = vpop.f32.mrb[43].mxu1  ;;  %v3892_v34 = vadd.f32 %v3891_v60, %v3785_v0  ;;  %v5887_v29 = vpop.f32.mrb[139].mxu0 }
 0x4dd   : > { %v7848_v43 = vpop.f32.mrb[44].mxu1  ;;  %v3896_v32 = vpop.f32.mrb[140].mxu0 }
 0x4de   : > { %v6026_v47 = vpop.f32.mrb[45].mxu1  ;;  %v3897_v9 = vadd.f32 %v3896_v32, %v3790_v8  ;;  %v5890_v41 = vpop.f32.mrb[141].mxu0 }
 0x4df   : > { %v7850_v35 = vpop.f32.mrb[46].mxu1  ;;  %v3899_v62 = vpop.f32.mrb[142].mxu0 }
 0x4e0   : > { %v6027_v50 = vpop.f32.mrb[47].mxu1  ;;  %v5891_v30 = vpop.f32.mrb[143].mxu0 }
 0x4e5   : > { %v7852_v15 = vpop.f32.mrb[48].mxu1  ;;  %v3997_v58 = vpop.f32.mrb[144].mxu0 }
 0x4e6   : > { %v6030_v6 = vpop.f32.mrb[49].mxu1  ;;  %v4035_v10 = vadd.f32 %v3997_v58, %v3865_v4  ;;  %v5902_v24 = vpop.f32.mrb[145].mxu0 }
 0x4e7   : > { %v4629_v14 = vpop.f32.mrb[50].mxu1  ;;  %v4000_v39 = vpop.f32.mrb[146].mxu0 }
 0x4e8   : > { %v6031_v0 = vpop.f32.mrb[51].mxu1  ;;  %v4036_v31 = vadd.f32 %v4000_v39, %v3868_v45  ;;  %v5903_v28 = vpop.f32.mrb[147].mxu0 }
 0x4ed   : > { %v7854_v27 = vpop.f32.mrb[52].mxu1  ;;  %v4005_v61 = vpop.f32.mrb[148].mxu0 }
 0x4ee   : > { %v6070_v8 = vpop.f32.mrb[53].mxu1  ;;  %v4037_v18 = vadd.f32 %v4005_v61, %v3873_v53  ;;  %v5906_v55 = vpop.f32.mrb[149].mxu0 }
 0x4ef   : > { %v7856_v42 = vpop.f32.mrb[54].mxu1  ;;  %v4008_v22 = vpop.f32.mrb[150].mxu0 }
 0x4f0   : > { %v6071_v20 = vpop.f32.mrb[55].mxu1  ;;  %v4038_v23 = vadd.f32 %v4008_v22, %v3876_v46  ;;  %v5907_v1 = vpop.f32.mrb[151].mxu0 }
 0x4f5   : > { %v7858_v11 = vpop.f32.mrb[56].mxu1  ;;  %v4013_v25 = vpop.f32.mrb[152].mxu0 }
 0x4f6   : > { %v6074_v4 = vpop.f32.mrb[57].mxu1  ;;  %v4039_v57 = vadd.f32 %v4013_v25, %v3881_v59  ;;  %v5910_v45 = vpop.f32.mrb[153].mxu0 }
 0x4f7   : > { %v7860_v16 = vpop.f32.mrb[58].mxu1  ;;  %v4016_v33 = vpop.f32.mrb[154].mxu0 }
 0x4f8   : > { %v6075_v12 = vpop.f32.mrb[59].mxu1  ;;  %v4040_v3 = vadd.f32 %v4016_v33, %v3884_v44  ;;  %v5911_v21 = vpop.f32.mrb[155].mxu0 }
 0x4fd   : > { %v7862_v53 = vpop.f32.mrb[60].mxu1  ;;  %v4021_v37 = vpop.f32.mrb[156].mxu0 }
 0x4fe   : > { %v6078_v2 = vpop.f32.mrb[61].mxu1  ;;  %v4041_v60 = vadd.f32 %v4021_v37, %v3889_v13  ;;  %v5914_v46 = vpop.f32.mrb[157].mxu0 }
 0x4ff   : > { %v7864_v29 = vpop.f32.mrb[62].mxu1  ;;  %v4024_v32 = vpop.f32.mrb[158].mxu0 }
 0x500   : > { %v6079_v47 = vpop.f32.mrb[63].mxu1  ;;  %v4042_v41 = vadd.f32 %v4024_v32, %v3892_v34  ;;  %v5915_v50 = vpop.f32.mrb[159].mxu0 }
 0x505   : > { %v7866_v59 = vpop.f32.mrb[64].mxu1  ;;  %v4029_v30 = vpop.f32.mrb[160].mxu0 }
 0x506   : > { %v6082_v62 = vpop.f32.mrb[65].mxu1  ;;  %v4043_v6 = vadd.f32 %v4029_v30, %v3897_v9  ;;  %v5918_v44 = vpop.f32.mrb[161].mxu0 }
 0x507   : > { %v7868_v58 = vpop.f32.mrb[66].mxu1  ;;  %v4032_v24 = vpop.f32.mrb[162].mxu0 }
 0x508   : > { %v6083_v14 = vpop.f32.mrb[67].mxu1  ;;  %v5919_v0 = vpop.f32.mrb[163].mxu0 }
 0x50d   : > { %v7870_v39 = vpop.f32.mrb[68].mxu1  ;;  %v4144_v28 = vpop.f32.mrb[164].mxu0 }
 0x50e   : > { %v6086_v13 = vpop.f32.mrb[69].mxu1  ;;  %v4182_v8 = vadd.f32 %v4144_v28, %v4035_v10  ;;  %v5930_v55 = vpop.f32.mrb[165].mxu0 }
 0x50f   : > { %v4925_v61 = vpop.f32.mrb[70].mxu1  ;;  %v4147_v20 = vpop.f32.mrb[166].mxu0 }
 0x510   : > { %v6087_v34 = vpop.f32.mrb[71].mxu1  ;;  %v4183_v22 = vadd.f32 %v4147_v20, %v4036_v31  ;;  %v5931_v1 = vpop.f32.mrb[167].mxu0  ;;  %v4354_v4 = vadd.f32 %v7812_v26, %v4182_v8 }
 0x512   : > { %v4355_v9 = vadd.f32 %v7814_v36, %v4183_v22 }
 0x515   : > { %v4152_v25 = vpop.f32.mrb[168].mxu0 }
 0x516   : > { %v4184_v45 = vadd.f32 %v4152_v25, %v4037_v18  ;;  %v5934_v12 = vpop.f32.mrb[169].mxu0 }
 0x517   : > { %v4155_v33 = vpop.f32.mrb[170].mxu0 }
 0x518   : > { %v4185_v21 = vadd.f32 %v4155_v33, %v4038_v23  ;;  %v5935_v2 = vpop.f32.mrb[171].mxu0  ;;  %v4356_v37 = vadd.f32 %v7820_v7, %v4184_v45 }
 0x51a   : > { %v4357_v10 = vadd.f32 %v7822_v52, %v4185_v21 }
 0x51d   : > { %v4160_v46 = vpop.f32.mrb[172].mxu0 }
 0x51e   : > { %v4186_v47 = vadd.f32 %v4160_v46, %v4039_v57  ;;  %v5938_v32 = vpop.f32.mrb[173].mxu0 }
 0x51f   : > { %v4163_v50 = vpop.f32.mrb[174].mxu0 }
 0x520   : > { %v4187_v31 = vadd.f32 %v4163_v50, %v4040_v3  ;;  %v5939_v62 = vpop.f32.mrb[175].mxu0  ;;  %v4358_v26 = vadd.f32 %v7826_v54, %v4186_v47 }
 0x522   : > { %v4359_v36 = vadd.f32 %v7828_v17, %v4187_v31 }
 0x525   : > { %v4168_v30 = vpop.f32.mrb[176].mxu0 }
 0x526   : > { %v4188_v18 = vadd.f32 %v4168_v30, %v4041_v60  ;;  %v5942_v44 = vpop.f32.mrb[177].mxu0 }
 0x527   : > { %v4171_v14 = vpop.f32.mrb[178].mxu0 }
 0x528   : > { %v4189_v23 = vadd.f32 %v4171_v14, %v4042_v41  ;;  %v5943_v24 = vpop.f32.mrb[179].mxu0  ;;  %v4360_v7 = vadd.f32 %v7830_v63, %v4188_v18  ;;  %v7897_v14 = vld [vmem:[%s7951_s6] ss:$0 sm:$0xff] }
 0x52a   : > { %v4361_v52 = vadd.f32 %v7832_v51, %v4189_v23 }
 0x52d   : > { %v4176_v0 = vpop.f32.mrb[180].mxu0 }
 0x52e   : > { %v4190_v57 = vadd.f32 %v4176_v0, %v4043_v6  ;;  %v5946_v13 = vpop.f32.mrb[181].mxu0 }
 0x52f   : > { %v4179_v28 = vpop.f32.mrb[182].mxu0 }
 0x530   : > { %v5947_v3 = vpop.f32.mrb[183].mxu0  ;;  %v4362_v8 = vadd.f32 %v7834_v40, %v4190_v57 }
 0x535   : > { %v4453_v54 = vpop.f32.mrb[184].mxu0 }
 0x536   : > { %v4491_v61 = vadd.f32 %v4453_v54, %v4354_v4  ;;  %v5986_v17 = vpop.f32.mrb[185].mxu0 }
 0x537   : > { %v4456_v55 = vpop.f32.mrb[186].mxu0 }
 0x538   : > { %v4492_v60 = vadd.f32 %v4456_v55, %v4355_v9  ;;  %v5987_v34 = vpop.f32.mrb[187].mxu0  ;;  %v4632_v41 = vadd.f32 %v7836_v38, %v4491_v61 }
 0x53a   : > { %v4633_v20 = vadd.f32 %v7838_v49, %v4492_v60 }
 0x53d   : > { %v4461_v63 = vpop.f32.mrb[188].mxu0 }
 0x53e   : > { %v4493_v22 = vadd.f32 %v4461_v63, %v4356_v37  ;;  %v5990_v51 = vpop.f32.mrb[189].mxu0 }
 0x53f   : > { %v4464_v1 = vpop.f32.mrb[190].mxu0 }
 0x540   : > { %v4494_v6 = vadd.f32 %v4464_v1, %v4357_v10  ;;  %v5991_v25 = vpop.f32.mrb[191].mxu0  ;;  %v4634_v45 = vadd.f32 %v7840_v48, %v4493_v22 }
 0x542   : > { %v4635_v40 = vadd.f32 %v7842_v19, %v4494_v6 }
 0x545   : > { %v4469_v12 = vpop.f32.mrb[192].mxu0 }
 0x546   : > { %v4495_v4 = vadd.f32 %v4469_v12, %v4358_v26  ;;  %v5994_v33 = vpop.f32.mrb[193].mxu0 }
 0x547   : > { %v4472_v21 = vpop.f32.mrb[194].mxu0 }
 0x548   : > { %v4496_v9 = vadd.f32 %v4472_v21, %v4359_v36  ;;  %v5995_v2 = vpop.f32.mrb[195].mxu0  ;;  %v4636_v38 = vadd.f32 %v7844_v56, %v4495_v4 }
 0x54a   : > { %v4637_v49 = vadd.f32 %v7846_v5, %v4496_v9 }
 0x54d   : > { %v4477_v46 = vpop.f32.mrb[196].mxu0 }
 0x54e   : > { %v4497_v37 = vadd.f32 %v4477_v46, %v4360_v7  ;;  %v5998_v47 = vpop.f32.mrb[197].mxu0 }
 0x54f   : > { %v4480_v32 = vpop.f32.mrb[198].mxu0 }
 0x550   : > { %v4498_v10 = vadd.f32 %v4480_v32, %v4361_v52  ;;  %v5999_v50 = vpop.f32.mrb[199].mxu0  ;;  %v4638_v48 = vadd.f32 %v7848_v43, %v4497_v37 }
 0x552   : > { %v7889_v19 = vadd.f32 %v7850_v35, %v4498_v10 }
 0x555   : > { %v4485_v31 = vpop.f32.mrb[200].mxu0 }
 0x556   : > { %v4499_v62 = vadd.f32 %v4485_v31, %v4362_v8  ;;  %v6002_v26 = vpop.f32.mrb[201].mxu0 }
 0x557   : > { %v4488_v36 = vpop.f32.mrb[202].mxu0 }
 0x558   : > { %v6003_v30 = vpop.f32.mrb[203].mxu0  ;;  %v7892_v56 = vadd.f32 %v7852_v15, %v4499_v62 }
 0x55d   : > { %v4752_v5 = vpop.f32.mrb[204].mxu0 }
 0x55e   : > { %v4790_v18 = vadd.f32 %v4752_v5, %v4632_v41  ;;  %v6042_v44 = vpop.f32.mrb[205].mxu0 }
 0x55f   : > { %v4755_v43 = vpop.f32.mrb[206].mxu0 }
 0x560   : > { %v4928_v35 = vadd.f32 %v7854_v27, %v4790_v18  ;;  %v4791_v23 = vadd.f32 %v4755_v43, %v4633_v20  ;;  %v6043_v24 = vpop.f32.mrb[207].mxu0 }
 0x562   : > { %v4943_v7 = vadd.f32 %v7897_v14, %v4928_v35  ;;  %v4929_v52 = vadd.f32 %v7856_v42, %v4791_v23 }
 0x564   : > { %v4952_v15 = vmax.f32 %v4943_v7, 0.0  ;;  %v4944_v0 = vadd.f32 %v7897_v14, %v4929_v52 }
 0x565   : > { %v4760_v57 = vpop.f32.mrb[208].mxu0 }
 0x566   : > { %v5362_v27 = vpack.c.bf16 %v4952_v15, %v4952_v15  ;;  %v4953_v13 = vmax.f32 %v4944_v0, 0.0  ;;  %v4792_v28 = vadd.f32 %v4760_v57, %v4634_v45  ;;  %v6046_v3 = vpop.f32.mrb[209].mxu0 }
 0x567   : > { %v4763_v8 = vpop.f32.mrb[210].mxu0 }
 0x568   : > { %4999 = vst.msk [vmem:[%s7907_s19] sm:$0xf] %vm4998_vm10, %v5362_v27  ;;  %v5363_v42 = vpack.c.bf16 %v4953_v13, %v4953_v13  ;;  %v4930_v54 = vadd.f32 %v7858_v11, %v4792_v28  ;;  %v4793_v61 = vadd.f32 %v4763_v8, %v4635_v40  ;;  %v6047_v17 = vpop.f32.mrb[211].mxu0 }
 0x56a   : > { %5000 = vst.msk [vmem:[%s7907_s19 + $0x4] sm:$0xf] %vm4998_vm10, %v5363_v42  ;;  %v4945_v55 = vadd.f32 %v7897_v14, %v4930_v54  ;;  %v4931_v60 = vadd.f32 %v7860_v16, %v4793_v61 }
 0x56c   : > { %v4954_v34 = vmax.f32 %v4945_v55, 0.0  ;;  %v4946_v41 = vadd.f32 %v7897_v14, %v4931_v60 }
 0x56d   : > { %v4768_v20 = vpop.f32.mrb[212].mxu0 }
 0x56e   : > { %v5364_v63 = vpack.c.bf16 %v4954_v34, %v4954_v34  ;;  %v4955_v22 = vmax.f32 %v4946_v41, 0.0  ;;  %v4794_v51 = vadd.f32 %v4768_v20, %v4636_v38  ;;  %v6050_v1 = vpop.f32.mrb[213].mxu0 }
 0x56f   : > { %v4771_v6 = vpop.f32.mrb[214].mxu0 }
 0x570   : > { %5001 = vst.msk [vmem:[%s7907_s19 + $0x8] sm:$0xf] %vm4998_vm10, %v5364_v63  ;;  %v5365_v11 = vpack.c.bf16 %v4955_v22, %v4955_v22  ;;  %v4932_v25 = vadd.f32 %v7862_v53, %v4794_v51  ;;  %v4795_v45 = vadd.f32 %v4771_v6, %v4637_v49  ;;  %v6051_v40 = vpop.f32.mrb[215].mxu0 }
 0x572   : > { %5002 = vst.msk [vmem:[%s7907_s19 + $0xc] sm:$0xf] %vm4998_vm10, %v5365_v11  ;;  %v4947_v16 = vadd.f32 %v7897_v14, %v4932_v25  ;;  %v4933_v12 = vadd.f32 %v7864_v29, %v4795_v45 }
 0x574   : > { %v4956_v4 = vmax.f32 %v4947_v16, 0.0  ;;  %v4948_v33 = vadd.f32 %v7897_v14, %v4933_v12 }
 0x575   : > { %v4776_v21 = vpop.f32.mrb[216].mxu0 }
 0x576   : > { %v5366_v9 = vpack.c.bf16 %v4956_v4, %v4956_v4  ;;  %v4957_v2 = vmax.f32 %v4948_v33, 0.0  ;;  %v4796_v38 = vadd.f32 %v4776_v21, %v4638_v48  ;;  %v6054_v46 = vpop.f32.mrb[217].mxu0 }
 0x577   : > { %v4779_v37 = vpop.f32.mrb[218].mxu0 }
 0x578   : > { %5003 = vst.msk [vmem:[%s7907_s19 + $0x10] sm:$0xf] %vm4998_vm10, %v5366_v9  ;;  %v5367_v53 = vpack.c.bf16 %v4957_v2, %v4957_v2  ;;  %v4934_v49 = vadd.f32 %v7866_v59, %v4796_v38  ;;  %v4797_v47 = vadd.f32 %v4779_v37, %v7889_v19  ;;  %v6055_v32 = vpop.f32.mrb[219].mxu0 }
 0x57a   : > { %5004 = vst.msk [vmem:[%s7907_s19 + $0x14] sm:$0xf] %vm4998_vm10, %v5367_v53  ;;  %v4949_v29 = vadd.f32 %v7897_v14, %v4934_v49  ;;  %v4935_v10 = vadd.f32 %v7868_v58, %v4797_v47 }
 0x57c   : > { %v4958_v50 = vmax.f32 %v4949_v29, 0.0  ;;  %v4950_v48 = vadd.f32 %v7897_v14, %v4935_v10 }
 0x57d   : > { %v4784_v31 = vpop.f32.mrb[220].mxu0 }
 0x57e   : > { %v5368_v62 = vpack.c.bf16 %v4958_v50, %v4958_v50  ;;  %v4959_v26 = vmax.f32 %v4950_v48, 0.0  ;;  %v4798_v36 = vadd.f32 %v4784_v31, %v7892_v56  ;;  %v6058_v59 = vpop.f32.mrb[221].mxu0 }
 0x57f   : > { %v4787_v30 = vpop.f32.mrb[222].mxu0 }
 0x580   : > { %5005 = vst.msk [vmem:[%s7907_s19 + $0x18] sm:$0xf] %vm4998_vm10, %v5368_v62  ;;  %v5369_v19 = vpack.c.bf16 %v4959_v26, %v4959_v26  ;;  %v4936_v5 = vadd.f32 %v7870_v39, %v4798_v36  ;;  %v6059_v18 = vpop.f32.mrb[223].mxu0 }
 0x582   : > { %5006 = vst.msk [vmem:[%s7907_s19 + $0x1c] sm:$0xf] %vm4998_vm10, %v5369_v19  ;;  %v4951_v58 = vadd.f32 %v7897_v14, %v4936_v5 }
 0x584   : > { %v4960_v44 = vmax.f32 %v4951_v58, 0.0 }
 0x586   : > { %v5370_v43 = vpack.c.bf16 %v4960_v44, %v4960_v44 }
 0x588   : > { %5008 = vst.msk [vmem:[%s7907_s19 + $0x20] sm:$0x3] %vm5007_vm11, %v5370_v43 }
 0x589 PF: > { %s17_s24 = sadd.s32 1, %s6449_s24  }
 0x58a   : > { %p14_p4 = scmp.ge.s32.totalorder %s17_s24, 4  }
 0x58c   :  { %16 = sbr.rel (!%p14_p4) target bundleno = 1 (0x1), region = 78 }

// kernel: dqn_forward.3
= control target key start
LH: loop header
LB: loop body
LE: loop exit
PB: predicated region body
PF: predicated region fallthrough
CT: control target
= control target key end

     0   :  { %vm836_vm0 = vcmask 523264   ;;  %s11335_s1 = inlined_call_operand.vmem [shape: bf16[3136,512], index: 1, kind: input, shape index: {}]   ;;  %s11336_s0 = inlined_call_operand.vmem [shape: bf16[8,4352], index: 0, kind: input, shape index: {}]   ;;  %s11337_s3 = inlined_call_operand.vmem [shape: bf16[512,128], index: 3, kind: input, shape index: {}]   ;;  %s11338_s2 = inlined_call_operand.vmem [shape: f32[1,512], index: 2, kind: input, shape index: {}]   ;;  %s11339_s4 = inlined_call_operand.vmem [shape: f32[1,128], index: 4, kind: input, shape index: {}]   ;;  %s11340_s5 = inlined_call_operand.vmem [shape: f32[8,128], index: 5, kind: output, shape index: {}]  }
   0x1   :  { %v7319_v0 = vld [vmem:[%s11335_s1 + $0x384] ss:$16 sps:$4 sm:$0xff]   ;;  %v7323_v2 = vld [vmem:[%s11335_s1 + $0x380] ss:$16 sps:$4 sm:$0xff]   ;;  %v24_v39 = vld [vmem:[%s11336_s0 + $0x18] sm:$0xff] }
   0x2   :  { %v7321_v1 = vld [vmem:[%s11335_s1 + $0x584] ss:$16 sps:$4 sm:$0xff]   ;;  %840 = vmatprep.subr.bf16.mxu0 %v7319_v0  ;;  %v7324_v3 = vld [vmem:[%s11335_s1 + $0x580] ss:$16 sps:$4 sm:$0xff]   ;;  %v6417_v40 = vcombine.low %v24_v39, %v24_v39  ;;  %v7397_v52 = vld [vmem:[%s11335_s1 + $0x38c] ss:$16 sps:$4 sm:$0xff]   ;;  %v8745_v53 = vcombine.high %v24_v39, %v24_v39 }
   0x3   :  { %881 = vmatprep.subr.bf16.mxu1 %v7321_v1  ;;  %v7325_v4 = vld [vmem:[%s11335_s1 + $0x3a4] ss:$16 sps:$4 sm:$0xff]   ;;  %841 = vmatpush1.bf16.msra.mxu0 %v7323_v2  ;;  %v7329_v6 = vld [vmem:[%s11335_s1 + $0x3a0] ss:$16 sps:$4 sm:$0xff]   ;;  %v7395_v54 = vld [vmem:[%s11335_s1 + $0x388] ss:$16 sps:$4 sm:$0xff]  }
   0x4   :  { %882 = vmatpush1.bf16.msra.mxu1 %v7324_v3  ;;  %v7327_v5 = vld [vmem:[%s11335_s1 + $0x5a4] ss:$16 sps:$4 sm:$0xff]   ;;  %842 = vmatprep.subr.bf16.mxu0 %v7325_v4  ;;  %v7330_v7 = vld [vmem:[%s11335_s1 + $0x5a0] ss:$16 sps:$4 sm:$0xff]   ;;  %v7403_v57 = vld [vmem:[%s11335_s1 + $0x3ac] ss:$16 sps:$4 sm:$0xff]  }
   0x5   :  { %883 = vmatprep.subr.bf16.mxu1 %v7327_v5  ;;  %v7331_v8 = vld [vmem:[%s11335_s1 + $0x3c4] ss:$16 sps:$4 sm:$0xff]   ;;  %v7335_v10 = vld [vmem:[%s11335_s1 + $0x3c0] ss:$16 sps:$4 sm:$0xff]   ;;  %872 = vmatprep.mubr.bf16.mxu0 %v6417_v40  ;;  %v7401_v58 = vld [vmem:[%s11335_s1 + $0x3a8] ss:$16 sps:$4 sm:$0xff]  }
   0x6   :  { %v7333_v9 = vld [vmem:[%s11335_s1 + $0x5c4] ss:$16 sps:$4 sm:$0xff]   ;;  %v7336_v11 = vld [vmem:[%s11335_s1 + $0x5c0] ss:$16 sps:$4 sm:$0xff]   ;;  %v7409_v61 = vld [vmem:[%s11335_s1 + $0x3cc] ss:$16 sps:$4 sm:$0xff]  }
   0x7   :  { %843 = vmatpush1.bf16.msra.mxu0 %v7329_v6  ;;  %v7337_v12 = vld [vmem:[%s11335_s1 + $0x3e4] ss:$16 sps:$4 sm:$0xff]   ;;  %v7341_v14 = vld [vmem:[%s11335_s1 + $0x3e0] ss:$16 sps:$4 sm:$0xff]   ;;  %v7407_v62 = vld [vmem:[%s11335_s1 + $0x3c8] ss:$16 sps:$4 sm:$0xff]  }
   0x8   :  { %884 = vmatpush1.bf16.msra.mxu1 %v7330_v7  ;;  %844 = vmatprep.subr.bf16.mxu0 %v7331_v8  ;;  %v7339_v13 = vld [vmem:[%s11335_s1 + $0x5e4] ss:$16 sps:$4 sm:$0xff]   ;;  %v7342_v15 = vld [vmem:[%s11335_s1 + $0x5e0] ss:$16 sps:$4 sm:$0xff]   ;;  %v7415_v1 = vld [vmem:[%s11335_s1 + $0x3ec] ss:$16 sps:$4 sm:$0xff]  }
   0x9   :  { %885 = vmatprep.subr.bf16.mxu1 %v7333_v9  ;;  %v7343_v16 = vld [vmem:[%s11335_s1 + $0x404] ss:$16 sps:$4 sm:$0xff]   ;;  %v7347_v18 = vld [vmem:[%s11335_s1 + $0x400] ss:$16 sps:$4 sm:$0xff]   ;;  %v7413_v2 = vld [vmem:[%s11335_s1 + $0x3e8] ss:$16 sps:$4 sm:$0xff]  }
   0xa   :  { %v7345_v17 = vld [vmem:[%s11335_s1 + $0x604] ss:$16 sps:$4 sm:$0xff]   ;;  %v7348_v19 = vld [vmem:[%s11335_s1 + $0x600] ss:$16 sps:$4 sm:$0xff]   ;;  %v7421_v4 = vld [vmem:[%s11335_s1 + $0x40c] ss:$16 sps:$4 sm:$0xff]  }
   0xb   :  { %845 = vmatpush1.bf16.msra.mxu0 %v7335_v10  ;;  %v7349_v20 = vld [vmem:[%s11335_s1 + $0x424] ss:$16 sps:$4 sm:$0xff]   ;;  %v7353_v22 = vld [vmem:[%s11335_s1 + $0x420] ss:$16 sps:$4 sm:$0xff]   ;;  %v7424_v5 = vld [vmem:[%s11335_s1 + $0x58c] ss:$16 sps:$4 sm:$0xff]  }
   0xc   :  { %886 = vmatpush1.bf16.msra.mxu1 %v7336_v11  ;;  %846 = vmatprep.subr.bf16.mxu0 %v7337_v12  ;;  %v7351_v21 = vld [vmem:[%s11335_s1 + $0x624] ss:$16 sps:$4 sm:$0xff]   ;;  %v7354_v23 = vld [vmem:[%s11335_s1 + $0x620] ss:$16 sps:$4 sm:$0xff]   ;;  %v7419_v7 = vld [vmem:[%s11335_s1 + $0x408] ss:$16 sps:$4 sm:$0xff]  }
   0xd   :  { %887 = vmatprep.subr.bf16.mxu1 %v7339_v13  ;;  %v7355_v24 = vld [vmem:[%s11335_s1 + $0x444] ss:$16 sps:$4 sm:$0xff]   ;;  %v7359_v26 = vld [vmem:[%s11335_s1 + $0x440] ss:$16 sps:$4 sm:$0xff]   ;;  %v7422_v8 = vld [vmem:[%s11335_s1 + $0x588] ss:$16 sps:$4 sm:$0xff]  }
   0xe   :  { %v7357_v25 = vld [vmem:[%s11335_s1 + $0x644] ss:$16 sps:$4 sm:$0xff]   ;;  %v7360_v27 = vld [vmem:[%s11335_s1 + $0x640] ss:$16 sps:$4 sm:$0xff]   ;;  %v7427_v9 = vld [vmem:[%s11335_s1 + $0x42c] ss:$16 sps:$4 sm:$0xff]  }
   0xf   :  { %847 = vmatpush1.bf16.msra.mxu0 %v7341_v14  ;;  %v7361_v28 = vld [vmem:[%s11335_s1 + $0x464] ss:$16 sps:$4 sm:$0xff]   ;;  %v7365_v30 = vld [vmem:[%s11335_s1 + $0x460] ss:$16 sps:$4 sm:$0xff]   ;;  %v7430_v10 = vld [vmem:[%s11335_s1 + $0x5ac] ss:$16 sps:$4 sm:$0xff]  }
  0x10   :  { %888 = vmatpush1.bf16.msra.mxu1 %v7342_v15  ;;  %848 = vmatprep.subr.bf16.mxu0 %v7343_v16  ;;  %v7363_v29 = vld [vmem:[%s11335_s1 + $0x664] ss:$16 sps:$4 sm:$0xff]   ;;  %v7366_v31 = vld [vmem:[%s11335_s1 + $0x660] ss:$16 sps:$4 sm:$0xff]   ;;  %v7425_v11 = vld [vmem:[%s11335_s1 + $0x428] ss:$16 sps:$4 sm:$0xff]  }
  0x11   :  { %889 = vmatprep.subr.bf16.mxu1 %v7345_v17  ;;  %v7367_v32 = vld [vmem:[%s11335_s1 + $0x484] ss:$16 sps:$4 sm:$0xff]   ;;  %v7371_v34 = vld [vmem:[%s11335_s1 + $0x480] ss:$16 sps:$4 sm:$0xff]   ;;  %v7428_v12 = vld [vmem:[%s11335_s1 + $0x5a8] ss:$16 sps:$4 sm:$0xff]  }
  0x12   :  { %v7369_v33 = vld [vmem:[%s11335_s1 + $0x684] ss:$16 sps:$4 sm:$0xff]   ;;  %v7372_v35 = vld [vmem:[%s11335_s1 + $0x680] ss:$16 sps:$4 sm:$0xff]   ;;  %v7433_v13 = vld [vmem:[%s11335_s1 + $0x44c] ss:$16 sps:$4 sm:$0xff]  }
  0x13   :  { %849 = vmatpush1.bf16.msra.mxu0 %v7347_v18  ;;  %v7373_v36 = vld [vmem:[%s11335_s1 + $0x4a4] ss:$16 sps:$4 sm:$0xff]   ;;  %v8699_v37 = vld [vmem:[%s11336_s0 + $0x20] ss:$0 sps:$4 sm:$0xff]   ;;  %v7436_v14 = vld [vmem:[%s11335_s1 + $0x5cc] ss:$16 sps:$4 sm:$0xff]  }
  0x14   :  { %890 = vmatpush1.bf16.msra.mxu1 %v7348_v19  ;;  %850 = vmatprep.subr.bf16.mxu0 %v7349_v20  ;;  %v7375_v38 = vld [vmem:[%s11335_s1 + $0x6a4] ss:$16 sps:$4 sm:$0xff]   ;;  %v7377_v41 = vld [vmem:[%s11335_s1 + $0x4a0] ss:$16 sps:$4 sm:$0xff]   ;;  %v7431_v15 = vld [vmem:[%s11335_s1 + $0x448] ss:$16 sps:$4 sm:$0xff]  }
  0x15   :  { %891 = vmatprep.subr.bf16.mxu1 %v7351_v21  ;;  %6532 = vmatprep.mubr.msk.bf16.mxu1 %vm836_vm0, %v8699_v37  ;;  %v7378_v42 = vld [vmem:[%s11335_s1 + $0x6a0] ss:$16 sps:$4 sm:$0xff]   ;;  %v7379_v43 = vld [vmem:[%s11335_s1 + $0x4c4] ss:$16 sps:$4 sm:$0xff]   ;;  %v7434_v16 = vld [vmem:[%s11335_s1 + $0x5c8] ss:$16 sps:$4 sm:$0xff]  }
  0x16   :  { %v7381_v44 = vld [vmem:[%s11335_s1 + $0x6c4] ss:$16 sps:$4 sm:$0xff]   ;;  %v7383_v45 = vld [vmem:[%s11335_s1 + $0x4c0] ss:$16 sps:$4 sm:$0xff]   ;;  %v7439_v17 = vld [vmem:[%s11335_s1 + $0x46c] ss:$16 sps:$4 sm:$0xff]  }
  0x17   :  { %851 = vmatpush1.bf16.msra.mxu0 %v7353_v22  ;;  %v7384_v46 = vld [vmem:[%s11335_s1 + $0x6c0] ss:$16 sps:$4 sm:$0xff]   ;;  %v7385_v47 = vld [vmem:[%s11335_s1 + $0x4e4] ss:$16 sps:$4 sm:$0xff]   ;;  %v7442_v18 = vld [vmem:[%s11335_s1 + $0x5ec] ss:$16 sps:$4 sm:$0xff]  }
  0x18   :  { %892 = vmatpush1.bf16.msra.mxu1 %v7354_v23  ;;  %852 = vmatprep.subr.bf16.mxu0 %v7355_v24  ;;  %v7387_v48 = vld [vmem:[%s11335_s1 + $0x6e4] ss:$16 sps:$4 sm:$0xff]   ;;  %v7389_v49 = vld [vmem:[%s11335_s1 + $0x4e0] ss:$16 sps:$4 sm:$0xff]   ;;  %v7437_v19 = vld [vmem:[%s11335_s1 + $0x468] ss:$16 sps:$4 sm:$0xff]  }
  0x19   :  { %893 = vmatprep.subr.bf16.mxu1 %v7357_v25  ;;  %v7390_v50 = vld [vmem:[%s11335_s1 + $0x6e0] ss:$16 sps:$4 sm:$0xff]   ;;  %v7392_v51 = vld [vmem:[%s11335_s1 + $0x504] ss:$16 sps:$4 sm:$0xff]   ;;  %v7440_v20 = vld [vmem:[%s11335_s1 + $0x5e8] ss:$16 sps:$4 sm:$0xff]  }
  0x1a   :  { %v7398_v55 = vld [vmem:[%s11335_s1 + $0x500] ss:$16 sps:$4 sm:$0xff]   ;;  %v7399_v56 = vld [vmem:[%s11335_s1 + $0x524] ss:$16 sps:$4 sm:$0xff]   ;;  %v7445_v21 = vld [vmem:[%s11335_s1 + $0x48c] ss:$16 sps:$4 sm:$0xff]  }
  0x1b   :  { %853 = vmatpush1.bf16.msra.mxu0 %v7359_v26  ;;  %v7404_v59 = vld [vmem:[%s11335_s1 + $0x520] ss:$16 sps:$4 sm:$0xff]   ;;  %v7405_v60 = vld [vmem:[%s11335_s1 + $0x544] ss:$16 sps:$4 sm:$0xff]   ;;  %v7448_v22 = vld [vmem:[%s11335_s1 + $0x60c] ss:$16 sps:$4 sm:$0xff]  }
  0x1c   :  { %894 = vmatpush1.bf16.msra.mxu1 %v7360_v27  ;;  %854 = vmatprep.subr.bf16.mxu0 %v7361_v28  ;;  %v7410_v63 = vld [vmem:[%s11335_s1 + $0x540] ss:$16 sps:$4 sm:$0xff]   ;;  %v7411_v0 = vld [vmem:[%s11335_s1 + $0x564] ss:$16 sps:$4 sm:$0xff]   ;;  %v7443_v23 = vld [vmem:[%s11335_s1 + $0x488] ss:$16 sps:$4 sm:$0xff]  }
  0x1d   :  { %895 = vmatprep.subr.bf16.mxu1 %v7363_v29  ;;  %v7416_v3 = vld [vmem:[%s11335_s1 + $0x560] ss:$16 sps:$4 sm:$0xff]   ;;  %v8799_v6 = vld [vmem:[%s11336_s0 + $0x14] ss:$0 sps:$4 sm:$0xff]   ;;  %v7446_v24 = vld [vmem:[%s11335_s1 + $0x608] ss:$16 sps:$4 sm:$0xff]  }
  0x1e   :  { %v7451_v25 = vld [vmem:[%s11335_s1 + $0x4ac] ss:$16 sps:$4 sm:$0xff]   ;;  %v7449_v27 = vld [vmem:[%s11335_s1 + $0x4a8] ss:$16 sps:$4 sm:$0xff]  }
  0x1f   :  { %855 = vmatpush1.bf16.msra.mxu0 %v7365_v30  ;;  %v7454_v26 = vld [vmem:[%s11335_s1 + $0x62c] ss:$16 sps:$4 sm:$0xff]   ;;  %v7452_v28 = vld [vmem:[%s11335_s1 + $0x628] ss:$16 sps:$4 sm:$0xff]  }
  0x20   :  { %896 = vmatpush1.bf16.msra.mxu1 %v7366_v31  ;;  %856 = vmatprep.subr.bf16.mxu0 %v7367_v32  ;;  %v7457_v29 = vld [vmem:[%s11335_s1 + $0x4cc] ss:$16 sps:$4 sm:$0xff]   ;;  %v7455_v31 = vld [vmem:[%s11335_s1 + $0x4c8] ss:$16 sps:$4 sm:$0xff]  }
  0x21   :  { %897 = vmatprep.subr.bf16.mxu1 %v7369_v33  ;;  %v7460_v30 = vld [vmem:[%s11335_s1 + $0x64c] ss:$16 sps:$4 sm:$0xff]   ;;  %v7458_v32 = vld [vmem:[%s11335_s1 + $0x648] ss:$16 sps:$4 sm:$0xff]  }
  0x22   :  { %v7463_v33 = vld [vmem:[%s11335_s1 + $0x4ec] ss:$16 sps:$4 sm:$0xff]   ;;  %v7467_v39 = vld [vmem:[%s11335_s1 + $0x508] ss:$16 sps:$4 sm:$0xff]  }
  0x23   :  { %857 = vmatpush1.bf16.msra.mxu0 %v7371_v34  ;;  %v7466_v34 = vld [vmem:[%s11335_s1 + $0x66c] ss:$16 sps:$4 sm:$0xff]  }
  0x24   :  { %898 = vmatpush1.bf16.msra.mxu1 %v7372_v35  ;;  %858 = vmatprep.subr.bf16.mxu0 %v7373_v36  ;;  %v7461_v35 = vld [vmem:[%s11335_s1 + $0x4e8] ss:$16 sps:$4 sm:$0xff]  }
  0x25   :  { %899 = vmatprep.subr.bf16.mxu1 %v7375_v38  ;;  %v7464_v36 = vld [vmem:[%s11335_s1 + $0x668] ss:$16 sps:$4 sm:$0xff]   ;;  %v7472_v38 = vld [vmem:[%s11335_s1 + $0x68c] ss:$16 sps:$4 sm:$0xff]  }
  0x27   :  { %859 = vmatpush1.bf16.msra.mxu0 %v7377_v41  ;;  %v7475_v41 = vld [vmem:[%s11335_s1 + $0x52c] ss:$16 sps:$4 sm:$0xff]  }
  0x28   :  { %900 = vmatpush1.bf16.msra.mxu1 %v7378_v42  ;;  %860 = vmatprep.subr.bf16.mxu0 %v7379_v43  ;;  %v7478_v42 = vld [vmem:[%s11335_s1 + $0x6ac] ss:$16 sps:$4 sm:$0xff]   ;;  %v7473_v43 = vld [vmem:[%s11335_s1 + $0x528] ss:$16 sps:$4 sm:$0xff]  }
  0x29   :  { %901 = vmatprep.subr.bf16.mxu1 %v7381_v44  ;;  %v7476_v44 = vld [vmem:[%s11335_s1 + $0x6a8] ss:$16 sps:$4 sm:$0xff]  }
  0x2b   :  { %861 = vmatpush1.bf16.msra.mxu0 %v7383_v45  ;;  %v7481_v45 = vld [vmem:[%s11335_s1 + $0x54c] ss:$16 sps:$4 sm:$0xff]  }
  0x2c   :  { %902 = vmatpush1.bf16.msra.mxu1 %v7384_v46  ;;  %862 = vmatprep.subr.bf16.mxu0 %v7385_v47  ;;  %v7484_v46 = vld [vmem:[%s11335_s1 + $0x6cc] ss:$16 sps:$4 sm:$0xff]   ;;  %v7479_v47 = vld [vmem:[%s11335_s1 + $0x548] ss:$16 sps:$4 sm:$0xff]  }
  0x2d   :  { %903 = vmatprep.subr.bf16.mxu1 %v7387_v48  ;;  %v7482_v48 = vld [vmem:[%s11335_s1 + $0x6c8] ss:$16 sps:$4 sm:$0xff]  }
  0x2f   :  { %863 = vmatpush1.bf16.msra.mxu0 %v7389_v49  ;;  %v7487_v49 = vld [vmem:[%s11335_s1 + $0x56c] ss:$16 sps:$4 sm:$0xff]  }
  0x30   :  { %904 = vmatpush1.bf16.msra.mxu1 %v7390_v50  ;;  %864 = vmatprep.subr.bf16.mxu0 %v7392_v51  ;;  %v7490_v50 = vld [vmem:[%s11335_s1 + $0x6ec] ss:$16 sps:$4 sm:$0xff]   ;;  %v7485_v51 = vld [vmem:[%s11335_s1 + $0x568] ss:$16 sps:$4 sm:$0xff]  }
  0x31   :  { %922 = vmatprep.subr.bf16.mxu1 %v7397_v52  ;;  %v7488_v52 = vld [vmem:[%s11335_s1 + $0x6e8] ss:$16 sps:$4 sm:$0xff]  }
  0x33   :  { %914 = vmatmul.mubr.bf16.vlgmr.msra.gmra.mrb[0].mxu1 %v8745_v53  ;;  %865 = vmatpush1.bf16.msra.mxu0 %v7398_v55  ;;  %v7496_v55 = vld [vmem:[%s11335_s1 + $0x204] ss:$16 sps:$4 sm:$0xff]  }
  0x34   :  { %923 = vmatpush1.bf16.msra.mxu1 %v7395_v54  ;;  %866 = vmatprep.subr.bf16.mxu0 %v7399_v56  ;;  %v7493_v54 = vld [vmem:[%s11335_s1 + $0x4] ss:$16 sps:$4 sm:$0xff]   ;;  %v8951_v56 = vld [vmem:[%s11336_s0 + $0x8] sm:$0xff] }
  0x35   :  { %924 = vmatprep.subr.bf16.mxu1 %v7403_v57  ;;  %954 = vmatprep.mubr.bf16.mxu1 %v6417_v40  ;;  %v7470_v40 = vld [vmem:[%s11335_s1 + $0x688] ss:$16 sps:$4 sm:$0xff]   ;;  %v7491_v57 = vld [vmem:[%s11335_s1] ss:$16 sps:$4 sm:$0xff]  }
  0x37   :  { %867 = vmatpush1.bf16.msra.mxu0 %v7404_v59  ;;  %v7499_v59 = vld [vmem:[%s11335_s1 + $0x24] ss:$16 sps:$4 sm:$0xff]  }
  0x38   :  { %925 = vmatpush1.bf16.msra.mxu1 %v7401_v58  ;;  %868 = vmatprep.subr.bf16.mxu0 %v7405_v60  ;;  %v7494_v58 = vld [vmem:[%s11335_s1 + $0x200] ss:$16 sps:$4 sm:$0xff]   ;;  %v7502_v60 = vld [vmem:[%s11335_s1 + $0x224] ss:$16 sps:$4 sm:$0xff]  }
  0x39   :  { %926 = vmatprep.subr.bf16.mxu1 %v7409_v61  ;;  %v8967_v61 = vcombine.high %v8951_v56, %v8951_v56 }
  0x3b   :  { %869 = vmatpush1.bf16.msra.mxu0 %v7410_v63  ;;  %v7500_v63 = vld [vmem:[%s11335_s1 + $0x220] ss:$16 sps:$4 sm:$0xff]  }
  0x3c   :  { %927 = vmatpush1.bf16.msra.mxu1 %v7407_v62  ;;  %870 = vmatprep.subr.bf16.mxu0 %v7411_v0  ;;  %v7497_v62 = vld [vmem:[%s11335_s1 + $0x20] ss:$16 sps:$4 sm:$0xff]   ;;  %v7505_v0 = vld [vmem:[%s11335_s1 + $0x44] ss:$16 sps:$4 sm:$0xff]  }
  0x3d   :  { %928 = vmatprep.subr.bf16.mxu1 %v7415_v1  ;;  %v7503_v1 = vld [vmem:[%s11335_s1 + $0x40] ss:$16 sps:$4 sm:$0xff]  }
  0x3f   :  { %871 = vmatpush1.bf16.msra.mxu0 %v7416_v3  ;;  %v7506_v3 = vld [vmem:[%s11335_s1 + $0x240] ss:$16 sps:$4 sm:$0xff]  }
  0x40   :  { %929 = vmatpush1.bf16.msra.mxu1 %v7413_v2  ;;  %963 = vmatprep.subr.bf16.mxu0 %v7424_v5  ;;  %v8991_v2 = vld [vmem:[%s11336_s0] sm:$0xff] }
  0x41   :  { %930 = vmatprep.subr.bf16.mxu1 %v7421_v4  ;;  %v7511_v4 = vld [vmem:[%s11335_s1 + $0x64] ss:$16 sps:$4 sm:$0xff]   ;;  %v9001_v5 = vcombine.high %v8991_v2, %v8991_v2 }
  0x42   :  { %873 = vmatmul.mubr.bf16.vlgmr.msra.gmra.mrb[0].mxu0 %v8799_v6 }
  0x43   :  { %964 = vmatpush1.bf16.msra.mxu0 %v7422_v8  ;;  %6533 = vmatprep.mubr.msk.bf16.mxu0 %vm836_vm0, %v8699_v37  ;;  %v7469_v37 = vld [vmem:[%s11335_s1 + $0x50c] ss:$16 sps:$4 sm:$0xff]   ;;  %v7512_v8 = vld [vmem:[%s11335_s1 + $0x260] ss:$16 sps:$4 sm:$0xff]  }
  0x44   :  { %931 = vmatpush1.bf16.msra.mxu1 %v7419_v7  ;;  %965 = vmatprep.subr.bf16.mxu0 %v7430_v10  ;;  %v7509_v7 = vld [vmem:[%s11335_s1 + $0x60] ss:$16 sps:$4 sm:$0xff]   ;;  %v7520_v10 = vld [vmem:[%s11335_s1 + $0x284] ss:$16 sps:$4 sm:$0xff]  }
  0x45   :  { %932 = vmatprep.subr.bf16.mxu1 %v7427_v9  ;;  %v7517_v9 = vld [vmem:[%s11335_s1 + $0x84] ss:$16 sps:$4 sm:$0xff]  }
  0x47   :  { %966 = vmatpush1.bf16.msra.mxu0 %v7428_v12  ;;  %v7518_v12 = vld [vmem:[%s11335_s1 + $0x280] ss:$16 sps:$4 sm:$0xff]  }
  0x48   :  { %933 = vmatpush1.bf16.msra.mxu1 %v7425_v11  ;;  %967 = vmatprep.subr.bf16.mxu0 %v7436_v14  ;;  %v7515_v11 = vld [vmem:[%s11335_s1 + $0x80] ss:$16 sps:$4 sm:$0xff]   ;;  %v7526_v14 = vld [vmem:[%s11335_s1 + $0x2a4] ss:$16 sps:$4 sm:$0xff]  }
  0x49   :  { %934 = vmatprep.subr.bf16.mxu1 %v7433_v13  ;;  %v7523_v13 = vld [vmem:[%s11335_s1 + $0xa4] ss:$16 sps:$4 sm:$0xff]  }
  0x4b   :  { %968 = vmatpush1.bf16.msra.mxu0 %v7434_v16  ;;  %v7524_v16 = vld [vmem:[%s11335_s1 + $0x2a0] ss:$16 sps:$4 sm:$0xff]  }
  0x4c   :  { %935 = vmatpush1.bf16.msra.mxu1 %v7431_v15  ;;  %969 = vmatprep.subr.bf16.mxu0 %v7442_v18  ;;  %v7521_v15 = vld [vmem:[%s11335_s1 + $0xa0] ss:$16 sps:$4 sm:$0xff]   ;;  %v7532_v18 = vld [vmem:[%s11335_s1 + $0x2c4] ss:$16 sps:$4 sm:$0xff]  }
  0x4d   :  { %936 = vmatprep.subr.bf16.mxu1 %v7439_v17  ;;  %v7529_v17 = vld [vmem:[%s11335_s1 + $0xc4] ss:$16 sps:$4 sm:$0xff]  }
  0x4f   :  { %970 = vmatpush1.bf16.msra.mxu0 %v7440_v20  ;;  %v7530_v20 = vld [vmem:[%s11335_s1 + $0x2c0] ss:$16 sps:$4 sm:$0xff]  }
  0x50   :  { %937 = vmatpush1.bf16.msra.mxu1 %v7437_v19  ;;  %971 = vmatprep.subr.bf16.mxu0 %v7448_v22  ;;  %v7527_v19 = vld [vmem:[%s11335_s1 + $0xc0] ss:$16 sps:$4 sm:$0xff]   ;;  %v7538_v22 = vld [vmem:[%s11335_s1 + $0x2e4] ss:$16 sps:$4 sm:$0xff]  }
  0x51   :  { %938 = vmatprep.subr.bf16.mxu1 %v7445_v21  ;;  %v7535_v21 = vld [vmem:[%s11335_s1 + $0xe4] ss:$16 sps:$4 sm:$0xff]  }
  0x53   :  { %972 = vmatpush1.bf16.msra.mxu0 %v7446_v24  ;;  %v7536_v24 = vld [vmem:[%s11335_s1 + $0x2e0] ss:$16 sps:$4 sm:$0xff]  }
  0x54   :  { %939 = vmatpush1.bf16.msra.mxu1 %v7443_v23  ;;  %973 = vmatprep.subr.bf16.mxu0 %v7454_v26  ;;  %v7533_v23 = vld [vmem:[%s11335_s1 + $0xe0] ss:$16 sps:$4 sm:$0xff]   ;;  %v7544_v26 = vld [vmem:[%s11335_s1 + $0x304] ss:$16 sps:$4 sm:$0xff]  }
  0x55   :  { %940 = vmatprep.subr.bf16.mxu1 %v7451_v25  ;;  %v7541_v25 = vld [vmem:[%s11335_s1 + $0x104] ss:$16 sps:$4 sm:$0xff]  }
  0x57   :  { %974 = vmatpush1.bf16.msra.mxu0 %v7452_v28  ;;  %v7542_v28 = vld [vmem:[%s11335_s1 + $0x300] ss:$16 sps:$4 sm:$0xff]  }
  0x58   :  { %941 = vmatpush1.bf16.msra.mxu1 %v7449_v27  ;;  %975 = vmatprep.subr.bf16.mxu0 %v7460_v30  ;;  %v7539_v27 = vld [vmem:[%s11335_s1 + $0x100] ss:$16 sps:$4 sm:$0xff]   ;;  %v7550_v30 = vld [vmem:[%s11335_s1 + $0x324] ss:$16 sps:$4 sm:$0xff]  }
  0x59   :  { %942 = vmatprep.subr.bf16.mxu1 %v7457_v29  ;;  %v7547_v29 = vld [vmem:[%s11335_s1 + $0x124] ss:$16 sps:$4 sm:$0xff]  }
  0x5b   :  { %976 = vmatpush1.bf16.msra.mxu0 %v7458_v32  ;;  %v7548_v32 = vld [vmem:[%s11335_s1 + $0x320] ss:$16 sps:$4 sm:$0xff]  }
  0x5c   :  { %943 = vmatpush1.bf16.msra.mxu1 %v7455_v31  ;;  %977 = vmatprep.subr.bf16.mxu0 %v7466_v34  ;;  %v7545_v31 = vld [vmem:[%s11335_s1 + $0x120] ss:$16 sps:$4 sm:$0xff]   ;;  %v7556_v34 = vld [vmem:[%s11335_s1 + $0x344] ss:$16 sps:$4 sm:$0xff]  }
  0x5d   :  { %944 = vmatprep.subr.bf16.mxu1 %v7463_v33  ;;  %v7553_v33 = vld [vmem:[%s11335_s1 + $0x144] ss:$16 sps:$4 sm:$0xff]  }
  0x5f   :  { %978 = vmatpush1.bf16.msra.mxu0 %v7464_v36  ;;  %v7554_v36 = vld [vmem:[%s11335_s1 + $0x340] ss:$16 sps:$4 sm:$0xff]  }
  0x60   :  { %945 = vmatpush1.bf16.msra.mxu1 %v7461_v35  ;;  %979 = vmatprep.subr.bf16.mxu0 %v7472_v38  ;;  %v7551_v35 = vld [vmem:[%s11335_s1 + $0x140] ss:$16 sps:$4 sm:$0xff]   ;;  %v7562_v38 = vld [vmem:[%s11335_s1 + $0x364] ss:$16 sps:$4 sm:$0xff]  }
  0x61   :  { %946 = vmatprep.subr.bf16.mxu1 %v7469_v37  ;;  %v7559_v37 = vld [vmem:[%s11335_s1 + $0x164] ss:$16 sps:$4 sm:$0xff]  }
  0x63   :  { %980 = vmatpush1.bf16.msra.mxu0 %v7470_v40  ;;  %v7560_v40 = vld [vmem:[%s11335_s1 + $0x360] ss:$16 sps:$4 sm:$0xff]  }
  0x64   :  { %947 = vmatpush1.bf16.msra.mxu1 %v7467_v39  ;;  %981 = vmatprep.subr.bf16.mxu0 %v7478_v42  ;;  %v7557_v39 = vld [vmem:[%s11335_s1 + $0x160] ss:$16 sps:$4 sm:$0xff]   ;;  %v7570_v42 = vld [vmem:[%s11335_s1 + $0xc] ss:$16 sps:$4 sm:$0xff]  }
  0x65   :  { %948 = vmatprep.subr.bf16.mxu1 %v7475_v41  ;;  %v7566_v41 = vld [vmem:[%s11335_s1 + $0x184] ss:$16 sps:$4 sm:$0xff]  }
  0x67   :  { %982 = vmatpush1.bf16.msra.mxu0 %v7476_v44  ;;  %v9120_v44 = vcombine.low %v8951_v56, %v8951_v56  ;;  %v7588_v56 = vld [vmem:[%s11335_s1 + $0x6c] ss:$16 sps:$4 sm:$0xff]  }
  0x68   :  { %949 = vmatpush1.bf16.msra.mxu1 %v7473_v43  ;;  %983 = vmatprep.subr.bf16.mxu0 %v7484_v46  ;;  %v7564_v43 = vld [vmem:[%s11335_s1 + $0x180] ss:$16 sps:$4 sm:$0xff]   ;;  %v7573_v46 = vld [vmem:[%s11335_s1 + $0x1a4] ss:$16 sps:$4 sm:$0xff]  }
  0x69   :  { %950 = vmatprep.subr.bf16.mxu1 %v7481_v45  ;;  %v7568_v45 = vld [vmem:[%s11335_s1 + $0x8] ss:$16 sps:$4 sm:$0xff]  }
  0x6b   :  { %984 = vmatpush1.bf16.msra.mxu0 %v7482_v48  ;;  %v7571_v48 = vld [vmem:[%s11335_s1 + $0x1a0] ss:$16 sps:$4 sm:$0xff]  }
  0x6c   :  { %951 = vmatpush1.bf16.msra.mxu1 %v7479_v47  ;;  %985 = vmatprep.subr.bf16.mxu0 %v7490_v50  ;;  %v7576_v47 = vld [vmem:[%s11335_s1 + $0x2c] ss:$16 sps:$4 sm:$0xff]   ;;  %v7579_v50 = vld [vmem:[%s11335_s1 + $0x1c4] ss:$16 sps:$4 sm:$0xff]  }
  0x6d   :  { %952 = vmatprep.subr.bf16.mxu1 %v7487_v49  ;;  %v7574_v49 = vld [vmem:[%s11335_s1 + $0x28] ss:$16 sps:$4 sm:$0xff]  }
  0x6f   :  { %986 = vmatpush1.bf16.msra.mxu0 %v7488_v52  ;;  %v7577_v52 = vld [vmem:[%s11335_s1 + $0x1c0] ss:$16 sps:$4 sm:$0xff]  }
  0x70   :  { %953 = vmatpush1.bf16.msra.mxu1 %v7485_v51  ;;  %1580 = vmatprep.subr.bf16.mxu0 %v7493_v54  ;;  %v7582_v51 = vld [vmem:[%s11335_s1 + $0x4c] ss:$16 sps:$4 sm:$0xff]   ;;  %v7580_v54 = vld [vmem:[%s11335_s1 + $0x48] ss:$16 sps:$4 sm:$0xff]  }
  0x71   :  { %1621 = vmatprep.subr.bf16.mxu1 %v7496_v55  ;;  %v7585_v55 = vld [vmem:[%s11335_s1 + $0x1e4] ss:$16 sps:$4 sm:$0xff]  }
  0x72   :  { %996 = vmatmul.mubr.bf16.vlgmr.msra.gmra.mrb[4].mxu0 %v8745_v53  ;;  %v7508_v53 = vld [vmem:[%s11335_s1 + $0x244] ss:$16 sps:$4 sm:$0xff]  }
  0x73   :  { %955 = vmatmul.mubr.bf16.vlgmr.msra.gmra.mrb[4].mxu1 %v8799_v6  ;;  %1581 = vmatpush1.bf16.msra.mxu0 %v7491_v57  ;;  %v7514_v6 = vld [vmem:[%s11335_s1 + $0x264] ss:$16 sps:$4 sm:$0xff]   ;;  %v7583_v57 = vld [vmem:[%s11335_s1 + $0x1e0] ss:$16 sps:$4 sm:$0xff]  }
  0x74   :  { %1622 = vmatpush1.bf16.msra.mxu1 %v7494_v58  ;;  %1582 = vmatprep.subr.bf16.mxu0 %v7499_v59  ;;  %v7586_v58 = vld [vmem:[%s11335_s1 + $0x68] ss:$16 sps:$4 sm:$0xff]   ;;  %v7593_v59 = vld [vmem:[%s11335_s1 + $0x8c] ss:$16 sps:$4 sm:$0xff]  }
  0x75   :  { %1623 = vmatprep.subr.bf16.mxu1 %v7502_v60  ;;  %6650 = vmatprep.mubr.msk.bf16.mxu1 %vm836_vm0, %v8967_v61  ;;  %v7596_v60 = vld [vmem:[%s11335_s1 + $0x20c] ss:$16 sps:$4 sm:$0xff]  }
  0x76   :  { %1612 = vmatprep.mubr.bf16.mxu0 %v9001_v5 }
  0x77   :  { %1583 = vmatpush1.bf16.msra.mxu0 %v7497_v62  ;;  %v9171_v62 = vcombine.low %v8991_v2, %v8991_v2  ;;  %v7597_v2 = vld [vmem:[%s11335_s1 + $0xa8] ss:$16 sps:$4 sm:$0xff]  }
  0x78   :  { %1624 = vmatpush1.bf16.msra.mxu1 %v7500_v63  ;;  %1584 = vmatprep.subr.bf16.mxu0 %v7505_v0  ;;  %v7591_v63 = vld [vmem:[%s11335_s1 + $0x88] ss:$16 sps:$4 sm:$0xff]  }
  0x79   :  { %1625 = vmatprep.subr.bf16.mxu1 %v7508_v53  ;;  %v7594_v0 = vld [vmem:[%s11335_s1 + $0x208] ss:$16 sps:$4 sm:$0xff]   ;;  %v7599_v53 = vld [vmem:[%s11335_s1 + $0xac] ss:$16 sps:$4 sm:$0xff]  }
  0x7b   :  { %1585 = vmatpush1.bf16.msra.mxu0 %v7503_v1  ;;  %v7602_v1 = vld [vmem:[%s11335_s1 + $0x22c] ss:$16 sps:$4 sm:$0xff]  }
  0x7c   :  { %1626 = vmatpush1.bf16.msra.mxu1 %v7506_v3  ;;  %1586 = vmatprep.subr.bf16.mxu0 %v7511_v4  ;;  %v7600_v3 = vld [vmem:[%s11335_s1 + $0x228] ss:$16 sps:$4 sm:$0xff]   ;;  %v7605_v4 = vld [vmem:[%s11335_s1 + $0xcc] ss:$16 sps:$4 sm:$0xff]  }
  0x7d   :  { %1627 = vmatprep.subr.bf16.mxu1 %v7514_v6  ;;  %v7603_v6 = vld [vmem:[%s11335_s1 + $0xc8] ss:$16 sps:$4 sm:$0xff]  }
  0x7f   :  { %1587 = vmatpush1.bf16.msra.mxu0 %v7509_v7  ;;  %v7606_v7 = vld [vmem:[%s11335_s1 + $0x248] ss:$16 sps:$4 sm:$0xff]  }
  0x80   :  { %1628 = vmatpush1.bf16.msra.mxu1 %v7512_v8  ;;  %1588 = vmatprep.subr.bf16.mxu0 %v7517_v9  ;;  %v7611_v8 = vld [vmem:[%s11335_s1 + $0xec] ss:$16 sps:$4 sm:$0xff]   ;;  %v7609_v9 = vld [vmem:[%s11335_s1 + $0xe8] ss:$16 sps:$4 sm:$0xff]  }
  0x81   :  { %1629 = vmatprep.subr.bf16.mxu1 %v7520_v10  ;;  %v7612_v10 = vld [vmem:[%s11335_s1 + $0x268] ss:$16 sps:$4 sm:$0xff]  }
  0x83   :  { %1589 = vmatpush1.bf16.msra.mxu0 %v7515_v11  ;;  %v7617_v11 = vld [vmem:[%s11335_s1 + $0x10c] ss:$16 sps:$4 sm:$0xff]  }
  0x84   :  { %1630 = vmatpush1.bf16.msra.mxu1 %v7518_v12  ;;  %1590 = vmatprep.subr.bf16.mxu0 %v7523_v13  ;;  %v7620_v12 = vld [vmem:[%s11335_s1 + $0x28c] ss:$16 sps:$4 sm:$0xff]   ;;  %v7615_v13 = vld [vmem:[%s11335_s1 + $0x108] ss:$16 sps:$4 sm:$0xff]  }
  0x85   :  { %1631 = vmatprep.subr.bf16.mxu1 %v7526_v14  ;;  %v7618_v14 = vld [vmem:[%s11335_s1 + $0x288] ss:$16 sps:$4 sm:$0xff]  }
  0x87   :  { %1591 = vmatpush1.bf16.msra.mxu0 %v7521_v15  ;;  %v7623_v15 = vld [vmem:[%s11335_s1 + $0x12c] ss:$16 sps:$4 sm:$0xff]  }
  0x88   :  { %1632 = vmatpush1.bf16.msra.mxu1 %v7524_v16  ;;  %1592 = vmatprep.subr.bf16.mxu0 %v7529_v17  ;;  %v7626_v16 = vld [vmem:[%s11335_s1 + $0x2ac] ss:$16 sps:$4 sm:$0xff]   ;;  %v7621_v17 = vld [vmem:[%s11335_s1 + $0x128] ss:$16 sps:$4 sm:$0xff]  }
  0x89   :  { %1633 = vmatprep.subr.bf16.mxu1 %v7532_v18  ;;  %v7624_v18 = vld [vmem:[%s11335_s1 + $0x2a8] ss:$16 sps:$4 sm:$0xff]  }
  0x8b   :  { %1593 = vmatpush1.bf16.msra.mxu0 %v7527_v19  ;;  %v7629_v19 = vld [vmem:[%s11335_s1 + $0x14c] ss:$16 sps:$4 sm:$0xff]  }
  0x8c   :  { %1634 = vmatpush1.bf16.msra.mxu1 %v7530_v20  ;;  %1594 = vmatprep.subr.bf16.mxu0 %v7535_v21  ;;  %v7632_v20 = vld [vmem:[%s11335_s1 + $0x2cc] ss:$16 sps:$4 sm:$0xff]   ;;  %v7627_v21 = vld [vmem:[%s11335_s1 + $0x148] ss:$16 sps:$4 sm:$0xff]  }
  0x8d   :  { %1635 = vmatprep.subr.bf16.mxu1 %v7538_v22  ;;  %v7630_v22 = vld [vmem:[%s11335_s1 + $0x2c8] ss:$16 sps:$4 sm:$0xff]  }
  0x8f   :  { %1595 = vmatpush1.bf16.msra.mxu0 %v7533_v23  ;;  %v7635_v23 = vld [vmem:[%s11335_s1 + $0x16c] ss:$16 sps:$4 sm:$0xff]  }
  0x90   :  { %1636 = vmatpush1.bf16.msra.mxu1 %v7536_v24  ;;  %1596 = vmatprep.subr.bf16.mxu0 %v7541_v25  ;;  %v7638_v24 = vld [vmem:[%s11335_s1 + $0x2ec] ss:$16 sps:$4 sm:$0xff]   ;;  %v7633_v25 = vld [vmem:[%s11335_s1 + $0x168] ss:$16 sps:$4 sm:$0xff]  }
  0x91   :  { %1637 = vmatprep.subr.bf16.mxu1 %v7544_v26  ;;  %v7636_v26 = vld [vmem:[%s11335_s1 + $0x2e8] ss:$16 sps:$4 sm:$0xff]  }
  0x93   :  { %1597 = vmatpush1.bf16.msra.mxu0 %v7539_v27  ;;  %v7641_v27 = vld [vmem:[%s11335_s1 + $0x18c] ss:$16 sps:$4 sm:$0xff]  }
  0x94   :  { %1638 = vmatpush1.bf16.msra.mxu1 %v7542_v28  ;;  %1598 = vmatprep.subr.bf16.mxu0 %v7547_v29  ;;  %v7644_v28 = vld [vmem:[%s11335_s1 + $0x30c] ss:$16 sps:$4 sm:$0xff]   ;;  %v7639_v29 = vld [vmem:[%s11335_s1 + $0x188] ss:$16 sps:$4 sm:$0xff]  }
  0x95   :  { %1639 = vmatprep.subr.bf16.mxu1 %v7550_v30  ;;  %v7642_v30 = vld [vmem:[%s11335_s1 + $0x308] ss:$16 sps:$4 sm:$0xff]  }
  0x97   :  { %1599 = vmatpush1.bf16.msra.mxu0 %v7545_v31  ;;  %v7647_v31 = vld [vmem:[%s11335_s1 + $0x1ac] ss:$16 sps:$4 sm:$0xff]  }
  0x98   :  { %1640 = vmatpush1.bf16.msra.mxu1 %v7548_v32  ;;  %1600 = vmatprep.subr.bf16.mxu0 %v7553_v33  ;;  %v7650_v32 = vld [vmem:[%s11335_s1 + $0x32c] ss:$16 sps:$4 sm:$0xff]   ;;  %v7645_v33 = vld [vmem:[%s11335_s1 + $0x1a8] ss:$16 sps:$4 sm:$0xff]  }
  0x99   :  { %1641 = vmatprep.subr.bf16.mxu1 %v7556_v34  ;;  %v7648_v34 = vld [vmem:[%s11335_s1 + $0x328] ss:$16 sps:$4 sm:$0xff]  }
  0x9b   :  { %1601 = vmatpush1.bf16.msra.mxu0 %v7551_v35  ;;  %v7653_v35 = vld [vmem:[%s11335_s1 + $0x1cc] ss:$16 sps:$4 sm:$0xff]  }
  0x9c   :  { %1642 = vmatpush1.bf16.msra.mxu1 %v7554_v36  ;;  %1602 = vmatprep.subr.bf16.mxu0 %v7559_v37  ;;  %v7656_v36 = vld [vmem:[%s11335_s1 + $0x34c] ss:$16 sps:$4 sm:$0xff]   ;;  %v7651_v37 = vld [vmem:[%s11335_s1 + $0x1c8] ss:$16 sps:$4 sm:$0xff]  }
  0x9d   :  { %1643 = vmatprep.subr.bf16.mxu1 %v7562_v38  ;;  %v7654_v38 = vld [vmem:[%s11335_s1 + $0x348] ss:$16 sps:$4 sm:$0xff]  }
  0x9f   :  { %1603 = vmatpush1.bf16.msra.mxu0 %v7557_v39  ;;  %v7659_v39 = vld [vmem:[%s11335_s1 + $0x1ec] ss:$16 sps:$4 sm:$0xff]  }
  0xa0   :  { %1644 = vmatpush1.bf16.msra.mxu1 %v7560_v40  ;;  %1604 = vmatprep.subr.bf16.mxu0 %v7566_v41  ;;  %v7662_v40 = vld [vmem:[%s11335_s1 + $0x36c] ss:$16 sps:$4 sm:$0xff]   ;;  %v7657_v41 = vld [vmem:[%s11335_s1 + $0x1e8] ss:$16 sps:$4 sm:$0xff]  }
  0xa1   :  { %1662 = vmatprep.subr.bf16.mxu1 %v7570_v42  ;;  %v7660_v42 = vld [vmem:[%s11335_s1 + $0x368] ss:$16 sps:$4 sm:$0xff]  }
  0xa3   :  { %1654 = vmatmul.mubr.bf16.vlgmr.msra.gmra.mrb[8].mxu1 %v9120_v44  ;;  %1605 = vmatpush1.bf16.msra.mxu0 %v7564_v43  ;;  %v7665_v43 = vld [vmem:[%s11335_s1 + $0x704] ss:$16 sps:$4 sm:$0xff]  }
  0xa4   :  { %1663 = vmatpush1.bf16.msra.mxu1 %v7568_v45  ;;  %1606 = vmatprep.subr.bf16.mxu0 %v7573_v46  ;;  %v7668_v45 = vld [vmem:[%s11335_s1 + $0x904] ss:$16 sps:$4 sm:$0xff]   ;;  %v7663_v46 = vld [vmem:[%s11335_s1 + $0x700] ss:$16 sps:$4 sm:$0xff]  }
  0xa5   :  { %1664 = vmatprep.subr.bf16.mxu1 %v7576_v47  ;;  %1694 = vmatprep.mubr.bf16.mxu1 %v9001_v5  ;;  %v7608_v5 = vld [vmem:[%s11335_s1 + $0x24c] ss:$16 sps:$4 sm:$0xff]   ;;  %v9326_v47 = vld [vmem:[%s11336_s0 + $0x30] sm:$0xff] }
  0xa7   :  { %1607 = vmatpush1.bf16.msra.mxu0 %v7571_v48  ;;  %v9331_v48 = vld [vmem:[%s11336_s0 + $0x28] sm:$0xff] }
  0xa8   :  { %1665 = vmatpush1.bf16.msra.mxu1 %v7574_v49  ;;  %1608 = vmatprep.subr.bf16.mxu0 %v7579_v50  ;;  %v7666_v49 = vld [vmem:[%s11335_s1 + $0x900] ss:$16 sps:$4 sm:$0xff]   ;;  %v7671_v50 = vld [vmem:[%s11335_s1 + $0x724] ss:$16 sps:$4 sm:$0xff]  }
  0xa9   :  { %1666 = vmatprep.subr.bf16.mxu1 %v7582_v51  ;;  %v7674_v51 = vld [vmem:[%s11335_s1 + $0x924] ss:$16 sps:$4 sm:$0xff]  }
  0xab   :  { %1609 = vmatpush1.bf16.msra.mxu0 %v7577_v52  ;;  %v9344_v52 = vcombine.high %v9326_v47, %v9326_v47 }
  0xac   :  { %1667 = vmatpush1.bf16.msra.mxu1 %v7580_v54  ;;  %1610 = vmatprep.subr.bf16.mxu0 %v7585_v55  ;;  %v9348_v54 = vcombine.high %v9331_v48, %v9331_v48  ;;  %v7669_v55 = vld [vmem:[%s11335_s1 + $0x720] ss:$16 sps:$4 sm:$0xff]  }
  0xad   :  { %1668 = vmatprep.subr.bf16.mxu1 %v7588_v56  ;;  %v7672_v56 = vld [vmem:[%s11335_s1 + $0x920] ss:$16 sps:$4 sm:$0xff]  }
  0xaf   :  { %1611 = vmatpush1.bf16.msra.mxu0 %v7583_v57  ;;  %v7677_v57 = vld [vmem:[%s11335_s1 + $0x744] ss:$16 sps:$4 sm:$0xff]  }
  0xb0   :  { %1669 = vmatpush1.bf16.msra.mxu1 %v7586_v58  ;;  %1703 = vmatprep.subr.bf16.mxu0 %v7596_v60  ;;  %v7675_v58 = vld [vmem:[%s11335_s1 + $0x740] ss:$16 sps:$4 sm:$0xff]   ;;  %v7683_v60 = vld [vmem:[%s11335_s1 + $0x764] ss:$16 sps:$4 sm:$0xff]  }
  0xb1   :  { %1670 = vmatprep.subr.bf16.mxu1 %v7593_v59  ;;  %v7678_v59 = vld [vmem:[%s11335_s1 + $0x940] ss:$16 sps:$4 sm:$0xff]  }
  0xb2   :  { %1613 = vmatmul.mubr.bf16.vlgmr.msra.gmra.mrb[8].mxu0 %v9171_v62 }
  0xb3   :  { %1704 = vmatpush1.bf16.msra.mxu0 %v7594_v0  ;;  %6651 = vmatprep.mubr.msk.bf16.mxu0 %vm836_vm0, %v8967_v61  ;;  %v7614_v61 = vld [vmem:[%s11335_s1 + $0x26c] ss:$16 sps:$4 sm:$0xff]   ;;  %v7684_v0 = vld [vmem:[%s11335_s1 + $0x960] ss:$16 sps:$4 sm:$0xff]  }
  0xb4   :  { %1671 = vmatpush1.bf16.msra.mxu1 %v7591_v63  ;;  %1705 = vmatprep.subr.bf16.mxu0 %v7602_v1  ;;  %v7681_v63 = vld [vmem:[%s11335_s1 + $0x760] ss:$16 sps:$4 sm:$0xff]   ;;  %v7692_v1 = vld [vmem:[%s11335_s1 + $0x984] ss:$16 sps:$4 sm:$0xff]  }
  0xb5   :  { %1672 = vmatprep.subr.bf16.mxu1 %v7599_v53  ;;  %v7689_v53 = vld [vmem:[%s11335_s1 + $0x784] ss:$16 sps:$4 sm:$0xff]  }
  0xb7   :  { %1706 = vmatpush1.bf16.msra.mxu0 %v7600_v3  ;;  %v7690_v3 = vld [vmem:[%s11335_s1 + $0x980] ss:$16 sps:$4 sm:$0xff]  }
  0xb8   :  { %1673 = vmatpush1.bf16.msra.mxu1 %v7597_v2  ;;  %1707 = vmatprep.subr.bf16.mxu0 %v7608_v5  ;;  %v7687_v2 = vld [vmem:[%s11335_s1 + $0x780] ss:$16 sps:$4 sm:$0xff]   ;;  %v7698_v5 = vld [vmem:[%s11335_s1 + $0x9a4] ss:$16 sps:$4 sm:$0xff]  }
  0xb9   :  { %1674 = vmatprep.subr.bf16.mxu1 %v7605_v4  ;;  %v7695_v4 = vld [vmem:[%s11335_s1 + $0x7a4] ss:$16 sps:$4 sm:$0xff]  }
  0xbb   :  { %1708 = vmatpush1.bf16.msra.mxu0 %v7606_v7  ;;  %v7696_v7 = vld [vmem:[%s11335_s1 + $0x9a0] ss:$16 sps:$4 sm:$0xff]  }
  0xbc   :  { %1675 = vmatpush1.bf16.msra.mxu1 %v7603_v6  ;;  %1709 = vmatprep.subr.bf16.mxu0 %v7614_v61  ;;  %v7693_v6 = vld [vmem:[%s11335_s1 + $0x7a0] ss:$16 sps:$4 sm:$0xff]   ;;  %v7704_v61 = vld [vmem:[%s11335_s1 + $0x9c4] ss:$16 sps:$4 sm:$0xff]  }
  0xbd   :  { %1676 = vmatprep.subr.bf16.mxu1 %v7611_v8  ;;  %v7701_v8 = vld [vmem:[%s11335_s1 + $0x7c4] ss:$16 sps:$4 sm:$0xff]  }
  0xbf   :  { %1710 = vmatpush1.bf16.msra.mxu0 %v7612_v10  ;;  %v7702_v10 = vld [vmem:[%s11335_s1 + $0x9c0] ss:$16 sps:$4 sm:$0xff]  }
  0xc0   :  { %1677 = vmatpush1.bf16.msra.mxu1 %v7609_v9  ;;  %1711 = vmatprep.subr.bf16.mxu0 %v7620_v12  ;;  %v7699_v9 = vld [vmem:[%s11335_s1 + $0x7c0] ss:$16 sps:$4 sm:$0xff]   ;;  %v7710_v12 = vld [vmem:[%s11335_s1 + $0x9e4] ss:$16 sps:$4 sm:$0xff]  }
  0xc1   :  { %1678 = vmatprep.subr.bf16.mxu1 %v7617_v11  ;;  %v7707_v11 = vld [vmem:[%s11335_s1 + $0x7e4] ss:$16 sps:$4 sm:$0xff]  }
  0xc3   :  { %1712 = vmatpush1.bf16.msra.mxu0 %v7618_v14  ;;  %v7708_v14 = vld [vmem:[%s11335_s1 + $0x9e0] ss:$16 sps:$4 sm:$0xff]  }
  0xc4   :  { %1679 = vmatpush1.bf16.msra.mxu1 %v7615_v13  ;;  %1713 = vmatprep.subr.bf16.mxu0 %v7626_v16  ;;  %v7705_v13 = vld [vmem:[%s11335_s1 + $0x7e0] ss:$16 sps:$4 sm:$0xff]   ;;  %v7716_v16 = vld [vmem:[%s11335_s1 + $0xa04] ss:$16 sps:$4 sm:$0xff]  }
  0xc5   :  { %1680 = vmatprep.subr.bf16.mxu1 %v7623_v15  ;;  %v7713_v15 = vld [vmem:[%s11335_s1 + $0x804] ss:$16 sps:$4 sm:$0xff]  }
  0xc7   :  { %1714 = vmatpush1.bf16.msra.mxu0 %v7624_v18  ;;  %v7714_v18 = vld [vmem:[%s11335_s1 + $0xa00] ss:$16 sps:$4 sm:$0xff]  }
  0xc8   :  { %1681 = vmatpush1.bf16.msra.mxu1 %v7621_v17  ;;  %1715 = vmatprep.subr.bf16.mxu0 %v7632_v20  ;;  %v7711_v17 = vld [vmem:[%s11335_s1 + $0x800] ss:$16 sps:$4 sm:$0xff]   ;;  %v7722_v20 = vld [vmem:[%s11335_s1 + $0xa24] ss:$16 sps:$4 sm:$0xff]  }
  0xc9   :  { %1682 = vmatprep.subr.bf16.mxu1 %v7629_v19  ;;  %v7719_v19 = vld [vmem:[%s11335_s1 + $0x824] ss:$16 sps:$4 sm:$0xff]  }
  0xcb   :  { %1716 = vmatpush1.bf16.msra.mxu0 %v7630_v22  ;;  %v7720_v22 = vld [vmem:[%s11335_s1 + $0xa20] ss:$16 sps:$4 sm:$0xff]  }
  0xcc   :  { %1683 = vmatpush1.bf16.msra.mxu1 %v7627_v21  ;;  %1717 = vmatprep.subr.bf16.mxu0 %v7638_v24  ;;  %v7717_v21 = vld [vmem:[%s11335_s1 + $0x820] ss:$16 sps:$4 sm:$0xff]   ;;  %v7728_v24 = vld [vmem:[%s11335_s1 + $0xa44] ss:$16 sps:$4 sm:$0xff]  }
  0xcd   :  { %1684 = vmatprep.subr.bf16.mxu1 %v7635_v23  ;;  %v7725_v23 = vld [vmem:[%s11335_s1 + $0x844] ss:$16 sps:$4 sm:$0xff]  }
  0xcf   :  { %1718 = vmatpush1.bf16.msra.mxu0 %v7636_v26 }
  0xd0   :  { %1685 = vmatpush1.bf16.msra.mxu1 %v7633_v25  ;;  %1719 = vmatprep.subr.bf16.mxu0 %v7644_v28  ;;  %v7726_v28 = vld [vmem:[%s11335_s1 + $0xa40] ss:$16 sps:$4 sm:$0xff]  }
  0xd1   :  { %1686 = vmatprep.subr.bf16.mxu1 %v7641_v27  ;;  %v7723_v27 = vld [vmem:[%s11335_s1 + $0x840] ss:$16 sps:$4 sm:$0xff]  }
  0xd3   :  { %1720 = vmatpush1.bf16.msra.mxu0 %v7642_v30  ;;  %v7731_v30 = vld [vmem:[%s11335_s1 + $0x864] ss:$16 sps:$4 sm:$0xff]  }
  0xd4   :  { %1687 = vmatpush1.bf16.msra.mxu1 %v7639_v29  ;;  %1721 = vmatprep.subr.bf16.mxu0 %v7650_v32  ;;  %v7734_v32 = vld [vmem:[%s11335_s1 + $0xa64] ss:$16 sps:$4 sm:$0xff]  }
  0xd5   :  { %1688 = vmatprep.subr.bf16.mxu1 %v7647_v31 }
  0xd7   :  { %1722 = vmatpush1.bf16.msra.mxu0 %v7648_v34  ;;  %v7732_v34 = vld [vmem:[%s11335_s1 + $0xa60] ss:$16 sps:$4 sm:$0xff]  }
  0xd8   :  { %1689 = vmatpush1.bf16.msra.mxu1 %v7645_v33  ;;  %1723 = vmatprep.subr.bf16.mxu0 %v7656_v36  ;;  %v7729_v33 = vld [vmem:[%s11335_s1 + $0x860] ss:$16 sps:$4 sm:$0xff]   ;;  %v7742_v36 = vld [vmem:[%s11335_s1 + $0x70c] ss:$16 sps:$4 sm:$0xff]  }
  0xd9   :  { %1690 = vmatprep.subr.bf16.mxu1 %v7653_v35  ;;  %v7738_v35 = vld [vmem:[%s11335_s1 + $0x884] ss:$16 sps:$4 sm:$0xff]  }
  0xdb   :  { %1724 = vmatpush1.bf16.msra.mxu0 %v7654_v38  ;;  %v9492_v38 = vcombine.low %v9326_v47, %v9326_v47 }
  0xdc   :  { %1691 = vmatpush1.bf16.msra.mxu1 %v7651_v37  ;;  %1725 = vmatprep.subr.bf16.mxu0 %v7662_v40  ;;  %v7736_v37 = vld [vmem:[%s11335_s1 + $0x880] ss:$16 sps:$4 sm:$0xff]   ;;  %v7745_v40 = vld [vmem:[%s11335_s1 + $0x8a4] ss:$16 sps:$4 sm:$0xff]  }
  0xdd   :  { %1692 = vmatprep.subr.bf16.mxu1 %v7659_v39  ;;  %v7740_v39 = vld [vmem:[%s11335_s1 + $0x708] ss:$16 sps:$4 sm:$0xff]  }
  0xdf   :  { %1726 = vmatpush1.bf16.msra.mxu0 %v7660_v42  ;;  %v7743_v42 = vld [vmem:[%s11335_s1 + $0x8a0] ss:$16 sps:$4 sm:$0xff]  }
  0xe0   :  { %1693 = vmatpush1.bf16.msra.mxu1 %v7657_v41  ;;  %2432 = vmatprep.subr.bf16.mxu0 %v7665_v43  ;;  %v7748_v41 = vld [vmem:[%s11335_s1 + $0x72c] ss:$16 sps:$4 sm:$0xff]   ;;  %v7746_v43 = vld [vmem:[%s11335_s1 + $0x728] ss:$16 sps:$4 sm:$0xff]  }
  0xe1   :  { %2473 = vmatprep.subr.bf16.mxu1 %v7668_v45  ;;  %v7751_v45 = vld [vmem:[%s11335_s1 + $0x8c4] ss:$16 sps:$4 sm:$0xff]  }
  0xe2   :  { %1736 = vmatmul.mubr.bf16.vlgmr.msra.gmra.mrb[12].mxu0 %v9120_v44  ;;  %v7680_v44 = vld [vmem:[%s11335_s1 + $0x944] ss:$16 sps:$4 sm:$0xff]  }
  0xe3   :  { %1695 = vmatmul.mubr.bf16.vlgmr.msra.gmra.mrb[12].mxu1 %v9171_v62  ;;  %2433 = vmatpush1.bf16.msra.mxu0 %v7663_v46  ;;  %v7686_v62 = vld [vmem:[%s11335_s1 + $0x964] ss:$16 sps:$4 sm:$0xff]   ;;  %v7754_v46 = vld [vmem:[%s11335_s1 + $0x74c] ss:$16 sps:$4 sm:$0xff]  }
  0xe4   :  { %2474 = vmatpush1.bf16.msra.mxu1 %v7666_v49  ;;  %2434 = vmatprep.subr.bf16.mxu0 %v7671_v50 }
  0xe5   :  { %2475 = vmatprep.subr.bf16.mxu1 %v7674_v51  ;;  %6768 = vmatprep.mubr.msk.bf16.mxu1 %vm836_vm0, %v9344_v52 }
  0xe6   :  { %2464 = vmatprep.mubr.bf16.mxu0 %v9348_v54 }
  0xe7   :  { %2435 = vmatpush1.bf16.msra.mxu0 %v7669_v55 }
  0xe8   :  { %2476 = vmatpush1.bf16.msra.mxu1 %v7672_v56  ;;  %2436 = vmatprep.subr.bf16.mxu0 %v7677_v57  ;;  %v7749_v56 = vld [vmem:[%s11335_s1 + $0x8c0] ss:$16 sps:$4 sm:$0xff]   ;;  %v7752_v57 = vld [vmem:[%s11335_s1 + $0x748] ss:$16 sps:$4 sm:$0xff]  }
  0xe9   :  { %2477 = vmatprep.subr.bf16.mxu1 %v7680_v44 }
  0xeb   :  { %2437 = vmatpush1.bf16.msra.mxu0 %v7675_v58  ;;  %v7760_v58 = vld [vmem:[%s11335_s1 + $0x76c] ss:$16 sps:$4 sm:$0xff]  }
  0xec   :  { %2478 = vmatpush1.bf16.msra.mxu1 %v7678_v59  ;;  %2438 = vmatprep.subr.bf16.mxu0 %v7683_v60  ;;  %v7755_v59 = vld [vmem:[%s11335_s1 + $0x8e0] ss:$16 sps:$4 sm:$0xff]   ;;  %v7758_v60 = vld [vmem:[%s11335_s1 + $0x768] ss:$16 sps:$4 sm:$0xff]  }
  0xed   :  { %2479 = vmatprep.subr.bf16.mxu1 %v7686_v62  ;;  %v7765_v62 = vld [vmem:[%s11335_s1 + $0x78c] ss:$16 sps:$4 sm:$0xff]  }
  0xef   :  { %2439 = vmatpush1.bf16.msra.mxu0 %v7681_v63  ;;  %v7768_v63 = vld [vmem:[%s11335_s1 + $0x90c] ss:$16 sps:$4 sm:$0xff]  }
  0xf0   :  { %2480 = vmatpush1.bf16.msra.mxu1 %v7684_v0  ;;  %2440 = vmatprep.subr.bf16.mxu0 %v7689_v53  ;;  %v9547_v0 = vcombine.low %v9331_v48, %v9331_v48  ;;  %v7763_v53 = vld [vmem:[%s11335_s1 + $0x788] ss:$16 sps:$4 sm:$0xff]   ;;  %v7774_v48 = vld [vmem:[%s11335_s1 + $0x92c] ss:$16 sps:$4 sm:$0xff]  }
  0xf1   :  { %2481 = vmatprep.subr.bf16.mxu1 %v7692_v1  ;;  %v7766_v1 = vld [vmem:[%s11335_s1 + $0x908] ss:$16 sps:$4 sm:$0xff]  }
  0xf3   :  { %2441 = vmatpush1.bf16.msra.mxu0 %v7687_v2  ;;  %v7771_v2 = vld [vmem:[%s11335_s1 + $0x7ac] ss:$16 sps:$4 sm:$0xff]  }
  0xf4   :  { %2482 = vmatpush1.bf16.msra.mxu1 %v7690_v3  ;;  %2442 = vmatprep.subr.bf16.mxu0 %v7695_v4  ;;  %v7769_v3 = vld [vmem:[%s11335_s1 + $0x7a8] ss:$16 sps:$4 sm:$0xff]  }
  0xf5   :  { %2483 = vmatprep.subr.bf16.mxu1 %v7698_v5  ;;  %v7772_v4 = vld [vmem:[%s11335_s1 + $0x928] ss:$16 sps:$4 sm:$0xff]   ;;  %v7777_v5 = vld [vmem:[%s11335_s1 + $0x7cc] ss:$16 sps:$4 sm:$0xff]  }
  0xf7   :  { %2443 = vmatpush1.bf16.msra.mxu0 %v7693_v6  ;;  %v7780_v6 = vld [vmem:[%s11335_s1 + $0x94c] ss:$16 sps:$4 sm:$0xff]  }
  0xf8   :  { %2484 = vmatpush1.bf16.msra.mxu1 %v7696_v7  ;;  %2444 = vmatprep.subr.bf16.mxu0 %v7701_v8  ;;  %v7775_v7 = vld [vmem:[%s11335_s1 + $0x7c8] ss:$16 sps:$4 sm:$0xff]  }
  0xf9   :  { %2485 = vmatprep.subr.bf16.mxu1 %v7704_v61  ;;  %v7778_v8 = vld [vmem:[%s11335_s1 + $0x948] ss:$16 sps:$4 sm:$0xff]   ;;  %v7783_v61 = vld [vmem:[%s11335_s1 + $0x7ec] ss:$16 sps:$4 sm:$0xff]  }
  0xfb   :  { %2445 = vmatpush1.bf16.msra.mxu0 %v7699_v9  ;;  %v7781_v9 = vld [vmem:[%s11335_s1 + $0x7e8] ss:$16 sps:$4 sm:$0xff]  }
  0xfc   :  { %2486 = vmatpush1.bf16.msra.mxu1 %v7702_v10  ;;  %2446 = vmatprep.subr.bf16.mxu0 %v7707_v11  ;;  %v7784_v10 = vld [vmem:[%s11335_s1 + $0x968] ss:$16 sps:$4 sm:$0xff]   ;;  %v7789_v11 = vld [vmem:[%s11335_s1 + $0x80c] ss:$16 sps:$4 sm:$0xff]  }
  0xfd   :  { %2487 = vmatprep.subr.bf16.mxu1 %v7710_v12  ;;  %v7792_v12 = vld [vmem:[%s11335_s1 + $0x98c] ss:$16 sps:$4 sm:$0xff]  }
  0xff   :  { %2447 = vmatpush1.bf16.msra.mxu0 %v7705_v13  ;;  %v7787_v13 = vld [vmem:[%s11335_s1 + $0x808] ss:$16 sps:$4 sm:$0xff]  }
 0x100   :  { %2488 = vmatpush1.bf16.msra.mxu1 %v7708_v14  ;;  %2448 = vmatprep.subr.bf16.mxu0 %v7713_v15  ;;  %v7790_v14 = vld [vmem:[%s11335_s1 + $0x988] ss:$16 sps:$4 sm:$0xff]   ;;  %v7795_v15 = vld [vmem:[%s11335_s1 + $0x82c] ss:$16 sps:$4 sm:$0xff]  }
 0x101   :  { %2489 = vmatprep.subr.bf16.mxu1 %v7716_v16  ;;  %v7798_v16 = vld [vmem:[%s11335_s1 + $0x9ac] ss:$16 sps:$4 sm:$0xff]  }
 0x103   :  { %2449 = vmatpush1.bf16.msra.mxu0 %v7711_v17  ;;  %v7793_v17 = vld [vmem:[%s11335_s1 + $0x828] ss:$16 sps:$4 sm:$0xff]  }
 0x104   :  { %2490 = vmatpush1.bf16.msra.mxu1 %v7714_v18  ;;  %2450 = vmatprep.subr.bf16.mxu0 %v7719_v19  ;;  %v7796_v18 = vld [vmem:[%s11335_s1 + $0x9a8] ss:$16 sps:$4 sm:$0xff]   ;;  %v7801_v19 = vld [vmem:[%s11335_s1 + $0x84c] ss:$16 sps:$4 sm:$0xff]  }
 0x105   :  { %2491 = vmatprep.subr.bf16.mxu1 %v7722_v20  ;;  %v7804_v20 = vld [vmem:[%s11335_s1 + $0x9cc] ss:$16 sps:$4 sm:$0xff]  }
 0x106   :  { %v915_v25 = vpop.f32.mrb[0].mxu1 }
 0x107   :  { %v917_v26 = vpop.f32.mrb[1].mxu1  ;;  %2451 = vmatpush1.bf16.msra.mxu0 %v7717_v21  ;;  %v7799_v21 = vld [vmem:[%s11335_s1 + $0x848] ss:$16 sps:$4 sm:$0xff]  }
 0x108   :  { %v919_v29 = vpop.f32.mrb[2].mxu1  ;;  %2492 = vmatpush1.bf16.msra.mxu1 %v7720_v22  ;;  %2452 = vmatprep.subr.bf16.mxu0 %v7725_v23  ;;  %v7802_v22 = vld [vmem:[%s11335_s1 + $0x9c8] ss:$16 sps:$4 sm:$0xff]   ;;  %v7807_v23 = vld [vmem:[%s11335_s1 + $0x86c] ss:$16 sps:$4 sm:$0xff]  }
 0x109   :  { %v920_v31 = vpop.f32.mrb[3].mxu1  ;;  %2493 = vmatprep.subr.bf16.mxu1 %v7728_v24  ;;  %v7810_v24 = vld [vmem:[%s11335_s1 + $0x9ec] ss:$16 sps:$4 sm:$0xff]   ;;  %v7811_v29 = vld [vmem:[%s11335_s1 + $0x888] ss:$16 sps:$4 sm:$0xff]  }
 0x10a   :  { %v7819_v31 = vld [vmem:[%s11335_s1 + $0x8ac] ss:$16 sps:$4 sm:$0xff]  }
 0x10b   :  { %2453 = vmatpush1.bf16.msra.mxu0 %v7723_v27  ;;  %v7813_v27 = vld [vmem:[%s11335_s1 + $0x88c] ss:$16 sps:$4 sm:$0xff]  }
 0x10c   :  { %2494 = vmatpush1.bf16.msra.mxu1 %v7726_v28  ;;  %2454 = vmatprep.subr.bf16.mxu0 %v7731_v30  ;;  %v7816_v28 = vld [vmem:[%s11335_s1 + $0xa0c] ss:$16 sps:$4 sm:$0xff]   ;;  %v7814_v30 = vld [vmem:[%s11335_s1 + $0xa08] ss:$16 sps:$4 sm:$0xff]  }
 0x10d   :  { %2495 = vmatprep.subr.bf16.mxu1 %v7734_v32  ;;  %v7822_v32 = vld [vmem:[%s11335_s1 + $0xa2c] ss:$16 sps:$4 sm:$0xff]  }
 0x10f   :  { %2455 = vmatpush1.bf16.msra.mxu0 %v7729_v33  ;;  %v7817_v33 = vld [vmem:[%s11335_s1 + $0x8a8] ss:$16 sps:$4 sm:$0xff]  }
 0x110   :  { %2496 = vmatpush1.bf16.msra.mxu1 %v7732_v34  ;;  %2456 = vmatprep.subr.bf16.mxu0 %v7738_v35  ;;  %v7820_v34 = vld [vmem:[%s11335_s1 + $0xa28] ss:$16 sps:$4 sm:$0xff]   ;;  %v7825_v35 = vld [vmem:[%s11335_s1 + $0x8cc] ss:$16 sps:$4 sm:$0xff]  }
 0x111   :  { %2514 = vmatprep.subr.bf16.mxu1 %v7742_v36  ;;  %v7828_v36 = vld [vmem:[%s11335_s1 + $0xa4c] ss:$16 sps:$4 sm:$0xff]  }
 0x113   :  { %2506 = vmatmul.mubr.bf16.vlgmr.msra.gmra.mrb[16].mxu1 %v9492_v38  ;;  %2457 = vmatpush1.bf16.msra.mxu0 %v7736_v37 }
 0x114   :  { %2515 = vmatpush1.bf16.msra.mxu1 %v7740_v39  ;;  %2458 = vmatprep.subr.bf16.mxu0 %v7745_v40 }
 0x115   :  { %2516 = vmatprep.subr.bf16.mxu1 %v7748_v41  ;;  %v874_v47 = vpop.f32.mrb[0].mxu0  ;;  %2546 = vmatprep.mubr.bf16.mxu1 %v9348_v54  ;;  %v7757_v54 = vld [vmem:[%s11335_s1 + $0x8e4] ss:$16 sps:$4 sm:$0xff]  }
 0x116   :  { %v9517_v49 = vadd.f32 %v915_v25, %v874_v47  ;;  %v876_v50 = vpop.f32.mrb[1].mxu0  ;;  %v7805_v25 = vld [vmem:[%s11335_s1 + $0x868] ss:$16 sps:$4 sm:$0xff]  }
 0x117   :  { %v9519_v51 = vadd.f32 %v917_v26, %v876_v50  ;;  %v878_v55 = vpop.f32.mrb[2].mxu0  ;;  %2459 = vmatpush1.bf16.msra.mxu0 %v7743_v42  ;;  %v7808_v26 = vld [vmem:[%s11335_s1 + $0x9e8] ss:$16 sps:$4 sm:$0xff]  }
 0x118   :  { %2517 = vmatpush1.bf16.msra.mxu1 %v7746_v43  ;;  %v879_v44 = vpop.f32.mrb[3].mxu0  ;;  %2460 = vmatprep.subr.bf16.mxu0 %v7751_v45  ;;  %v7823_v47 = vld [vmem:[%s11335_s1 + $0x8c8] ss:$16 sps:$4 sm:$0xff]  }
 0x119   :  { %2518 = vmatprep.subr.bf16.mxu1 %v7754_v46  ;;  %v7826_v50 = vld [vmem:[%s11335_s1 + $0xa48] ss:$16 sps:$4 sm:$0xff]   ;;  %v7834_v44 = vld [vmem:[%s11335_s1 + $0xa6c] ss:$16 sps:$4 sm:$0xff]  }
 0x11b   :  { %2461 = vmatpush1.bf16.msra.mxu0 %v7749_v56 }
 0x11c   :  { %2519 = vmatpush1.bf16.msra.mxu1 %v7752_v57  ;;  %2462 = vmatprep.subr.bf16.mxu0 %v7757_v54  ;;  %v7831_v57 = vld [vmem:[%s11335_s1 + $0x8ec] ss:$16 sps:$4 sm:$0xff]   ;;  %v7829_v54 = vld [vmem:[%s11335_s1 + $0x8e8] ss:$16 sps:$4 sm:$0xff]  }
 0x11d   :  { %2520 = vmatprep.subr.bf16.mxu1 %v7760_v58  ;;  %v7832_v58 = vld [vmem:[%s11335_s1 + $0xa68] ss:$16 sps:$4 sm:$0xff]  }
 0x11f   :  { %2463 = vmatpush1.bf16.msra.mxu0 %v7755_v59  ;;  %v7837_v59 = vld [vmem:[%s11335_s1 + $0xa84] ss:$16 sps:$4 sm:$0xff]  }
 0x120   :  { %2521 = vmatpush1.bf16.msra.mxu1 %v7758_v60  ;;  %2555 = vmatprep.subr.bf16.mxu0 %v7768_v63  ;;  %v7840_v60 = vld [vmem:[%s11335_s1 + $0xc84] ss:$16 sps:$4 sm:$0xff]   ;;  %v7838_v63 = vld [vmem:[%s11335_s1 + $0xc80] ss:$16 sps:$4 sm:$0xff]  }
 0x121   :  { %2522 = vmatprep.subr.bf16.mxu1 %v7765_v62  ;;  %v7835_v62 = vld [vmem:[%s11335_s1 + $0xa80] ss:$16 sps:$4 sm:$0xff]  }
 0x122   :  { %2465 = vmatmul.mubr.bf16.vlgmr.msra.gmra.mrb[16].mxu0 %v9547_v0 }
 0x123   :  { %2556 = vmatpush1.bf16.msra.mxu0 %v7766_v1  ;;  %6769 = vmatprep.mubr.msk.bf16.mxu0 %vm836_vm0, %v9344_v52  ;;  %v7786_v52 = vld [vmem:[%s11335_s1 + $0x96c] ss:$16 sps:$4 sm:$0xff]   ;;  %v7846_v1 = vld [vmem:[%s11335_s1 + $0xca4] ss:$16 sps:$4 sm:$0xff]  }
 0x124   :  { %2523 = vmatpush1.bf16.msra.mxu1 %v7763_v53  ;;  %2557 = vmatprep.subr.bf16.mxu0 %v7774_v48  ;;  %v7843_v53 = vld [vmem:[%s11335_s1 + $0xaa4] ss:$16 sps:$4 sm:$0xff]  }
 0x125   :  { %2524 = vmatprep.subr.bf16.mxu1 %v7771_v2  ;;  %v9715_v2 = vld [vmem:[%s11336_s0 + $0x48] ss:$0 sps:$4 sm:$0xff]   ;;  %v9720_v48 = vld [vmem:[%s11336_s0 + $0x40] sm:$0xff] }
 0x127   :  { %2558 = vmatpush1.bf16.msra.mxu0 %v7772_v4  ;;  %v7841_v4 = vld [vmem:[%s11335_s1 + $0xaa0] ss:$16 sps:$4 sm:$0xff]  }
 0x128   :  { %2525 = vmatpush1.bf16.msra.mxu1 %v7769_v3  ;;  %2559 = vmatprep.subr.bf16.mxu0 %v7780_v6  ;;  %v9724_v3 = vcombine.low %v9720_v48, %v9720_v48  ;;  %v7849_v6 = vld [vmem:[%s11335_s1 + $0xac4] ss:$16 sps:$4 sm:$0xff]  }
 0x129   :  { %2526 = vmatprep.subr.bf16.mxu1 %v7777_v5  ;;  %v7844_v5 = vld [vmem:[%s11335_s1 + $0xca0] ss:$16 sps:$4 sm:$0xff]  }
 0x12b   :  { %2560 = vmatpush1.bf16.msra.mxu0 %v7778_v8  ;;  %v7855_v8 = vld [vmem:[%s11335_s1 + $0xae4] ss:$16 sps:$4 sm:$0xff]  }
 0x12c   :  { %2527 = vmatpush1.bf16.msra.mxu1 %v7775_v7  ;;  %2561 = vmatprep.subr.bf16.mxu0 %v7786_v52  ;;  %v7850_v7 = vld [vmem:[%s11335_s1 + $0xcc0] ss:$16 sps:$4 sm:$0xff]  }
 0x12d   :  { %2528 = vmatprep.subr.bf16.mxu1 %v7783_v61  ;;  %v7858_v61 = vld [vmem:[%s11335_s1 + $0xce4] ss:$16 sps:$4 sm:$0xff]   ;;  %v7853_v52 = vld [vmem:[%s11335_s1 + $0xae0] ss:$16 sps:$4 sm:$0xff]  }
 0x12f   :  { %2562 = vmatpush1.bf16.msra.mxu0 %v7784_v10  ;;  %v7861_v10 = vld [vmem:[%s11335_s1 + $0xb04] ss:$16 sps:$4 sm:$0xff]  }
 0x130   :  { %2529 = vmatpush1.bf16.msra.mxu1 %v7781_v9  ;;  %2563 = vmatprep.subr.bf16.mxu0 %v7792_v12  ;;  %v7856_v9 = vld [vmem:[%s11335_s1 + $0xce0] ss:$16 sps:$4 sm:$0xff]  }
 0x131   :  { %2530 = vmatprep.subr.bf16.mxu1 %v7789_v11  ;;  %v7864_v11 = vld [vmem:[%s11335_s1 + $0xd04] ss:$16 sps:$4 sm:$0xff]   ;;  %v7859_v12 = vld [vmem:[%s11335_s1 + $0xb00] ss:$16 sps:$4 sm:$0xff]  }
 0x133   :  { %2564 = vmatpush1.bf16.msra.mxu0 %v7790_v14  ;;  %v7867_v14 = vld [vmem:[%s11335_s1 + $0xb24] ss:$16 sps:$4 sm:$0xff]  }
 0x134   :  { %2531 = vmatpush1.bf16.msra.mxu1 %v7787_v13  ;;  %2565 = vmatprep.subr.bf16.mxu0 %v7798_v16  ;;  %v7862_v13 = vld [vmem:[%s11335_s1 + $0xd00] ss:$16 sps:$4 sm:$0xff]  }
 0x135   :  { %2532 = vmatprep.subr.bf16.mxu1 %v7795_v15  ;;  %v7870_v15 = vld [vmem:[%s11335_s1 + $0xd24] ss:$16 sps:$4 sm:$0xff]   ;;  %v7865_v16 = vld [vmem:[%s11335_s1 + $0xb20] ss:$16 sps:$4 sm:$0xff]  }
 0x137   :  { %2566 = vmatpush1.bf16.msra.mxu0 %v7796_v18  ;;  %v7873_v18 = vld [vmem:[%s11335_s1 + $0xb44] ss:$16 sps:$4 sm:$0xff]  }
 0x138   :  { %2533 = vmatpush1.bf16.msra.mxu1 %v7793_v17  ;;  %2567 = vmatprep.subr.bf16.mxu0 %v7804_v20  ;;  %v7868_v17 = vld [vmem:[%s11335_s1 + $0xd20] ss:$16 sps:$4 sm:$0xff]  }
 0x139   :  { %2534 = vmatprep.subr.bf16.mxu1 %v7801_v19  ;;  %v7876_v19 = vld [vmem:[%s11335_s1 + $0xd44] ss:$16 sps:$4 sm:$0xff]   ;;  %v7871_v20 = vld [vmem:[%s11335_s1 + $0xb40] ss:$16 sps:$4 sm:$0xff]  }
 0x13b   :  { %2568 = vmatpush1.bf16.msra.mxu0 %v7802_v22  ;;  %v7879_v22 = vld [vmem:[%s11335_s1 + $0xb64] ss:$16 sps:$4 sm:$0xff]  }
 0x13c   :  { %2535 = vmatpush1.bf16.msra.mxu1 %v7799_v21  ;;  %2569 = vmatprep.subr.bf16.mxu0 %v7810_v24  ;;  %v7874_v21 = vld [vmem:[%s11335_s1 + $0xd40] ss:$16 sps:$4 sm:$0xff]  }
 0x13d   :  { %2536 = vmatprep.subr.bf16.mxu1 %v7807_v23  ;;  %v7882_v23 = vld [vmem:[%s11335_s1 + $0xd64] ss:$16 sps:$4 sm:$0xff]   ;;  %v7877_v24 = vld [vmem:[%s11335_s1 + $0xb60] ss:$16 sps:$4 sm:$0xff]  }
 0x13f   :  { %2570 = vmatpush1.bf16.msra.mxu0 %v7808_v26  ;;  %v7885_v26 = vld [vmem:[%s11335_s1 + $0xb84] ss:$16 sps:$4 sm:$0xff]  }
 0x140   :  { %2537 = vmatpush1.bf16.msra.mxu1 %v7805_v25  ;;  %2571 = vmatprep.subr.bf16.mxu0 %v7816_v28  ;;  %v7880_v25 = vld [vmem:[%s11335_s1 + $0xd60] ss:$16 sps:$4 sm:$0xff]  }
 0x141   :  { %2538 = vmatprep.subr.bf16.mxu1 %v7813_v27  ;;  %v7888_v27 = vld [vmem:[%s11335_s1 + $0xd84] ss:$16 sps:$4 sm:$0xff]   ;;  %v7883_v28 = vld [vmem:[%s11335_s1 + $0xb80] ss:$16 sps:$4 sm:$0xff]  }
 0x143   :  { %2572 = vmatpush1.bf16.msra.mxu0 %v7814_v30  ;;  %v7891_v30 = vld [vmem:[%s11335_s1 + $0xba4] ss:$16 sps:$4 sm:$0xff]  }
 0x144   :  { %2539 = vmatpush1.bf16.msra.mxu1 %v7811_v29  ;;  %2573 = vmatprep.subr.bf16.mxu0 %v7822_v32  ;;  %v7886_v29 = vld [vmem:[%s11335_s1 + $0xd80] ss:$16 sps:$4 sm:$0xff]  }
 0x145   :  { %2540 = vmatprep.subr.bf16.mxu1 %v7819_v31  ;;  %v997_v39 = vpop.f32.mrb[4].mxu0  ;;  %v7894_v31 = vld [vmem:[%s11335_s1 + $0xda4] ss:$16 sps:$4 sm:$0xff]   ;;  %v7889_v32 = vld [vmem:[%s11335_s1 + $0xba0] ss:$16 sps:$4 sm:$0xff]  }
 0x146   :  { %v956_v37 = vpop.f32.mrb[4].mxu1  ;;  %v999_v42 = vpop.f32.mrb[5].mxu0 }
 0x147   :  { %v9672_v40 = vadd.f32 %v997_v39, %v956_v37  ;;  %v958_v41 = vpop.f32.mrb[5].mxu1  ;;  %v1001_v46 = vpop.f32.mrb[6].mxu0  ;;  %2574 = vmatpush1.bf16.msra.mxu0 %v7820_v34  ;;  %v7897_v34 = vld [vmem:[%s11335_s1 + $0xbc4] ss:$16 sps:$4 sm:$0xff]   ;;  %v7895_v37 = vld [vmem:[%s11335_s1 + $0xbc0] ss:$16 sps:$4 sm:$0xff]  }
 0x148   :  { %v9674_v43 = vadd.f32 %v999_v42, %v958_v41  ;;  %v960_v45 = vpop.f32.mrb[6].mxu1  ;;  %2541 = vmatpush1.bf16.msra.mxu1 %v7817_v33  ;;  %v1002_v56 = vpop.f32.mrb[7].mxu0  ;;  %2575 = vmatprep.subr.bf16.mxu0 %v7828_v36  ;;  %v7892_v33 = vld [vmem:[%s11335_s1 + $0xda0] ss:$16 sps:$4 sm:$0xff]   ;;  %v7903_v46 = vld [vmem:[%s11335_s1 + $0xbe4] ss:$16 sps:$4 sm:$0xff]  }
 0x149   :  { %v961_v55 = vpop.f32.mrb[7].mxu1  ;;  %2542 = vmatprep.subr.bf16.mxu1 %v7825_v35  ;;  %v7900_v35 = vld [vmem:[%s11335_s1 + $0xdc4] ss:$16 sps:$4 sm:$0xff]   ;;  %v7898_v39 = vld [vmem:[%s11335_s1 + $0xdc0] ss:$16 sps:$4 sm:$0xff]  }
 0x14a   :  { %v7904_v55 = vld [vmem:[%s11335_s1 + $0xde0] ss:$16 sps:$4 sm:$0xff]   ;;  %v7910_v56 = vld [vmem:[%s11335_s1 + $0xc04] ss:$16 sps:$4 sm:$0xff]  }
 0x14b   :  { %2576 = vmatpush1.bf16.msra.mxu0 %v7826_v50  ;;  %v7901_v50 = vld [vmem:[%s11335_s1 + $0xbe0] ss:$16 sps:$4 sm:$0xff]  }
 0x14c   :  { %2543 = vmatpush1.bf16.msra.mxu1 %v7823_v47  ;;  %2577 = vmatprep.subr.bf16.mxu0 %v7834_v44  ;;  %v7906_v47 = vld [vmem:[%s11335_s1 + $0xde4] ss:$16 sps:$4 sm:$0xff]   ;;  %v7908_v44 = vld [vmem:[%s11335_s1 + $0xc00] ss:$16 sps:$4 sm:$0xff]  }
 0x14d   :  { %2544 = vmatprep.subr.bf16.mxu1 %v7831_v57  ;;  %v7914_v57 = vld [vmem:[%s11335_s1 + $0xa8c] ss:$16 sps:$4 sm:$0xff]  }
 0x14f   :  { %2578 = vmatpush1.bf16.msra.mxu0 %v7832_v58  ;;  %v7912_v58 = vld [vmem:[%s11335_s1 + $0xa88] ss:$16 sps:$4 sm:$0xff]  }
 0x150   :  { %2545 = vmatpush1.bf16.msra.mxu1 %v7829_v54  ;;  %3289 = vmatprep.subr.bf16.mxu0 %v7837_v59  ;;  %v9868_v54 = vcombine.high %v9720_v48, %v9720_v48  ;;  %v7917_v59 = vld [vmem:[%s11335_s1 + $0xc24] ss:$16 sps:$4 sm:$0xff]  }
 0x151   :  { %3330 = vmatprep.subr.bf16.mxu1 %v7840_v60  ;;  %v7920_v60 = vld [vmem:[%s11335_s1 + $0xaac] ss:$16 sps:$4 sm:$0xff]  }
 0x152   :  { %2588 = vmatmul.mubr.bf16.vlgmr.msra.gmra.mrb[20].mxu0 %v9492_v38  ;;  %v7852_v38 = vld [vmem:[%s11335_s1 + $0xcc4] ss:$16 sps:$4 sm:$0xff]  }
 0x153   :  { %2547 = vmatmul.mubr.bf16.vlgmr.msra.gmra.mrb[20].mxu1 %v9547_v0  ;;  %3290 = vmatpush1.bf16.msra.mxu0 %v7835_v62  ;;  %v7847_v0 = vld [vmem:[%s11335_s1 + $0xac0] ss:$16 sps:$4 sm:$0xff]  }
 0x154   :  { %3331 = vmatpush1.bf16.msra.mxu1 %v7838_v63  ;;  %3291 = vmatprep.subr.bf16.mxu0 %v7843_v53  ;;  %v7915_v62 = vld [vmem:[%s11335_s1 + $0xc20] ss:$16 sps:$4 sm:$0xff]   ;;  %v7918_v63 = vld [vmem:[%s11335_s1 + $0xaa8] ss:$16 sps:$4 sm:$0xff]   ;;  %v7923_v53 = vld [vmem:[%s11335_s1 + $0xc44] ss:$16 sps:$4 sm:$0xff]  }
 0x155   :  { %3332 = vmatprep.subr.bf16.mxu1 %v7846_v1  ;;  %6886 = vmatprep.mubr.msk.bf16.mxu1 %vm836_vm0, %v9715_v2  ;;  %v7926_v1 = vld [vmem:[%s11335_s1 + $0xacc] ss:$16 sps:$4 sm:$0xff]  }
 0x156   :  { %3321 = vmatprep.mubr.bf16.mxu0 %v9724_v3 }
 0x157   :  { %3292 = vmatpush1.bf16.msra.mxu0 %v7841_v4 }
 0x158   :  { %3333 = vmatpush1.bf16.msra.mxu1 %v7844_v5  ;;  %3293 = vmatprep.subr.bf16.mxu0 %v7849_v6 }
 0x159   :  { %3334 = vmatprep.subr.bf16.mxu1 %v7852_v38 }
 0x15b   :  { %3294 = vmatpush1.bf16.msra.mxu0 %v7847_v0  ;;  %v7921_v0 = vld [vmem:[%s11335_s1 + $0xc40] ss:$16 sps:$4 sm:$0xff]  }
 0x15c   :  { %3335 = vmatpush1.bf16.msra.mxu1 %v7850_v7  ;;  %3295 = vmatprep.subr.bf16.mxu0 %v7855_v8  ;;  %v7924_v7 = vld [vmem:[%s11335_s1 + $0xac8] ss:$16 sps:$4 sm:$0xff]  }
 0x15d   :  { %3336 = vmatprep.subr.bf16.mxu1 %v7858_v61 }
 0x15f   :  { %3296 = vmatpush1.bf16.msra.mxu0 %v7853_v52  ;;  %v7927_v52 = vld [vmem:[%s11335_s1 + $0xc60] ss:$16 sps:$4 sm:$0xff]  }
 0x160   :  { %3337 = vmatpush1.bf16.msra.mxu1 %v7856_v9  ;;  %3297 = vmatprep.subr.bf16.mxu0 %v7861_v10  ;;  %v7930_v9 = vld [vmem:[%s11335_s1 + $0xae8] ss:$16 sps:$4 sm:$0xff]   ;;  %v9920_v10 = vld [vmem:[%s11336_s0 + $0x3c] ss:$0 sps:$4 sm:$0xff]  }
 0x161   :  { %3338 = vmatprep.subr.bf16.mxu1 %v7864_v11  ;;  %v7937_v11 = vld [vmem:[%s11335_s1 + $0xb0c] ss:$16 sps:$4 sm:$0xff]  }
 0x163   :  { %3298 = vmatpush1.bf16.msra.mxu0 %v7859_v12  ;;  %v7940_v12 = vld [vmem:[%s11335_s1 + $0xc8c] ss:$16 sps:$4 sm:$0xff]  }
 0x164   :  { %3339 = vmatpush1.bf16.msra.mxu1 %v7862_v13  ;;  %3299 = vmatprep.subr.bf16.mxu0 %v7867_v14  ;;  %v7935_v13 = vld [vmem:[%s11335_s1 + $0xb08] ss:$16 sps:$4 sm:$0xff]  }
 0x165   :  { %3340 = vmatprep.subr.bf16.mxu1 %v7870_v15  ;;  %v7938_v14 = vld [vmem:[%s11335_s1 + $0xc88] ss:$16 sps:$4 sm:$0xff]   ;;  %v7943_v15 = vld [vmem:[%s11335_s1 + $0xb2c] ss:$16 sps:$4 sm:$0xff]  }
 0x167   :  { %3300 = vmatpush1.bf16.msra.mxu0 %v7865_v16  ;;  %v7946_v16 = vld [vmem:[%s11335_s1 + $0xcac] ss:$16 sps:$4 sm:$0xff]  }
 0x168   :  { %3341 = vmatpush1.bf16.msra.mxu1 %v7868_v17  ;;  %3301 = vmatprep.subr.bf16.mxu0 %v7873_v18  ;;  %v7941_v17 = vld [vmem:[%s11335_s1 + $0xb28] ss:$16 sps:$4 sm:$0xff]  }
 0x169   :  { %3342 = vmatprep.subr.bf16.mxu1 %v7876_v19  ;;  %v7944_v18 = vld [vmem:[%s11335_s1 + $0xca8] ss:$16 sps:$4 sm:$0xff]   ;;  %v7949_v19 = vld [vmem:[%s11335_s1 + $0xb4c] ss:$16 sps:$4 sm:$0xff]  }
 0x16b   :  { %3302 = vmatpush1.bf16.msra.mxu0 %v7871_v20  ;;  %v7952_v20 = vld [vmem:[%s11335_s1 + $0xccc] ss:$16 sps:$4 sm:$0xff]  }
 0x16c   :  { %3343 = vmatpush1.bf16.msra.mxu1 %v7874_v21  ;;  %3303 = vmatprep.subr.bf16.mxu0 %v7879_v22  ;;  %v7947_v21 = vld [vmem:[%s11335_s1 + $0xb48] ss:$16 sps:$4 sm:$0xff]  }
 0x16d   :  { %3344 = vmatprep.subr.bf16.mxu1 %v7882_v23  ;;  %v7950_v22 = vld [vmem:[%s11335_s1 + $0xcc8] ss:$16 sps:$4 sm:$0xff]   ;;  %v7955_v23 = vld [vmem:[%s11335_s1 + $0xb6c] ss:$16 sps:$4 sm:$0xff]  }
 0x16f   :  { %3304 = vmatpush1.bf16.msra.mxu0 %v7877_v24  ;;  %v7953_v24 = vld [vmem:[%s11335_s1 + $0xb68] ss:$16 sps:$4 sm:$0xff]  }
 0x170   :  { %3345 = vmatpush1.bf16.msra.mxu1 %v7880_v25  ;;  %3305 = vmatprep.subr.bf16.mxu0 %v7885_v26  ;;  %v7956_v25 = vld [vmem:[%s11335_s1 + $0xce8] ss:$16 sps:$4 sm:$0xff]   ;;  %v7961_v26 = vld [vmem:[%s11335_s1 + $0xb8c] ss:$16 sps:$4 sm:$0xff]  }
 0x171   :  { %3346 = vmatprep.subr.bf16.mxu1 %v7888_v27  ;;  %v7964_v27 = vld [vmem:[%s11335_s1 + $0xd0c] ss:$16 sps:$4 sm:$0xff]  }
 0x173   :  { %3306 = vmatpush1.bf16.msra.mxu0 %v7883_v28  ;;  %v7959_v28 = vld [vmem:[%s11335_s1 + $0xb88] ss:$16 sps:$4 sm:$0xff]  }
 0x174   :  { %3347 = vmatpush1.bf16.msra.mxu1 %v7886_v29  ;;  %3307 = vmatprep.subr.bf16.mxu0 %v7891_v30  ;;  %v7962_v29 = vld [vmem:[%s11335_s1 + $0xd08] ss:$16 sps:$4 sm:$0xff]   ;;  %v7967_v30 = vld [vmem:[%s11335_s1 + $0xbac] ss:$16 sps:$4 sm:$0xff]  }
 0x175   :  { %3348 = vmatprep.subr.bf16.mxu1 %v7894_v31  ;;  %v7970_v31 = vld [vmem:[%s11335_s1 + $0xd2c] ss:$16 sps:$4 sm:$0xff]  }
 0x176   :  { %v1655_v36 = vpop.f32.mrb[8].mxu1 }
 0x177   :  { %v1657_v41 = vpop.f32.mrb[9].mxu1  ;;  %3308 = vmatpush1.bf16.msra.mxu0 %v7889_v32  ;;  %v7965_v32 = vld [vmem:[%s11335_s1 + $0xba8] ss:$16 sps:$4 sm:$0xff]  }
 0x178   :  { %v1659_v42 = vpop.f32.mrb[10].mxu1  ;;  %3349 = vmatpush1.bf16.msra.mxu1 %v7892_v33  ;;  %3309 = vmatprep.subr.bf16.mxu0 %v7897_v34  ;;  %v7968_v33 = vld [vmem:[%s11335_s1 + $0xd28] ss:$16 sps:$4 sm:$0xff]   ;;  %v7973_v34 = vld [vmem:[%s11335_s1 + $0xbcc] ss:$16 sps:$4 sm:$0xff]  }
 0x179   :  { %v1660_v45 = vpop.f32.mrb[11].mxu1  ;;  %3350 = vmatprep.subr.bf16.mxu1 %v7900_v35  ;;  %v7976_v35 = vld [vmem:[%s11335_s1 + $0xd4c] ss:$16 sps:$4 sm:$0xff]   ;;  %v7977_v42 = vld [vmem:[%s11335_s1 + $0xbe8] ss:$16 sps:$4 sm:$0xff]  }
 0x17a   :  { %v7980_v45 = vld [vmem:[%s11335_s1 + $0xd68] ss:$16 sps:$4 sm:$0xff]  }
 0x17b   :  { %3310 = vmatpush1.bf16.msra.mxu0 %v7895_v37  ;;  %v7974_v37 = vld [vmem:[%s11335_s1 + $0xd48] ss:$16 sps:$4 sm:$0xff]  }
 0x17c   :  { %3351 = vmatpush1.bf16.msra.mxu1 %v7898_v39  ;;  %3311 = vmatprep.subr.bf16.mxu0 %v7903_v46  ;;  %v7979_v39 = vld [vmem:[%s11335_s1 + $0xbec] ss:$16 sps:$4 sm:$0xff]  }
 0x17d   :  { %3352 = vmatprep.subr.bf16.mxu1 %v7906_v47  ;;  %v7985_v46 = vld [vmem:[%s11335_s1 + $0xc0c] ss:$16 sps:$4 sm:$0xff]  }
 0x17e   :  { %v7988_v47 = vld [vmem:[%s11335_s1 + $0xd8c] ss:$16 sps:$4 sm:$0xff]  }
 0x17f   :  { %3312 = vmatpush1.bf16.msra.mxu0 %v7901_v50  ;;  %v7983_v50 = vld [vmem:[%s11335_s1 + $0xc08] ss:$16 sps:$4 sm:$0xff]  }
 0x180   :  { %3353 = vmatpush1.bf16.msra.mxu1 %v7904_v55  ;;  %3313 = vmatprep.subr.bf16.mxu0 %v7910_v56  ;;  %v7986_v55 = vld [vmem:[%s11335_s1 + $0xd88] ss:$16 sps:$4 sm:$0xff]   ;;  %v7991_v56 = vld [vmem:[%s11335_s1 + $0xc2c] ss:$16 sps:$4 sm:$0xff]  }
 0x181   :  { %3371 = vmatprep.subr.bf16.mxu1 %v7914_v57  ;;  %v7994_v57 = vld [vmem:[%s11335_s1 + $0xdac] ss:$16 sps:$4 sm:$0xff]  }
 0x183   :  { %3363 = vmatmul.mubr.bf16.vlgmr.msra.gmra.mrb[24].mxu1 %v9868_v54  ;;  %3314 = vmatpush1.bf16.msra.mxu0 %v7908_v44  ;;  %v7989_v44 = vld [vmem:[%s11335_s1 + $0xc28] ss:$16 sps:$4 sm:$0xff]  }
 0x184   :  { %3372 = vmatpush1.bf16.msra.mxu1 %v7912_v58  ;;  %3315 = vmatprep.subr.bf16.mxu0 %v7917_v59  ;;  %v7992_v58 = vld [vmem:[%s11335_s1 + $0xda8] ss:$16 sps:$4 sm:$0xff]   ;;  %v7997_v59 = vld [vmem:[%s11335_s1 + $0xc4c] ss:$16 sps:$4 sm:$0xff]  }
 0x185   :  { %3373 = vmatprep.subr.bf16.mxu1 %v7920_v60  ;;  %v1614_v48 = vpop.f32.mrb[8].mxu0  ;;  %3403 = vmatprep.mubr.bf16.mxu1 %v9724_v3  ;;  %v8000_v60 = vld [vmem:[%s11335_s1 + $0xdcc] ss:$16 sps:$4 sm:$0xff]  }
 0x186   :  { %v1615_v4 = vadd.f32 %v1614_v48, %v9517_v49  ;;  %v1616_v5 = vpop.f32.mrb[9].mxu0  ;;  %v7929_v49 = vld [vmem:[%s11335_s1 + $0xc64] ss:$16 sps:$4 sm:$0xff]  }
 0x187   :  { %v1617_v6 = vadd.f32 %v1616_v5, %v9519_v51  ;;  %v1618_v38 = vpop.f32.mrb[10].mxu0  ;;  %3316 = vmatpush1.bf16.msra.mxu0 %v7915_v62  ;;  %v7932_v51 = vld [vmem:[%s11335_s1 + $0xaec] ss:$16 sps:$4 sm:$0xff]  }
 0x188   :  { %3374 = vmatpush1.bf16.msra.mxu1 %v7918_v63  ;;  %v9901_v8 = vadd.f32 %v1655_v36, %v1615_v4  ;;  %v1619_v61 = vpop.f32.mrb[11].mxu0  ;;  %3317 = vmatprep.subr.bf16.mxu0 %v7923_v53  ;;  %v7971_v36 = vld [vmem:[%s11335_s1 + $0xbc8] ss:$16 sps:$4 sm:$0xff]  }
 0x189   :  { %3375 = vmatprep.subr.bf16.mxu1 %v7926_v1  ;;  %v9909_v3 = vadd.f32 %v1657_v41, %v1617_v6  ;;  %v7982_v41 = vld [vmem:[%s11335_s1 + $0xd6c] ss:$16 sps:$4 sm:$0xff]   ;;  %v7995_v38 = vld [vmem:[%s11335_s1 + $0xc48] ss:$16 sps:$4 sm:$0xff]  }
 0x18b   :  { %3318 = vmatpush1.bf16.msra.mxu0 %v7921_v0  ;;  %v7998_v0 = vld [vmem:[%s11335_s1 + $0xdc8] ss:$16 sps:$4 sm:$0xff]  }
 0x18c   :  { %3376 = vmatpush1.bf16.msra.mxu1 %v7924_v7  ;;  %3319 = vmatprep.subr.bf16.mxu0 %v7929_v49  ;;  %v8006_v49 = vld [vmem:[%s11335_s1 + $0xdec] ss:$16 sps:$4 sm:$0xff]  }
 0x18d   :  { %3377 = vmatprep.subr.bf16.mxu1 %v7932_v51 }
 0x18f   :  { %3320 = vmatpush1.bf16.msra.mxu0 %v7927_v52  ;;  %v8001_v52 = vld [vmem:[%s11335_s1 + $0xc68] ss:$16 sps:$4 sm:$0xff]  }
 0x190   :  { %3378 = vmatpush1.bf16.msra.mxu1 %v7930_v9  ;;  %3412 = vmatprep.subr.bf16.mxu0 %v7940_v12  ;;  %v8004_v9 = vld [vmem:[%s11335_s1 + $0xde8] ss:$16 sps:$4 sm:$0xff]   ;;  %v8012_v12 = vld [vmem:[%s11335_s1 + $0x1004] ss:$16 sps:$4 sm:$0xff]  }
 0x191   :  { %3379 = vmatprep.subr.bf16.mxu1 %v7937_v11  ;;  %v8009_v11 = vld [vmem:[%s11335_s1 + $0xe04] ss:$16 sps:$4 sm:$0xff]  }
 0x192   :  { %3322 = vmatmul.mubr.bf16.vlgmr.msra.gmra.mrb[24].mxu0 %v9920_v10 }
 0x193   :  { %3413 = vmatpush1.bf16.msra.mxu0 %v7938_v14  ;;  %6887 = vmatprep.mubr.msk.bf16.mxu0 %vm836_vm0, %v9715_v2  ;;  %v7958_v2 = vld [vmem:[%s11335_s1 + $0xcec] ss:$16 sps:$4 sm:$0xff]   ;;  %v10089_v14 = vld [vmem:[%s11336_s0 + $0x50] sm:$0xff] }
 0x194   :  { %3380 = vmatpush1.bf16.msra.mxu1 %v7935_v13  ;;  %3414 = vmatprep.subr.bf16.mxu0 %v7946_v16  ;;  %v10084_v13 = vld [vmem:[%s11336_s0 + $0x58] sm:$0xff]  ;;  %v8010_v16 = vld [vmem:[%s11335_s1 + $0x1000] ss:$16 sps:$4 sm:$0xff]  }
 0x195   :  { %3381 = vmatprep.subr.bf16.mxu1 %v7943_v15  ;;  %v8007_v15 = vld [vmem:[%s11335_s1 + $0xe00] ss:$16 sps:$4 sm:$0xff]  }
 0x197   :  { %3415 = vmatpush1.bf16.msra.mxu0 %v7944_v18  ;;  %v8018_v18 = vld [vmem:[%s11335_s1 + $0x1024] ss:$16 sps:$4 sm:$0xff]  }
 0x198   :  { %3382 = vmatpush1.bf16.msra.mxu1 %v7941_v17  ;;  %3416 = vmatprep.subr.bf16.mxu0 %v7952_v20  ;;  %v8015_v17 = vld [vmem:[%s11335_s1 + $0xe24] ss:$16 sps:$4 sm:$0xff]   ;;  %v10109_v20 = vcombine.high %v10089_v14, %v10089_v14 }
 0x199   :  { %3383 = vmatprep.subr.bf16.mxu1 %v7949_v19  ;;  %v10105_v19 = vcombine.high %v10084_v13, %v10084_v13 }
 0x19b   :  { %3417 = vmatpush1.bf16.msra.mxu0 %v7950_v22  ;;  %v8016_v22 = vld [vmem:[%s11335_s1 + $0x1020] ss:$16 sps:$4 sm:$0xff]  }
 0x19c   :  { %3384 = vmatpush1.bf16.msra.mxu1 %v7947_v21  ;;  %3418 = vmatprep.subr.bf16.mxu0 %v7958_v2  ;;  %v8013_v21 = vld [vmem:[%s11335_s1 + $0xe20] ss:$16 sps:$4 sm:$0xff]  }
 0x19d   :  { %3385 = vmatprep.subr.bf16.mxu1 %v7955_v23  ;;  %v8021_v23 = vld [vmem:[%s11335_s1 + $0xe44] ss:$16 sps:$4 sm:$0xff]   ;;  %v8022_v2 = vld [vmem:[%s11335_s1 + $0x1040] ss:$16 sps:$4 sm:$0xff]  }
 0x19f   :  { %3419 = vmatpush1.bf16.msra.mxu0 %v7956_v25  ;;  %v8030_v25 = vld [vmem:[%s11335_s1 + $0x1064] ss:$16 sps:$4 sm:$0xff]  }
 0x1a0   :  { %3386 = vmatpush1.bf16.msra.mxu1 %v7953_v24  ;;  %3420 = vmatprep.subr.bf16.mxu0 %v7964_v27  ;;  %v8027_v24 = vld [vmem:[%s11335_s1 + $0xe64] ss:$16 sps:$4 sm:$0xff]   ;;  %v8028_v27 = vld [vmem:[%s11335_s1 + $0x1060] ss:$16 sps:$4 sm:$0xff]  }
 0x1a1   :  { %3387 = vmatprep.subr.bf16.mxu1 %v7961_v26  ;;  %v8025_v26 = vld [vmem:[%s11335_s1 + $0xe60] ss:$16 sps:$4 sm:$0xff]  }
 0x1a3   :  { %3421 = vmatpush1.bf16.msra.mxu0 %v7962_v29  ;;  %v8036_v29 = vld [vmem:[%s11335_s1 + $0x1084] ss:$16 sps:$4 sm:$0xff]  }
 0x1a4   :  { %3388 = vmatpush1.bf16.msra.mxu1 %v7959_v28  ;;  %3422 = vmatprep.subr.bf16.mxu0 %v7970_v31  ;;  %v8033_v28 = vld [vmem:[%s11335_s1 + $0xe84] ss:$16 sps:$4 sm:$0xff]   ;;  %v8034_v31 = vld [vmem:[%s11335_s1 + $0x1080] ss:$16 sps:$4 sm:$0xff]  }
 0x1a5   :  { %3389 = vmatprep.subr.bf16.mxu1 %v7967_v30  ;;  %v8031_v30 = vld [vmem:[%s11335_s1 + $0xe80] ss:$16 sps:$4 sm:$0xff]  }
 0x1a7   :  { %3423 = vmatpush1.bf16.msra.mxu0 %v7968_v33  ;;  %v8042_v33 = vld [vmem:[%s11335_s1 + $0x10a4] ss:$16 sps:$4 sm:$0xff]  }
 0x1a8   :  { %3390 = vmatpush1.bf16.msra.mxu1 %v7965_v32  ;;  %3424 = vmatprep.subr.bf16.mxu0 %v7976_v35  ;;  %v8039_v32 = vld [vmem:[%s11335_s1 + $0xea4] ss:$16 sps:$4 sm:$0xff]   ;;  %v8040_v35 = vld [vmem:[%s11335_s1 + $0x10a0] ss:$16 sps:$4 sm:$0xff]  }
 0x1a9   :  { %3391 = vmatprep.subr.bf16.mxu1 %v7973_v34  ;;  %v8037_v34 = vld [vmem:[%s11335_s1 + $0xea0] ss:$16 sps:$4 sm:$0xff]  }
 0x1ab   :  { %3425 = vmatpush1.bf16.msra.mxu0 %v7974_v37  ;;  %v8048_v37 = vld [vmem:[%s11335_s1 + $0x10c4] ss:$16 sps:$4 sm:$0xff]  }
 0x1ac   :  { %3392 = vmatpush1.bf16.msra.mxu1 %v7971_v36  ;;  %3426 = vmatprep.subr.bf16.mxu0 %v7982_v41  ;;  %v8045_v36 = vld [vmem:[%s11335_s1 + $0xec4] ss:$16 sps:$4 sm:$0xff]   ;;  %v8046_v41 = vld [vmem:[%s11335_s1 + $0x10c0] ss:$16 sps:$4 sm:$0xff]  }
 0x1ad   :  { %3393 = vmatprep.subr.bf16.mxu1 %v7979_v39  ;;  %v8043_v39 = vld [vmem:[%s11335_s1 + $0xec0] ss:$16 sps:$4 sm:$0xff]  }
 0x1af   :  { %3427 = vmatpush1.bf16.msra.mxu0 %v7980_v45  ;;  %v8054_v45 = vld [vmem:[%s11335_s1 + $0x10e4] ss:$16 sps:$4 sm:$0xff]  }
 0x1b0   :  { %3394 = vmatpush1.bf16.msra.mxu1 %v7977_v42  ;;  %3428 = vmatprep.subr.bf16.mxu0 %v7988_v47  ;;  %v8051_v42 = vld [vmem:[%s11335_s1 + $0xee4] ss:$16 sps:$4 sm:$0xff]   ;;  %v8052_v47 = vld [vmem:[%s11335_s1 + $0x10e0] ss:$16 sps:$4 sm:$0xff]  }
 0x1b1   :  { %3395 = vmatprep.subr.bf16.mxu1 %v7985_v46  ;;  %v8049_v46 = vld [vmem:[%s11335_s1 + $0xee0] ss:$16 sps:$4 sm:$0xff]  }
 0x1b3   :  { %3429 = vmatpush1.bf16.msra.mxu0 %v7986_v55  ;;  %v8060_v55 = vld [vmem:[%s11335_s1 + $0x1104] ss:$16 sps:$4 sm:$0xff]  }
 0x1b4   :  { %3396 = vmatpush1.bf16.msra.mxu1 %v7983_v50  ;;  %3430 = vmatprep.subr.bf16.mxu0 %v7994_v57  ;;  %v8057_v50 = vld [vmem:[%s11335_s1 + $0xf04] ss:$16 sps:$4 sm:$0xff]   ;;  %v8058_v57 = vld [vmem:[%s11335_s1 + $0x1100] ss:$16 sps:$4 sm:$0xff]  }
 0x1b5   :  { %3397 = vmatprep.subr.bf16.mxu1 %v7991_v56  ;;  %v1737_v63 = vpop.f32.mrb[12].mxu0  ;;  %v8055_v56 = vld [vmem:[%s11335_s1 + $0xf00] ss:$16 sps:$4 sm:$0xff]  }
 0x1b6   :  { %v1696_v62 = vpop.f32.mrb[12].mxu1  ;;  %v1739_v48 = vpop.f32.mrb[13].mxu0 }
 0x1b7   :  { %v1697_v53 = vadd.f32 %v1696_v62, %v9672_v40  ;;  %v1698_v1 = vpop.f32.mrb[13].mxu1  ;;  %v1741_v6 = vpop.f32.mrb[14].mxu0  ;;  %3431 = vmatpush1.bf16.msra.mxu0 %v7992_v58  ;;  %v8066_v58 = vld [vmem:[%s11335_s1 + $0x1124] ss:$16 sps:$4 sm:$0xff]  }
 0x1b8   :  { %v1699_v4 = vadd.f32 %v1698_v1, %v9674_v43  ;;  %v1700_v5 = vpop.f32.mrb[14].mxu1  ;;  %3398 = vmatpush1.bf16.msra.mxu1 %v7989_v44  ;;  %v1742_v40 = vpop.f32.mrb[15].mxu0  ;;  %3432 = vmatprep.subr.bf16.mxu0 %v8000_v60  ;;  %v8003_v43 = vld [vmem:[%s11335_s1 + $0xc6c] ss:$16 sps:$4 sm:$0xff]   ;;  %v8063_v44 = vld [vmem:[%s11335_s1 + $0xf24] ss:$16 sps:$4 sm:$0xff]  }
 0x1b9   :  { %v10059_v7 = vadd.f32 %v1737_v63, %v1697_v53  ;;  %v1701_v61 = vpop.f32.mrb[15].mxu1  ;;  %3399 = vmatprep.subr.bf16.mxu1 %v7997_v59  ;;  %v8061_v59 = vld [vmem:[%s11335_s1 + $0xf20] ss:$16 sps:$4 sm:$0xff]   ;;  %v8069_v62 = vld [vmem:[%s11335_s1 + $0xf44] ss:$16 sps:$4 sm:$0xff]  }
 0x1ba   :  { %v10067_v51 = vadd.f32 %v1739_v48, %v1699_v4  ;;  %v8064_v60 = vld [vmem:[%s11335_s1 + $0x1120] ss:$16 sps:$4 sm:$0xff]   ;;  %v8072_v63 = vld [vmem:[%s11335_s1 + $0x1144] ss:$16 sps:$4 sm:$0xff]  }
 0x1bb   :  { %3433 = vmatpush1.bf16.msra.mxu0 %v7998_v0  ;;  %v8067_v4 = vld [vmem:[%s11335_s1 + $0xf40] ss:$16 sps:$4 sm:$0xff]   ;;  %v8078_v0 = vld [vmem:[%s11335_s1 + $0x1164] ss:$16 sps:$4 sm:$0xff]  }
 0x1bc   :  { %3400 = vmatpush1.bf16.msra.mxu1 %v7995_v38  ;;  %3434 = vmatprep.subr.bf16.mxu0 %v8006_v49  ;;  %v8070_v5 = vld [vmem:[%s11335_s1 + $0x1140] ss:$16 sps:$4 sm:$0xff]   ;;  %v8075_v38 = vld [vmem:[%s11335_s1 + $0xf64] ss:$16 sps:$4 sm:$0xff]   ;;  %v8086_v49 = vld [vmem:[%s11335_s1 + $0xe0c] ss:$16 sps:$4 sm:$0xff]  }
 0x1bd   :  { %3401 = vmatprep.subr.bf16.mxu1 %v8003_v43  ;;  %v8073_v61 = vld [vmem:[%s11335_s1 + $0xf60] ss:$16 sps:$4 sm:$0xff]   ;;  %v8082_v43 = vld [vmem:[%s11335_s1 + $0xf84] ss:$16 sps:$4 sm:$0xff]  }
 0x1be   :  { %v8076_v40 = vld [vmem:[%s11335_s1 + $0x1160] ss:$16 sps:$4 sm:$0xff]  }
 0x1bf   :  { %3435 = vmatpush1.bf16.msra.mxu0 %v8004_v9  ;;  %v8080_v9 = vld [vmem:[%s11335_s1 + $0xf80] ss:$16 sps:$4 sm:$0xff]  }
 0x1c0   :  { %3402 = vmatpush1.bf16.msra.mxu1 %v8001_v52  ;;  %4145 = vmatprep.subr.bf16.mxu0 %v8009_v11  ;;  %v10250_v52 = vcombine.low %v10084_v13, %v10084_v13  ;;  %v8084_v11 = vld [vmem:[%s11335_s1 + $0xe08] ss:$16 sps:$4 sm:$0xff]   ;;  %v8092_v13 = vld [vmem:[%s11335_s1 + $0xe2c] ss:$16 sps:$4 sm:$0xff]  }
 0x1c1   :  { %4186 = vmatprep.subr.bf16.mxu1 %v8012_v12  ;;  %v8089_v12 = vld [vmem:[%s11335_s1 + $0xfa4] ss:$16 sps:$4 sm:$0xff]  }
 0x1c2   :  { %3445 = vmatmul.mubr.bf16.vlgmr.msra.gmra.mrb[28].mxu0 %v9868_v54  ;;  %v8024_v54 = vld [vmem:[%s11335_s1 + $0x1044] ss:$16 sps:$4 sm:$0xff]  }
 0x1c3   :  { %3404 = vmatmul.mubr.bf16.vlgmr.msra.gmra.mrb[28].mxu1 %v9920_v10  ;;  %4146 = vmatpush1.bf16.msra.mxu0 %v8007_v15  ;;  %v8019_v10 = vld [vmem:[%s11335_s1 + $0xe40] ss:$16 sps:$4 sm:$0xff]  }
 0x1c4   :  { %4187 = vmatpush1.bf16.msra.mxu1 %v8010_v16  ;;  %4147 = vmatprep.subr.bf16.mxu0 %v8015_v17  ;;  %v8087_v15 = vld [vmem:[%s11335_s1 + $0xfa0] ss:$16 sps:$4 sm:$0xff]   ;;  %v8090_v16 = vld [vmem:[%s11335_s1 + $0xe28] ss:$16 sps:$4 sm:$0xff]   ;;  %v8095_v17 = vld [vmem:[%s11335_s1 + $0xfc4] ss:$16 sps:$4 sm:$0xff]  }
 0x1c5   :  { %4188 = vmatprep.subr.bf16.mxu1 %v8018_v18  ;;  %7004 = vmatprep.mubr.msk.bf16.mxu1 %vm836_vm0, %v10105_v19  ;;  %v8098_v18 = vld [vmem:[%s11335_s1 + $0xe4c] ss:$16 sps:$4 sm:$0xff]  }
 0x1c6   :  { %4177 = vmatprep.mubr.bf16.mxu0 %v10109_v20 }
 0x1c7   :  { %4148 = vmatpush1.bf16.msra.mxu0 %v8013_v21 }
 0x1c8   :  { %4189 = vmatpush1.bf16.msra.mxu1 %v8016_v22  ;;  %4149 = vmatprep.subr.bf16.mxu0 %v8021_v23 }
 0x1c9   :  { %4190 = vmatprep.subr.bf16.mxu1 %v8024_v54 }
 0x1cb   :  { %4150 = vmatpush1.bf16.msra.mxu0 %v8019_v10 }
 0x1cc   :  { %4191 = vmatpush1.bf16.msra.mxu1 %v8022_v2  ;;  %4151 = vmatprep.subr.bf16.mxu0 %v8027_v24  ;;  %v8093_v2 = vld [vmem:[%s11335_s1 + $0xfc0] ss:$16 sps:$4 sm:$0xff]   ;;  %v8096_v24 = vld [vmem:[%s11335_s1 + $0xe48] ss:$16 sps:$4 sm:$0xff]  }
 0x1cd   :  { %4192 = vmatprep.subr.bf16.mxu1 %v8030_v25 }
 0x1cf   :  { %4152 = vmatpush1.bf16.msra.mxu0 %v8025_v26 }
 0x1d0   :  { %4193 = vmatpush1.bf16.msra.mxu1 %v8028_v27  ;;  %4153 = vmatprep.subr.bf16.mxu0 %v8033_v28  ;;  %v8104_v27 = vld [vmem:[%s11335_s1 + $0xe6c] ss:$16 sps:$4 sm:$0xff]  }
 0x1d1   :  { %4194 = vmatprep.subr.bf16.mxu1 %v8036_v29  ;;  %v8102_v29 = vld [vmem:[%s11335_s1 + $0xe68] ss:$16 sps:$4 sm:$0xff]  }
 0x1d3   :  { %4154 = vmatpush1.bf16.msra.mxu0 %v8031_v30  ;;  %v8109_v30 = vld [vmem:[%s11335_s1 + $0xe8c] ss:$16 sps:$4 sm:$0xff]  }
 0x1d4   :  { %4195 = vmatpush1.bf16.msra.mxu1 %v8034_v31  ;;  %4155 = vmatprep.subr.bf16.mxu0 %v8039_v32  ;;  %v10310_v31 = vcombine.low %v10089_v14, %v10089_v14  ;;  %v8107_v32 = vld [vmem:[%s11335_s1 + $0xe88] ss:$16 sps:$4 sm:$0xff]   ;;  %v8118_v14 = vld [vmem:[%s11335_s1 + $0x102c] ss:$16 sps:$4 sm:$0xff]  }
 0x1d5   :  { %4196 = vmatprep.subr.bf16.mxu1 %v8042_v33  ;;  %v8110_v33 = vld [vmem:[%s11335_s1 + $0x1008] ss:$16 sps:$4 sm:$0xff]  }
 0x1d7   :  { %4156 = vmatpush1.bf16.msra.mxu0 %v8037_v34  ;;  %v8115_v34 = vld [vmem:[%s11335_s1 + $0xeac] ss:$16 sps:$4 sm:$0xff]  }
 0x1d8   :  { %4197 = vmatpush1.bf16.msra.mxu1 %v8040_v35  ;;  %4157 = vmatprep.subr.bf16.mxu0 %v8045_v36  ;;  %v8113_v35 = vld [vmem:[%s11335_s1 + $0xea8] ss:$16 sps:$4 sm:$0xff]  }
 0x1d9   :  { %4198 = vmatprep.subr.bf16.mxu1 %v8048_v37  ;;  %v8116_v36 = vld [vmem:[%s11335_s1 + $0x1028] ss:$16 sps:$4 sm:$0xff]   ;;  %v8121_v37 = vld [vmem:[%s11335_s1 + $0xecc] ss:$16 sps:$4 sm:$0xff]  }
 0x1db   :  { %4158 = vmatpush1.bf16.msra.mxu0 %v8043_v39  ;;  %v8124_v39 = vld [vmem:[%s11335_s1 + $0x104c] ss:$16 sps:$4 sm:$0xff]  }
 0x1dc   :  { %4199 = vmatpush1.bf16.msra.mxu1 %v8046_v41  ;;  %4159 = vmatprep.subr.bf16.mxu0 %v8051_v42  ;;  %v8119_v41 = vld [vmem:[%s11335_s1 + $0xec8] ss:$16 sps:$4 sm:$0xff]  }
 0x1dd   :  { %4200 = vmatprep.subr.bf16.mxu1 %v8054_v45  ;;  %v8122_v42 = vld [vmem:[%s11335_s1 + $0x1048] ss:$16 sps:$4 sm:$0xff]   ;;  %v8127_v45 = vld [vmem:[%s11335_s1 + $0xeec] ss:$16 sps:$4 sm:$0xff]  }
 0x1df   :  { %4160 = vmatpush1.bf16.msra.mxu0 %v8049_v46  ;;  %v8125_v46 = vld [vmem:[%s11335_s1 + $0xee8] ss:$16 sps:$4 sm:$0xff]  }
 0x1e0   :  { %4201 = vmatpush1.bf16.msra.mxu1 %v8052_v47  ;;  %4161 = vmatprep.subr.bf16.mxu0 %v8057_v50  ;;  %v8128_v47 = vld [vmem:[%s11335_s1 + $0x1068] ss:$16 sps:$4 sm:$0xff]   ;;  %v8133_v50 = vld [vmem:[%s11335_s1 + $0xf0c] ss:$16 sps:$4 sm:$0xff]  }
 0x1e1   :  { %4202 = vmatprep.subr.bf16.mxu1 %v8060_v55  ;;  %v8136_v55 = vld [vmem:[%s11335_s1 + $0x108c] ss:$16 sps:$4 sm:$0xff]  }
 0x1e3   :  { %4162 = vmatpush1.bf16.msra.mxu0 %v8055_v56  ;;  %v8131_v56 = vld [vmem:[%s11335_s1 + $0xf08] ss:$16 sps:$4 sm:$0xff]  }
 0x1e4   :  { %4203 = vmatpush1.bf16.msra.mxu1 %v8058_v57  ;;  %4163 = vmatprep.subr.bf16.mxu0 %v8063_v44  ;;  %v8134_v57 = vld [vmem:[%s11335_s1 + $0x1088] ss:$16 sps:$4 sm:$0xff]   ;;  %v8139_v44 = vld [vmem:[%s11335_s1 + $0xf2c] ss:$16 sps:$4 sm:$0xff]  }
 0x1e5   :  { %4204 = vmatprep.subr.bf16.mxu1 %v8066_v58  ;;  %v8142_v58 = vld [vmem:[%s11335_s1 + $0x10ac] ss:$16 sps:$4 sm:$0xff]  }
 0x1e6   :  { %v2507_v53 = vpop.f32.mrb[16].mxu1 }
 0x1e7   :  { %v2509_v1 = vpop.f32.mrb[17].mxu1  ;;  %4164 = vmatpush1.bf16.msra.mxu0 %v8061_v59  ;;  %v8137_v59 = vld [vmem:[%s11335_s1 + $0xf28] ss:$16 sps:$4 sm:$0xff]  }
 0x1e8   :  { %v2511_v48 = vpop.f32.mrb[18].mxu1  ;;  %4205 = vmatpush1.bf16.msra.mxu1 %v8064_v60  ;;  %4165 = vmatprep.subr.bf16.mxu0 %v8069_v62  ;;  %v8140_v60 = vld [vmem:[%s11335_s1 + $0x10a8] ss:$16 sps:$4 sm:$0xff]   ;;  %v8145_v62 = vld [vmem:[%s11335_s1 + $0xf4c] ss:$16 sps:$4 sm:$0xff]  }
 0x1e9   :  { %v2512_v6 = vpop.f32.mrb[19].mxu1  ;;  %4206 = vmatprep.subr.bf16.mxu1 %v8072_v63  ;;  %v8148_v63 = vld [vmem:[%s11335_s1 + $0x10cc] ss:$16 sps:$4 sm:$0xff]  }
 0x1ea   :  { %v8151_v48 = vld [vmem:[%s11335_s1 + $0xf6c] ss:$16 sps:$4 sm:$0xff]   ;;  %v8152_v6 = vld [vmem:[%s11335_s1 + $0x10e8] ss:$16 sps:$4 sm:$0xff]  }
 0x1eb   :  { %4166 = vmatpush1.bf16.msra.mxu0 %v8067_v4  ;;  %v8154_v4 = vld [vmem:[%s11335_s1 + $0x10ec] ss:$16 sps:$4 sm:$0xff]  }
 0x1ec   :  { %4207 = vmatpush1.bf16.msra.mxu1 %v8070_v5  ;;  %4167 = vmatprep.subr.bf16.mxu0 %v8075_v38  ;;  %v8149_v5 = vld [vmem:[%s11335_s1 + $0xf68] ss:$16 sps:$4 sm:$0xff]   ;;  %v8157_v38 = vld [vmem:[%s11335_s1 + $0xf8c] ss:$16 sps:$4 sm:$0xff]  }
 0x1ed   :  { %4208 = vmatprep.subr.bf16.mxu1 %v8078_v0  ;;  %v8160_v0 = vld [vmem:[%s11335_s1 + $0x110c] ss:$16 sps:$4 sm:$0xff]  }
 0x1ef   :  { %4168 = vmatpush1.bf16.msra.mxu0 %v8073_v61  ;;  %v8155_v61 = vld [vmem:[%s11335_s1 + $0xf88] ss:$16 sps:$4 sm:$0xff]  }
 0x1f0   :  { %4209 = vmatpush1.bf16.msra.mxu1 %v8076_v40  ;;  %4169 = vmatprep.subr.bf16.mxu0 %v8082_v43  ;;  %v8158_v40 = vld [vmem:[%s11335_s1 + $0x1108] ss:$16 sps:$4 sm:$0xff]   ;;  %v8163_v43 = vld [vmem:[%s11335_s1 + $0xfac] ss:$16 sps:$4 sm:$0xff]  }
 0x1f1   :  { %4227 = vmatprep.subr.bf16.mxu1 %v8086_v49  ;;  %v8166_v49 = vld [vmem:[%s11335_s1 + $0x112c] ss:$16 sps:$4 sm:$0xff]  }
 0x1f3   :  { %4219 = vmatmul.mubr.bf16.vlgmr.msra.gmra.mrb[32].mxu1 %v10250_v52  ;;  %4170 = vmatpush1.bf16.msra.mxu0 %v8080_v9  ;;  %v8161_v9 = vld [vmem:[%s11335_s1 + $0xfa8] ss:$16 sps:$4 sm:$0xff]  }
 0x1f4   :  { %4228 = vmatpush1.bf16.msra.mxu1 %v8084_v11  ;;  %4171 = vmatprep.subr.bf16.mxu0 %v8089_v12  ;;  %v8164_v11 = vld [vmem:[%s11335_s1 + $0x1128] ss:$16 sps:$4 sm:$0xff]   ;;  %v8169_v12 = vld [vmem:[%s11335_s1 + $0xfcc] ss:$16 sps:$4 sm:$0xff]  }
 0x1f5   :  { %4229 = vmatprep.subr.bf16.mxu1 %v8092_v13  ;;  %v2466_v21 = vpop.f32.mrb[16].mxu0  ;;  %4259 = vmatprep.mubr.bf16.mxu1 %v10109_v20  ;;  %v8101_v20 = vld [vmem:[%s11335_s1 + $0xfe4] ss:$16 sps:$4 sm:$0xff]   ;;  %v8172_v13 = vld [vmem:[%s11335_s1 + $0x114c] ss:$16 sps:$4 sm:$0xff]  }
 0x1f6   :  { %v2508_v22 = vadd.f32 %v2507_v53, %v2466_v21  ;;  %v2468_v23 = vpop.f32.mrb[17].mxu0  ;;  %v8143_v53 = vld [vmem:[%s11335_s1 + $0xf48] ss:$16 sps:$4 sm:$0xff]  }
 0x1f7   :  { %v2510_v54 = vadd.f32 %v2509_v1, %v2468_v23  ;;  %v2470_v10 = vpop.f32.mrb[18].mxu0  ;;  %4172 = vmatpush1.bf16.msra.mxu0 %v8087_v15  ;;  %v8146_v1 = vld [vmem:[%s11335_s1 + $0x10c8] ss:$16 sps:$4 sm:$0xff]  }
 0x1f8   :  { %4230 = vmatpush1.bf16.msra.mxu1 %v8090_v16  ;;  %v10285_v25 = vadd.f32 %v2508_v22, %v9901_v8  ;;  %v2471_v26 = vpop.f32.mrb[19].mxu0  ;;  %4173 = vmatprep.subr.bf16.mxu0 %v8095_v17  ;;  %v8099_v8 = vld [vmem:[%s11335_s1 + $0xfe0] ss:$16 sps:$4 sm:$0xff]   ;;  %v8167_v10 = vld [vmem:[%s11335_s1 + $0xfc8] ss:$16 sps:$4 sm:$0xff]  }
 0x1f9   :  { %4231 = vmatprep.subr.bf16.mxu1 %v8098_v18  ;;  %v10294_v28 = vadd.f32 %v2510_v54, %v9909_v3  ;;  %v8112_v3 = vld [vmem:[%s11335_s1 + $0x100c] ss:$16 sps:$4 sm:$0xff]  }
 0x1fb   :  { %4174 = vmatpush1.bf16.msra.mxu0 %v8093_v2  ;;  %v8170_v2 = vld [vmem:[%s11335_s1 + $0x1148] ss:$16 sps:$4 sm:$0xff]  }
 0x1fc   :  { %4232 = vmatpush1.bf16.msra.mxu1 %v8096_v24  ;;  %4175 = vmatprep.subr.bf16.mxu0 %v8101_v20 }
 0x1fd   :  { %4233 = vmatprep.subr.bf16.mxu1 %v8104_v27  ;;  %v8175_v27 = vld [vmem:[%s11335_s1 + $0xfec] ss:$16 sps:$4 sm:$0xff]  }
 0x1ff   :  { %4176 = vmatpush1.bf16.msra.mxu0 %v8099_v8  ;;  %v8178_v8 = vld [vmem:[%s11335_s1 + $0x116c] ss:$16 sps:$4 sm:$0xff]  }
 0x200   :  { %4234 = vmatpush1.bf16.msra.mxu1 %v8102_v29  ;;  %4268 = vmatprep.subr.bf16.mxu0 %v8112_v3  ;;  %v8181_v3 = vld [vmem:[%s11335_s1 + $0x1184] ss:$16 sps:$4 sm:$0xff]  }
 0x201   :  { %4235 = vmatprep.subr.bf16.mxu1 %v8109_v30  ;;  %v8176_v30 = vld [vmem:[%s11335_s1 + $0x1168] ss:$16 sps:$4 sm:$0xff]  }
 0x202   :  { %4178 = vmatmul.mubr.bf16.vlgmr.msra.gmra.mrb[32].mxu0 %v10310_v31 }
 0x203   :  { %4269 = vmatpush1.bf16.msra.mxu0 %v8110_v33  ;;  %7005 = vmatprep.mubr.msk.bf16.mxu0 %vm836_vm0, %v10105_v19  ;;  %v8130_v19 = vld [vmem:[%s11335_s1 + $0x106c] ss:$16 sps:$4 sm:$0xff]   ;;  %v8182_v33 = vld [vmem:[%s11335_s1 + $0x1380] ss:$16 sps:$4 sm:$0xff]  }
 0x204   :  { %4236 = vmatpush1.bf16.msra.mxu1 %v8107_v32  ;;  %4270 = vmatprep.subr.bf16.mxu0 %v8118_v14  ;;  %v8179_v32 = vld [vmem:[%s11335_s1 + $0x1180] ss:$16 sps:$4 sm:$0xff]   ;;  %v8190_v14 = vld [vmem:[%s11335_s1 + $0x13a4] ss:$16 sps:$4 sm:$0xff]  }
 0x205   :  { %4237 = vmatprep.subr.bf16.mxu1 %v8115_v34  ;;  %v8187_v34 = vld [vmem:[%s11335_s1 + $0x11a4] ss:$16 sps:$4 sm:$0xff]  }
 0x207   :  { %4271 = vmatpush1.bf16.msra.mxu0 %v8116_v36  ;;  %v10485_v36 = vld [vmem:[%s11336_s0 + $0x70] ss:$0 sps:$4 sm:$0xff]  }
 0x208   :  { %4238 = vmatpush1.bf16.msra.mxu1 %v8113_v35  ;;  %4272 = vmatprep.subr.bf16.mxu0 %v8124_v39  ;;  %v10480_v35 = vld [vmem:[%s11336_s0 + $0x68] sm:$0xff]  ;;  %v8185_v39 = vld [vmem:[%s11335_s1 + $0x11a0] ss:$16 sps:$4 sm:$0xff]  }
 0x209   :  { %4239 = vmatprep.subr.bf16.mxu1 %v8121_v37  ;;  %v10489_v37 = vcombine.low %v10480_v35, %v10480_v35 }
 0x20b   :  { %4273 = vmatpush1.bf16.msra.mxu0 %v8122_v42  ;;  %v8193_v42 = vld [vmem:[%s11335_s1 + $0x11c4] ss:$16 sps:$4 sm:$0xff]  }
 0x20c   :  { %4240 = vmatpush1.bf16.msra.mxu1 %v8119_v41  ;;  %4274 = vmatprep.subr.bf16.mxu0 %v8130_v19  ;;  %v8188_v41 = vld [vmem:[%s11335_s1 + $0x13a0] ss:$16 sps:$4 sm:$0xff]   ;;  %v8199_v19 = vld [vmem:[%s11335_s1 + $0x11e4] ss:$16 sps:$4 sm:$0xff]  }
 0x20d   :  { %4241 = vmatprep.subr.bf16.mxu1 %v8127_v45  ;;  %v8194_v45 = vld [vmem:[%s11335_s1 + $0x13c0] ss:$16 sps:$4 sm:$0xff]  }
 0x20f   :  { %4275 = vmatpush1.bf16.msra.mxu0 %v8128_v47  ;;  %v8197_v47 = vld [vmem:[%s11335_s1 + $0x11e0] ss:$16 sps:$4 sm:$0xff]  }
 0x210   :  { %4242 = vmatpush1.bf16.msra.mxu1 %v8125_v46  ;;  %4276 = vmatprep.subr.bf16.mxu0 %v8136_v55  ;;  %v8202_v46 = vld [vmem:[%s11335_s1 + $0x13e4] ss:$16 sps:$4 sm:$0xff]  }
 0x211   :  { %4243 = vmatprep.subr.bf16.mxu1 %v8133_v50  ;;  %v8200_v50 = vld [vmem:[%s11335_s1 + $0x13e0] ss:$16 sps:$4 sm:$0xff]   ;;  %v8205_v55 = vld [vmem:[%s11335_s1 + $0x1204] ss:$16 sps:$4 sm:$0xff]  }
 0x213   :  { %4277 = vmatpush1.bf16.msra.mxu0 %v8134_v57  ;;  %v8203_v57 = vld [vmem:[%s11335_s1 + $0x1200] ss:$16 sps:$4 sm:$0xff]  }
 0x214   :  { %4244 = vmatpush1.bf16.msra.mxu1 %v8131_v56  ;;  %4278 = vmatprep.subr.bf16.mxu0 %v8142_v58  ;;  %v8208_v56 = vld [vmem:[%s11335_s1 + $0x1404] ss:$16 sps:$4 sm:$0xff]  }
 0x215   :  { %4245 = vmatprep.subr.bf16.mxu1 %v8139_v44  ;;  %v8206_v44 = vld [vmem:[%s11335_s1 + $0x1400] ss:$16 sps:$4 sm:$0xff]   ;;  %v8211_v58 = vld [vmem:[%s11335_s1 + $0x1224] ss:$16 sps:$4 sm:$0xff]  }
 0x217   :  { %4279 = vmatpush1.bf16.msra.mxu0 %v8140_v60  ;;  %v8209_v60 = vld [vmem:[%s11335_s1 + $0x1220] ss:$16 sps:$4 sm:$0xff]  }
 0x218   :  { %4246 = vmatpush1.bf16.msra.mxu1 %v8137_v59  ;;  %4280 = vmatprep.subr.bf16.mxu0 %v8148_v63  ;;  %v8214_v59 = vld [vmem:[%s11335_s1 + $0x1424] ss:$16 sps:$4 sm:$0xff]  }
 0x219   :  { %4247 = vmatprep.subr.bf16.mxu1 %v8145_v62  ;;  %v8212_v62 = vld [vmem:[%s11335_s1 + $0x1420] ss:$16 sps:$4 sm:$0xff]   ;;  %v8217_v63 = vld [vmem:[%s11335_s1 + $0x1244] ss:$16 sps:$4 sm:$0xff]  }
 0x21b   :  { %4281 = vmatpush1.bf16.msra.mxu0 %v8146_v1  ;;  %v8215_v1 = vld [vmem:[%s11335_s1 + $0x1240] ss:$16 sps:$4 sm:$0xff]  }
 0x21c   :  { %4248 = vmatpush1.bf16.msra.mxu1 %v8143_v53  ;;  %4282 = vmatprep.subr.bf16.mxu0 %v8154_v4  ;;  %v8220_v53 = vld [vmem:[%s11335_s1 + $0x1444] ss:$16 sps:$4 sm:$0xff]  }
 0x21d   :  { %4249 = vmatprep.subr.bf16.mxu1 %v8151_v48  ;;  %v8218_v48 = vld [vmem:[%s11335_s1 + $0x1440] ss:$16 sps:$4 sm:$0xff]   ;;  %v8223_v4 = vld [vmem:[%s11335_s1 + $0x1264] ss:$16 sps:$4 sm:$0xff]  }
 0x21f   :  { %4283 = vmatpush1.bf16.msra.mxu0 %v8152_v6  ;;  %v8221_v6 = vld [vmem:[%s11335_s1 + $0x1260] ss:$16 sps:$4 sm:$0xff]  }
 0x220   :  { %4250 = vmatpush1.bf16.msra.mxu1 %v8149_v5  ;;  %4284 = vmatprep.subr.bf16.mxu0 %v8160_v0  ;;  %v8226_v5 = vld [vmem:[%s11335_s1 + $0x1464] ss:$16 sps:$4 sm:$0xff]  }
 0x221   :  { %4251 = vmatprep.subr.bf16.mxu1 %v8157_v38  ;;  %v8224_v38 = vld [vmem:[%s11335_s1 + $0x1460] ss:$16 sps:$4 sm:$0xff]   ;;  %v8229_v0 = vld [vmem:[%s11335_s1 + $0x1284] ss:$16 sps:$4 sm:$0xff]  }
 0x223   :  { %4285 = vmatpush1.bf16.msra.mxu0 %v8158_v40  ;;  %v8227_v40 = vld [vmem:[%s11335_s1 + $0x1280] ss:$16 sps:$4 sm:$0xff]  }
 0x224   :  { %4252 = vmatpush1.bf16.msra.mxu1 %v8155_v61  ;;  %4286 = vmatprep.subr.bf16.mxu0 %v8166_v49  ;;  %v8232_v61 = vld [vmem:[%s11335_s1 + $0x1484] ss:$16 sps:$4 sm:$0xff]  }
 0x225   :  { %4253 = vmatprep.subr.bf16.mxu1 %v8163_v43  ;;  %v2589_v16 = vpop.f32.mrb[20].mxu0  ;;  %v8230_v43 = vld [vmem:[%s11335_s1 + $0x1480] ss:$16 sps:$4 sm:$0xff]   ;;  %v8235_v49 = vld [vmem:[%s11335_s1 + $0x12a4] ss:$16 sps:$4 sm:$0xff]  }
 0x226   :  { %v2548_v15 = vpop.f32.mrb[20].mxu1  ;;  %v2591_v21 = vpop.f32.mrb[21].mxu0 }
 0x227   :  { %v2590_v17 = vadd.f32 %v2589_v16, %v2548_v15  ;;  %v2550_v18 = vpop.f32.mrb[21].mxu1  ;;  %v2593_v54 = vpop.f32.mrb[22].mxu0  ;;  %4287 = vmatpush1.bf16.msra.mxu0 %v8164_v11  ;;  %v8233_v11 = vld [vmem:[%s11335_s1 + $0x12a0] ss:$16 sps:$4 sm:$0xff]   ;;  %v8244_v15 = vld [vmem:[%s11335_s1 + $0x14c4] ss:$16 sps:$4 sm:$0xff]  }
 0x228   :  { %v2592_v22 = vadd.f32 %v2591_v21, %v2550_v18  ;;  %v2552_v23 = vpop.f32.mrb[22].mxu1  ;;  %4254 = vmatpush1.bf16.msra.mxu1 %v8161_v9  ;;  %v2594_v20 = vpop.f32.mrb[23].mxu0  ;;  %4288 = vmatprep.subr.bf16.mxu0 %v8172_v13  ;;  %v8238_v9 = vld [vmem:[%s11335_s1 + $0x14a4] ss:$16 sps:$4 sm:$0xff]   ;;  %v8239_v21 = vld [vmem:[%s11335_s1 + $0x12c0] ss:$16 sps:$4 sm:$0xff]  }
 0x229   :  { %v10442_v24 = vadd.f32 %v2590_v17, %v10059_v7  ;;  %v2553_v26 = vpop.f32.mrb[23].mxu1  ;;  %4255 = vmatprep.subr.bf16.mxu1 %v8169_v12  ;;  %v8173_v7 = vld [vmem:[%s11335_s1 + $0xfe8] ss:$16 sps:$4 sm:$0xff]   ;;  %v8236_v12 = vld [vmem:[%s11335_s1 + $0x14a0] ss:$16 sps:$4 sm:$0xff]  }
 0x22a   :  { %v10451_v29 = vadd.f32 %v2592_v22, %v10067_v51  ;;  %v8184_v51 = vld [vmem:[%s11335_s1 + $0x1384] ss:$16 sps:$4 sm:$0xff]   ;;  %v8242_v22 = vld [vmem:[%s11335_s1 + $0x14c0] ss:$16 sps:$4 sm:$0xff]  }
 0x22b   :  { %4289 = vmatpush1.bf16.msra.mxu0 %v8170_v2  ;;  %v8241_v13 = vld [vmem:[%s11335_s1 + $0x12c4] ss:$16 sps:$4 sm:$0xff]   ;;  %v8245_v2 = vld [vmem:[%s11335_s1 + $0x12e0] ss:$16 sps:$4 sm:$0xff]  }
 0x22c   :  { %4256 = vmatpush1.bf16.msra.mxu1 %v8167_v10  ;;  %4290 = vmatprep.subr.bf16.mxu0 %v8178_v8  ;;  %v8247_v54 = vld [vmem:[%s11335_s1 + $0x12e4] ss:$16 sps:$4 sm:$0xff]   ;;  %v8248_v26 = vld [vmem:[%s11335_s1 + $0x14e0] ss:$16 sps:$4 sm:$0xff]   ;;  %v10630_v8 = vcombine.high %v10480_v35, %v10480_v35 }
 0x22d   :  { %4257 = vmatprep.subr.bf16.mxu1 %v8175_v27  ;;  %v8250_v10 = vld [vmem:[%s11335_s1 + $0x14e4] ss:$16 sps:$4 sm:$0xff]   ;;  %v8258_v27 = vld [vmem:[%s11335_s1 + $0x118c] ss:$16 sps:$4 sm:$0xff]  }
 0x22e   :  { %v8254_v20 = vld [vmem:[%s11335_s1 + $0x1304] ss:$16 sps:$4 sm:$0xff]  }
 0x22f   :  { %4291 = vmatpush1.bf16.msra.mxu0 %v8176_v30  ;;  %v8256_v30 = vld [vmem:[%s11335_s1 + $0x1188] ss:$16 sps:$4 sm:$0xff]  }
 0x230   :  { %4258 = vmatpush1.bf16.msra.mxu1 %v8173_v7  ;;  %5002 = vmatprep.subr.bf16.mxu0 %v8181_v3  ;;  %v8252_v7 = vld [vmem:[%s11335_s1 + $0x1300] ss:$16 sps:$4 sm:$0xff]   ;;  %v8261_v3 = vld [vmem:[%s11335_s1 + $0x1324] ss:$16 sps:$4 sm:$0xff]  }
 0x231   :  { %5043 = vmatprep.subr.bf16.mxu1 %v8184_v51  ;;  %v8264_v51 = vld [vmem:[%s11335_s1 + $0x11ac] ss:$16 sps:$4 sm:$0xff]  }
 0x232   :  { %4301 = vmatmul.mubr.bf16.vlgmr.msra.gmra.mrb[36].mxu0 %v10250_v52  ;;  %v8196_v52 = vld [vmem:[%s11335_s1 + $0x13c4] ss:$16 sps:$4 sm:$0xff]  }
 0x233   :  { %4260 = vmatmul.mubr.bf16.vlgmr.msra.gmra.mrb[36].mxu1 %v10310_v31  ;;  %5003 = vmatpush1.bf16.msra.mxu0 %v8179_v32  ;;  %v8191_v31 = vld [vmem:[%s11335_s1 + $0x11c0] ss:$16 sps:$4 sm:$0xff]  }
 0x234   :  { %5044 = vmatpush1.bf16.msra.mxu1 %v8182_v33  ;;  %5004 = vmatprep.subr.bf16.mxu0 %v8187_v34  ;;  %v8259_v32 = vld [vmem:[%s11335_s1 + $0x1320] ss:$16 sps:$4 sm:$0xff]   ;;  %v8262_v33 = vld [vmem:[%s11335_s1 + $0x11a8] ss:$16 sps:$4 sm:$0xff]   ;;  %v8267_v34 = vld [vmem:[%s11335_s1 + $0x1344] ss:$16 sps:$4 sm:$0xff]  }
 0x235   :  { %5045 = vmatprep.subr.bf16.mxu1 %v8190_v14  ;;  %7122 = vmatprep.mubr.msk.bf16.mxu1 %vm836_vm0, %v10485_v36  ;;  %v8270_v14 = vld [vmem:[%s11335_s1 + $0x11cc] ss:$16 sps:$4 sm:$0xff]  }
 0x236   :  { %5034 = vmatprep.mubr.bf16.mxu0 %v10489_v37 }
 0x237   :  { %5005 = vmatpush1.bf16.msra.mxu0 %v8185_v39 }
 0x238   :  { %5046 = vmatpush1.bf16.msra.mxu1 %v8188_v41  ;;  %5006 = vmatprep.subr.bf16.mxu0 %v8193_v42 }
 0x239   :  { %5047 = vmatprep.subr.bf16.mxu1 %v8196_v52 }
 0x23b   :  { %5007 = vmatpush1.bf16.msra.mxu0 %v8191_v31  ;;  %v8265_v31 = vld [vmem:[%s11335_s1 + $0x1340] ss:$16 sps:$4 sm:$0xff]  }
 0x23c   :  { %5048 = vmatpush1.bf16.msra.mxu1 %v8194_v45  ;;  %5008 = vmatprep.subr.bf16.mxu0 %v8199_v19  ;;  %v8268_v45 = vld [vmem:[%s11335_s1 + $0x11c8] ss:$16 sps:$4 sm:$0xff]  }
 0x23d   :  { %5049 = vmatprep.subr.bf16.mxu1 %v8202_v46 }
 0x23f   :  { %5009 = vmatpush1.bf16.msra.mxu0 %v8197_v47  ;;  %v8276_v47 = vld [vmem:[%s11335_s1 + $0x11ec] ss:$16 sps:$4 sm:$0xff]  }
 0x240   :  { %5050 = vmatpush1.bf16.msra.mxu1 %v8200_v50  ;;  %5010 = vmatprep.subr.bf16.mxu0 %v8205_v55  ;;  %v8274_v55 = vld [vmem:[%s11335_s1 + $0x11e8] ss:$16 sps:$4 sm:$0xff]  }
 0x241   :  { %5051 = vmatprep.subr.bf16.mxu1 %v8208_v56  ;;  %v8281_v56 = vld [vmem:[%s11335_s1 + $0x120c] ss:$16 sps:$4 sm:$0xff]  }
 0x243   :  { %5011 = vmatpush1.bf16.msra.mxu0 %v8203_v57  ;;  %v10691_v57 = vld [vmem:[%s11336_s0 + $0x64] ss:$0 sps:$4 sm:$0xff]  }
 0x244   :  { %5052 = vmatpush1.bf16.msra.mxu1 %v8206_v44  ;;  %5012 = vmatprep.subr.bf16.mxu0 %v8211_v58  ;;  %v8279_v44 = vld [vmem:[%s11335_s1 + $0x1208] ss:$16 sps:$4 sm:$0xff]  }
 0x245   :  { %5053 = vmatprep.subr.bf16.mxu1 %v8214_v59  ;;  %v8282_v58 = vld [vmem:[%s11335_s1 + $0x1388] ss:$16 sps:$4 sm:$0xff]   ;;  %v8287_v59 = vld [vmem:[%s11335_s1 + $0x122c] ss:$16 sps:$4 sm:$0xff]  }
 0x247   :  { %5013 = vmatpush1.bf16.msra.mxu0 %v8209_v60  ;;  %v8290_v60 = vld [vmem:[%s11335_s1 + $0x13ac] ss:$16 sps:$4 sm:$0xff]  }
 0x248   :  { %5054 = vmatpush1.bf16.msra.mxu1 %v8212_v62  ;;  %5014 = vmatprep.subr.bf16.mxu0 %v8217_v63  ;;  %v8285_v62 = vld [vmem:[%s11335_s1 + $0x1228] ss:$16 sps:$4 sm:$0xff]  }
 0x249   :  { %5055 = vmatprep.subr.bf16.mxu1 %v8220_v53  ;;  %v8288_v63 = vld [vmem:[%s11335_s1 + $0x13a8] ss:$16 sps:$4 sm:$0xff]   ;;  %v8293_v53 = vld [vmem:[%s11335_s1 + $0x124c] ss:$16 sps:$4 sm:$0xff]  }
 0x24b   :  { %5015 = vmatpush1.bf16.msra.mxu0 %v8215_v1  ;;  %v8296_v1 = vld [vmem:[%s11335_s1 + $0x13cc] ss:$16 sps:$4 sm:$0xff]  }
 0x24c   :  { %5056 = vmatpush1.bf16.msra.mxu1 %v8218_v48  ;;  %5016 = vmatprep.subr.bf16.mxu0 %v8223_v4  ;;  %v8291_v48 = vld [vmem:[%s11335_s1 + $0x1248] ss:$16 sps:$4 sm:$0xff]  }
 0x24d   :  { %5057 = vmatprep.subr.bf16.mxu1 %v8226_v5  ;;  %v8294_v4 = vld [vmem:[%s11335_s1 + $0x13c8] ss:$16 sps:$4 sm:$0xff]   ;;  %v8299_v5 = vld [vmem:[%s11335_s1 + $0x126c] ss:$16 sps:$4 sm:$0xff]  }
 0x24f   :  { %5017 = vmatpush1.bf16.msra.mxu0 %v8221_v6  ;;  %v8297_v6 = vld [vmem:[%s11335_s1 + $0x1268] ss:$16 sps:$4 sm:$0xff]  }
 0x250   :  { %5058 = vmatpush1.bf16.msra.mxu1 %v8224_v38  ;;  %5018 = vmatprep.subr.bf16.mxu0 %v8229_v0  ;;  %v8300_v38 = vld [vmem:[%s11335_s1 + $0x13e8] ss:$16 sps:$4 sm:$0xff]   ;;  %v8305_v0 = vld [vmem:[%s11335_s1 + $0x128c] ss:$16 sps:$4 sm:$0xff]  }
 0x251   :  { %5059 = vmatprep.subr.bf16.mxu1 %v8232_v61  ;;  %v8308_v61 = vld [vmem:[%s11335_s1 + $0x140c] ss:$16 sps:$4 sm:$0xff]  }
 0x253   :  { %5019 = vmatpush1.bf16.msra.mxu0 %v8227_v40  ;;  %v8303_v40 = vld [vmem:[%s11335_s1 + $0x1288] ss:$16 sps:$4 sm:$0xff]  }
 0x254   :  { %5060 = vmatpush1.bf16.msra.mxu1 %v8230_v43  ;;  %5020 = vmatprep.subr.bf16.mxu0 %v8235_v49  ;;  %v8306_v43 = vld [vmem:[%s11335_s1 + $0x1408] ss:$16 sps:$4 sm:$0xff]   ;;  %v8311_v49 = vld [vmem:[%s11335_s1 + $0x12ac] ss:$16 sps:$4 sm:$0xff]  }
 0x255   :  { %5061 = vmatprep.subr.bf16.mxu1 %v8238_v9  ;;  %v8314_v9 = vld [vmem:[%s11335_s1 + $0x142c] ss:$16 sps:$4 sm:$0xff]  }
 0x256   :  { %v3364_v16 = vpop.f32.mrb[24].mxu1 }
 0x257   :  { %v3366_v17 = vpop.f32.mrb[25].mxu1  ;;  %5021 = vmatpush1.bf16.msra.mxu0 %v8233_v11  ;;  %v8309_v11 = vld [vmem:[%s11335_s1 + $0x12a8] ss:$16 sps:$4 sm:$0xff]  }
 0x258   :  { %v3368_v18 = vpop.f32.mrb[26].mxu1  ;;  %5062 = vmatpush1.bf16.msra.mxu1 %v8236_v12  ;;  %5022 = vmatprep.subr.bf16.mxu0 %v8241_v13  ;;  %v8312_v12 = vld [vmem:[%s11335_s1 + $0x1428] ss:$16 sps:$4 sm:$0xff]   ;;  %v8317_v13 = vld [vmem:[%s11335_s1 + $0x12cc] ss:$16 sps:$4 sm:$0xff]  }
 0x259   :  { %v3369_v23 = vpop.f32.mrb[27].mxu1  ;;  %5063 = vmatprep.subr.bf16.mxu1 %v8244_v15  ;;  %v8320_v15 = vld [vmem:[%s11335_s1 + $0x144c] ss:$16 sps:$4 sm:$0xff]  }
 0x25a   :  { %v8323_v18 = vld [vmem:[%s11335_s1 + $0x12ec] ss:$16 sps:$4 sm:$0xff]   ;;  %v8324_v23 = vld [vmem:[%s11335_s1 + $0x1468] ss:$16 sps:$4 sm:$0xff]  }
 0x25b   :  { %5023 = vmatpush1.bf16.msra.mxu0 %v8239_v21  ;;  %v8326_v21 = vld [vmem:[%s11335_s1 + $0x146c] ss:$16 sps:$4 sm:$0xff]  }
 0x25c   :  { %5064 = vmatpush1.bf16.msra.mxu1 %v8242_v22  ;;  %5024 = vmatprep.subr.bf16.mxu0 %v8247_v54  ;;  %v8321_v22 = vld [vmem:[%s11335_s1 + $0x12e8] ss:$16 sps:$4 sm:$0xff]   ;;  %v8329_v54 = vld [vmem:[%s11335_s1 + $0x130c] ss:$16 sps:$4 sm:$0xff]  }
 0x25d   :  { %5065 = vmatprep.subr.bf16.mxu1 %v8250_v10  ;;  %v8332_v10 = vld [vmem:[%s11335_s1 + $0x148c] ss:$16 sps:$4 sm:$0xff]  }
 0x25f   :  { %5025 = vmatpush1.bf16.msra.mxu0 %v8245_v2  ;;  %v8327_v2 = vld [vmem:[%s11335_s1 + $0x1308] ss:$16 sps:$4 sm:$0xff]  }
 0x260   :  { %5066 = vmatpush1.bf16.msra.mxu1 %v8248_v26  ;;  %5026 = vmatprep.subr.bf16.mxu0 %v8254_v20  ;;  %v8330_v26 = vld [vmem:[%s11335_s1 + $0x1488] ss:$16 sps:$4 sm:$0xff]   ;;  %v8335_v20 = vld [vmem:[%s11335_s1 + $0x132c] ss:$16 sps:$4 sm:$0xff]  }
 0x261   :  { %5084 = vmatprep.subr.bf16.mxu1 %v8258_v27  ;;  %v8338_v27 = vld [vmem:[%s11335_s1 + $0x14ac] ss:$16 sps:$4 sm:$0xff]  }
 0x263   :  { %5076 = vmatmul.mubr.bf16.vlgmr.msra.gmra.mrb[40].mxu1 %v10630_v8  ;;  %5027 = vmatpush1.bf16.msra.mxu0 %v8252_v7  ;;  %v8333_v7 = vld [vmem:[%s11335_s1 + $0x1328] ss:$16 sps:$4 sm:$0xff]  }
 0x264   :  { %5085 = vmatpush1.bf16.msra.mxu1 %v8256_v30  ;;  %5028 = vmatprep.subr.bf16.mxu0 %v8261_v3  ;;  %v8336_v30 = vld [vmem:[%s11335_s1 + $0x14a8] ss:$16 sps:$4 sm:$0xff]   ;;  %v8341_v3 = vld [vmem:[%s11335_s1 + $0x134c] ss:$16 sps:$4 sm:$0xff]  }
 0x265   :  { %5086 = vmatprep.subr.bf16.mxu1 %v8264_v51  ;;  %v3323_v35 = vpop.f32.mrb[24].mxu0  ;;  %5116 = vmatprep.mubr.bf16.mxu1 %v10489_v37  ;;  %v8273_v37 = vld [vmem:[%s11335_s1 + $0x1364] ss:$16 sps:$4 sm:$0xff]   ;;  %v8344_v51 = vld [vmem:[%s11335_s1 + $0x14cc] ss:$16 sps:$4 sm:$0xff]  }
 0x266   :  { %v3365_v39 = vadd.f32 %v3364_v16, %v3323_v35  ;;  %v3325_v41 = vpop.f32.mrb[25].mxu0  ;;  %v8315_v16 = vld [vmem:[%s11335_s1 + $0x12c8] ss:$16 sps:$4 sm:$0xff]  }
 0x267   :  { %v3367_v42 = vadd.f32 %v3366_v17, %v3325_v41  ;;  %v3327_v52 = vpop.f32.mrb[26].mxu0  ;;  %5029 = vmatpush1.bf16.msra.mxu0 %v8259_v32  ;;  %v8318_v17 = vld [vmem:[%s11335_s1 + $0x1448] ss:$16 sps:$4 sm:$0xff]  }
 0x268   :  { %5087 = vmatpush1.bf16.msra.mxu1 %v8262_v33  ;;  %v10665_v19 = vadd.f32 %v3365_v39, %v10285_v25  ;;  %v3328_v46 = vpop.f32.mrb[27].mxu0  ;;  %5030 = vmatprep.subr.bf16.mxu0 %v8267_v34  ;;  %v8271_v25 = vld [vmem:[%s11335_s1 + $0x1360] ss:$16 sps:$4 sm:$0xff]   ;;  %v8339_v52 = vld [vmem:[%s11335_s1 + $0x1348] ss:$16 sps:$4 sm:$0xff]  }
 0x269   :  { %5088 = vmatprep.subr.bf16.mxu1 %v8270_v14  ;;  %v10674_v50 = vadd.f32 %v3367_v42, %v10294_v28  ;;  %v8284_v28 = vld [vmem:[%s11335_s1 + $0x138c] ss:$16 sps:$4 sm:$0xff]  }
 0x26b   :  { %5031 = vmatpush1.bf16.msra.mxu0 %v8265_v31  ;;  %v8342_v31 = vld [vmem:[%s11335_s1 + $0x14c8] ss:$16 sps:$4 sm:$0xff]  }
 0x26c   :  { %5089 = vmatpush1.bf16.msra.mxu1 %v8268_v45  ;;  %5032 = vmatprep.subr.bf16.mxu0 %v8273_v37 }
 0x26d   :  { %5090 = vmatprep.subr.bf16.mxu1 %v8276_v47  ;;  %v8347_v47 = vld [vmem:[%s11335_s1 + $0x136c] ss:$16 sps:$4 sm:$0xff]  }
 0x26f   :  { %5033 = vmatpush1.bf16.msra.mxu0 %v8271_v25  ;;  %v8350_v25 = vld [vmem:[%s11335_s1 + $0x14ec] ss:$16 sps:$4 sm:$0xff]  }
 0x270   :  { %5091 = vmatpush1.bf16.msra.mxu1 %v8274_v55  ;;  %5125 = vmatprep.subr.bf16.mxu0 %v8284_v28  ;;  %v8353_v28 = vld [vmem:[%s11335_s1 + $0x1504] ss:$16 sps:$4 sm:$0xff]  }
 0x271   :  { %5092 = vmatprep.subr.bf16.mxu1 %v8281_v56  ;;  %v8348_v56 = vld [vmem:[%s11335_s1 + $0x14e8] ss:$16 sps:$4 sm:$0xff]  }
 0x272   :  { %5035 = vmatmul.mubr.bf16.vlgmr.msra.gmra.mrb[40].mxu0 %v10691_v57 }
 0x273   :  { %5126 = vmatpush1.bf16.msra.mxu0 %v8282_v58  ;;  %7123 = vmatprep.mubr.msk.bf16.mxu0 %vm836_vm0, %v10485_v36  ;;  %v8302_v36 = vld [vmem:[%s11335_s1 + $0x13ec] ss:$16 sps:$4 sm:$0xff]  }
 0x274   :  { %5093 = vmatpush1.bf16.msra.mxu1 %v8279_v44  ;;  %5127 = vmatprep.subr.bf16.mxu0 %v8290_v60  ;;  %v10849_v44 = vld [vmem:[%s11336_s0 + $0x80] sm:$0xff]  ;;  %v10854_v58 = vld [vmem:[%s11336_s0 + $0x78] sm:$0xff] }
 0x275   :  { %5094 = vmatprep.subr.bf16.mxu1 %v8287_v59  ;;  %v8351_v59 = vld [vmem:[%s11335_s1 + $0x1500] ss:$16 sps:$4 sm:$0xff]  }
 0x276   :  { %v8354_v60 = vld [vmem:[%s11335_s1 + $0x1700] ss:$16 sps:$4 sm:$0xff]  }
 0x277   :  { %5128 = vmatpush1.bf16.msra.mxu0 %v8288_v63  ;;  %v8362_v63 = vld [vmem:[%s11335_s1 + $0x1724] ss:$16 sps:$4 sm:$0xff]  }
 0x278   :  { %5095 = vmatpush1.bf16.msra.mxu1 %v8285_v62  ;;  %5129 = vmatprep.subr.bf16.mxu0 %v8296_v1  ;;  %v8359_v62 = vld [vmem:[%s11335_s1 + $0x1524] ss:$16 sps:$4 sm:$0xff]   ;;  %v10874_v1 = vcombine.high %v10854_v58, %v10854_v58 }
 0x279   :  { %5096 = vmatprep.subr.bf16.mxu1 %v8293_v53  ;;  %v10870_v53 = vcombine.high %v10849_v44, %v10849_v44 }
 0x27b   :  { %5130 = vmatpush1.bf16.msra.mxu0 %v8294_v4  ;;  %v8360_v4 = vld [vmem:[%s11335_s1 + $0x1720] ss:$16 sps:$4 sm:$0xff]  }
 0x27c   :  { %5097 = vmatpush1.bf16.msra.mxu1 %v8291_v48  ;;  %5131 = vmatprep.subr.bf16.mxu0 %v8302_v36  ;;  %v8357_v48 = vld [vmem:[%s11335_s1 + $0x1520] ss:$16 sps:$4 sm:$0xff]  }
 0x27d   :  { %5098 = vmatprep.subr.bf16.mxu1 %v8299_v5  ;;  %v8365_v5 = vld [vmem:[%s11335_s1 + $0x1544] ss:$16 sps:$4 sm:$0xff]   ;;  %v8366_v36 = vld [vmem:[%s11335_s1 + $0x1740] ss:$16 sps:$4 sm:$0xff]  }
 0x27f   :  { %5132 = vmatpush1.bf16.msra.mxu0 %v8300_v38  ;;  %v8374_v38 = vld [vmem:[%s11335_s1 + $0x1764] ss:$16 sps:$4 sm:$0xff]  }
 0x280   :  { %5099 = vmatpush1.bf16.msra.mxu1 %v8297_v6  ;;  %5133 = vmatprep.subr.bf16.mxu0 %v8308_v61  ;;  %v8371_v6 = vld [vmem:[%s11335_s1 + $0x1564] ss:$16 sps:$4 sm:$0xff]   ;;  %v8372_v61 = vld [vmem:[%s11335_s1 + $0x1760] ss:$16 sps:$4 sm:$0xff]  }
 0x281   :  { %5100 = vmatprep.subr.bf16.mxu1 %v8305_v0  ;;  %v8369_v0 = vld [vmem:[%s11335_s1 + $0x1560] ss:$16 sps:$4 sm:$0xff]  }
 0x283   :  { %5134 = vmatpush1.bf16.msra.mxu0 %v8306_v43  ;;  %v8380_v43 = vld [vmem:[%s11335_s1 + $0x1784] ss:$16 sps:$4 sm:$0xff]  }
 0x284   :  { %5101 = vmatpush1.bf16.msra.mxu1 %v8303_v40  ;;  %5135 = vmatprep.subr.bf16.mxu0 %v8314_v9  ;;  %v8377_v40 = vld [vmem:[%s11335_s1 + $0x1584] ss:$16 sps:$4 sm:$0xff]   ;;  %v8378_v9 = vld [vmem:[%s11335_s1 + $0x1780] ss:$16 sps:$4 sm:$0xff]  }
 0x285   :  { %5102 = vmatprep.subr.bf16.mxu1 %v8311_v49  ;;  %v8375_v49 = vld [vmem:[%s11335_s1 + $0x1580] ss:$16 sps:$4 sm:$0xff]  }
 0x287   :  { %5136 = vmatpush1.bf16.msra.mxu0 %v8312_v12  ;;  %v8386_v12 = vld [vmem:[%s11335_s1 + $0x17a4] ss:$16 sps:$4 sm:$0xff]  }
 0x288   :  { %5103 = vmatpush1.bf16.msra.mxu1 %v8309_v11  ;;  %5137 = vmatprep.subr.bf16.mxu0 %v8320_v15  ;;  %v8383_v11 = vld [vmem:[%s11335_s1 + $0x15a4] ss:$16 sps:$4 sm:$0xff]   ;;  %v8384_v15 = vld [vmem:[%s11335_s1 + $0x17a0] ss:$16 sps:$4 sm:$0xff]  }
 0x289   :  { %5104 = vmatprep.subr.bf16.mxu1 %v8317_v13  ;;  %v8381_v13 = vld [vmem:[%s11335_s1 + $0x15a0] ss:$16 sps:$4 sm:$0xff]  }
 0x28b   :  { %5138 = vmatpush1.bf16.msra.mxu0 %v8318_v17  ;;  %v8392_v17 = vld [vmem:[%s11335_s1 + $0x17c4] ss:$16 sps:$4 sm:$0xff]  }
 0x28c   :  { %5105 = vmatpush1.bf16.msra.mxu1 %v8315_v16  ;;  %5139 = vmatprep.subr.bf16.mxu0 %v8326_v21  ;;  %v8389_v16 = vld [vmem:[%s11335_s1 + $0x15c4] ss:$16 sps:$4 sm:$0xff]   ;;  %v8390_v21 = vld [vmem:[%s11335_s1 + $0x17c0] ss:$16 sps:$4 sm:$0xff]  }
 0x28d   :  { %5106 = vmatprep.subr.bf16.mxu1 %v8323_v18  ;;  %v8387_v18 = vld [vmem:[%s11335_s1 + $0x15c0] ss:$16 sps:$4 sm:$0xff]  }
 0x28f   :  { %5140 = vmatpush1.bf16.msra.mxu0 %v8324_v23  ;;  %v8398_v23 = vld [vmem:[%s11335_s1 + $0x17e4] ss:$16 sps:$4 sm:$0xff]  }
 0x290   :  { %5107 = vmatpush1.bf16.msra.mxu1 %v8321_v22  ;;  %5141 = vmatprep.subr.bf16.mxu0 %v8332_v10  ;;  %v8395_v22 = vld [vmem:[%s11335_s1 + $0x15e4] ss:$16 sps:$4 sm:$0xff]   ;;  %v8396_v10 = vld [vmem:[%s11335_s1 + $0x17e0] ss:$16 sps:$4 sm:$0xff]  }
 0x291   :  { %5108 = vmatprep.subr.bf16.mxu1 %v8329_v54  ;;  %v8393_v54 = vld [vmem:[%s11335_s1 + $0x15e0] ss:$16 sps:$4 sm:$0xff]  }
 0x293   :  { %5142 = vmatpush1.bf16.msra.mxu0 %v8330_v26  ;;  %v8404_v26 = vld [vmem:[%s11335_s1 + $0x1804] ss:$16 sps:$4 sm:$0xff]  }
 0x294   :  { %5109 = vmatpush1.bf16.msra.mxu1 %v8327_v2  ;;  %5143 = vmatprep.subr.bf16.mxu0 %v8338_v27  ;;  %v8401_v2 = vld [vmem:[%s11335_s1 + $0x1604] ss:$16 sps:$4 sm:$0xff]   ;;  %v8402_v27 = vld [vmem:[%s11335_s1 + $0x1800] ss:$16 sps:$4 sm:$0xff]  }
 0x295   :  { %5110 = vmatprep.subr.bf16.mxu1 %v8335_v20  ;;  %v3446_v33 = vpop.f32.mrb[28].mxu0  ;;  %v8399_v20 = vld [vmem:[%s11335_s1 + $0x1600] ss:$16 sps:$4 sm:$0xff]  }
 0x296   :  { %v3405_v32 = vpop.f32.mrb[28].mxu1  ;;  %v3448_v35 = vpop.f32.mrb[29].mxu0 }
 0x297   :  { %v3447_v34 = vadd.f32 %v3446_v33, %v3405_v32  ;;  %v3407_v14 = vpop.f32.mrb[29].mxu1  ;;  %v3450_v42 = vpop.f32.mrb[30].mxu0  ;;  %5144 = vmatpush1.bf16.msra.mxu0 %v8336_v30  ;;  %v8410_v30 = vld [vmem:[%s11335_s1 + $0x1824] ss:$16 sps:$4 sm:$0xff]  }
 0x298   :  { %v3449_v39 = vadd.f32 %v3448_v35, %v3407_v14  ;;  %v3409_v41 = vpop.f32.mrb[30].mxu1  ;;  %5111 = vmatpush1.bf16.msra.mxu1 %v8333_v7  ;;  %v3451_v37 = vpop.f32.mrb[31].mxu0  ;;  %5145 = vmatprep.subr.bf16.mxu0 %v8344_v51  ;;  %v8407_v7 = vld [vmem:[%s11335_s1 + $0x1624] ss:$16 sps:$4 sm:$0xff]   ;;  %v8408_v51 = vld [vmem:[%s11335_s1 + $0x1820] ss:$16 sps:$4 sm:$0xff]  }
 0x299   :  { %v10823_v45 = vadd.f32 %v3447_v34, %v10442_v24  ;;  %v3410_v46 = vpop.f32.mrb[31].mxu1  ;;  %5112 = vmatprep.subr.bf16.mxu1 %v8341_v3  ;;  %v8345_v24 = vld [vmem:[%s11335_s1 + $0x1368] ss:$16 sps:$4 sm:$0xff]   ;;  %v8405_v3 = vld [vmem:[%s11335_s1 + $0x1620] ss:$16 sps:$4 sm:$0xff]  }
 0x29a   :  { %v10832_v55 = vadd.f32 %v3449_v39, %v10451_v29  ;;  %v8356_v29 = vld [vmem:[%s11335_s1 + $0x1704] ss:$16 sps:$4 sm:$0xff]   ;;  %v8411_v39 = vld [vmem:[%s11335_s1 + $0x1640] ss:$16 sps:$4 sm:$0xff]  }
 0x29b   :  { %5146 = vmatpush1.bf16.msra.mxu0 %v8342_v31  ;;  %v8413_v32 = vld [vmem:[%s11335_s1 + $0x1644] ss:$16 sps:$4 sm:$0xff]   ;;  %v8414_v41 = vld [vmem:[%s11335_s1 + $0x1840] ss:$16 sps:$4 sm:$0xff]  }
 0x29c   :  { %5113 = vmatpush1.bf16.msra.mxu1 %v8339_v52  ;;  %5147 = vmatprep.subr.bf16.mxu0 %v8350_v25  ;;  %v8416_v33 = vld [vmem:[%s11335_s1 + $0x1844] ss:$16 sps:$4 sm:$0xff]   ;;  %v8417_v46 = vld [vmem:[%s11335_s1 + $0x1660] ss:$16 sps:$4 sm:$0xff]   ;;  %v8430_v25 = vld [vmem:[%s11335_s1 + $0x150c] ss:$16 sps:$4 sm:$0xff]  }
 0x29d   :  { %5114 = vmatprep.subr.bf16.mxu1 %v8347_v47  ;;  %v8419_v52 = vld [vmem:[%s11335_s1 + $0x1664] ss:$16 sps:$4 sm:$0xff]   ;;  %v8420_v37 = vld [vmem:[%s11335_s1 + $0x1860] ss:$16 sps:$4 sm:$0xff]  }
 0x29e   :  { %v8422_v31 = vld [vmem:[%s11335_s1 + $0x1864] ss:$16 sps:$4 sm:$0xff]  }
 0x29f   :  { %5148 = vmatpush1.bf16.msra.mxu0 %v8348_v56  ;;  %v8426_v47 = vld [vmem:[%s11335_s1 + $0x1684] ss:$16 sps:$4 sm:$0xff]   ;;  %v8424_v56 = vld [vmem:[%s11335_s1 + $0x1680] ss:$16 sps:$4 sm:$0xff]  }
 0x2a0   :  { %5115 = vmatpush1.bf16.msra.mxu1 %v8345_v24  ;;  %5858 = vmatprep.subr.bf16.mxu0 %v8353_v28  ;;  %v11015_v24 = vcombine.low %v10849_v44, %v10849_v44  ;;  %v8428_v28 = vld [vmem:[%s11335_s1 + $0x1508] ss:$16 sps:$4 sm:$0xff]   ;;  %v8436_v44 = vld [vmem:[%s11335_s1 + $0x152c] ss:$16 sps:$4 sm:$0xff]  }
 0x2a1   :  { %5899 = vmatprep.subr.bf16.mxu1 %v8356_v29  ;;  %v8433_v29 = vld [vmem:[%s11335_s1 + $0x16a4] ss:$16 sps:$4 sm:$0xff]  }
 0x2a2   :  { %5158 = vmatmul.mubr.bf16.vlgmr.msra.gmra.mrb[44].mxu0 %v10630_v8  ;;  %v8368_v8 = vld [vmem:[%s11335_s1 + $0x1744] ss:$16 sps:$4 sm:$0xff]  }
 0x2a3   :  { %5117 = vmatmul.mubr.bf16.vlgmr.msra.gmra.mrb[44].mxu1 %v10691_v57  ;;  %5859 = vmatpush1.bf16.msra.mxu0 %v8351_v59  ;;  %v8363_v57 = vld [vmem:[%s11335_s1 + $0x1540] ss:$16 sps:$4 sm:$0xff]  }
 0x2a4   :  { %5900 = vmatpush1.bf16.msra.mxu1 %v8354_v60  ;;  %5860 = vmatprep.subr.bf16.mxu0 %v8359_v62  ;;  %v8431_v59 = vld [vmem:[%s11335_s1 + $0x16a0] ss:$16 sps:$4 sm:$0xff]   ;;  %v8434_v60 = vld [vmem:[%s11335_s1 + $0x1528] ss:$16 sps:$4 sm:$0xff]   ;;  %v8439_v62 = vld [vmem:[%s11335_s1 + $0x16c4] ss:$16 sps:$4 sm:$0xff]  }
 0x2a5   :  { %5901 = vmatprep.subr.bf16.mxu1 %v8362_v63  ;;  %7240 = vmatprep.mubr.msk.bf16.mxu1 %vm836_vm0, %v10870_v53  ;;  %v8442_v63 = vld [vmem:[%s11335_s1 + $0x154c] ss:$16 sps:$4 sm:$0xff]  }
 0x2a6   :  { %5890 = vmatprep.mubr.bf16.mxu0 %v10874_v1 }
 0x2a7   :  { %5861 = vmatpush1.bf16.msra.mxu0 %v8357_v48 }
 0x2a8   :  { %5902 = vmatpush1.bf16.msra.mxu1 %v8360_v4  ;;  %5862 = vmatprep.subr.bf16.mxu0 %v8365_v5 }
 0x2a9   :  { %5903 = vmatprep.subr.bf16.mxu1 %v8368_v8 }
 0x2ab   :  { %5863 = vmatpush1.bf16.msra.mxu0 %v8363_v57 }
 0x2ac   :  { %5904 = vmatpush1.bf16.msra.mxu1 %v8366_v36  ;;  %5864 = vmatprep.subr.bf16.mxu0 %v8371_v6  ;;  %v8437_v36 = vld [vmem:[%s11335_s1 + $0x16c0] ss:$16 sps:$4 sm:$0xff]   ;;  %v8440_v6 = vld [vmem:[%s11335_s1 + $0x1548] ss:$16 sps:$4 sm:$0xff]  }
 0x2ad   :  { %5905 = vmatprep.subr.bf16.mxu1 %v8374_v38 }
 0x2af   :  { %5865 = vmatpush1.bf16.msra.mxu0 %v8369_v0 }
 0x2b0   :  { %5906 = vmatpush1.bf16.msra.mxu1 %v8372_v61  ;;  %5866 = vmatprep.subr.bf16.mxu0 %v8377_v40  ;;  %v8448_v61 = vld [vmem:[%s11335_s1 + $0x156c] ss:$16 sps:$4 sm:$0xff]  }
 0x2b1   :  { %5907 = vmatprep.subr.bf16.mxu1 %v8380_v43  ;;  %v8446_v43 = vld [vmem:[%s11335_s1 + $0x1568] ss:$16 sps:$4 sm:$0xff]  }
 0x2b3   :  { %5867 = vmatpush1.bf16.msra.mxu0 %v8375_v49  ;;  %v8453_v49 = vld [vmem:[%s11335_s1 + $0x158c] ss:$16 sps:$4 sm:$0xff]  }
 0x2b4   :  { %5908 = vmatpush1.bf16.msra.mxu1 %v8378_v9  ;;  %5868 = vmatprep.subr.bf16.mxu0 %v8383_v11  ;;  %v11075_v9 = vcombine.low %v10854_v58, %v10854_v58  ;;  %v8451_v11 = vld [vmem:[%s11335_s1 + $0x1588] ss:$16 sps:$4 sm:$0xff]   ;;  %v8462_v58 = vld [vmem:[%s11335_s1 + $0x172c] ss:$16 sps:$4 sm:$0xff]  }
 0x2b5   :  { %5909 = vmatprep.subr.bf16.mxu1 %v8386_v12  ;;  %v8454_v12 = vld [vmem:[%s11335_s1 + $0x1708] ss:$16 sps:$4 sm:$0xff]  }
 0x2b7   :  { %5869 = vmatpush1.bf16.msra.mxu0 %v8381_v13  ;;  %v8459_v13 = vld [vmem:[%s11335_s1 + $0x15ac] ss:$16 sps:$4 sm:$0xff]  }
 0x2b8   :  { %5910 = vmatpush1.bf16.msra.mxu1 %v8384_v15  ;;  %5870 = vmatprep.subr.bf16.mxu0 %v8389_v16  ;;  %v8457_v15 = vld [vmem:[%s11335_s1 + $0x15a8] ss:$16 sps:$4 sm:$0xff]  }
 0x2b9   :  { %5911 = vmatprep.subr.bf16.mxu1 %v8392_v17  ;;  %v8460_v16 = vld [vmem:[%s11335_s1 + $0x1728] ss:$16 sps:$4 sm:$0xff]   ;;  %v8465_v17 = vld [vmem:[%s11335_s1 + $0x15cc] ss:$16 sps:$4 sm:$0xff]  }
 0x2bb   :  { %5871 = vmatpush1.bf16.msra.mxu0 %v8387_v18  ;;  %v8468_v18 = vld [vmem:[%s11335_s1 + $0x174c] ss:$16 sps:$4 sm:$0xff]  }
 0x2bc   :  { %5912 = vmatpush1.bf16.msra.mxu1 %v8390_v21  ;;  %5872 = vmatprep.subr.bf16.mxu0 %v8395_v22  ;;  %v8463_v21 = vld [vmem:[%s11335_s1 + $0x15c8] ss:$16 sps:$4 sm:$0xff]  }
 0x2bd   :  { %5913 = vmatprep.subr.bf16.mxu1 %v8398_v23  ;;  %v8466_v22 = vld [vmem:[%s11335_s1 + $0x1748] ss:$16 sps:$4 sm:$0xff]   ;;  %v8471_v23 = vld [vmem:[%s11335_s1 + $0x15ec] ss:$16 sps:$4 sm:$0xff]  }
 0x2bf   :  { %5873 = vmatpush1.bf16.msra.mxu0 %v8393_v54  ;;  %v8469_v54 = vld [vmem:[%s11335_s1 + $0x15e8] ss:$16 sps:$4 sm:$0xff]  }
 0x2c0   :  { %5914 = vmatpush1.bf16.msra.mxu1 %v8396_v10  ;;  %5874 = vmatprep.subr.bf16.mxu0 %v8401_v2  ;;  %v8472_v10 = vld [vmem:[%s11335_s1 + $0x1768] ss:$16 sps:$4 sm:$0xff]   ;;  %v8477_v2 = vld [vmem:[%s11335_s1 + $0x160c] ss:$16 sps:$4 sm:$0xff]  }
 0x2c1   :  { %5915 = vmatprep.subr.bf16.mxu1 %v8404_v26  ;;  %v8480_v26 = vld [vmem:[%s11335_s1 + $0x178c] ss:$16 sps:$4 sm:$0xff]  }
 0x2c3   :  { %5875 = vmatpush1.bf16.msra.mxu0 %v8399_v20  ;;  %v8475_v20 = vld [vmem:[%s11335_s1 + $0x1608] ss:$16 sps:$4 sm:$0xff]  }
 0x2c4   :  { %5916 = vmatpush1.bf16.msra.mxu1 %v8402_v27  ;;  %5876 = vmatprep.subr.bf16.mxu0 %v8407_v7  ;;  %v8478_v27 = vld [vmem:[%s11335_s1 + $0x1788] ss:$16 sps:$4 sm:$0xff]   ;;  %v8483_v7 = vld [vmem:[%s11335_s1 + $0x162c] ss:$16 sps:$4 sm:$0xff]  }
 0x2c5   :  { %5917 = vmatprep.subr.bf16.mxu1 %v8410_v30  ;;  %v8486_v30 = vld [vmem:[%s11335_s1 + $0x17ac] ss:$16 sps:$4 sm:$0xff]  }
 0x2c6   :  { %v4220_v34 = vpop.f32.mrb[32].mxu1 }
 0x2c7   :  { %v4222_v14 = vpop.f32.mrb[33].mxu1  ;;  %5877 = vmatpush1.bf16.msra.mxu0 %v8405_v3  ;;  %v8481_v3 = vld [vmem:[%s11335_s1 + $0x1628] ss:$16 sps:$4 sm:$0xff]  }
 0x2c8   :  { %v4224_v35 = vpop.f32.mrb[34].mxu1  ;;  %5918 = vmatpush1.bf16.msra.mxu1 %v8408_v51  ;;  %5878 = vmatprep.subr.bf16.mxu0 %v8413_v32  ;;  %v8484_v51 = vld [vmem:[%s11335_s1 + $0x17a8] ss:$16 sps:$4 sm:$0xff]   ;;  %v8489_v32 = vld [vmem:[%s11335_s1 + $0x164c] ss:$16 sps:$4 sm:$0xff]  }
 0x2c9   :  { %v4225_v42 = vpop.f32.mrb[35].mxu1  ;;  %5919 = vmatprep.subr.bf16.mxu1 %v8416_v33  ;;  %v8492_v33 = vld [vmem:[%s11335_s1 + $0x17cc] ss:$16 sps:$4 sm:$0xff]  }
 0x2ca   :  { %v8495_v35 = vld [vmem:[%s11335_s1 + $0x166c] ss:$16 sps:$4 sm:$0xff]   ;;  %v8496_v42 = vld [vmem:[%s11335_s1 + $0x17e8] ss:$16 sps:$4 sm:$0xff]  }
 0x2cb   :  { %5879 = vmatpush1.bf16.msra.mxu0 %v8411_v39  ;;  %v8498_v39 = vld [vmem:[%s11335_s1 + $0x17ec] ss:$16 sps:$4 sm:$0xff]  }
 0x2cc   :  { %5920 = vmatpush1.bf16.msra.mxu1 %v8414_v41  ;;  %5880 = vmatprep.subr.bf16.mxu0 %v8419_v52  ;;  %v8493_v41 = vld [vmem:[%s11335_s1 + $0x1668] ss:$16 sps:$4 sm:$0xff]   ;;  %v8501_v52 = vld [vmem:[%s11335_s1 + $0x168c] ss:$16 sps:$4 sm:$0xff]  }
 0x2cd   :  { %5921 = vmatprep.subr.bf16.mxu1 %v8422_v31  ;;  %v8504_v31 = vld [vmem:[%s11335_s1 + $0x180c] ss:$16 sps:$4 sm:$0xff]  }
 0x2cf   :  { %5881 = vmatpush1.bf16.msra.mxu0 %v8417_v46  ;;  %v8499_v46 = vld [vmem:[%s11335_s1 + $0x1688] ss:$16 sps:$4 sm:$0xff]  }
 0x2d0   :  { %5922 = vmatpush1.bf16.msra.mxu1 %v8420_v37  ;;  %5882 = vmatprep.subr.bf16.mxu0 %v8426_v47  ;;  %v8502_v37 = vld [vmem:[%s11335_s1 + $0x1808] ss:$16 sps:$4 sm:$0xff]   ;;  %v8507_v47 = vld [vmem:[%s11335_s1 + $0x16ac] ss:$16 sps:$4 sm:$0xff]  }
 0x2d1   :  { %5940 = vmatprep.subr.bf16.mxu1 %v8430_v25  ;;  %v8510_v25 = vld [vmem:[%s11335_s1 + $0x182c] ss:$16 sps:$4 sm:$0xff]  }
 0x2d3   :  { %5932 = vmatmul.mubr.bf16.vlgmr.msra.gmra.mrb[48].mxu1 %v11015_v24  ;;  %5883 = vmatpush1.bf16.msra.mxu0 %v8424_v56  ;;  %v8505_v56 = vld [vmem:[%s11335_s1 + $0x16a8] ss:$16 sps:$4 sm:$0xff]  }
 0x2d4   :  { %5941 = vmatpush1.bf16.msra.mxu1 %v8428_v28  ;;  %5884 = vmatprep.subr.bf16.mxu0 %v8433_v29  ;;  %v8508_v28 = vld [vmem:[%s11335_s1 + $0x1828] ss:$16 sps:$4 sm:$0xff]   ;;  %v8513_v29 = vld [vmem:[%s11335_s1 + $0x16cc] ss:$16 sps:$4 sm:$0xff]  }
 0x2d5   :  { %5942 = vmatprep.subr.bf16.mxu1 %v8436_v44  ;;  %v4179_v48 = vpop.f32.mrb[32].mxu0  ;;  %5972 = vmatprep.mubr.bf16.mxu1 %v10874_v1  ;;  %v8445_v1 = vld [vmem:[%s11335_s1 + $0x16e4] ss:$16 sps:$4 sm:$0xff]   ;;  %v8516_v44 = vld [vmem:[%s11335_s1 + $0x184c] ss:$16 sps:$4 sm:$0xff]  }
 0x2d6   :  { %v4221_v4 = vadd.f32 %v4220_v34, %v4179_v48  ;;  %v4181_v5 = vpop.f32.mrb[33].mxu0  ;;  %v8487_v34 = vld [vmem:[%s11335_s1 + $0x1648] ss:$16 sps:$4 sm:$0xff]  }
 0x2d7   :  { %v4223_v8 = vadd.f32 %v4222_v14, %v4181_v5  ;;  %v4183_v57 = vpop.f32.mrb[34].mxu0  ;;  %5885 = vmatpush1.bf16.msra.mxu0 %v8431_v59  ;;  %v8490_v14 = vld [vmem:[%s11335_s1 + $0x17c8] ss:$16 sps:$4 sm:$0xff]  }
 0x2d8   :  { %5943 = vmatpush1.bf16.msra.mxu1 %v8434_v60  ;;  %v11050_v38 = vadd.f32 %v4221_v4, %v10665_v19  ;;  %v4184_v0 = vpop.f32.mrb[35].mxu0  ;;  %5886 = vmatprep.subr.bf16.mxu0 %v8439_v62  ;;  %v8443_v19 = vld [vmem:[%s11335_s1 + $0x16e0] ss:$16 sps:$4 sm:$0xff]   ;;  %v8511_v62 = vld [vmem:[%s11335_s1 + $0x16c8] ss:$16 sps:$4 sm:$0xff]  }
 0x2d9   :  { %5944 = vmatprep.subr.bf16.mxu1 %v8442_v63  ;;  %v11059_v40 = vadd.f32 %v4223_v8, %v10674_v50  ;;  %v8456_v50 = vld [vmem:[%s11335_s1 + $0x170c] ss:$16 sps:$4 sm:$0xff]   ;;  %v8514_v63 = vld [vmem:[%s11335_s1 + $0x1848] ss:$16 sps:$4 sm:$0xff]  }
 0x2da   :  { %v8519_v8 = vld [vmem:[%s11335_s1 + $0x16ec] ss:$16 sps:$4 sm:$0xff]  }
 0x2db   :  { %5887 = vmatpush1.bf16.msra.mxu0 %v8437_v36  ;;  %v8522_v57 = vld [vmem:[%s11335_s1 + $0x186c] ss:$16 sps:$4 sm:$0xff]  }
 0x2dc   :  { %5945 = vmatpush1.bf16.msra.mxu1 %v8440_v6  ;;  %5888 = vmatprep.subr.bf16.mxu0 %v8445_v1 }
 0x2dd   :  { %5946 = vmatprep.subr.bf16.mxu1 %v8448_v61 }
 0x2df   :  { %5889 = vmatpush1.bf16.msra.mxu0 %v8443_v19 }
 0x2e0   :  { %5947 = vmatpush1.bf16.msra.mxu1 %v8446_v43  ;;  %5981 = vmatprep.subr.bf16.mxu0 %v8456_v50  ;;  %v8520_v50 = vld [vmem:[%s11335_s1 + $0x1868] ss:$16 sps:$4 sm:$0xff]  }
 0x2e1   :  { %5948 = vmatprep.subr.bf16.mxu1 %v8453_v49  ;;  %v8517_v49 = vld [vmem:[%s11335_s1 + $0x16e8] ss:$16 sps:$4 sm:$0xff]  }
 0x2e2   :  { %5891 = vmatmul.mubr.bf16.vlgmr.msra.gmra.mrb[48].mxu0 %v11075_v9 }
 0x2e3   :  { %5982 = vmatpush1.bf16.msra.mxu0 %v8454_v12  ;;  %7241 = vmatprep.mubr.msk.bf16.mxu0 %vm836_vm0, %v10870_v53  ;;  %v8474_v53 = vld [vmem:[%s11335_s1 + $0x176c] ss:$16 sps:$4 sm:$0xff]  }
 0x2e4   :  { %5949 = vmatpush1.bf16.msra.mxu1 %v8451_v11  ;;  %5983 = vmatprep.subr.bf16.mxu0 %v8462_v58  ;;  %v8525_v11 = vld [vmem:[%s11337_s3 + $0x48] sm:$0xff]   ;;  %v8530_v58 = vld [vmem:[%s11337_s3 + $0x18] sm:$0xff]  }
 0x2e5   :  { %5950 = vmatprep.subr.bf16.mxu1 %v8459_v13  ;;  %v8526_v12 = vld [vmem:[%s11337_s3 + $0x8] sm:$0xff]   ;;  %v8527_v13 = vld [vmem:[%s11337_s3 + $0x50] sm:$0xff]  }
 0x2e7   :  { %5984 = vmatpush1.bf16.msra.mxu0 %v8460_v16  ;;  %v8532_v16 = vld [vmem:[%s11337_s3 + $0x20] sm:$0xff]  }
 0x2e8   :  { %5951 = vmatpush1.bf16.msra.mxu1 %v8457_v15  ;;  %5985 = vmatprep.subr.bf16.mxu0 %v8468_v18  ;;  %v8531_v15 = vld [vmem:[%s11337_s3 + $0x60] sm:$0xff]   ;;  %v8533_v18 = vld [vmem:[%s11337_s3 + $0x68] sm:$0xff]  }
 0x2e9   :  { %5952 = vmatprep.subr.bf16.mxu1 %v8465_v17 }
 0x2eb   :  { %5986 = vmatpush1.bf16.msra.mxu0 %v8466_v22  ;;  %v8534_v22 = vld [vmem:[%s11337_s3 + $0x28] sm:$0xff]  }
 0x2ec   :  { %5953 = vmatpush1.bf16.msra.mxu1 %v8463_v21  ;;  %5987 = vmatprep.subr.bf16.mxu0 %v8474_v53 }
 0x2ed   :  { %5954 = vmatprep.subr.bf16.mxu1 %v8471_v23 }
 0x2ef   :  { %5988 = vmatpush1.bf16.msra.mxu0 %v8472_v10  ;;  %v8536_v10 = vld [vmem:[%s11337_s3 + $0x30] sm:$0xff]  }
 0x2f0   :  { %5955 = vmatpush1.bf16.msra.mxu1 %v8469_v54  ;;  %5989 = vmatprep.subr.bf16.mxu0 %v8480_v26  ;;  %v8535_v54 = vld [vmem:[%s11337_s3 + $0x70] sm:$0xff]   ;;  %v8538_v26 = vld [vmem:[%s11337_s3 + $0x38] sm:$0xff]  }
 0x2f1   :  { %5956 = vmatprep.subr.bf16.mxu1 %v8477_v2  ;;  %v8537_v2 = vld [vmem:[%s11337_s3 + $0x78] sm:$0xff]  }
 0x2f3   :  { %5990 = vmatpush1.bf16.msra.mxu0 %v8478_v27  ;;  %v8540_v27 = vld [vmem:[%s11337_s3 + $0x80] sm:$0xff]  }
 0x2f4   :  { %5957 = vmatpush1.bf16.msra.mxu1 %v8475_v20  ;;  %5991 = vmatprep.subr.bf16.mxu0 %v8486_v30  ;;  %v8539_v20 = vld [vmem:[%s11337_s3 + $0xc0] sm:$0xff]  }
 0x2f5   :  { %5958 = vmatprep.subr.bf16.mxu1 %v8483_v7  ;;  %v8541_v7 = vld [vmem:[%s11337_s3 + $0xc8] sm:$0xff]  }
 0x2f7   :  { %5992 = vmatpush1.bf16.msra.mxu0 %v8484_v51 }
 0x2f8   :  { %5959 = vmatpush1.bf16.msra.mxu1 %v8481_v3  ;;  %5993 = vmatprep.subr.bf16.mxu0 %v8492_v33 }
 0x2f9   :  { %5960 = vmatprep.subr.bf16.mxu1 %v8489_v32  ;;  %v8542_v32 = vld [vmem:[%s11337_s3 + $0x88] sm:$0xff]  }
 0x2fb   :  { %5994 = vmatpush1.bf16.msra.mxu0 %v8490_v14  ;;  %v8543_v14 = vld [vmem:[%s11337_s3 + $0xd0] sm:$0xff]  }
 0x2fc   :  { %5961 = vmatpush1.bf16.msra.mxu1 %v8487_v34  ;;  %5995 = vmatprep.subr.bf16.mxu0 %v8498_v39 }
 0x2fd   :  { %5962 = vmatprep.subr.bf16.mxu1 %v8495_v35 }
 0x2ff   :  { %5996 = vmatpush1.bf16.msra.mxu0 %v8496_v42  ;;  %v8544_v42 = vld [vmem:[%s11337_s3 + $0x90] sm:$0xff]  }
 0x300   :  { %5963 = vmatpush1.bf16.msra.mxu1 %v8493_v41  ;;  %5997 = vmatprep.subr.bf16.mxu0 %v8504_v31  ;;  %v8546_v31 = vld [vmem:[%s11337_s3 + $0x98] sm:$0xff]  }
 0x301   :  { %5964 = vmatprep.subr.bf16.mxu1 %v8501_v52  ;;  %v8545_v52 = vld [vmem:[%s11337_s3 + $0xd8] sm:$0xff]  }
 0x303   :  { %5998 = vmatpush1.bf16.msra.mxu0 %v8502_v37  ;;  %v8550_v37 = vld [vmem:[%s11337_s3 + $0xa8] sm:$0xff]  }
 0x304   :  { %5965 = vmatpush1.bf16.msra.mxu1 %v8499_v46  ;;  %5999 = vmatprep.subr.bf16.mxu0 %v8510_v25  ;;  %v8549_v46 = vld [vmem:[%s11337_s3 + $0xe8] sm:$0xff]   ;;  %v8552_v25 = vld [vmem:[%s11337_s3 + $0xb0] sm:$0xff]  }
 0x305   :  { %5966 = vmatprep.subr.bf16.mxu1 %v8507_v47  ;;  %v4302_v60 = vpop.f32.mrb[36].mxu0  ;;  %v8551_v47 = vld [vmem:[%s11337_s3 + $0xf0] sm:$0xff]  }
 0x306   :  { %v4261_v59 = vpop.f32.mrb[36].mxu1  ;;  %v4304_v5 = vpop.f32.mrb[37].mxu0 }
 0x307   :  { %v4303_v48 = vadd.f32 %v4302_v60, %v4261_v59  ;;  %v4263_v4 = vpop.f32.mrb[37].mxu1  ;;  %v4306_v0 = vpop.f32.mrb[38].mxu0  ;;  %6000 = vmatpush1.bf16.msra.mxu0 %v8508_v28  ;;  %v8554_v28 = vld [vmem:[%s11337_s3 + $0xb8] sm:$0xff]  }
 0x308   :  { %v4305_v36 = vadd.f32 %v4304_v5, %v4263_v4  ;;  %v4265_v6 = vpop.f32.mrb[38].mxu1  ;;  %5967 = vmatpush1.bf16.msra.mxu1 %v8505_v56  ;;  %v4307_v19 = vpop.f32.mrb[39].mxu0  ;;  %6001 = vmatprep.subr.bf16.mxu0 %v8516_v44  ;;  %v8553_v56 = vld [vmem:[%s11337_s3 + $0xf8] sm:$0xff]  }
 0x309   :  { %v11213_v1 = vadd.f32 %v4303_v48, %v10823_v45  ;;  %v4266_v61 = vpop.f32.mrb[39].mxu1  ;;  %5968 = vmatprep.subr.bf16.mxu1 %v8513_v29  ;;  %v8523_v45 = vld [vmem:[%s11337_s3 + $0x40] sm:$0xff]  }
 0x30a   :  { %v11216_v43 = vadd.f32 %v4305_v36, %v10832_v55  ;;  %v8524_v55 = vld [vmem:[%s11337_s3] sm:$0xff]  }
 0x30b   :  { %6002 = vmatpush1.bf16.msra.mxu0 %v8514_v63 }
 0x30c   :  { %5969 = vmatpush1.bf16.msra.mxu1 %v8511_v62  ;;  %6003 = vmatprep.subr.bf16.mxu0 %v8522_v57 }
 0x30d   :  { %5970 = vmatprep.subr.bf16.mxu1 %v8519_v8 }
 0x30f   :  { %6004 = vmatpush1.bf16.msra.mxu0 %v8520_v50 }
 0x310   :  { %5971 = vmatpush1.bf16.msra.mxu1 %v8517_v49  ;;  %7275 = vmatprep.subr.bf16.mxu0 %v8523_v45  ;;  %v6028_v49 = vlaneseq }
 0x311   :  { %7297 = vmatprep.subr.bf16.mxu1 %v8539_v20 }
 0x312   :  { %6014 = vmatmul.mubr.bf16.vlgmr.msra.gmra.mrb[52].mxu0 %v11015_v24  ;;  %v8529_v24 = vld [vmem:[%s11337_s3 + $0x58] sm:$0xff]   ;;  %v6029_v50 = vshrl.u32 %v6028_v49, 7 }
 0x313   :  { %5973 = vmatmul.mubr.bf16.vlgmr.msra.gmra.mrb[52].mxu1 %v11075_v9  ;;  %7276 = vmatpush3.bf16.msra.mxu0 %v8524_v55  ;;  %v8528_v9 = vld [vmem:[%s11337_s3 + $0x10] sm:$0xff]   ;;  %v6026_v55 = vld [vmem:[%s11338_s2] sm:$0xf] }
 0x314   :  { %7277 = vmatprep.subr.bf16.mxu0 %v8525_v11  ;;  %7298 = vmatpush3.bf16.msra.mxu1 %v8540_v27  ;;  %v6030_v45 = vsub.s32 0, %v6029_v50  ;;  %v6034_v11 = vsub.s32 1, %v6029_v50  ;;  %v6042_v20 = vsub.s32 3, %v6029_v50 }
 0x315   :  { %7299 = vmatprep.subr.bf16.mxu1 %v8541_v7 }
 0x317   :  { %7278 = vmatpush3.bf16.msra.mxu0 %v8526_v12 }
 0x318   :  { %7279 = vmatprep.subr.bf16.mxu0 %v8527_v13  ;;  %7300 = vmatpush3.bf16.msra.mxu1 %v8542_v32 }
 0x319   :  { %7301 = vmatprep.subr.bf16.mxu1 %v8543_v14 }
 0x31b   :  { %7280 = vmatpush3.bf16.msra.mxu0 %v8528_v9  ;;  %v6031_v9 = vrot.slane %v6026_v55, %v6030_v45 }
 0x31c   :  { %7281 = vmatprep.subr.bf16.mxu0 %v8529_v24  ;;  %7302 = vmatpush3.bf16.msra.mxu1 %v8544_v42 }
 0x31d   :  { %7303 = vmatprep.subr.bf16.mxu1 %v8545_v52 }
 0x31f   :  { %7282 = vmatpush3.bf16.msra.mxu0 %v8530_v58  ;;  %v6035_v58 = vrot.slane %v6026_v55, %v6034_v11 }
 0x320   :  { %7283 = vmatprep.subr.bf16.mxu0 %v8531_v15  ;;  %7304 = vmatpush3.bf16.msra.mxu1 %v8546_v31 }
 0x323   :  { %7284 = vmatpush3.bf16.msra.mxu0 %v8532_v16 }
 0x324   :  { %7285 = vmatprep.subr.bf16.mxu0 %v8533_v18 }
 0x327   :  { %7286 = vmatpush3.bf16.msra.mxu0 %v8534_v22 }
 0x328   :  { %7287 = vmatprep.subr.bf16.mxu0 %v8535_v54 }
 0x32b   :  { %7288 = vmatpush3.bf16.msra.mxu0 %v8536_v10 }
 0x32c   :  { %7289 = vmatprep.subr.bf16.mxu0 %v8537_v2 }
 0x32f   :  { %7290 = vmatpush3.bf16.msra.mxu0 %v8538_v26  ;;  %v6038_v26 = vsub.s32 2, %v6029_v50 }
 0x336   :  { %v5077_v17 = vpop.f32.mrb[40].mxu1 }
 0x337   :  { %v5079_v21 = vpop.f32.mrb[41].mxu1 }
 0x338   :  { %v5081_v23 = vpop.f32.mrb[42].mxu1 }
 0x339   :  { %v5082_v53 = vpop.f32.mrb[43].mxu1 }
 0x345   :  { %v5036_v30 = vpop.f32.mrb[40].mxu0 }
 0x346   :  { %v5078_v3 = vadd.f32 %v5077_v17, %v5036_v30  ;;  %v5038_v51 = vpop.f32.mrb[41].mxu0 }
 0x347   :  { %v5080_v33 = vadd.f32 %v5079_v21, %v5038_v51  ;;  %v5040_v34 = vpop.f32.mrb[42].mxu0 }
 0x348   :  { %v5166_v35 = vadd.f32 %v5078_v3, %v11050_v38  ;;  %v5041_v39 = vpop.f32.mrb[43].mxu0  ;;  %v8547_v38 = vld [vmem:[%s11337_s3 + $0xe0] sm:$0xff]   ;;  %v6039_v3 = vrot.slane %v6026_v55, %v6038_v26  ;;  %v6043_v34 = vrot.slane %v6026_v55, %v6042_v20 }
 0x349   :  { %v5167_v41 = vadd.f32 %v5080_v33, %v11059_v40  ;;  %v8548_v40 = vld [vmem:[%s11337_s3 + $0xa0] sm:$0xff]   ;;  %7305 = vmatprep.subr.bf16.mxu1 %v8547_v38 }
 0x34a   :  { %7306 = vmatpush3.bf16.msra.mxu1 %v8548_v40 }
 0x34b   :  { %7307 = vmatprep.subr.bf16.mxu1 %v8549_v46 }
 0x34e   :  { %7308 = vmatpush3.bf16.msra.mxu1 %v8550_v37 }
 0x34f   :  { %7309 = vmatprep.subr.bf16.mxu1 %v8551_v47 }
 0x352   :  { %7310 = vmatpush3.bf16.msra.mxu1 %v8552_v25 }
 0x353   :  { %7311 = vmatprep.subr.bf16.mxu1 %v8553_v56 }
 0x356   :  { %7312 = vmatpush3.bf16.msra.mxu1 %v8554_v28 }
 0x375   :  { %v5159_v44 = vpop.f32.mrb[44].mxu0 }
 0x376   :  { %v5118_v29 = vpop.f32.mrb[44].mxu1  ;;  %v5161_v62 = vpop.f32.mrb[45].mxu0 }
 0x377   :  { %v5160_v59 = vadd.f32 %v5159_v44, %v5118_v29  ;;  %v5120_v60 = vpop.f32.mrb[45].mxu1  ;;  %v5163_v4 = vpop.f32.mrb[46].mxu0 }
 0x378   :  { %v5162_v63 = vadd.f32 %v5161_v62, %v5120_v60  ;;  %v5122_v48 = vpop.f32.mrb[46].mxu1  ;;  %v5164_v57 = vpop.f32.mrb[47].mxu0  ;;  %v7242_v62 = vld [vmem:[%s11339_s4] ss:$0 sm:$0xff] }
 0x379   :  { %v5168_v5 = vadd.f32 %v5160_v59, %v11213_v1  ;;  %v5123_v8 = vpop.f32.mrb[47].mxu1 }
 0x37a   :  { %v5169_v36 = vadd.f32 %v5162_v63, %v11216_v43 }
 0x3a6   :  { %v5933_v6 = vpop.f32.mrb[48].mxu1 }
 0x3a7   :  { %v5935_v0 = vpop.f32.mrb[49].mxu1 }
 0x3a8   :  { %v5937_v61 = vpop.f32.mrb[50].mxu1 }
 0x3a9   :  { %v5938_v19 = vpop.f32.mrb[51].mxu1 }
 0x3b5   :  { %v5892_v12 = vpop.f32.mrb[48].mxu0 }
 0x3b6   :  { %v5934_v13 = vadd.f32 %v5933_v6, %v5892_v12  ;;  %v5894_v1 = vpop.f32.mrb[49].mxu0 }
 0x3b7   :  { %v5936_v24 = vadd.f32 %v5935_v0, %v5894_v1  ;;  %v5896_v15 = vpop.f32.mrb[50].mxu0 }
 0x3b8   :  { %v6022_v43 = vadd.f32 %v5934_v13, %v5166_v35  ;;  %v5897_v16 = vpop.f32.mrb[51].mxu0 }
 0x3b9   :  { %v6023_v17 = vadd.f32 %v5936_v24, %v5167_v41 }
 0x3ba   :  { %v6048_v18 = vadd.f32 %v6031_v9, %v6022_v43 }
 0x3bb   :  { %v6049_v21 = vadd.f32 %v6035_v58, %v6023_v17 }
 0x3bc   :  { %vm6052_vm1 = vcmp.gt.f32.partialorder %v6048_v18, 0.0  ;;  %v6056_v22 = vmul.f32 0.01, %v6048_v18 }
 0x3bd   :  { %vm6053_vm2 = vcmp.gt.f32.partialorder %v6049_v21, 0.0  ;;  %v6057_v23 = vmul.f32 0.01, %v6049_v21 }
 0x3be   :  { %v6060_v53 = vsel %vm6052_vm1, %v6048_v18, %v6056_v22 }
 0x3bf   :  { %v6061_v54 = vsel %vm6053_vm2, %v6049_v21, %v6057_v23  ;;  %v6064_v2 = vpack.c.bf16 %v6060_v53, %v6060_v53 }
 0x3c0   :  { %v6065_v10 = vpack.c.bf16 %v6061_v54, %v6061_v54 }
 0x3c2   :  { %6363 = vmatprep.mubr.bf16.mxu0 %v6065_v10 }
 0x3c3   :  { %6364 = vmatmul.mubr.bf16.vlgmr.msra.gmra.mrb[56].mxu0 %v6064_v2 }
 0x3e5   :  { %v6015_v7 = vpop.f32.mrb[52].mxu0 }
 0x3e6   :  { %v5974_v27 = vpop.f32.mrb[52].mxu1  ;;  %v6017_v32 = vpop.f32.mrb[53].mxu0 }
 0x3e7   :  { %v6016_v30 = vadd.f32 %v6015_v7, %v5974_v27  ;;  %v5976_v51 = vpop.f32.mrb[53].mxu1  ;;  %v6019_v35 = vpop.f32.mrb[54].mxu0 }
 0x3e8   :  { %v6018_v33 = vadd.f32 %v6017_v32, %v5976_v51  ;;  %v5978_v14 = vpop.f32.mrb[54].mxu1  ;;  %v6020_v42 = vpop.f32.mrb[55].mxu0 }
 0x3e9   :  { %v6024_v39 = vadd.f32 %v6016_v30, %v5168_v5  ;;  %v5979_v41 = vpop.f32.mrb[55].mxu1 }
 0x3ea   :  { %v6025_v52 = vadd.f32 %v6018_v33, %v5169_v36 }
 0x3eb   :  { %v6050_v31 = vadd.f32 %v6039_v3, %v6024_v39 }
 0x3ec   :  { %v6051_v38 = vadd.f32 %v6043_v34, %v6025_v52 }
 0x3ed   :  { %vm6054_vm3 = vcmp.gt.f32.partialorder %v6050_v31, 0.0  ;;  %v6058_v40 = vmul.f32 0.01, %v6050_v31 }
 0x3ee   :  { %vm6055_vm4 = vcmp.gt.f32.partialorder %v6051_v38, 0.0  ;;  %v6059_v46 = vmul.f32 0.01, %v6051_v38 }
 0x3ef   :  { %v6062_v37 = vsel %vm6054_vm3, %v6050_v31, %v6058_v40 }
 0x3f0   :  { %v6063_v47 = vsel %vm6055_vm4, %v6051_v38, %v6059_v46  ;;  %v6066_v56 = vpack.c.bf16 %v6062_v37, %v6062_v37 }
 0x3f1   :  { %v6067_v25 = vpack.c.bf16 %v6063_v47, %v6063_v47 }
 0x3f3   :  { %6403 = vmatprep.mubr.bf16.mxu1 %v6067_v25 }
 0x3f4   :  { %6404 = vmatmul.mubr.bf16.vlgmr.msra.gmra.mrb[56].mxu1 %v6066_v56 }
 0x496   :  { %v7291_v28 = vpop.f32.mrb[56].mxu0 }
 0x497   :  { %v7292_v29 = vpop.f32.mrb[57].mxu0 }
 0x498   :  { %v7293_v44 = vadd.f32 %v7292_v29, %v7291_v28  ;;  %v7294_v59 = vpop.f32.mrb[58].mxu0 }
 0x499   :  { %v7295_v60 = vpop.f32.mrb[59].mxu0 }
 0x49a   :  { %v6366_v4 = vadd.f32 %v7293_v44, %v7242_v62 }
 0x4c7   :  { %v7313_v63 = vpop.f32.mrb[56].mxu1 }
 0x4c8   :  { %v7314_v48 = vpop.f32.mrb[57].mxu1 }
 0x4c9   :  { %v7315_v5 = vadd.f32 %v7314_v48, %v7313_v63  ;;  %v7316_v8 = vpop.f32.mrb[58].mxu1 }
 0x4ca   :  { %v7317_v57 = vpop.f32.mrb[59].mxu1 }
 0x4cb   :  { %v6406_v36 = vadd.f32 %v7315_v5, %v6366_v4 }
 0x4cd   :  { %6411 = vst [vmem:[%s11340_s5] sm:$0xff] %v6406_v36 }

</bundles_post_ra>
